<compile_context>
chip_gen: v7x
topology: tpu7x:2x2x1
jax: 0.10.0
libtpu: 0.0.40
codegen_flags: <defaults>
</compile_context>

<pallas_src>
import jax
import jax.numpy as jnp
from jax import lax
from jax.experimental import pallas as pl
from jax.experimental.pallas import tpu as pltpu

OH1 = OW1 = 28          # conv1 output spatial (28x28: pad=2, stride=1)
OH2 = OW2 = 12          # conv2 output spatial (12x12: k=5, stride=2, pad=0)
P2 = OH2 * OW2          # 144 conv2 output pixels
K2 = 25                 # conv2 taps (5x5); conv1 also has 25 taps
C = 64                  # channels

# Explicit VMEM budget (feedback: size for v7x's 64 MiB physical VMEM).
# Actual working set here is ~3 MiB (largest resident weight: dense1 2.4 MiB).
_VMEM_LIMIT = 32 * 1024 * 1024


# ----------------------------------------------------------------------------
# Kernel 1: conv1 + ReLU + conv2 + ReLU for one image, entirely in VMEM.
# ----------------------------------------------------------------------------
def _conv_fused_kernel(cols_ref, w1_ref, b1_ref, w2_ref, b2_ref, out_ref):
    """cols_ref: (1, 25*144, 25) bf16 -- conv1 im2col rows, pre-permuted so
                 rows [k*144:(k+1)*144] are the conv1 inputs needed by conv2
                 tap k = (kh2, kw2).
       w1_ref:   (25, 64)     bf16   -- conv1 weight, (kh1*5+kw1, cout)
       b1_ref:   (1, 64)      f32
       w2_ref:   (25, 64, 64) bf16   -- conv2 weight, (tap, cin, cout)
       b2_ref:   (1, 64)      f32
       out_ref:  (1, 144, 64) bf16   -- conv2 output, (pixel(h,w), channel)
    """
    acc = jnp.zeros((P2, C), jnp.float32)
    for k in range(K2):                                   # 25 taps, unrolled
        patch = cols_ref[0, k * P2:(k + 1) * P2, :]       # (144, 25) bf16
        y1 = jnp.dot(patch, w1_ref[...], preferred_element_type=jnp.float32)
        y1 = jnp.maximum(y1 + b1_ref[...], 0.0).astype(jnp.bfloat16)
        acc = acc + jnp.dot(y1, w2_ref[k], preferred_element_type=jnp.float32)
    y2 = jnp.maximum(acc + b2_ref[...], 0.0)              # bias + ReLU in f32
    out_ref[0] = y2.astype(out_ref.dtype)


def conv_stage(cols, w1, b1, w2, b2):
    B = cols.shape[0]
    return pl.pallas_call(
        _conv_fused_kernel,
        out_shape=jax.ShapeDtypeStruct((B, P2, C), jnp.bfloat16),
        grid=(B,),
        in_specs=[
            pl.BlockSpec((1, K2 * P2, K2), lambda b: (b, 0, 0)),
            pl.BlockSpec((K2, C), lambda b: (0, 0)),
            pl.BlockSpec((1, C), lambda b: (0, 0)),
            pl.BlockSpec((K2, C, C), lambda b: (0, 0, 0)),
            pl.BlockSpec((1, C), lambda b: (0, 0)),
        ],
        out_specs=pl.BlockSpec((1, P2, C), lambda b: (b, 0, 0)),
        compiler_params=pltpu.CompilerParams(
            dimension_semantics=("parallel",),
            vmem_limit_bytes=_VMEM_LIMIT),
    )(cols, w1, b1, w2, b2)


# ----------------------------------------------------------------------------
# Kernel 2: dense1 + ReLU + dense2, fused; M-tiled over batch.
# ----------------------------------------------------------------------------
def _dense_fused_kernel(x_ref, w1_ref, b1_ref, w2_ref, b2_ref, o_ref):
    h = jnp.dot(x_ref[...], w1_ref[...], preferred_element_type=jnp.float32)
    h = jnp.maximum(h + b1_ref[...], 0.0).astype(jnp.bfloat16)
    o = jnp.dot(h, w2_ref[...], preferred_element_type=jnp.float32) + b2_ref[...]
    o_ref[...] = o.astype(o_ref.dtype)


def dense_stage(flat, w1, b1, w2, b2, *, tm):
    B, K = flat.shape
    N1 = w1.shape[1]
    N2 = w2.shape[1]
    return pl.pallas_call(
        _dense_fused_kernel,
        out_shape=jax.ShapeDtypeStruct((B, N2), jnp.float32),
        grid=(pl.cdiv(B, tm),),
        in_specs=[
            pl.BlockSpec((tm, K), lambda i: (i, 0)),
            pl.BlockSpec((K, N1), lambda i: (0, 0)),   # weights stay resident
            pl.BlockSpec((1, N1), lambda i: (0, 0)),
            pl.BlockSpec((N1, N2), lambda i: (0, 0)),
            pl.BlockSpec((1, N2), lambda i: (0, 0)),
        ],
        out_specs=pl.BlockSpec((tm, N2), lambda i: (i, 0)),
        compiler_params=pltpu.CompilerParams(
            dimension_semantics=("parallel",),
            vmem_limit_bytes=_VMEM_LIMIT),
    )(flat, w1, b1, w2, b2)


# ----------------------------------------------------------------------------
# Host glue: conv1 im2col rows, permuted into conv2's (tap-major) order.
# ----------------------------------------------------------------------------
def _conv2_ordered_patches(x):
    """x: (B, 1, 28, 28) NCHW -> (B, 25*144, 25) bf16.

    Row (k2*144 + p) holds the 25 conv1 inputs (order kh1*5+kw1) of the conv1
    output pixel read by conv2 tap k2=(kh2,kw2) at conv2 output pixel
    p=(oh,ow), i.e. input pixel (2*oh+kh2, 2*ow+kw2)."""
    B = x.shape[0]
    xp = jnp.pad(x[:, 0], ((0, 0), (2, 2), (2, 2)))               # (B, 32, 32)
    # conv1 im2col at every 28x28 output position: (B, 28, 28, 25)
    p1 = jnp.stack([xp[:, kh:kh + OH1, kw:kw + OW1]
                    for kh in range(5) for kw in range(5)], axis=-1)
    rows = [p1[:, kh2:kh2 + 2 * OH2 - 1:2, kw2:kw2 + 2 * OW2 - 1:2, :]
            .reshape(B, P2, K2)
            for kh2 in range(5) for kw2 in range(5)]
    return jnp.concatenate(rows, axis=1).astype(jnp.bfloat16)     # (B,3600,25)


# ----------------------------------------------------------------------------
# Parameters: PyTorch-style init + one-time kernel layout prep (hoisted).
# ----------------------------------------------------------------------------
def init_params(key):
    ks = jax.random.split(key, 8)

    def u(k, shape, fan_in):
        bound = 1.0 / jnp.sqrt(jnp.float32(fan_in))
        return jax.random.uniform(k, shape, jnp.float32, -bound, bound)

    return {
        "conv1_w": u(ks[0], (64, 1, 5, 5), 1 * 5 * 5),
        "conv1_b": u(ks[1], (64,), 1 * 5 * 5),
        "conv2_w": u(ks[2], (64, 64, 5, 5), 64 * 5 * 5),
        "conv2_b": u(ks[3], (64,), 64 * 5 * 5),
        "dense1_w": u(ks[4], (128, 64 * 12 * 12), 64 * 12 * 12),
        "dense1_b": u(ks[5], (128,), 64 * 12 * 12),
        "dense2_w": u(ks[6], (10, 128), 128),
        "dense2_b": u(ks[7], (10,), 128),
    }


def prepare_params(p):
    """One-time layout prep: (K, N) bf16 GEMM layouts; conv2 reordered to
    (tap, cin, cout); dense1 columns permuted from PyTorch's (c, h, w) flatten
    order to this kernel's (h, w, c) order."""
    w1 = p["conv1_w"].reshape(C, K2).T.astype(jnp.bfloat16)            # (25,64)
    w2 = jnp.transpose(p["conv2_w"], (2, 3, 1, 0)).reshape(K2, C, C) \
        .astype(jnp.bfloat16)                                          # (25,64,64)
    wd1 = p["dense1_w"].reshape(128, C, OH2, OW2) \
        .transpose(0, 2, 3, 1).reshape(128, C * P2).T \
        .astype(jnp.bfloat16)                                          # (9216,128)
    wd2 = p["dense2_w"].T.astype(jnp.bfloat16)                         # (128,10)
    return {
        "w1": w1, "b1": p["conv1_b"].reshape(1, C).astype(jnp.float32),
        "w2": w2, "b2": p["conv2_b"].reshape(1, C).astype(jnp.float32),
        "wd1": wd1, "bd1": p["dense1_b"].reshape(1, 128).astype(jnp.float32),
        "wd2": wd2, "bd2": p["dense2_b"].reshape(1, 10).astype(jnp.float32),
    }


# ----------------------------------------------------------------------------
# Forward pass (Pallas hot path; only the tiny (B,9216) flat crosses HBM).
# ----------------------------------------------------------------------------
def forward(prepped, x):
    """x: (B, 1, 28, 28) NCHW like the PyTorch module.  Returns (B, 10) f32."""
    B = x.shape[0]
    cols = _conv2_ordered_patches(x)                                # (B,3600,25)
    y2 = conv_stage(cols, prepped["w1"], prepped["b1"],
                    prepped["w2"], prepped["b2"])                   # (B,144,64)
    # TODO(synk): F.dropout(0.25 / 0.5) defaults to training-mode RNG in the
    # PyTorch module; implemented here as eval-mode identity (deterministic).
    flat = y2.reshape(B, P2 * C)    # free reshape; (h,w,c) order matches wd1
    tm = B if B <= 128 else 128
    return dense_stage(flat, prepped["wd1"], prepped["bd1"],
                       prepped["wd2"], prepped["bd2"], tm=tm)


# ----------------------------------------------------------------------------
# Pure-JAX f32 reference (sanity check; kernel path is bf16 on the MXU)
# ----------------------------------------------------------------------------
def reference(params, x):
    dn = ("NCHW", "OIHW", "NCHW")
    y = lax.conv_general_dilated(x, params["conv1_w"], (1, 1),
                                 ((2, 2), (2, 2)), dimension_numbers=dn)
    y = jax.nn.relu(y + params["conv1_b"][None, :, None, None])
    y = lax.conv_general_dilated(y, params["conv2_w"], (2, 2),
                                 ((0, 0), (0, 0)), dimension_numbers=dn)
    y = jax.nn.relu(y + params["conv2_b"][None, :, None, None])
    y = y.reshape(x.shape[0], -1)
    y = jax.nn.relu(y @ params["dense1_w"].T + params["dense1_b"])
    return y @ params["dense2_w"].T + params["dense2_b"]


if __name__ == "__main__":
    key = jax.random.PRNGKey(0)
    k_x, k_p = jax.random.split(key)
    params = init_params(k_p)
    prepped = prepare_params(params)        # weight layout prep done ONCE here
    # dense1 in_features = 64*12*12 forces 28x28 spatial input; small batch.
    x = jax.random.normal(k_x, (2, 1, 28, 28), jnp.float32)

    out = jax.jit(forward)(prepped, x)
    out = jax.block_until_ready(out)

    ref = reference(params, x)
    assert out.shape == (2, 10)
    # bf16 matmul operands with f32 accumulation -> a few-percent tolerance.
    assert jnp.allclose(out, ref, atol=3e-2, rtol=3e-2), \
        float(jnp.max(jnp.abs(out - ref)))
    print("KERNEL_OK")
</pallas_src>

<mosaic_0001>
module attributes {stable_mosaic.version = 11 : i64} {
  func.func @_conv_fused_kernel(%arg0: i32, %arg1: memref<1x3600x25xbf16, #tpu.memory_space<vmem>>, %arg2: memref<25x64xbf16, #tpu.memory_space<vmem>>, %arg3: memref<1x64xf32, #tpu.memory_space<vmem>>, %arg4: memref<25x64x64xbf16, #tpu.memory_space<vmem>>, %arg5: memref<1x64xf32, #tpu.memory_space<vmem>>, %arg6: memref<1x144x64xbf16, #tpu.memory_space<vmem>>) attributes {dimension_semantics = [#tpu.dimension_semantics<parallel>], iteration_bounds = array<i64: 2>, scalar_prefetch = 0 : i64, scratch_operands = 0 : i64, tpu.core_type = #tpu.core_type<tc>, window_params = [{transform_indices = @transform_0, window_bounds = array<i64: 1, 3600, 25>}, {pipeline_mode = #tpu.pipeline_mode<synchronous>, transform_indices = @transform_1, window_bounds = array<i64: 25, 64>}, {pipeline_mode = #tpu.pipeline_mode<synchronous>, transform_indices = @transform_2, window_bounds = array<i64: 1, 64>}, {pipeline_mode = #tpu.pipeline_mode<synchronous>, transform_indices = @transform_3, window_bounds = array<i64: 25, 64, 64>}, {pipeline_mode = #tpu.pipeline_mode<synchronous>, transform_indices = @transform_4, window_bounds = array<i64: 1, 64>}, {transform_indices = @transform_5, window_bounds = array<i64: 1, 144, 64>}]} {
    %cst = arith.constant 0.000000e+00 : f32
    %0 = vector.broadcast %cst : f32 to vector<144x64xf32>
    %c0 = arith.constant 0 : index
    %c0_0 = arith.constant 0 : index
    %c0_1 = arith.constant 0 : index
    %1 = vector.load %arg1[%c0, %c0_0, %c0_1] : memref<1x3600x25xbf16, #tpu.memory_space<vmem>>, vector<1x144x25xbf16>
    %2 = vector.shape_cast %1 : vector<1x144x25xbf16> to vector<144x25xbf16>
    %c0_2 = arith.constant 0 : index
    %c0_3 = arith.constant 0 : index
    %3 = vector.load %arg2[%c0_2, %c0_3] : memref<25x64xbf16, #tpu.memory_space<vmem>>, vector<25x64xbf16>
    %cst_4 = arith.constant dense<0.000000e+00> : vector<144x64xf32>
    %4 = tpu.matmul %2, %3, %cst_4 {dimension_numbers = #tpu.dot_dimension_numbers<[1], [0], [0], [1], [0, 0, 1, 1], [], []>} : vector<144x25xbf16>, vector<25x64xbf16>, vector<144x64xf32> -> vector<144x64xf32>
    %c0_5 = arith.constant 0 : index
    %c0_6 = arith.constant 0 : index
    %5 = vector.load %arg3[%c0_5, %c0_6] : memref<1x64xf32, #tpu.memory_space<vmem>>, vector<1x64xf32>
    %6 = vector.broadcast %5 : vector<1x64xf32> to vector<144x64xf32>
    %7 = arith.addf %4, %6 : vector<144x64xf32>
    %cst_7 = arith.constant 0.000000e+00 : f32
    %8 = vector.broadcast %cst_7 : f32 to vector<144x64xf32>
    %9 = arith.maximumf %7, %8 : vector<144x64xf32>
    %10 = arith.truncf %9 : vector<144x64xf32> to vector<144x64xbf16>
    %c0_8 = arith.constant 0 : index
    %c0_9 = arith.constant 0 : index
    %c0_10 = arith.constant 0 : index
    %11 = vector.load %arg4[%c0_8, %c0_9, %c0_10] : memref<25x64x64xbf16, #tpu.memory_space<vmem>>, vector<1x64x64xbf16>
    %12 = vector.shape_cast %11 : vector<1x64x64xbf16> to vector<64x64xbf16>
    %cst_11 = arith.constant dense<0.000000e+00> : vector<144x64xf32>
    %13 = tpu.matmul %10, %12, %cst_11 {dimension_numbers = #tpu.dot_dimension_numbers<[1], [0], [0], [1], [0, 0, 1, 1], [], []>} : vector<144x64xbf16>, vector<64x64xbf16>, vector<144x64xf32> -> vector<144x64xf32>
    %14 = arith.addf %0, %13 : vector<144x64xf32>
    %c0_12 = arith.constant 0 : index
    %c144 = arith.constant 144 : index
    %c0_13 = arith.constant 0 : index
    %15 = vector.load %arg1[%c0_12, %c144, %c0_13] : memref<1x3600x25xbf16, #tpu.memory_space<vmem>>, vector<1x144x25xbf16>
    %16 = vector.shape_cast %15 : vector<1x144x25xbf16> to vector<144x25xbf16>
    %c0_14 = arith.constant 0 : index
    %c0_15 = arith.constant 0 : index
    %17 = vector.load %arg2[%c0_14, %c0_15] : memref<25x64xbf16, #tpu.memory_space<vmem>>, vector<25x64xbf16>
    %cst_16 = arith.constant dense<0.000000e+00> : vector<144x64xf32>
    %18 = tpu.matmul %16, %17, %cst_16 {dimension_numbers = #tpu.dot_dimension_numbers<[1], [0], [0], [1], [0, 0, 1, 1], [], []>} : vector<144x25xbf16>, vector<25x64xbf16>, vector<144x64xf32> -> vector<144x64xf32>
    %c0_17 = arith.constant 0 : index
    %c0_18 = arith.constant 0 : index
    %19 = vector.load %arg3[%c0_17, %c0_18] : memref<1x64xf32, #tpu.memory_space<vmem>>, vector<1x64xf32>
    %20 = vector.broadcast %19 : vector<1x64xf32> to vector<144x64xf32>
    %21 = arith.addf %18, %20 : vector<144x64xf32>
    %cst_19 = arith.constant 0.000000e+00 : f32
    %22 = vector.broadcast %cst_19 : f32 to vector<144x64xf32>
    %23 = arith.maximumf %21, %22 : vector<144x64xf32>
    %24 = arith.truncf %23 : vector<144x64xf32> to vector<144x64xbf16>
    %c1 = arith.constant 1 : index
    %c0_20 = arith.constant 0 : index
    %c0_21 = arith.constant 0 : index
    %25 = vector.load %arg4[%c1, %c0_20, %c0_21] : memref<25x64x64xbf16, #tpu.memory_space<vmem>>, vector<1x64x64xbf16>
    %26 = vector.shape_cast %25 : vector<1x64x64xbf16> to vector<64x64xbf16>
    %cst_22 = arith.constant dense<0.000000e+00> : vector<144x64xf32>
    %27 = tpu.matmul %24, %26, %cst_22 {dimension_numbers = #tpu.dot_dimension_numbers<[1], [0], [0], [1], [0, 0, 1, 1], [], []>} : vector<144x64xbf16>, vector<64x64xbf16>, vector<144x64xf32> -> vector<144x64xf32>
    %28 = arith.addf %14, %27 : vector<144x64xf32>
    %c0_23 = arith.constant 0 : index
    %c288 = arith.constant 288 : index
    %c0_24 = arith.constant 0 : index
    %29 = vector.load %arg1[%c0_23, %c288, %c0_24] : memref<1x3600x25xbf16, #tpu.memory_space<vmem>>, vector<1x144x25xbf16>
    %30 = vector.shape_cast %29 : vector<1x144x25xbf16> to vector<144x25xbf16>
    %c0_25 = arith.constant 0 : index
    %c0_26 = arith.constant 0 : index
    %31 = vector.load %arg2[%c0_25, %c0_26] : memref<25x64xbf16, #tpu.memory_space<vmem>>, vector<25x64xbf16>
    %cst_27 = arith.constant dense<0.000000e+00> : vector<144x64xf32>
    %32 = tpu.matmul %30, %31, %cst_27 {dimension_numbers = #tpu.dot_dimension_numbers<[1], [0], [0], [1], [0, 0, 1, 1], [], []>} : vector<144x25xbf16>, vector<25x64xbf16>, vector<144x64xf32> -> vector<144x64xf32>
    %c0_28 = arith.constant 0 : index
    %c0_29 = arith.constant 0 : index
    %33 = vector.load %arg3[%c0_28, %c0_29] : memref<1x64xf32, #tpu.memory_space<vmem>>, vector<1x64xf32>
    %34 = vector.broadcast %33 : vector<1x64xf32> to vector<144x64xf32>
    %35 = arith.addf %32, %34 : vector<144x64xf32>
    %cst_30 = arith.constant 0.000000e+00 : f32
    %36 = vector.broadcast %cst_30 : f32 to vector<144x64xf32>
    %37 = arith.maximumf %35, %36 : vector<144x64xf32>
    %38 = arith.truncf %37 : vector<144x64xf32> to vector<144x64xbf16>
    %c2 = arith.constant 2 : index
    %c0_31 = arith.constant 0 : index
    %c0_32 = arith.constant 0 : index
    %39 = vector.load %arg4[%c2, %c0_31, %c0_32] : memref<25x64x64xbf16, #tpu.memory_space<vmem>>, vector<1x64x64xbf16>
    %40 = vector.shape_cast %39 : vector<1x64x64xbf16> to vector<64x64xbf16>
    %cst_33 = arith.constant dense<0.000000e+00> : vector<144x64xf32>
    %41 = tpu.matmul %38, %40, %cst_33 {dimension_numbers = #tpu.dot_dimension_numbers<[1], [0], [0], [1], [0, 0, 1, 1], [], []>} : vector<144x64xbf16>, vector<64x64xbf16>, vector<144x64xf32> -> vector<144x64xf32>
    %42 = arith.addf %28, %41 : vector<144x64xf32>
    %c0_34 = arith.constant 0 : index
    %c432 = arith.constant 432 : index
    %c0_35 = arith.constant 0 : index
    %43 = vector.load %arg1[%c0_34, %c432, %c0_35] : memref<1x3600x25xbf16, #tpu.memory_space<vmem>>, vector<1x144x25xbf16>
    %44 = vector.shape_cast %43 : vector<1x144x25xbf16> to vector<144x25xbf16>
    %c0_36 = arith.constant 0 : index
    %c0_37 = arith.constant 0 : index
    %45 = vector.load %arg2[%c0_36, %c0_37] : memref<25x64xbf16, #tpu.memory_space<vmem>>, vector<25x64xbf16>
    %cst_38 = arith.constant dense<0.000000e+00> : vector<144x64xf32>
    %46 = tpu.matmul %44, %45, %cst_38 {dimension_numbers = #tpu.dot_dimension_numbers<[1], [0], [0], [1], [0, 0, 1, 1], [], []>} : vector<144x25xbf16>, vector<25x64xbf16>, vector<144x64xf32> -> vector<144x64xf32>
    %c0_39 = arith.constant 0 : index
    %c0_40 = arith.constant 0 : index
    %47 = vector.load %arg3[%c0_39, %c0_40] : memref<1x64xf32, #tpu.memory_space<vmem>>, vector<1x64xf32>
    %48 = vector.broadcast %47 : vector<1x64xf32> to vector<144x64xf32>
    %49 = arith.addf %46, %48 : vector<144x64xf32>
    %cst_41 = arith.constant 0.000000e+00 : f32
    %50 = vector.broadcast %cst_41 : f32 to vector<144x64xf32>
    %51 = arith.maximumf %49, %50 : vector<144x64xf32>
    %52 = arith.truncf %51 : vector<144x64xf32> to vector<144x64xbf16>
    %c3 = arith.constant 3 : index
    %c0_42 = arith.constant 0 : index
    %c0_43 = arith.constant 0 : index
    %53 = vector.load %arg4[%c3, %c0_42, %c0_43] : memref<25x64x64xbf16, #tpu.memory_space<vmem>>, vector<1x64x64xbf16>
    %54 = vector.shape_cast %53 : vector<1x64x64xbf16> to vector<64x64xbf16>
    %cst_44 = arith.constant dense<0.000000e+00> : vector<144x64xf32>
    %55 = tpu.matmul %52, %54, %cst_44 {dimension_numbers = #tpu.dot_dimension_numbers<[1], [0], [0], [1], [0, 0, 1, 1], [], []>} : vector<144x64xbf16>, vector<64x64xbf16>, vector<144x64xf32> -> vector<144x64xf32>
    %56 = arith.addf %42, %55 : vector<144x64xf32>
    %c0_45 = arith.constant 0 : index
    %c576 = arith.constant 576 : index
    %c0_46 = arith.constant 0 : index
    %57 = vector.load %arg1[%c0_45, %c576, %c0_46] : memref<1x3600x25xbf16, #tpu.memory_space<vmem>>, vector<1x144x25xbf16>
    %58 = vector.shape_cast %57 : vector<1x144x25xbf16> to vector<144x25xbf16>
    %c0_47 = arith.constant 0 : index
    %c0_48 = arith.constant 0 : index
    %59 = vector.load %arg2[%c0_47, %c0_48] : memref<25x64xbf16, #tpu.memory_space<vmem>>, vector<25x64xbf16>
    %cst_49 = arith.constant dense<0.000000e+00> : vector<144x64xf32>
    %60 = tpu.matmul %58, %59, %cst_49 {dimension_numbers = #tpu.dot_dimension_numbers<[1], [0], [0], [1], [0, 0, 1, 1], [], []>} : vector<144x25xbf16>, vector<25x64xbf16>, vector<144x64xf32> -> vector<144x64xf32>
    %c0_50 = arith.constant 0 : index
    %c0_51 = arith.constant 0 : index
    %61 = vector.load %arg3[%c0_50, %c0_51] : memref<1x64xf32, #tpu.memory_space<vmem>>, vector<1x64xf32>
    %62 = vector.broadcast %61 : vector<1x64xf32> to vector<144x64xf32>
    %63 = arith.addf %60, %62 : vector<144x64xf32>
    %cst_52 = arith.constant 0.000000e+00 : f32
    %64 = vector.broadcast %cst_52 : f32 to vector<144x64xf32>
    %65 = arith.maximumf %63, %64 : vector<144x64xf32>
    %66 = arith.truncf %65 : vector<144x64xf32> to vector<144x64xbf16>
    %c4 = arith.constant 4 : index
    %c0_53 = arith.constant 0 : index
    %c0_54 = arith.constant 0 : index
    %67 = vector.load %arg4[%c4, %c0_53, %c0_54] : memref<25x64x64xbf16, #tpu.memory_space<vmem>>, vector<1x64x64xbf16>
    %68 = vector.shape_cast %67 : vector<1x64x64xbf16> to vector<64x64xbf16>
    %cst_55 = arith.constant dense<0.000000e+00> : vector<144x64xf32>
    %69 = tpu.matmul %66, %68, %cst_55 {dimension_numbers = #tpu.dot_dimension_numbers<[1], [0], [0], [1], [0, 0, 1, 1], [], []>} : vector<144x64xbf16>, vector<64x64xbf16>, vector<144x64xf32> -> vector<144x64xf32>
    %70 = arith.addf %56, %69 : vector<144x64xf32>
    %c0_56 = arith.constant 0 : index
    %c720 = arith.constant 720 : index
    %c0_57 = arith.constant 0 : index
    %71 = vector.load %arg1[%c0_56, %c720, %c0_57] : memref<1x3600x25xbf16, #tpu.memory_space<vmem>>, vector<1x144x25xbf16>
    %72 = vector.shape_cast %71 : vector<1x144x25xbf16> to vector<144x25xbf16>
    %c0_58 = arith.constant 0 : index
    %c0_59 = arith.constant 0 : index
    %73 = vector.load %arg2[%c0_58, %c0_59] : memref<25x64xbf16, #tpu.memory_space<vmem>>, vector<25x64xbf16>
    %cst_60 = arith.constant dense<0.000000e+00> : vector<144x64xf32>
    %74 = tpu.matmul %72, %73, %cst_60 {dimension_numbers = #tpu.dot_dimension_numbers<[1], [0], [0], [1], [0, 0, 1, 1], [], []>} : vector<144x25xbf16>, vector<25x64xbf16>, vector<144x64xf32> -> vector<144x64xf32>
    %c0_61 = arith.constant 0 : index
    %c0_62 = arith.constant 0 : index
    %75 = vector.load %arg3[%c0_61, %c0_62] : memref<1x64xf32, #tpu.memory_space<vmem>>, vector<1x64xf32>
    %76 = vector.broadcast %75 : vector<1x64xf32> to vector<144x64xf32>
    %77 = arith.addf %74, %76 : vector<144x64xf32>
    %cst_63 = arith.constant 0.000000e+00 : f32
    %78 = vector.broadcast %cst_63 : f32 to vector<144x64xf32>
    %79 = arith.maximumf %77, %78 : vector<144x64xf32>
    %80 = arith.truncf %79 : vector<144x64xf32> to vector<144x64xbf16>
    %c5 = arith.constant 5 : index
    %c0_64 = arith.constant 0 : index
    %c0_65 = arith.constant 0 : index
    %81 = vector.load %arg4[%c5, %c0_64, %c0_65] : memref<25x64x64xbf16, #tpu.memory_space<vmem>>, vector<1x64x64xbf16>
    %82 = vector.shape_cast %81 : vector<1x64x64xbf16> to vector<64x64xbf16>
    %cst_66 = arith.constant dense<0.000000e+00> : vector<144x64xf32>
    %83 = tpu.matmul %80, %82, %cst_66 {dimension_numbers = #tpu.dot_dimension_numbers<[1], [0], [0], [1], [0, 0, 1, 1], [], []>} : vector<144x64xbf16>, vector<64x64xbf16>, vector<144x64xf32> -> vector<144x64xf32>
    %84 = arith.addf %70, %83 : vector<144x64xf32>
    %c0_67 = arith.constant 0 : index
    %c864 = arith.constant 864 : index
    %c0_68 = arith.constant 0 : index
    %85 = vector.load %arg1[%c0_67, %c864, %c0_68] : memref<1x3600x25xbf16, #tpu.memory_space<vmem>>, vector<1x144x25xbf16>
    %86 = vector.shape_cast %85 : vector<1x144x25xbf16> to vector<144x25xbf16>
    %c0_69 = arith.constant 0 : index
    %c0_70 = arith.constant 0 : index
    %87 = vector.load %arg2[%c0_69, %c0_70] : memref<25x64xbf16, #tpu.memory_space<vmem>>, vector<25x64xbf16>
    %cst_71 = arith.constant dense<0.000000e+00> : vector<144x64xf32>
    %88 = tpu.matmul %86, %87, %cst_71 {dimension_numbers = #tpu.dot_dimension_numbers<[1], [0], [0], [1], [0, 0, 1, 1], [], []>} : vector<144x25xbf16>, vector<25x64xbf16>, vector<144x64xf32> -> vector<144x64xf32>
    %c0_72 = arith.constant 0 : index
    %c0_73 = arith.constant 0 : index
    %89 = vector.load %arg3[%c0_72, %c0_73] : memref<1x64xf32, #tpu.memory_space<vmem>>, vector<1x64xf32>
    %90 = vector.broadcast %89 : vector<1x64xf32> to vector<144x64xf32>
    %91 = arith.addf %88, %90 : vector<144x64xf32>
    %cst_74 = arith.constant 0.000000e+00 : f32
    %92 = vector.broadcast %cst_74 : f32 to vector<144x64xf32>
    %93 = arith.maximumf %91, %92 : vector<144x64xf32>
    %94 = arith.truncf %93 : vector<144x64xf32> to vector<144x64xbf16>
    %c6 = arith.constant 6 : index
    %c0_75 = arith.constant 0 : index
    %c0_76 = arith.constant 0 : index
    %95 = vector.load %arg4[%c6, %c0_75, %c0_76] : memref<25x64x64xbf16, #tpu.memory_space<vmem>>, vector<1x64x64xbf16>
    %96 = vector.shape_cast %95 : vector<1x64x64xbf16> to vector<64x64xbf16>
    %cst_77 = arith.constant dense<0.000000e+00> : vector<144x64xf32>
    %97 = tpu.matmul %94, %96, %cst_77 {dimension_numbers = #tpu.dot_dimension_numbers<[1], [0], [0], [1], [0, 0, 1, 1], [], []>} : vector<144x64xbf16>, vector<64x64xbf16>, vector<144x64xf32> -> vector<144x64xf32>
    %98 = arith.addf %84, %97 : vector<144x64xf32>
    %c0_78 = arith.constant 0 : index
    %c1008 = arith.constant 1008 : index
    %c0_79 = arith.constant 0 : index
    %99 = vector.load %arg1[%c0_78, %c1008, %c0_79] : memref<1x3600x25xbf16, #tpu.memory_space<vmem>>, vector<1x144x25xbf16>
    %100 = vector.shape_cast %99 : vector<1x144x25xbf16> to vector<144x25xbf16>
    %c0_80 = arith.constant 0 : index
    %c0_81 = arith.constant 0 : index
    %101 = vector.load %arg2[%c0_80, %c0_81] : memref<25x64xbf16, #tpu.memory_space<vmem>>, vector<25x64xbf16>
    %cst_82 = arith.constant dense<0.000000e+00> : vector<144x64xf32>
    %102 = tpu.matmul %100, %101, %cst_82 {dimension_numbers = #tpu.dot_dimension_numbers<[1], [0], [0], [1], [0, 0, 1, 1], [], []>} : vector<144x25xbf16>, vector<25x64xbf16>, vector<144x64xf32> -> vector<144x64xf32>
    %c0_83 = arith.constant 0 : index
    %c0_84 = arith.constant 0 : index
    %103 = vector.load %arg3[%c0_83, %c0_84] : memref<1x64xf32, #tpu.memory_space<vmem>>, vector<1x64xf32>
    %104 = vector.broadcast %103 : vector<1x64xf32> to vector<144x64xf32>
    %105 = arith.addf %102, %104 : vector<144x64xf32>
    %cst_85 = arith.constant 0.000000e+00 : f32
    %106 = vector.broadcast %cst_85 : f32 to vector<144x64xf32>
    %107 = arith.maximumf %105, %106 : vector<144x64xf32>
    %108 = arith.truncf %107 : vector<144x64xf32> to vector<144x64xbf16>
    %c7 = arith.constant 7 : index
    %c0_86 = arith.constant 0 : index
    %c0_87 = arith.constant 0 : index
    %109 = vector.load %arg4[%c7, %c0_86, %c0_87] : memref<25x64x64xbf16, #tpu.memory_space<vmem>>, vector<1x64x64xbf16>
    %110 = vector.shape_cast %109 : vector<1x64x64xbf16> to vector<64x64xbf16>
    %cst_88 = arith.constant dense<0.000000e+00> : vector<144x64xf32>
    %111 = tpu.matmul %108, %110, %cst_88 {dimension_numbers = #tpu.dot_dimension_numbers<[1], [0], [0], [1], [0, 0, 1, 1], [], []>} : vector<144x64xbf16>, vector<64x64xbf16>, vector<144x64xf32> -> vector<144x64xf32>
    %112 = arith.addf %98, %111 : vector<144x64xf32>
    %c0_89 = arith.constant 0 : index
    %c1152 = arith.constant 1152 : index
    %c0_90 = arith.constant 0 : index
    %113 = vector.load %arg1[%c0_89, %c1152, %c0_90] : memref<1x3600x25xbf16, #tpu.memory_space<vmem>>, vector<1x144x25xbf16>
    %114 = vector.shape_cast %113 : vector<1x144x25xbf16> to vector<144x25xbf16>
    %c0_91 = arith.constant 0 : index
    %c0_92 = arith.constant 0 : index
    %115 = vector.load %arg2[%c0_91, %c0_92] : memref<25x64xbf16, #tpu.memory_space<vmem>>, vector<25x64xbf16>
    %cst_93 = arith.constant dense<0.000000e+00> : vector<144x64xf32>
    %116 = tpu.matmul %114, %115, %cst_93 {dimension_numbers = #tpu.dot_dimension_numbers<[1], [0], [0], [1], [0, 0, 1, 1], [], []>} : vector<144x25xbf16>, vector<25x64xbf16>, vector<144x64xf32> -> vector<144x64xf32>
    %c0_94 = arith.constant 0 : index
    %c0_95 = arith.constant 0 : index
    %117 = vector.load %arg3[%c0_94, %c0_95] : memref<1x64xf32, #tpu.memory_space<vmem>>, vector<1x64xf32>
    %118 = vector.broadcast %117 : vector<1x64xf32> to vector<144x64xf32>
    %119 = arith.addf %116, %118 : vector<144x64xf32>
    %cst_96 = arith.constant 0.000000e+00 : f32
    %120 = vector.broadcast %cst_96 : f32 to vector<144x64xf32>
    %121 = arith.maximumf %119, %120 : vector<144x64xf32>
    %122 = arith.truncf %121 : vector<144x64xf32> to vector<144x64xbf16>
    %c8 = arith.constant 8 : index
    %c0_97 = arith.constant 0 : index
    %c0_98 = arith.constant 0 : index
    %123 = vector.load %arg4[%c8, %c0_97, %c0_98] : memref<25x64x64xbf16, #tpu.memory_space<vmem>>, vector<1x64x64xbf16>
    %124 = vector.shape_cast %123 : vector<1x64x64xbf16> to vector<64x64xbf16>
    %cst_99 = arith.constant dense<0.000000e+00> : vector<144x64xf32>
    %125 = tpu.matmul %122, %124, %cst_99 {dimension_numbers = #tpu.dot_dimension_numbers<[1], [0], [0], [1], [0, 0, 1, 1], [], []>} : vector<144x64xbf16>, vector<64x64xbf16>, vector<144x64xf32> -> vector<144x64xf32>
    %126 = arith.addf %112, %125 : vector<144x64xf32>
    %c0_100 = arith.constant 0 : index
    %c1296 = arith.constant 1296 : index
    %c0_101 = arith.constant 0 : index
    %127 = vector.load %arg1[%c0_100, %c1296, %c0_101] : memref<1x3600x25xbf16, #tpu.memory_space<vmem>>, vector<1x144x25xbf16>
    %128 = vector.shape_cast %127 : vector<1x144x25xbf16> to vector<144x25xbf16>
    %c0_102 = arith.constant 0 : index
    %c0_103 = arith.constant 0 : index
    %129 = vector.load %arg2[%c0_102, %c0_103] : memref<25x64xbf16, #tpu.memory_space<vmem>>, vector<25x64xbf16>
    %cst_104 = arith.constant dense<0.000000e+00> : vector<144x64xf32>
    %130 = tpu.matmul %128, %129, %cst_104 {dimension_numbers = #tpu.dot_dimension_numbers<[1], [0], [0], [1], [0, 0, 1, 1], [], []>} : vector<144x25xbf16>, vector<25x64xbf16>, vector<144x64xf32> -> vector<144x64xf32>
    %c0_105 = arith.constant 0 : index
    %c0_106 = arith.constant 0 : index
    %131 = vector.load %arg3[%c0_105, %c0_106] : memref<1x64xf32, #tpu.memory_space<vmem>>, vector<1x64xf32>
    %132 = vector.broadcast %131 : vector<1x64xf32> to vector<144x64xf32>
    %133 = arith.addf %130, %132 : vector<144x64xf32>
    %cst_107 = arith.constant 0.000000e+00 : f32
    %134 = vector.broadcast %cst_107 : f32 to vector<144x64xf32>
    %135 = arith.maximumf %133, %134 : vector<144x64xf32>
    %136 = arith.truncf %135 : vector<144x64xf32> to vector<144x64xbf16>
    %c9 = arith.constant 9 : index
    %c0_108 = arith.constant 0 : index
    %c0_109 = arith.constant 0 : index
    %137 = vector.load %arg4[%c9, %c0_108, %c0_109] : memref<25x64x64xbf16, #tpu.memory_space<vmem>>, vector<1x64x64xbf16>
    %138 = vector.shape_cast %137 : vector<1x64x64xbf16> to vector<64x64xbf16>
    %cst_110 = arith.constant dense<0.000000e+00> : vector<144x64xf32>
    %139 = tpu.matmul %136, %138, %cst_110 {dimension_numbers = #tpu.dot_dimension_numbers<[1], [0], [0], [1], [0, 0, 1, 1], [], []>} : vector<144x64xbf16>, vector<64x64xbf16>, vector<144x64xf32> -> vector<144x64xf32>
    %140 = arith.addf %126, %139 : vector<144x64xf32>
    %c0_111 = arith.constant 0 : index
    %c1440 = arith.constant 1440 : index
    %c0_112 = arith.constant 0 : index
    %141 = vector.load %arg1[%c0_111, %c1440, %c0_112] : memref<1x3600x25xbf16, #tpu.memory_space<vmem>>, vector<1x144x25xbf16>
    %142 = vector.shape_cast %141 : vector<1x144x25xbf16> to vector<144x25xbf16>
    %c0_113 = arith.constant 0 : index
    %c0_114 = arith.constant 0 : index
    %143 = vector.load %arg2[%c0_113, %c0_114] : memref<25x64xbf16, #tpu.memory_space<vmem>>, vector<25x64xbf16>
    %cst_115 = arith.constant dense<0.000000e+00> : vector<144x64xf32>
    %144 = tpu.matmul %142, %143, %cst_115 {dimension_numbers = #tpu.dot_dimension_numbers<[1], [0], [0], [1], [0, 0, 1, 1], [], []>} : vector<144x25xbf16>, vector<25x64xbf16>, vector<144x64xf32> -> vector<144x64xf32>
    %c0_116 = arith.constant 0 : index
    %c0_117 = arith.constant 0 : index
    %145 = vector.load %arg3[%c0_116, %c0_117] : memref<1x64xf32, #tpu.memory_space<vmem>>, vector<1x64xf32>
    %146 = vector.broadcast %145 : vector<1x64xf32> to vector<144x64xf32>
    %147 = arith.addf %144, %146 : vector<144x64xf32>
    %cst_118 = arith.constant 0.000000e+00 : f32
    %148 = vector.broadcast %cst_118 : f32 to vector<144x64xf32>
    %149 = arith.maximumf %147, %148 : vector<144x64xf32>
    %150 = arith.truncf %149 : vector<144x64xf32> to vector<144x64xbf16>
    %c10 = arith.constant 10 : index
    %c0_119 = arith.constant 0 : index
    %c0_120 = arith.constant 0 : index
    %151 = vector.load %arg4[%c10, %c0_119, %c0_120] : memref<25x64x64xbf16, #tpu.memory_space<vmem>>, vector<1x64x64xbf16>
    %152 = vector.shape_cast %151 : vector<1x64x64xbf16> to vector<64x64xbf16>
    %cst_121 = arith.constant dense<0.000000e+00> : vector<144x64xf32>
    %153 = tpu.matmul %150, %152, %cst_121 {dimension_numbers = #tpu.dot_dimension_numbers<[1], [0], [0], [1], [0, 0, 1, 1], [], []>} : vector<144x64xbf16>, vector<64x64xbf16>, vector<144x64xf32> -> vector<144x64xf32>
    %154 = arith.addf %140, %153 : vector<144x64xf32>
    %c0_122 = arith.constant 0 : index
    %c1584 = arith.constant 1584 : index
    %c0_123 = arith.constant 0 : index
    %155 = vector.load %arg1[%c0_122, %c1584, %c0_123] : memref<1x3600x25xbf16, #tpu.memory_space<vmem>>, vector<1x144x25xbf16>
    %156 = vector.shape_cast %155 : vector<1x144x25xbf16> to vector<144x25xbf16>
    %c0_124 = arith.constant 0 : index
    %c0_125 = arith.constant 0 : index
    %157 = vector.load %arg2[%c0_124, %c0_125] : memref<25x64xbf16, #tpu.memory_space<vmem>>, vector<25x64xbf16>
    %cst_126 = arith.constant dense<0.000000e+00> : vector<144x64xf32>
    %158 = tpu.matmul %156, %157, %cst_126 {dimension_numbers = #tpu.dot_dimension_numbers<[1], [0], [0], [1], [0, 0, 1, 1], [], []>} : vector<144x25xbf16>, vector<25x64xbf16>, vector<144x64xf32> -> vector<144x64xf32>
    %c0_127 = arith.constant 0 : index
    %c0_128 = arith.constant 0 : index
    %159 = vector.load %arg3[%c0_127, %c0_128] : memref<1x64xf32, #tpu.memory_space<vmem>>, vector<1x64xf32>
    %160 = vector.broadcast %159 : vector<1x64xf32> to vector<144x64xf32>
    %161 = arith.addf %158, %160 : vector<144x64xf32>
    %cst_129 = arith.constant 0.000000e+00 : f32
    %162 = vector.broadcast %cst_129 : f32 to vector<144x64xf32>
    %163 = arith.maximumf %161, %162 : vector<144x64xf32>
    %164 = arith.truncf %163 : vector<144x64xf32> to vector<144x64xbf16>
    %c11 = arith.constant 11 : index
    %c0_130 = arith.constant 0 : index
    %c0_131 = arith.constant 0 : index
    %165 = vector.load %arg4[%c11, %c0_130, %c0_131] : memref<25x64x64xbf16, #tpu.memory_space<vmem>>, vector<1x64x64xbf16>
    %166 = vector.shape_cast %165 : vector<1x64x64xbf16> to vector<64x64xbf16>
    %cst_132 = arith.constant dense<0.000000e+00> : vector<144x64xf32>
    %167 = tpu.matmul %164, %166, %cst_132 {dimension_numbers = #tpu.dot_dimension_numbers<[1], [0], [0], [1], [0, 0, 1, 1], [], []>} : vector<144x64xbf16>, vector<64x64xbf16>, vector<144x64xf32> -> vector<144x64xf32>
    %168 = arith.addf %154, %167 : vector<144x64xf32>
    %c0_133 = arith.constant 0 : index
    %c1728 = arith.constant 1728 : index
    %c0_134 = arith.constant 0 : index
    %169 = vector.load %arg1[%c0_133, %c1728, %c0_134] : memref<1x3600x25xbf16, #tpu.memory_space<vmem>>, vector<1x144x25xbf16>
    %170 = vector.shape_cast %169 : vector<1x144x25xbf16> to vector<144x25xbf16>
    %c0_135 = arith.constant 0 : index
    %c0_136 = arith.constant 0 : index
    %171 = vector.load %arg2[%c0_135, %c0_136] : memref<25x64xbf16, #tpu.memory_space<vmem>>, vector<25x64xbf16>
    %cst_137 = arith.constant dense<0.000000e+00> : vector<144x64xf32>
    %172 = tpu.matmul %170, %171, %cst_137 {dimension_numbers = #tpu.dot_dimension_numbers<[1], [0], [0], [1], [0, 0, 1, 1], [], []>} : vector<144x25xbf16>, vector<25x64xbf16>, vector<144x64xf32> -> vector<144x64xf32>
    %c0_138 = arith.constant 0 : index
    %c0_139 = arith.constant 0 : index
    %173 = vector.load %arg3[%c0_138, %c0_139] : memref<1x64xf32, #tpu.memory_space<vmem>>, vector<1x64xf32>
    %174 = vector.broadcast %173 : vector<1x64xf32> to vector<144x64xf32>
    %175 = arith.addf %172, %174 : vector<144x64xf32>
    %cst_140 = arith.constant 0.000000e+00 : f32
    %176 = vector.broadcast %cst_140 : f32 to vector<144x64xf32>
    %177 = arith.maximumf %175, %176 : vector<144x64xf32>
    %178 = arith.truncf %177 : vector<144x64xf32> to vector<144x64xbf16>
    %c12 = arith.constant 12 : index
    %c0_141 = arith.constant 0 : index
    %c0_142 = arith.constant 0 : index
    %179 = vector.load %arg4[%c12, %c0_141, %c0_142] : memref<25x64x64xbf16, #tpu.memory_space<vmem>>, vector<1x64x64xbf16>
    %180 = vector.shape_cast %179 : vector<1x64x64xbf16> to vector<64x64xbf16>
    %cst_143 = arith.constant dense<0.000000e+00> : vector<144x64xf32>
    %181 = tpu.matmul %178, %180, %cst_143 {dimension_numbers = #tpu.dot_dimension_numbers<[1], [0], [0], [1], [0, 0, 1, 1], [], []>} : vector<144x64xbf16>, vector<64x64xbf16>, vector<144x64xf32> -> vector<144x64xf32>
    %182 = arith.addf %168, %181 : vector<144x64xf32>
    %c0_144 = arith.constant 0 : index
    %c1872 = arith.constant 1872 : index
    %c0_145 = arith.constant 0 : index
    %183 = vector.load %arg1[%c0_144, %c1872, %c0_145] : memref<1x3600x25xbf16, #tpu.memory_space<vmem>>, vector<1x144x25xbf16>
    %184 = vector.shape_cast %183 : vector<1x144x25xbf16> to vector<144x25xbf16>
    %c0_146 = arith.constant 0 : index
    %c0_147 = arith.constant 0 : index
    %185 = vector.load %arg2[%c0_146, %c0_147] : memref<25x64xbf16, #tpu.memory_space<vmem>>, vector<25x64xbf16>
    %cst_148 = arith.constant dense<0.000000e+00> : vector<144x64xf32>
    %186 = tpu.matmul %184, %185, %cst_148 {dimension_numbers = #tpu.dot_dimension_numbers<[1], [0], [0], [1], [0, 0, 1, 1], [], []>} : vector<144x25xbf16>, vector<25x64xbf16>, vector<144x64xf32> -> vector<144x64xf32>
    %c0_149 = arith.constant 0 : index
    %c0_150 = arith.constant 0 : index
    %187 = vector.load %arg3[%c0_149, %c0_150] : memref<1x64xf32, #tpu.memory_space<vmem>>, vector<1x64xf32>
    %188 = vector.broadcast %187 : vector<1x64xf32> to vector<144x64xf32>
    %189 = arith.addf %186, %188 : vector<144x64xf32>
    %cst_151 = arith.constant 0.000000e+00 : f32
    %190 = vector.broadcast %cst_151 : f32 to vector<144x64xf32>
    %191 = arith.maximumf %189, %190 : vector<144x64xf32>
    %192 = arith.truncf %191 : vector<144x64xf32> to vector<144x64xbf16>
    %c13 = arith.constant 13 : index
    %c0_152 = arith.constant 0 : index
    %c0_153 = arith.constant 0 : index
    %193 = vector.load %arg4[%c13, %c0_152, %c0_153] : memref<25x64x64xbf16, #tpu.memory_space<vmem>>, vector<1x64x64xbf16>
    %194 = vector.shape_cast %193 : vector<1x64x64xbf16> to vector<64x64xbf16>
    %cst_154 = arith.constant dense<0.000000e+00> : vector<144x64xf32>
    %195 = tpu.matmul %192, %194, %cst_154 {dimension_numbers = #tpu.dot_dimension_numbers<[1], [0], [0], [1], [0, 0, 1, 1], [], []>} : vector<144x64xbf16>, vector<64x64xbf16>, vector<144x64xf32> -> vector<144x64xf32>
    %196 = arith.addf %182, %195 : vector<144x64xf32>
    %c0_155 = arith.constant 0 : index
    %c2016 = arith.constant 2016 : index
    %c0_156 = arith.constant 0 : index
    %197 = vector.load %arg1[%c0_155, %c2016, %c0_156] : memref<1x3600x25xbf16, #tpu.memory_space<vmem>>, vector<1x144x25xbf16>
    %198 = vector.shape_cast %197 : vector<1x144x25xbf16> to vector<144x25xbf16>
    %c0_157 = arith.constant 0 : index
    %c0_158 = arith.constant 0 : index
    %199 = vector.load %arg2[%c0_157, %c0_158] : memref<25x64xbf16, #tpu.memory_space<vmem>>, vector<25x64xbf16>
    %cst_159 = arith.constant dense<0.000000e+00> : vector<144x64xf32>
    %200 = tpu.matmul %198, %199, %cst_159 {dimension_numbers = #tpu.dot_dimension_numbers<[1], [0], [0], [1], [0, 0, 1, 1], [], []>} : vector<144x25xbf16>, vector<25x64xbf16>, vector<144x64xf32> -> vector<144x64xf32>
    %c0_160 = arith.constant 0 : index
    %c0_161 = arith.constant 0 : index
    %201 = vector.load %arg3[%c0_160, %c0_161] : memref<1x64xf32, #tpu.memory_space<vmem>>, vector<1x64xf32>
    %202 = vector.broadcast %201 : vector<1x64xf32> to vector<144x64xf32>
    %203 = arith.addf %200, %202 : vector<144x64xf32>
    %cst_162 = arith.constant 0.000000e+00 : f32
    %204 = vector.broadcast %cst_162 : f32 to vector<144x64xf32>
    %205 = arith.maximumf %203, %204 : vector<144x64xf32>
    %206 = arith.truncf %205 : vector<144x64xf32> to vector<144x64xbf16>
    %c14 = arith.constant 14 : index
    %c0_163 = arith.constant 0 : index
    %c0_164 = arith.constant 0 : index
    %207 = vector.load %arg4[%c14, %c0_163, %c0_164] : memref<25x64x64xbf16, #tpu.memory_space<vmem>>, vector<1x64x64xbf16>
    %208 = vector.shape_cast %207 : vector<1x64x64xbf16> to vector<64x64xbf16>
    %cst_165 = arith.constant dense<0.000000e+00> : vector<144x64xf32>
    %209 = tpu.matmul %206, %208, %cst_165 {dimension_numbers = #tpu.dot_dimension_numbers<[1], [0], [0], [1], [0, 0, 1, 1], [], []>} : vector<144x64xbf16>, vector<64x64xbf16>, vector<144x64xf32> -> vector<144x64xf32>
    %210 = arith.addf %196, %209 : vector<144x64xf32>
    %c0_166 = arith.constant 0 : index
    %c2160 = arith.constant 2160 : index
    %c0_167 = arith.constant 0 : index
    %211 = vector.load %arg1[%c0_166, %c2160, %c0_167] : memref<1x3600x25xbf16, #tpu.memory_space<vmem>>, vector<1x144x25xbf16>
    %212 = vector.shape_cast %211 : vector<1x144x25xbf16> to vector<144x25xbf16>
    %c0_168 = arith.constant 0 : index
    %c0_169 = arith.constant 0 : index
    %213 = vector.load %arg2[%c0_168, %c0_169] : memref<25x64xbf16, #tpu.memory_space<vmem>>, vector<25x64xbf16>
    %cst_170 = arith.constant dense<0.000000e+00> : vector<144x64xf32>
    %214 = tpu.matmul %212, %213, %cst_170 {dimension_numbers = #tpu.dot_dimension_numbers<[1], [0], [0], [1], [0, 0, 1, 1], [], []>} : vector<144x25xbf16>, vector<25x64xbf16>, vector<144x64xf32> -> vector<144x64xf32>
    %c0_171 = arith.constant 0 : index
    %c0_172 = arith.constant 0 : index
    %215 = vector.load %arg3[%c0_171, %c0_172] : memref<1x64xf32, #tpu.memory_space<vmem>>, vector<1x64xf32>
    %216 = vector.broadcast %215 : vector<1x64xf32> to vector<144x64xf32>
    %217 = arith.addf %214, %216 : vector<144x64xf32>
    %cst_173 = arith.constant 0.000000e+00 : f32
    %218 = vector.broadcast %cst_173 : f32 to vector<144x64xf32>
    %219 = arith.maximumf %217, %218 : vector<144x64xf32>
    %220 = arith.truncf %219 : vector<144x64xf32> to vector<144x64xbf16>
    %c15 = arith.constant 15 : index
    %c0_174 = arith.constant 0 : index
    %c0_175 = arith.constant 0 : index
    %221 = vector.load %arg4[%c15, %c0_174, %c0_175] : memref<25x64x64xbf16, #tpu.memory_space<vmem>>, vector<1x64x64xbf16>
    %222 = vector.shape_cast %221 : vector<1x64x64xbf16> to vector<64x64xbf16>
    %cst_176 = arith.constant dense<0.000000e+00> : vector<144x64xf32>
    %223 = tpu.matmul %220, %222, %cst_176 {dimension_numbers = #tpu.dot_dimension_numbers<[1], [0], [0], [1], [0, 0, 1, 1], [], []>} : vector<144x64xbf16>, vector<64x64xbf16>, vector<144x64xf32> -> vector<144x64xf32>
    %224 = arith.addf %210, %223 : vector<144x64xf32>
    %c0_177 = arith.constant 0 : index
    %c2304 = arith.constant 2304 : index
    %c0_178 = arith.constant 0 : index
    %225 = vector.load %arg1[%c0_177, %c2304, %c0_178] : memref<1x3600x25xbf16, #tpu.memory_space<vmem>>, vector<1x144x25xbf16>
    %226 = vector.shape_cast %225 : vector<1x144x25xbf16> to vector<144x25xbf16>
    %c0_179 = arith.constant 0 : index
    %c0_180 = arith.constant 0 : index
    %227 = vector.load %arg2[%c0_179, %c0_180] : memref<25x64xbf16, #tpu.memory_space<vmem>>, vector<25x64xbf16>
    %cst_181 = arith.constant dense<0.000000e+00> : vector<144x64xf32>
    %228 = tpu.matmul %226, %227, %cst_181 {dimension_numbers = #tpu.dot_dimension_numbers<[1], [0], [0], [1], [0, 0, 1, 1], [], []>} : vector<144x25xbf16>, vector<25x64xbf16>, vector<144x64xf32> -> vector<144x64xf32>
    %c0_182 = arith.constant 0 : index
    %c0_183 = arith.constant 0 : index
    %229 = vector.load %arg3[%c0_182, %c0_183] : memref<1x64xf32, #tpu.memory_space<vmem>>, vector<1x64xf32>
    %230 = vector.broadcast %229 : vector<1x64xf32> to vector<144x64xf32>
    %231 = arith.addf %228, %230 : vector<144x64xf32>
    %cst_184 = arith.constant 0.000000e+00 : f32
    %232 = vector.broadcast %cst_184 : f32 to vector<144x64xf32>
    %233 = arith.maximumf %231, %232 : vector<144x64xf32>
    %234 = arith.truncf %233 : vector<144x64xf32> to vector<144x64xbf16>
    %c16 = arith.constant 16 : index
    %c0_185 = arith.constant 0 : index
    %c0_186 = arith.constant 0 : index
    %235 = vector.load %arg4[%c16, %c0_185, %c0_186] : memref<25x64x64xbf16, #tpu.memory_space<vmem>>, vector<1x64x64xbf16>
    %236 = vector.shape_cast %235 : vector<1x64x64xbf16> to vector<64x64xbf16>
    %cst_187 = arith.constant dense<0.000000e+00> : vector<144x64xf32>
    %237 = tpu.matmul %234, %236, %cst_187 {dimension_numbers = #tpu.dot_dimension_numbers<[1], [0], [0], [1], [0, 0, 1, 1], [], []>} : vector<144x64xbf16>, vector<64x64xbf16>, vector<144x64xf32> -> vector<144x64xf32>
    %238 = arith.addf %224, %237 : vector<144x64xf32>
    %c0_188 = arith.constant 0 : index
    %c2448 = arith.constant 2448 : index
    %c0_189 = arith.constant 0 : index
    %239 = vector.load %arg1[%c0_188, %c2448, %c0_189] : memref<1x3600x25xbf16, #tpu.memory_space<vmem>>, vector<1x144x25xbf16>
    %240 = vector.shape_cast %239 : vector<1x144x25xbf16> to vector<144x25xbf16>
    %c0_190 = arith.constant 0 : index
    %c0_191 = arith.constant 0 : index
    %241 = vector.load %arg2[%c0_190, %c0_191] : memref<25x64xbf16, #tpu.memory_space<vmem>>, vector<25x64xbf16>
    %cst_192 = arith.constant dense<0.000000e+00> : vector<144x64xf32>
    %242 = tpu.matmul %240, %241, %cst_192 {dimension_numbers = #tpu.dot_dimension_numbers<[1], [0], [0], [1], [0, 0, 1, 1], [], []>} : vector<144x25xbf16>, vector<25x64xbf16>, vector<144x64xf32> -> vector<144x64xf32>
    %c0_193 = arith.constant 0 : index
    %c0_194 = arith.constant 0 : index
    %243 = vector.load %arg3[%c0_193, %c0_194] : memref<1x64xf32, #tpu.memory_space<vmem>>, vector<1x64xf32>
    %244 = vector.broadcast %243 : vector<1x64xf32> to vector<144x64xf32>
    %245 = arith.addf %242, %244 : vector<144x64xf32>
    %cst_195 = arith.constant 0.000000e+00 : f32
    %246 = vector.broadcast %cst_195 : f32 to vector<144x64xf32>
    %247 = arith.maximumf %245, %246 : vector<144x64xf32>
    %248 = arith.truncf %247 : vector<144x64xf32> to vector<144x64xbf16>
    %c17 = arith.constant 17 : index
    %c0_196 = arith.constant 0 : index
    %c0_197 = arith.constant 0 : index
    %249 = vector.load %arg4[%c17, %c0_196, %c0_197] : memref<25x64x64xbf16, #tpu.memory_space<vmem>>, vector<1x64x64xbf16>
    %250 = vector.shape_cast %249 : vector<1x64x64xbf16> to vector<64x64xbf16>
    %cst_198 = arith.constant dense<0.000000e+00> : vector<144x64xf32>
    %251 = tpu.matmul %248, %250, %cst_198 {dimension_numbers = #tpu.dot_dimension_numbers<[1], [0], [0], [1], [0, 0, 1, 1], [], []>} : vector<144x64xbf16>, vector<64x64xbf16>, vector<144x64xf32> -> vector<144x64xf32>
    %252 = arith.addf %238, %251 : vector<144x64xf32>
    %c0_199 = arith.constant 0 : index
    %c2592 = arith.constant 2592 : index
    %c0_200 = arith.constant 0 : index
    %253 = vector.load %arg1[%c0_199, %c2592, %c0_200] : memref<1x3600x25xbf16, #tpu.memory_space<vmem>>, vector<1x144x25xbf16>
    %254 = vector.shape_cast %253 : vector<1x144x25xbf16> to vector<144x25xbf16>
    %c0_201 = arith.constant 0 : index
    %c0_202 = arith.constant 0 : index
    %255 = vector.load %arg2[%c0_201, %c0_202] : memref<25x64xbf16, #tpu.memory_space<vmem>>, vector<25x64xbf16>
    %cst_203 = arith.constant dense<0.000000e+00> : vector<144x64xf32>
    %256 = tpu.matmul %254, %255, %cst_203 {dimension_numbers = #tpu.dot_dimension_numbers<[1], [0], [0], [1], [0, 0, 1, 1], [], []>} : vector<144x25xbf16>, vector<25x64xbf16>, vector<144x64xf32> -> vector<144x64xf32>
    %c0_204 = arith.constant 0 : index
    %c0_205 = arith.constant 0 : index
    %257 = vector.load %arg3[%c0_204, %c0_205] : memref<1x64xf32, #tpu.memory_space<vmem>>, vector<1x64xf32>
    %258 = vector.broadcast %257 : vector<1x64xf32> to vector<144x64xf32>
    %259 = arith.addf %256, %258 : vector<144x64xf32>
    %cst_206 = arith.constant 0.000000e+00 : f32
    %260 = vector.broadcast %cst_206 : f32 to vector<144x64xf32>
    %261 = arith.maximumf %259, %260 : vector<144x64xf32>
    %262 = arith.truncf %261 : vector<144x64xf32> to vector<144x64xbf16>
    %c18 = arith.constant 18 : index
    %c0_207 = arith.constant 0 : index
    %c0_208 = arith.constant 0 : index
    %263 = vector.load %arg4[%c18, %c0_207, %c0_208] : memref<25x64x64xbf16, #tpu.memory_space<vmem>>, vector<1x64x64xbf16>
    %264 = vector.shape_cast %263 : vector<1x64x64xbf16> to vector<64x64xbf16>
    %cst_209 = arith.constant dense<0.000000e+00> : vector<144x64xf32>
    %265 = tpu.matmul %262, %264, %cst_209 {dimension_numbers = #tpu.dot_dimension_numbers<[1], [0], [0], [1], [0, 0, 1, 1], [], []>} : vector<144x64xbf16>, vector<64x64xbf16>, vector<144x64xf32> -> vector<144x64xf32>
    %266 = arith.addf %252, %265 : vector<144x64xf32>
    %c0_210 = arith.constant 0 : index
    %c2736 = arith.constant 2736 : index
    %c0_211 = arith.constant 0 : index
    %267 = vector.load %arg1[%c0_210, %c2736, %c0_211] : memref<1x3600x25xbf16, #tpu.memory_space<vmem>>, vector<1x144x25xbf16>
    %268 = vector.shape_cast %267 : vector<1x144x25xbf16> to vector<144x25xbf16>
    %c0_212 = arith.constant 0 : index
    %c0_213 = arith.constant 0 : index
    %269 = vector.load %arg2[%c0_212, %c0_213] : memref<25x64xbf16, #tpu.memory_space<vmem>>, vector<25x64xbf16>
    %cst_214 = arith.constant dense<0.000000e+00> : vector<144x64xf32>
    %270 = tpu.matmul %268, %269, %cst_214 {dimension_numbers = #tpu.dot_dimension_numbers<[1], [0], [0], [1], [0, 0, 1, 1], [], []>} : vector<144x25xbf16>, vector<25x64xbf16>, vector<144x64xf32> -> vector<144x64xf32>
    %c0_215 = arith.constant 0 : index
    %c0_216 = arith.constant 0 : index
    %271 = vector.load %arg3[%c0_215, %c0_216] : memref<1x64xf32, #tpu.memory_space<vmem>>, vector<1x64xf32>
    %272 = vector.broadcast %271 : vector<1x64xf32> to vector<144x64xf32>
    %273 = arith.addf %270, %272 : vector<144x64xf32>
    %cst_217 = arith.constant 0.000000e+00 : f32
    %274 = vector.broadcast %cst_217 : f32 to vector<144x64xf32>
    %275 = arith.maximumf %273, %274 : vector<144x64xf32>
    %276 = arith.truncf %275 : vector<144x64xf32> to vector<144x64xbf16>
    %c19 = arith.constant 19 : index
    %c0_218 = arith.constant 0 : index
    %c0_219 = arith.constant 0 : index
    %277 = vector.load %arg4[%c19, %c0_218, %c0_219] : memref<25x64x64xbf16, #tpu.memory_space<vmem>>, vector<1x64x64xbf16>
    %278 = vector.shape_cast %277 : vector<1x64x64xbf16> to vector<64x64xbf16>
    %cst_220 = arith.constant dense<0.000000e+00> : vector<144x64xf32>
    %279 = tpu.matmul %276, %278, %cst_220 {dimension_numbers = #tpu.dot_dimension_numbers<[1], [0], [0], [1], [0, 0, 1, 1], [], []>} : vector<144x64xbf16>, vector<64x64xbf16>, vector<144x64xf32> -> vector<144x64xf32>
    %280 = arith.addf %266, %279 : vector<144x64xf32>
    %c0_221 = arith.constant 0 : index
    %c2880 = arith.constant 2880 : index
    %c0_222 = arith.constant 0 : index
    %281 = vector.load %arg1[%c0_221, %c2880, %c0_222] : memref<1x3600x25xbf16, #tpu.memory_space<vmem>>, vector<1x144x25xbf16>
    %282 = vector.shape_cast %281 : vector<1x144x25xbf16> to vector<144x25xbf16>
    %c0_223 = arith.constant 0 : index
    %c0_224 = arith.constant 0 : index
    %283 = vector.load %arg2[%c0_223, %c0_224] : memref<25x64xbf16, #tpu.memory_space<vmem>>, vector<25x64xbf16>
    %cst_225 = arith.constant dense<0.000000e+00> : vector<144x64xf32>
    %284 = tpu.matmul %282, %283, %cst_225 {dimension_numbers = #tpu.dot_dimension_numbers<[1], [0], [0], [1], [0, 0, 1, 1], [], []>} : vector<144x25xbf16>, vector<25x64xbf16>, vector<144x64xf32> -> vector<144x64xf32>
    %c0_226 = arith.constant 0 : index
    %c0_227 = arith.constant 0 : index
    %285 = vector.load %arg3[%c0_226, %c0_227] : memref<1x64xf32, #tpu.memory_space<vmem>>, vector<1x64xf32>
    %286 = vector.broadcast %285 : vector<1x64xf32> to vector<144x64xf32>
    %287 = arith.addf %284, %286 : vector<144x64xf32>
    %cst_228 = arith.constant 0.000000e+00 : f32
    %288 = vector.broadcast %cst_228 : f32 to vector<144x64xf32>
    %289 = arith.maximumf %287, %288 : vector<144x64xf32>
    %290 = arith.truncf %289 : vector<144x64xf32> to vector<144x64xbf16>
    %c20 = arith.constant 20 : index
    %c0_229 = arith.constant 0 : index
    %c0_230 = arith.constant 0 : index
    %291 = vector.load %arg4[%c20, %c0_229, %c0_230] : memref<25x64x64xbf16, #tpu.memory_space<vmem>>, vector<1x64x64xbf16>
    %292 = vector.shape_cast %291 : vector<1x64x64xbf16> to vector<64x64xbf16>
    %cst_231 = arith.constant dense<0.000000e+00> : vector<144x64xf32>
    %293 = tpu.matmul %290, %292, %cst_231 {dimension_numbers = #tpu.dot_dimension_numbers<[1], [0], [0], [1], [0, 0, 1, 1], [], []>} : vector<144x64xbf16>, vector<64x64xbf16>, vector<144x64xf32> -> vector<144x64xf32>
    %294 = arith.addf %280, %293 : vector<144x64xf32>
    %c0_232 = arith.constant 0 : index
    %c3024 = arith.constant 3024 : index
    %c0_233 = arith.constant 0 : index
    %295 = vector.load %arg1[%c0_232, %c3024, %c0_233] : memref<1x3600x25xbf16, #tpu.memory_space<vmem>>, vector<1x144x25xbf16>
    %296 = vector.shape_cast %295 : vector<1x144x25xbf16> to vector<144x25xbf16>
    %c0_234 = arith.constant 0 : index
    %c0_235 = arith.constant 0 : index
    %297 = vector.load %arg2[%c0_234, %c0_235] : memref<25x64xbf16, #tpu.memory_space<vmem>>, vector<25x64xbf16>
    %cst_236 = arith.constant dense<0.000000e+00> : vector<144x64xf32>
    %298 = tpu.matmul %296, %297, %cst_236 {dimension_numbers = #tpu.dot_dimension_numbers<[1], [0], [0], [1], [0, 0, 1, 1], [], []>} : vector<144x25xbf16>, vector<25x64xbf16>, vector<144x64xf32> -> vector<144x64xf32>
    %c0_237 = arith.constant 0 : index
    %c0_238 = arith.constant 0 : index
    %299 = vector.load %arg3[%c0_237, %c0_238] : memref<1x64xf32, #tpu.memory_space<vmem>>, vector<1x64xf32>
    %300 = vector.broadcast %299 : vector<1x64xf32> to vector<144x64xf32>
    %301 = arith.addf %298, %300 : vector<144x64xf32>
    %cst_239 = arith.constant 0.000000e+00 : f32
    %302 = vector.broadcast %cst_239 : f32 to vector<144x64xf32>
    %303 = arith.maximumf %301, %302 : vector<144x64xf32>
    %304 = arith.truncf %303 : vector<144x64xf32> to vector<144x64xbf16>
    %c21 = arith.constant 21 : index
    %c0_240 = arith.constant 0 : index
    %c0_241 = arith.constant 0 : index
    %305 = vector.load %arg4[%c21, %c0_240, %c0_241] : memref<25x64x64xbf16, #tpu.memory_space<vmem>>, vector<1x64x64xbf16>
    %306 = vector.shape_cast %305 : vector<1x64x64xbf16> to vector<64x64xbf16>
    %cst_242 = arith.constant dense<0.000000e+00> : vector<144x64xf32>
    %307 = tpu.matmul %304, %306, %cst_242 {dimension_numbers = #tpu.dot_dimension_numbers<[1], [0], [0], [1], [0, 0, 1, 1], [], []>} : vector<144x64xbf16>, vector<64x64xbf16>, vector<144x64xf32> -> vector<144x64xf32>
    %308 = arith.addf %294, %307 : vector<144x64xf32>
    %c0_243 = arith.constant 0 : index
    %c3168 = arith.constant 3168 : index
    %c0_244 = arith.constant 0 : index
    %309 = vector.load %arg1[%c0_243, %c3168, %c0_244] : memref<1x3600x25xbf16, #tpu.memory_space<vmem>>, vector<1x144x25xbf16>
    %310 = vector.shape_cast %309 : vector<1x144x25xbf16> to vector<144x25xbf16>
    %c0_245 = arith.constant 0 : index
    %c0_246 = arith.constant 0 : index
    %311 = vector.load %arg2[%c0_245, %c0_246] : memref<25x64xbf16, #tpu.memory_space<vmem>>, vector<25x64xbf16>
    %cst_247 = arith.constant dense<0.000000e+00> : vector<144x64xf32>
    %312 = tpu.matmul %310, %311, %cst_247 {dimension_numbers = #tpu.dot_dimension_numbers<[1], [0], [0], [1], [0, 0, 1, 1], [], []>} : vector<144x25xbf16>, vector<25x64xbf16>, vector<144x64xf32> -> vector<144x64xf32>
    %c0_248 = arith.constant 0 : index
    %c0_249 = arith.constant 0 : index
    %313 = vector.load %arg3[%c0_248, %c0_249] : memref<1x64xf32, #tpu.memory_space<vmem>>, vector<1x64xf32>
    %314 = vector.broadcast %313 : vector<1x64xf32> to vector<144x64xf32>
    %315 = arith.addf %312, %314 : vector<144x64xf32>
    %cst_250 = arith.constant 0.000000e+00 : f32
    %316 = vector.broadcast %cst_250 : f32 to vector<144x64xf32>
    %317 = arith.maximumf %315, %316 : vector<144x64xf32>
    %318 = arith.truncf %317 : vector<144x64xf32> to vector<144x64xbf16>
    %c22 = arith.constant 22 : index
    %c0_251 = arith.constant 0 : index
    %c0_252 = arith.constant 0 : index
    %319 = vector.load %arg4[%c22, %c0_251, %c0_252] : memref<25x64x64xbf16, #tpu.memory_space<vmem>>, vector<1x64x64xbf16>
    %320 = vector.shape_cast %319 : vector<1x64x64xbf16> to vector<64x64xbf16>
    %cst_253 = arith.constant dense<0.000000e+00> : vector<144x64xf32>
    %321 = tpu.matmul %318, %320, %cst_253 {dimension_numbers = #tpu.dot_dimension_numbers<[1], [0], [0], [1], [0, 0, 1, 1], [], []>} : vector<144x64xbf16>, vector<64x64xbf16>, vector<144x64xf32> -> vector<144x64xf32>
    %322 = arith.addf %308, %321 : vector<144x64xf32>
    %c0_254 = arith.constant 0 : index
    %c3312 = arith.constant 3312 : index
    %c0_255 = arith.constant 0 : index
    %323 = vector.load %arg1[%c0_254, %c3312, %c0_255] : memref<1x3600x25xbf16, #tpu.memory_space<vmem>>, vector<1x144x25xbf16>
    %324 = vector.shape_cast %323 : vector<1x144x25xbf16> to vector<144x25xbf16>
    %c0_256 = arith.constant 0 : index
    %c0_257 = arith.constant 0 : index
    %325 = vector.load %arg2[%c0_256, %c0_257] : memref<25x64xbf16, #tpu.memory_space<vmem>>, vector<25x64xbf16>
    %cst_258 = arith.constant dense<0.000000e+00> : vector<144x64xf32>
    %326 = tpu.matmul %324, %325, %cst_258 {dimension_numbers = #tpu.dot_dimension_numbers<[1], [0], [0], [1], [0, 0, 1, 1], [], []>} : vector<144x25xbf16>, vector<25x64xbf16>, vector<144x64xf32> -> vector<144x64xf32>
    %c0_259 = arith.constant 0 : index
    %c0_260 = arith.constant 0 : index
    %327 = vector.load %arg3[%c0_259, %c0_260] : memref<1x64xf32, #tpu.memory_space<vmem>>, vector<1x64xf32>
    %328 = vector.broadcast %327 : vector<1x64xf32> to vector<144x64xf32>
    %329 = arith.addf %326, %328 : vector<144x64xf32>
    %cst_261 = arith.constant 0.000000e+00 : f32
    %330 = vector.broadcast %cst_261 : f32 to vector<144x64xf32>
    %331 = arith.maximumf %329, %330 : vector<144x64xf32>
    %332 = arith.truncf %331 : vector<144x64xf32> to vector<144x64xbf16>
    %c23 = arith.constant 23 : index
    %c0_262 = arith.constant 0 : index
    %c0_263 = arith.constant 0 : index
    %333 = vector.load %arg4[%c23, %c0_262, %c0_263] : memref<25x64x64xbf16, #tpu.memory_space<vmem>>, vector<1x64x64xbf16>
    %334 = vector.shape_cast %333 : vector<1x64x64xbf16> to vector<64x64xbf16>
    %cst_264 = arith.constant dense<0.000000e+00> : vector<144x64xf32>
    %335 = tpu.matmul %332, %334, %cst_264 {dimension_numbers = #tpu.dot_dimension_numbers<[1], [0], [0], [1], [0, 0, 1, 1], [], []>} : vector<144x64xbf16>, vector<64x64xbf16>, vector<144x64xf32> -> vector<144x64xf32>
    %336 = arith.addf %322, %335 : vector<144x64xf32>
    %c0_265 = arith.constant 0 : index
    %c3456 = arith.constant 3456 : index
    %c0_266 = arith.constant 0 : index
    %337 = vector.load %arg1[%c0_265, %c3456, %c0_266] : memref<1x3600x25xbf16, #tpu.memory_space<vmem>>, vector<1x144x25xbf16>
    %338 = vector.shape_cast %337 : vector<1x144x25xbf16> to vector<144x25xbf16>
    %c0_267 = arith.constant 0 : index
    %c0_268 = arith.constant 0 : index
    %339 = vector.load %arg2[%c0_267, %c0_268] : memref<25x64xbf16, #tpu.memory_space<vmem>>, vector<25x64xbf16>
    %cst_269 = arith.constant dense<0.000000e+00> : vector<144x64xf32>
    %340 = tpu.matmul %338, %339, %cst_269 {dimension_numbers = #tpu.dot_dimension_numbers<[1], [0], [0], [1], [0, 0, 1, 1], [], []>} : vector<144x25xbf16>, vector<25x64xbf16>, vector<144x64xf32> -> vector<144x64xf32>
    %c0_270 = arith.constant 0 : index
    %c0_271 = arith.constant 0 : index
    %341 = vector.load %arg3[%c0_270, %c0_271] : memref<1x64xf32, #tpu.memory_space<vmem>>, vector<1x64xf32>
    %342 = vector.broadcast %341 : vector<1x64xf32> to vector<144x64xf32>
    %343 = arith.addf %340, %342 : vector<144x64xf32>
    %cst_272 = arith.constant 0.000000e+00 : f32
    %344 = vector.broadcast %cst_272 : f32 to vector<144x64xf32>
    %345 = arith.maximumf %343, %344 : vector<144x64xf32>
    %346 = arith.truncf %345 : vector<144x64xf32> to vector<144x64xbf16>
    %c24 = arith.constant 24 : index
    %c0_273 = arith.constant 0 : index
    %c0_274 = arith.constant 0 : index
    %347 = vector.load %arg4[%c24, %c0_273, %c0_274] : memref<25x64x64xbf16, #tpu.memory_space<vmem>>, vector<1x64x64xbf16>
    %348 = vector.shape_cast %347 : vector<1x64x64xbf16> to vector<64x64xbf16>
    %cst_275 = arith.constant dense<0.000000e+00> : vector<144x64xf32>
    %349 = tpu.matmul %346, %348, %cst_275 {dimension_numbers = #tpu.dot_dimension_numbers<[1], [0], [0], [1], [0, 0, 1, 1], [], []>} : vector<144x64xbf16>, vector<64x64xbf16>, vector<144x64xf32> -> vector<144x64xf32>
    %350 = arith.addf %336, %349 : vector<144x64xf32>
    %c0_276 = arith.constant 0 : index
    %c0_277 = arith.constant 0 : index
    %351 = vector.load %arg5[%c0_276, %c0_277] : memref<1x64xf32, #tpu.memory_space<vmem>>, vector<1x64xf32>
    %352 = vector.broadcast %351 : vector<1x64xf32> to vector<144x64xf32>
    %353 = arith.addf %350, %352 : vector<144x64xf32>
    %cst_278 = arith.constant 0.000000e+00 : f32
    %354 = vector.broadcast %cst_278 : f32 to vector<144x64xf32>
    %355 = arith.maximumf %353, %354 : vector<144x64xf32>
    %356 = arith.truncf %355 : vector<144x64xf32> to vector<144x64xbf16>
    %c0_279 = arith.constant 0 : index
    %c0_280 = arith.constant 0 : index
    %c0_281 = arith.constant 0 : index
    %357 = vector.load %arg6[%c0_279, %c0_280, %c0_281] : memref<1x144x64xbf16, #tpu.memory_space<vmem>>, vector<1x144x64xbf16>
    %358 = vector.shape_cast %357 : vector<1x144x64xbf16> to vector<144x64xbf16>
    %359 = vector.shape_cast %356 : vector<144x64xbf16> to vector<1x144x64xbf16>
    tpu.vector_store %arg6[%c0_279, %c0_280, %c0_281], %359 {strides = array<i32>} : memref<1x144x64xbf16, #tpu.memory_space<vmem>>, vector<1x144x64xbf16>,
    return
  }
  func.func @transform_0(%arg0: i32) -> (i32, i32, i32) {
    %c0_i32 = arith.constant 0 : i32
    %c0_i32_0 = arith.constant 0 : i32
    %c0_i32_1 = arith.constant 0 : i32
    return %arg0, %c0_i32, %c0_i32_0 : i32, i32, i32
  }
  func.func @transform_1(%arg0: i32) -> (i32, i32) {
    %c0_i32 = arith.constant 0 : i32
    %c0_i32_0 = arith.constant 0 : i32
    %c0_i32_1 = arith.constant 0 : i32
    return %c0_i32, %c0_i32_0 : i32, i32
  }
  func.func @transform_2(%arg0: i32) -> (i32, i32) {
    %c0_i32 = arith.constant 0 : i32
    %c0_i32_0 = arith.constant 0 : i32
    %c0_i32_1 = arith.constant 0 : i32
    return %c0_i32, %c0_i32_0 : i32, i32
  }
  func.func @transform_3(%arg0: i32) -> (i32, i32, i32) {
    %c0_i32 = arith.constant 0 : i32
    %c0_i32_0 = arith.constant 0 : i32
    %c0_i32_1 = arith.constant 0 : i32
    %c0_i32_2 = arith.constant 0 : i32
    return %c0_i32, %c0_i32_0, %c0_i32_1 : i32, i32, i32
  }
  func.func @transform_4(%arg0: i32) -> (i32, i32) {
    %c0_i32 = arith.constant 0 : i32
    %c0_i32_0 = arith.constant 0 : i32
    %c0_i32_1 = arith.constant 0 : i32
    return %c0_i32, %c0_i32_0 : i32, i32
  }
  func.func @transform_5(%arg0: i32) -> (i32, i32, i32) {
    %c0_i32 = arith.constant 0 : i32
    %c0_i32_0 = arith.constant 0 : i32
    %c0_i32_1 = arith.constant 0 : i32
    return %arg0, %c0_i32, %c0_i32_0 : i32, i32, i32
  }
}

module attributes {stable_mosaic.version = 11 : i64} {
  func.func @_dense_fused_kernel(%arg0: i32, %arg1: memref<2x9216xbf16, #tpu.memory_space<vmem>>, %arg2: memref<9216x128xbf16, #tpu.memory_space<vmem>>, %arg3: memref<1x128xf32, #tpu.memory_space<vmem>>, %arg4: memref<128x10xbf16, #tpu.memory_space<vmem>>, %arg5: memref<1x10xf32, #tpu.memory_space<vmem>>, %arg6: memref<2x10xf32, #tpu.memory_space<vmem>>) attributes {dimension_semantics = [#tpu.dimension_semantics<parallel>], iteration_bounds = array<i64: 1>, scalar_prefetch = 0 : i64, scratch_operands = 0 : i64, tpu.core_type = #tpu.core_type<tc>, window_params = [{transform_indices = @transform_0, window_bounds = array<i64: 2, 9216>}, {pipeline_mode = #tpu.pipeline_mode<synchronous>, transform_indices = @transform_1, window_bounds = array<i64: 9216, 128>}, {pipeline_mode = #tpu.pipeline_mode<synchronous>, transform_indices = @transform_2, window_bounds = array<i64: 1, 128>}, {pipeline_mode = #tpu.pipeline_mode<synchronous>, transform_indices = @transform_3, window_bounds = array<i64: 128, 10>}, {pipeline_mode = #tpu.pipeline_mode<synchronous>, transform_indices = @transform_4, window_bounds = array<i64: 1, 10>}, {transform_indices = @transform_5, window_bounds = array<i64: 2, 10>}]} {
    %c0 = arith.constant 0 : index
    %c0_0 = arith.constant 0 : index
    %0 = vector.load %arg1[%c0, %c0_0] : memref<2x9216xbf16, #tpu.memory_space<vmem>>, vector<2x9216xbf16>
    %c0_1 = arith.constant 0 : index
    %c0_2 = arith.constant 0 : index
    %1 = vector.load %arg2[%c0_1, %c0_2] : memref<9216x128xbf16, #tpu.memory_space<vmem>>, vector<9216x128xbf16>
    %cst = arith.constant dense<0.000000e+00> : vector<2x128xf32>
    %2 = tpu.matmul %0, %1, %cst {dimension_numbers = #tpu.dot_dimension_numbers<[1], [0], [0], [1], [0, 0, 1, 1], [], []>} : vector<2x9216xbf16>, vector<9216x128xbf16>, vector<2x128xf32> -> vector<2x128xf32>
    %c0_3 = arith.constant 0 : index
    %c0_4 = arith.constant 0 : index
    %3 = vector.load %arg3[%c0_3, %c0_4] : memref<1x128xf32, #tpu.memory_space<vmem>>, vector<1x128xf32>
    %4 = vector.broadcast %3 : vector<1x128xf32> to vector<2x128xf32>
    %5 = arith.addf %2, %4 : vector<2x128xf32>
    %cst_5 = arith.constant 0.000000e+00 : f32
    %6 = vector.broadcast %cst_5 : f32 to vector<2x128xf32>
    %7 = arith.maximumf %5, %6 : vector<2x128xf32>
    %8 = arith.truncf %7 : vector<2x128xf32> to vector<2x128xbf16>
    %c0_6 = arith.constant 0 : index
    %c0_7 = arith.constant 0 : index
    %9 = vector.load %arg4[%c0_6, %c0_7] : memref<128x10xbf16, #tpu.memory_space<vmem>>, vector<128x10xbf16>
    %cst_8 = arith.constant dense<0.000000e+00> : vector<2x10xf32>
    %10 = tpu.matmul %8, %9, %cst_8 {dimension_numbers = #tpu.dot_dimension_numbers<[1], [0], [0], [1], [0, 0, 1, 1], [], []>} : vector<2x128xbf16>, vector<128x10xbf16>, vector<2x10xf32> -> vector<2x10xf32>
    %c0_9 = arith.constant 0 : index
    %c0_10 = arith.constant 0 : index
    %11 = vector.load %arg5[%c0_9, %c0_10] : memref<1x10xf32, #tpu.memory_space<vmem>>, vector<1x10xf32>
    %12 = vector.broadcast %11 : vector<1x10xf32> to vector<2x10xf32>
    %13 = arith.addf %10, %12 : vector<2x10xf32>
    %c0_11 = arith.constant 0 : index
    %c0_12 = arith.constant 0 : index
    %14 = vector.load %arg6[%c0_11, %c0_12] : memref<2x10xf32, #tpu.memory_space<vmem>>, vector<2x10xf32>
    tpu.vector_store %arg6[%c0_11, %c0_12], %13 {strides = array<i32>} : memref<2x10xf32, #tpu.memory_space<vmem>>, vector<2x10xf32>,
    return
  }
  func.func @transform_0(%arg0: i32) -> (i32, i32) {
    %c0_i32 = arith.constant 0 : i32
    %c0_i32_0 = arith.constant 0 : i32
    return %arg0, %c0_i32 : i32, i32
  }
  func.func @transform_1(%arg0: i32) -> (i32, i32) {
    %c0_i32 = arith.constant 0 : i32
    %c0_i32_0 = arith.constant 0 : i32
    %c0_i32_1 = arith.constant 0 : i32
    return %c0_i32, %c0_i32_0 : i32, i32
  }
  func.func @transform_2(%arg0: i32) -> (i32, i32) {
    %c0_i32 = arith.constant 0 : i32
    %c0_i32_0 = arith.constant 0 : i32
    %c0_i32_1 = arith.constant 0 : i32
    return %c0_i32, %c0_i32_0 : i32, i32
  }
  func.func @transform_3(%arg0: i32) -> (i32, i32) {
    %c0_i32 = arith.constant 0 : i32
    %c0_i32_0 = arith.constant 0 : i32
    %c0_i32_1 = arith.constant 0 : i32
    return %c0_i32, %c0_i32_0 : i32, i32
  }
  func.func @transform_4(%arg0: i32) -> (i32, i32) {
    %c0_i32 = arith.constant 0 : i32
    %c0_i32_0 = arith.constant 0 : i32
    %c0_i32_1 = arith.constant 0 : i32
    return %c0_i32, %c0_i32_0 : i32, i32
  }
  func.func @transform_5(%arg0: i32) -> (i32, i32) {
    %c0_i32 = arith.constant 0 : i32
    %c0_i32_0 = arith.constant 0 : i32
    return %arg0, %c0_i32 : i32, i32
  }
}

</mosaic_0001>

<bundles_post_ra>
// kernel: forward.3
= control target key start
LH: loop header
LB: loop body
LE: loop exit
PB: predicated region body
PF: predicated region fallthrough
CT: control target
= control target key end

     0   :  { %v1203_v28 = vlaneseq  ;;  %v8765_v36 = vmov 1966171168   ;;  %s10727_s0 = inlined_call_operand.vmem [shape: bf16[2,9216], index: 0, kind: input, shape index: {}]   ;;  %s10728_s1 = inlined_call_operand.vmem [shape: bf16[9216,128], index: 1, kind: input, shape index: {}]   ;;  %s10729_s2 = inlined_call_operand.vmem [shape: f32[1,128], index: 2, kind: input, shape index: {}]   ;;  %s10730_s3 = inlined_call_operand.vmem [shape: bf16[128,10], index: 3, kind: input, shape index: {}]   ;;  %s10731_s4 = inlined_call_operand.vmem [shape: f32[1,10], index: 4, kind: input, shape index: {}]   ;;  %s10732_s5 = inlined_call_operand.hbm [shape: f32[2,10], index: 5, kind: output, shape index: {}]  }
   0x1   :  { %v8148_v0 = vld [vmem:[%s10728_s1 + $0x40] sm:$0xff]   ;;  %v8152_v4 = vld [vmem:[%s10728_s1 + $0x48] sm:$0xff]   ;;  %v8156_v8 = vld [vmem:[%s10728_s1 + $0x50] sm:$0xff]   ;;  %v1201_v37 = vunpack.c.l.s4 %v8765_v36 }
   0x2   :  { %v8149_v1 = vld [vmem:[%s10728_s1 + $0xc0] sm:$0xff]   ;;  %7323 = vmatprep.subr.bf16.mxu0 %v8148_v0  ;;  %v8153_v5 = vld [vmem:[%s10728_s1 + $0xc8] sm:$0xff]   ;;  %v8157_v9 = vld [vmem:[%s10728_s1 + $0xd0] sm:$0xff]   ;;  %v1204_v33 = vshrl.u32 %v1203_v28, 7 }
   0x3   :  { %v8150_v2 = vld [vmem:[%s10728_s1] sm:$0xff]   ;;  %7345 = vmatprep.subr.bf16.mxu1 %v8149_v1  ;;  %v8154_v6 = vld [vmem:[%s10728_s1 + $0x8] sm:$0xff]   ;;  %v8158_v10 = vld [vmem:[%s10728_s1 + $0x10] sm:$0xff]   ;;  %v1202_v40 = vunpack.c.0.s8 %v1201_v37 }
   0x4   :  { %v8151_v3 = vld [vmem:[%s10728_s1 + $0x80] sm:$0xff]   ;;  %7324 = vmatpush3.bf16.msra.mxu0 %v8150_v2  ;;  %v8155_v7 = vld [vmem:[%s10728_s1 + $0x88] sm:$0xff]   ;;  %v8159_v11 = vld [vmem:[%s10728_s1 + $0x90] sm:$0xff]  }
   0x5   :  { %7346 = vmatpush3.bf16.msra.mxu1 %v8151_v3  ;;  %7325 = vmatprep.subr.bf16.mxu0 %v8152_v4  ;;  %v8160_v12 = vld [vmem:[%s10728_s1 + $0x58] sm:$0xff]   ;;  %v8164_v16 = vld [vmem:[%s10728_s1 + $0x60] sm:$0xff]   ;;  %v8168_v20 = vld [vmem:[%s10728_s1 + $0x68] sm:$0xff]   ;;  %v8904_v41 = vsub.s32 %v1202_v40, %v1204_v33 }
   0x6   :  { %7347 = vmatprep.subr.bf16.mxu1 %v8153_v5  ;;  %v8161_v13 = vld [vmem:[%s10728_s1 + $0xd8] sm:$0xff]   ;;  %v8165_v17 = vld [vmem:[%s10728_s1 + $0xe0] sm:$0xff]   ;;  %v8169_v21 = vld [vmem:[%s10728_s1 + $0xe8] sm:$0xff]  }
   0x7   :  { %v8162_v14 = vld [vmem:[%s10728_s1 + $0x18] sm:$0xff]   ;;  %v8166_v18 = vld [vmem:[%s10728_s1 + $0x20] sm:$0xff]   ;;  %v8170_v22 = vld [vmem:[%s10728_s1 + $0x28] sm:$0xff]  }
   0x8   :  { %7326 = vmatpush3.bf16.msra.mxu0 %v8154_v6  ;;  %v8163_v15 = vld [vmem:[%s10728_s1 + $0x98] sm:$0xff]   ;;  %v8167_v19 = vld [vmem:[%s10728_s1 + $0xa0] sm:$0xff]   ;;  %v8171_v23 = vld [vmem:[%s10728_s1 + $0xa8] sm:$0xff]  }
   0x9   :  { %7348 = vmatpush3.bf16.msra.mxu1 %v8155_v7  ;;  %7327 = vmatprep.subr.bf16.mxu0 %v8156_v8  ;;  %v8172_v24 = vld [vmem:[%s10728_s1 + $0x70] sm:$0xff]   ;;  %v8176_v29 = vld [vmem:[%s10728_s1 + $0x78] sm:$0xff]   ;;  %v22_v34 = vld [vmem:[%s10727_s0] sm:$0xff] }
   0xa   :  { %7349 = vmatprep.subr.bf16.mxu1 %v8157_v9  ;;  %v8173_v25 = vld [vmem:[%s10728_s1 + $0xf0] sm:$0xff]   ;;  %v8177_v30 = vld [vmem:[%s10728_s1 + $0xf8] sm:$0xff]   ;;  %v8181_v35 = vld [vmem:[%s10728_s1 + $0x140] sm:$0xff]   ;;  %v1199_v39 = vcombine.high %v22_v34, %v22_v34  ;;  %v1206_v42 = vrot.slane %v22_v34, %v8904_v41 }
   0xb   :  { %v8174_v26 = vld [vmem:[%s10728_s1 + $0x30] sm:$0xff]   ;;  %v8178_v31 = vld [vmem:[%s10728_s1 + $0x38] sm:$0xff]   ;;  %v8182_v38 = vld [vmem:[%s10728_s1 + $0x1c0] sm:$0xff]  }
   0xc   :  { %7328 = vmatpush3.bf16.msra.mxu0 %v8158_v10  ;;  %v8175_v27 = vld [vmem:[%s10728_s1 + $0xb0] sm:$0xff]   ;;  %v8179_v32 = vld [vmem:[%s10728_s1 + $0xb8] sm:$0xff]   ;;  %v8908_v43 = vrot.slane %v1199_v39, %v8904_v41  ;;  %v1214_v44 = vcombine.high %v1206_v42, %v1206_v42  ;;  %v1222_v45 = vrot.slane %v1206_v42, %v8904_v41  ;;  %v8183_v47 = vld [vmem:[%s10728_s1 + $0x100] sm:$0xff]  }
   0xd   :  { %7350 = vmatpush3.bf16.msra.mxu1 %v8159_v11  ;;  %7329 = vmatprep.subr.bf16.mxu0 %v8160_v12  ;;  %v8184_v49 = vld [vmem:[%s10728_s1 + $0x180] sm:$0xff]   ;;  %v8185_v52 = vld [vmem:[%s10728_s1 + $0x148] sm:$0xff]   ;;  %v8189_v58 = vld [vmem:[%s10728_s1 + $0x150] sm:$0xff]  }
   0xe   :  { %7351 = vmatprep.subr.bf16.mxu1 %v8161_v13  ;;  %v1215_v46 = vcombine.high %v8908_v43, %v8908_v43  ;;  %v1236_v48 = vrot.slane %v1214_v44, %v8904_v41  ;;  %v1244_v51 = vcombine.high %v1222_v45, %v1222_v45  ;;  %v8186_v54 = vld [vmem:[%s10728_s1 + $0x1c8] sm:$0xff]   ;;  %v8190_v59 = vld [vmem:[%s10728_s1 + $0x1d0] sm:$0xff]   ;;  %v8193_v62 = vld [vmem:[%s10728_s1 + $0x158] sm:$0xff]  }
   0xf   :  { %v8187_v55 = vld [vmem:[%s10728_s1 + $0x108] sm:$0xff]   ;;  %v8191_v60 = vld [vmem:[%s10728_s1 + $0x110] sm:$0xff]   ;;  %v8194_v63 = vld [vmem:[%s10728_s1 + $0x1d8] sm:$0xff]  }
  0x10   :  { %7330 = vmatpush3.bf16.msra.mxu0 %v8162_v14  ;;  %v1243_v50 = vrot.slane %v1215_v46, %v8904_v41  ;;  %5200 = vmatprep.mubr.bf16.mxu0 %v1236_v48  ;;  %v1246_v53 = vcombine.high %v1236_v48, %v1236_v48  ;;  %v8188_v57 = vld [vmem:[%s10728_s1 + $0x188] sm:$0xff]   ;;  %v8192_v61 = vld [vmem:[%s10728_s1 + $0x190] sm:$0xff]   ;;  %v8195_v0 = vld [vmem:[%s10728_s1 + $0x118] sm:$0xff]  }
  0x11   :  { %7352 = vmatpush3.bf16.msra.mxu1 %v8163_v15  ;;  %7331 = vmatprep.subr.bf16.mxu0 %v8164_v16  ;;  %v8196_v1 = vld [vmem:[%s10728_s1 + $0x198] sm:$0xff]   ;;  %v8197_v2 = vld [vmem:[%s10728_s1 + $0x160] sm:$0xff]   ;;  %v8201_v6 = vld [vmem:[%s10728_s1 + $0x168] sm:$0xff]  }
  0x12   :  { %7353 = vmatprep.subr.bf16.mxu1 %v8165_v17  ;;  %v1247_v56 = vcombine.high %v1243_v50, %v1243_v50  ;;  %5240 = vmatprep.mubr.bf16.mxu1 %v1246_v53  ;;  %v8198_v3 = vld [vmem:[%s10728_s1 + $0x1e0] sm:$0xff]   ;;  %v8202_v7 = vld [vmem:[%s10728_s1 + $0x1e8] sm:$0xff]   ;;  %v8205_v10 = vld [vmem:[%s10728_s1 + $0x170] sm:$0xff]  }
  0x13   :  { %v8199_v4 = vld [vmem:[%s10728_s1 + $0x120] sm:$0xff]   ;;  %v8203_v8 = vld [vmem:[%s10728_s1 + $0x128] sm:$0xff]   ;;  %v8206_v11 = vld [vmem:[%s10728_s1 + $0x1f0] sm:$0xff]  }
  0x14   :  { %7332 = vmatpush3.bf16.msra.mxu0 %v8166_v18  ;;  %v8200_v5 = vld [vmem:[%s10728_s1 + $0x1a0] sm:$0xff]   ;;  %v8204_v9 = vld [vmem:[%s10728_s1 + $0x1a8] sm:$0xff]   ;;  %v8207_v12 = vld [vmem:[%s10728_s1 + $0x130] sm:$0xff]   ;;  %v1229_v18 = vrot.slane %v8908_v43, %v8904_v41 }
  0x15   :  { %7354 = vmatpush3.bf16.msra.mxu1 %v8167_v19  ;;  %7333 = vmatprep.subr.bf16.mxu0 %v8168_v20  ;;  %v8208_v13 = vld [vmem:[%s10728_s1 + $0x1b0] sm:$0xff]   ;;  %v8209_v14 = vld [vmem:[%s10728_s1 + $0x178] sm:$0xff]   ;;  %v8213_v19 = vld [vmem:[%s10728_s1 + $0x240] sm:$0xff]  }
  0x16   :  { %7355 = vmatprep.subr.bf16.mxu1 %v8169_v21  ;;  %v8210_v15 = vld [vmem:[%s10728_s1 + $0x1f8] sm:$0xff]   ;;  %v8214_v20 = vld [vmem:[%s10728_s1 + $0x2c0] sm:$0xff]   ;;  %v8221_v28 = vld [vmem:[%s10728_s1 + $0x250] sm:$0xff]  }
  0x17   :  { %v8211_v16 = vld [vmem:[%s10728_s1 + $0x138] sm:$0xff]   ;;  %v8215_v21 = vld [vmem:[%s10728_s1 + $0x200] sm:$0xff]   ;;  %v8233_v40 = vld [vmem:[%s10728_s1 + $0x268] sm:$0xff]  }
  0x18   :  { %7334 = vmatpush3.bf16.msra.mxu0 %v8170_v22  ;;  %v8212_v17 = vld [vmem:[%s10728_s1 + $0x1b8] sm:$0xff]   ;;  %v8216_v22 = vld [vmem:[%s10728_s1 + $0x280] sm:$0xff]   ;;  %v8234_v42 = vld [vmem:[%s10728_s1 + $0x2e8] sm:$0xff]  }
  0x19   :  { %7356 = vmatpush3.bf16.msra.mxu1 %v8171_v23  ;;  %7335 = vmatprep.subr.bf16.mxu0 %v8172_v24  ;;  %v1245_v23 = vcombine.high %v1229_v18, %v1229_v18  ;;  %v8217_v24 = vld [vmem:[%s10728_s1 + $0x248] sm:$0xff]   ;;  %v8226_v33 = vld [vmem:[%s10728_s1 + $0x2d8] sm:$0xff]   ;;  %v8229_v36 = vld [vmem:[%s10728_s1 + $0x260] sm:$0xff]  }
  0x1a   :  { %7357 = vmatprep.subr.bf16.mxu1 %v8173_v25  ;;  %v8218_v25 = vld [vmem:[%s10728_s1 + $0x2c8] sm:$0xff]   ;;  %v8227_v34 = vld [vmem:[%s10728_s1 + $0x218] sm:$0xff]   ;;  %v8230_v37 = vld [vmem:[%s10728_s1 + $0x2e0] sm:$0xff]  }
  0x1b   :  { %v8232_v39 = vld [vmem:[%s10728_s1 + $0x2a0] sm:$0xff]   ;;  %v8235_v43 = vld [vmem:[%s10728_s1 + $0x228] sm:$0xff]  }
  0x1c   :  { %7336 = vmatpush3.bf16.msra.mxu0 %v8174_v26  ;;  %v8219_v26 = vld [vmem:[%s10728_s1 + $0x208] sm:$0xff]  }
  0x1d   :  { %7358 = vmatpush3.bf16.msra.mxu1 %v8175_v27  ;;  %7337 = vmatprep.subr.bf16.mxu0 %v8176_v29  ;;  %v8220_v27 = vld [vmem:[%s10728_s1 + $0x288] sm:$0xff]   ;;  %v8222_v29 = vld [vmem:[%s10728_s1 + $0x2d0] sm:$0xff]  }
  0x1e   :  { %7359 = vmatprep.subr.bf16.mxu1 %v8177_v30  ;;  %v8223_v30 = vld [vmem:[%s10728_s1 + $0x210] sm:$0xff]   ;;  %v8236_v44 = vld [vmem:[%s10728_s1 + $0x2a8] sm:$0xff]  }
  0x1f   :  { %v23_v46 = vld [vmem:[%s10727_s0 + $0x8] sm:$0xff] }
  0x20   :  { %7338 = vmatpush3.bf16.msra.mxu0 %v8178_v31  ;;  %v8224_v31 = vld [vmem:[%s10728_s1 + $0x290] sm:$0xff]   ;;  %v1255_v48 = vrot.slane %v23_v46, %v8904_v41 }
  0x21   :  { %7360 = vmatpush3.bf16.msra.mxu1 %v8179_v32  ;;  %7367 = vmatprep.subr.bf16.mxu0 %v8181_v35  ;;  %v8225_v32 = vld [vmem:[%s10728_s1 + $0x258] sm:$0xff]  }
  0x22   :  { %7389 = vmatprep.subr.bf16.mxu1 %v8182_v38  ;;  %v8228_v35 = vld [vmem:[%s10728_s1 + $0x298] sm:$0xff]   ;;  %v8231_v38 = vld [vmem:[%s10728_s1 + $0x220] sm:$0xff]  }
  0x23   :  { %5201 = vmatmul.mubr.bf16.vlgmr.msra.gmra.mrb[0].mxu0 %v1222_v45  ;;  %v8237_v45 = vld [vmem:[%s10728_s1 + $0x270] sm:$0xff]  }
  0x24   :  { %7368 = vmatpush3.bf16.msra.mxu0 %v8183_v47  ;;  %5241 = vmatmul.mubr.bf16.vlgmr.msra.gmra.mrb[0].mxu1 %v1244_v51  ;;  %v8238_v47 = vld [vmem:[%s10728_s1 + $0x2f0] sm:$0xff]  }
  0x25   :  { %7369 = vmatprep.subr.bf16.mxu0 %v8185_v52  ;;  %7390 = vmatpush3.bf16.msra.mxu1 %v8184_v49  ;;  %v1248_v49 = vcombine.high %v23_v46, %v23_v46  ;;  %v8240_v51 = vld [vmem:[%s10728_s1 + $0x2b0] sm:$0xff]   ;;  %v1263_v52 = vcombine.high %v1255_v48, %v1255_v48 }
  0x26   :  { %5280 = vmatprep.mubr.bf16.mxu0 %v1243_v50  ;;  %7391 = vmatprep.subr.bf16.mxu1 %v8186_v54  ;;  %v8239_v50 = vld [vmem:[%s10728_s1 + $0x230] sm:$0xff]   ;;  %v8241_v54 = vld [vmem:[%s10728_s1 + $0x278] sm:$0xff]  }
  0x27   :  { %5320 = vmatprep.mubr.bf16.mxu1 %v1247_v56  ;;  %v9096_v53 = vrot.slane %v1248_v49, %v8904_v41  ;;  %v1285_v56 = vrot.slane %v1263_v52, %v8904_v41  ;;  %v8288_v46 = vld [vmem:[%s10728_s1 + $0x410] sm:$0xff]   ;;  %v8291_v49 = vld [vmem:[%s10728_s1 + $0x4d8] sm:$0xff]   ;;  %v8294_v52 = vld [vmem:[%s10728_s1 + $0x460] sm:$0xff]  }
  0x28   :  { %7370 = vmatpush3.bf16.msra.mxu0 %v8187_v55  ;;  %v8242_v55 = vld [vmem:[%s10728_s1 + $0x2f8] sm:$0xff]  }
  0x29   :  { %7371 = vmatprep.subr.bf16.mxu0 %v8189_v58  ;;  %7392 = vmatpush3.bf16.msra.mxu1 %v8188_v57  ;;  %v1264_v57 = vcombine.high %v9096_v53, %v9096_v53  ;;  %v8243_v58 = vld [vmem:[%s10728_s1 + $0x238] sm:$0xff]  }
  0x2a   :  { %7393 = vmatprep.subr.bf16.mxu1 %v8190_v59  ;;  %v8244_v59 = vld [vmem:[%s10728_s1 + $0x2b8] sm:$0xff]  }
  0x2c   :  { %7372 = vmatpush3.bf16.msra.mxu0 %v8191_v60  ;;  %v1295_v60 = vcombine.high %v1285_v56, %v1285_v56 }
  0x2d   :  { %7373 = vmatprep.subr.bf16.mxu0 %v8193_v62  ;;  %7394 = vmatpush3.bf16.msra.mxu1 %v8192_v61  ;;  %v1271_v61 = vrot.slane %v1255_v48, %v8904_v41  ;;  %v8245_v62 = vld [vmem:[%s10728_s1 + $0x340] sm:$0xff]   ;;  %v8290_v48 = vld [vmem:[%s10728_s1 + $0x458] sm:$0xff]  }
  0x2e   :  { %7395 = vmatprep.subr.bf16.mxu1 %v8194_v63  ;;  %v8246_v63 = vld [vmem:[%s10728_s1 + $0x3c0] sm:$0xff]  }
  0x30   :  { %7374 = vmatpush3.bf16.msra.mxu0 %v8195_v0  ;;  %v1292_v0 = vrot.slane %v1264_v57, %v8904_v41  ;;  %v8299_v57 = vld [vmem:[%s10728_s1 + $0x4e8] sm:$0xff]  }
  0x31   :  { %7375 = vmatprep.subr.bf16.mxu0 %v8197_v2  ;;  %7396 = vmatpush3.bf16.msra.mxu1 %v8196_v1  ;;  %v8247_v1 = vld [vmem:[%s10728_s1 + $0x300] sm:$0xff]  }
  0x32   :  { %7397 = vmatprep.subr.bf16.mxu1 %v8198_v3  ;;  %v8248_v2 = vld [vmem:[%s10728_s1 + $0x380] sm:$0xff]   ;;  %v1293_v3 = vcombine.high %v1271_v61, %v1271_v61 }
  0x34   :  { %7376 = vmatpush3.bf16.msra.mxu0 %v8199_v4  ;;  %v8249_v4 = vld [vmem:[%s10728_s1 + $0x348] sm:$0xff]  }
  0x35   :  { %7377 = vmatprep.subr.bf16.mxu0 %v8201_v6  ;;  %7398 = vmatpush3.bf16.msra.mxu1 %v8200_v5  ;;  %v8250_v5 = vld [vmem:[%s10728_s1 + $0x3c8] sm:$0xff]   ;;  %v1296_v6 = vcombine.high %v1292_v0, %v1292_v0 }
  0x36   :  { %7399 = vmatprep.subr.bf16.mxu1 %v8202_v7  ;;  %v8251_v7 = vld [vmem:[%s10728_s1 + $0x308] sm:$0xff]  }
  0x38   :  { %7378 = vmatpush3.bf16.msra.mxu0 %v8203_v8  ;;  %v8252_v8 = vld [vmem:[%s10728_s1 + $0x388] sm:$0xff]  }
  0x39   :  { %7379 = vmatprep.subr.bf16.mxu0 %v8205_v10  ;;  %7400 = vmatpush3.bf16.msra.mxu1 %v8204_v9  ;;  %v8253_v9 = vld [vmem:[%s10728_s1 + $0x350] sm:$0xff]  }
  0x3a   :  { %7401 = vmatprep.subr.bf16.mxu1 %v8206_v11  ;;  %v8254_v10 = vld [vmem:[%s10728_s1 + $0x3d0] sm:$0xff]  }
  0x3b   :  { %v8255_v11 = vld [vmem:[%s10728_s1 + $0x310] sm:$0xff]  }
  0x3c   :  { %7380 = vmatpush3.bf16.msra.mxu0 %v8207_v12  ;;  %v8256_v12 = vld [vmem:[%s10728_s1 + $0x390] sm:$0xff]  }
  0x3d   :  { %7381 = vmatprep.subr.bf16.mxu0 %v8209_v14  ;;  %7402 = vmatpush3.bf16.msra.mxu1 %v8208_v13  ;;  %v8257_v13 = vld [vmem:[%s10728_s1 + $0x358] sm:$0xff]  }
  0x3e   :  { %7403 = vmatprep.subr.bf16.mxu1 %v8210_v15  ;;  %v8258_v14 = vld [vmem:[%s10728_s1 + $0x3d8] sm:$0xff]  }
  0x3f   :  { %v8259_v15 = vld [vmem:[%s10728_s1 + $0x318] sm:$0xff]  }
  0x40   :  { %7382 = vmatpush3.bf16.msra.mxu0 %v8211_v16  ;;  %v8260_v16 = vld [vmem:[%s10728_s1 + $0x398] sm:$0xff]  }
  0x41   :  { %7411 = vmatprep.subr.bf16.mxu0 %v8213_v19  ;;  %7404 = vmatpush3.bf16.msra.mxu1 %v8212_v17  ;;  %v8261_v17 = vld [vmem:[%s10728_s1 + $0x360] sm:$0xff]  }
  0x42   :  { %7433 = vmatprep.subr.bf16.mxu1 %v8214_v20  ;;  %v8263_v19 = vld [vmem:[%s10728_s1 + $0x320] sm:$0xff]  }
  0x43   :  { %5281 = vmatmul.mubr.bf16.vlgmr.msra.gmra.mrb[4].mxu0 %v1229_v18  ;;  %v8262_v18 = vld [vmem:[%s10728_s1 + $0x3e0] sm:$0xff]  }
  0x44   :  { %7412 = vmatpush3.bf16.msra.mxu0 %v8215_v21  ;;  %5321 = vmatmul.mubr.bf16.vlgmr.msra.gmra.mrb[4].mxu1 %v1245_v23  ;;  %v8264_v20 = vld [vmem:[%s10728_s1 + $0x3a0] sm:$0xff]   ;;  %v8265_v21 = vld [vmem:[%s10728_s1 + $0x368] sm:$0xff]  }
  0x45   :  { %7413 = vmatprep.subr.bf16.mxu0 %v8217_v24  ;;  %7434 = vmatpush3.bf16.msra.mxu1 %v8216_v22  ;;  %v8266_v22 = vld [vmem:[%s10728_s1 + $0x3e8] sm:$0xff]  }
  0x46   :  { %7435 = vmatprep.subr.bf16.mxu1 %v8218_v25  ;;  %5360 = vmatprep.mubr.bf16.mxu0 %v1285_v56  ;;  %v8267_v23 = vld [vmem:[%s10728_s1 + $0x328] sm:$0xff]   ;;  %v8269_v25 = vld [vmem:[%s10728_s1 + $0x370] sm:$0xff]  }
  0x47   :  { %5400 = vmatprep.mubr.bf16.mxu1 %v1295_v60  ;;  %v8268_v24 = vld [vmem:[%s10728_s1 + $0x3a8] sm:$0xff]   ;;  %v8302_v60 = vld [vmem:[%s10728_s1 + $0x470] sm:$0xff]  }
  0x48   :  { %7414 = vmatpush3.bf16.msra.mxu0 %v8219_v26  ;;  %v8270_v26 = vld [vmem:[%s10728_s1 + $0x3f0] sm:$0xff]   ;;  %v8298_v56 = vld [vmem:[%s10728_s1 + $0x468] sm:$0xff]  }
  0x49   :  { %7415 = vmatprep.subr.bf16.mxu0 %v8221_v28  ;;  %7436 = vmatpush3.bf16.msra.mxu1 %v8220_v27  ;;  %v8271_v27 = vld [vmem:[%s10728_s1 + $0x330] sm:$0xff]  }
  0x4a   :  { %7437 = vmatprep.subr.bf16.mxu1 %v8222_v29  ;;  %v8272_v28 = vld [vmem:[%s10728_s1 + $0x3b0] sm:$0xff]   ;;  %v8273_v29 = vld [vmem:[%s10728_s1 + $0x378] sm:$0xff]  }
  0x4c   :  { %7416 = vmatpush3.bf16.msra.mxu0 %v8223_v30  ;;  %v8274_v30 = vld [vmem:[%s10728_s1 + $0x3f8] sm:$0xff]  }
  0x4d   :  { %7417 = vmatprep.subr.bf16.mxu0 %v8225_v32  ;;  %7438 = vmatpush3.bf16.msra.mxu1 %v8224_v31  ;;  %v8275_v31 = vld [vmem:[%s10728_s1 + $0x338] sm:$0xff]  }
  0x4e   :  { %7439 = vmatprep.subr.bf16.mxu1 %v8226_v33  ;;  %v8276_v32 = vld [vmem:[%s10728_s1 + $0x3b8] sm:$0xff]   ;;  %v1278_v33 = vrot.slane %v9096_v53, %v8904_v41  ;;  %v8295_v53 = vld [vmem:[%s10728_s1 + $0x4e0] sm:$0xff]  }
  0x50   :  { %7418 = vmatpush3.bf16.msra.mxu0 %v8227_v34  ;;  %v8278_v34 = vld [vmem:[%s10728_s1 + $0x440] sm:$0xff]  }
  0x51   :  { %7419 = vmatprep.subr.bf16.mxu0 %v8229_v36  ;;  %7440 = vmatpush3.bf16.msra.mxu1 %v8228_v35  ;;  %v8279_v35 = vld [vmem:[%s10728_s1 + $0x4c0] sm:$0xff]  }
  0x52   :  { %7441 = vmatprep.subr.bf16.mxu1 %v8230_v37  ;;  %v8280_v36 = vld [vmem:[%s10728_s1 + $0x400] sm:$0xff]  }
  0x53   :  { %v8281_v37 = vld [vmem:[%s10728_s1 + $0x480] sm:$0xff]  }
  0x54   :  { %7420 = vmatpush3.bf16.msra.mxu0 %v8231_v38  ;;  %v1294_v38 = vcombine.high %v1278_v33, %v1278_v33 }
  0x55   :  { %7421 = vmatprep.subr.bf16.mxu0 %v8233_v40  ;;  %7442 = vmatpush3.bf16.msra.mxu1 %v8232_v39  ;;  %v8282_v39 = vld [vmem:[%s10728_s1 + $0x448] sm:$0xff]  }
  0x56   :  { %7443 = vmatprep.subr.bf16.mxu1 %v8234_v42  ;;  %v8283_v40 = vld [vmem:[%s10728_s1 + $0x4c8] sm:$0xff]  }
  0x57   :  { %v8284_v42 = vld [vmem:[%s10728_s1 + $0x408] sm:$0xff]  }
  0x58   :  { %7422 = vmatpush3.bf16.msra.mxu0 %v8235_v43  ;;  %v8285_v43 = vld [vmem:[%s10728_s1 + $0x488] sm:$0xff]  }
  0x59   :  { %7423 = vmatprep.subr.bf16.mxu0 %v8237_v45  ;;  %7444 = vmatpush3.bf16.msra.mxu1 %v8236_v44  ;;  %v8286_v44 = vld [vmem:[%s10728_s1 + $0x450] sm:$0xff]  }
  0x5a   :  { %7445 = vmatprep.subr.bf16.mxu1 %v8238_v47  ;;  %v8287_v45 = vld [vmem:[%s10728_s1 + $0x4d0] sm:$0xff]  }
  0x5b   :  { %v8289_v47 = vld [vmem:[%s10728_s1 + $0x490] sm:$0xff]  }
  0x5c   :  { %7424 = vmatpush3.bf16.msra.mxu0 %v8239_v50  ;;  %v8292_v50 = vld [vmem:[%s10728_s1 + $0x418] sm:$0xff]  }
  0x5d   :  { %7425 = vmatprep.subr.bf16.mxu0 %v8241_v54  ;;  %7446 = vmatpush3.bf16.msra.mxu1 %v8240_v51  ;;  %v8293_v51 = vld [vmem:[%s10728_s1 + $0x498] sm:$0xff]   ;;  %v8296_v54 = vld [vmem:[%s10728_s1 + $0x420] sm:$0xff]  }
  0x5e   :  { %7447 = vmatprep.subr.bf16.mxu1 %v8242_v55  ;;  %v8297_v55 = vld [vmem:[%s10728_s1 + $0x4a0] sm:$0xff]  }
  0x60   :  { %7426 = vmatpush3.bf16.msra.mxu0 %v8243_v58  ;;  %v8300_v58 = vld [vmem:[%s10728_s1 + $0x428] sm:$0xff]  }
  0x61   :  { %7455 = vmatprep.subr.bf16.mxu0 %v8245_v62  ;;  %7448 = vmatpush3.bf16.msra.mxu1 %v8244_v59  ;;  %v8301_v59 = vld [vmem:[%s10728_s1 + $0x4a8] sm:$0xff]   ;;  %v8303_v62 = vld [vmem:[%s10728_s1 + $0x4f0] sm:$0xff]  }
  0x62   :  { %7477 = vmatprep.subr.bf16.mxu1 %v8246_v63 }
  0x63   :  { %5361 = vmatmul.mubr.bf16.vlgmr.msra.gmra.mrb[8].mxu0 %v1271_v61  ;;  %v24_v61 = vld [vmem:[%s10727_s0 + $0x10] sm:$0xff] }
  0x64   :  { %7456 = vmatpush3.bf16.msra.mxu0 %v8247_v1  ;;  %5440 = vmatprep.mubr.bf16.mxu0 %v1292_v0  ;;  %v1304_v63 = vrot.slane %v24_v61, %v8904_v41  ;;  %v1297_v0 = vcombine.high %v24_v61, %v24_v61  ;;  %v8304_v1 = vld [vmem:[%s10728_s1 + $0x430] sm:$0xff]  }
  0x65   :  { %5401 = vmatmul.mubr.bf16.vlgmr.msra.gmra.mrb[8].mxu1 %v1293_v3  ;;  %7457 = vmatprep.subr.bf16.mxu0 %v8249_v4  ;;  %v8353_v61 = vld [vmem:[%s10728_s1 + $0x610] sm:$0xff]  }
  0x66   :  { %7478 = vmatpush3.bf16.msra.mxu1 %v8248_v2  ;;  %5480 = vmatprep.mubr.bf16.mxu1 %v1296_v6  ;;  %v8305_v2 = vld [vmem:[%s10728_s1 + $0x4b0] sm:$0xff]   ;;  %v1312_v3 = vcombine.high %v1304_v63, %v1304_v63  ;;  %v9302_v4 = vrot.slane %v1297_v0, %v8904_v41  ;;  %v8307_v6 = vld [vmem:[%s10728_s1 + $0x4f8] sm:$0xff]  }
  0x67   :  { %7479 = vmatprep.subr.bf16.mxu1 %v8250_v5  ;;  %v8306_v5 = vld [vmem:[%s10728_s1 + $0x478] sm:$0xff]  }
  0x68   :  { %7458 = vmatpush3.bf16.msra.mxu0 %v8251_v7  ;;  %v1334_v7 = vrot.slane %v1312_v3, %v8904_v41  ;;  %v8356_v0 = vld [vmem:[%s10728_s1 + $0x6d8] sm:$0xff]   ;;  %v8359_v3 = vld [vmem:[%s10728_s1 + $0x660] sm:$0xff]  }
  0x69   :  { %7459 = vmatprep.subr.bf16.mxu0 %v8253_v9  ;;  %v8308_v9 = vld [vmem:[%s10728_s1 + $0x438] sm:$0xff]  }
  0x6a   :  { %7480 = vmatpush3.bf16.msra.mxu1 %v8252_v8  ;;  %v1313_v8 = vcombine.high %v9302_v4, %v9302_v4 }
  0x6b   :  { %7481 = vmatprep.subr.bf16.mxu1 %v8254_v10  ;;  %v8309_v10 = vld [vmem:[%s10728_s1 + $0x4b8] sm:$0xff]  }
  0x6c   :  { %7460 = vmatpush3.bf16.msra.mxu0 %v8255_v11  ;;  %v1344_v11 = vcombine.high %v1334_v7, %v1334_v7 }
  0x6d   :  { %7461 = vmatprep.subr.bf16.mxu0 %v8257_v13  ;;  %v8310_v13 = vld [vmem:[%s10728_s1 + $0x540] sm:$0xff]  }
  0x6e   :  { %7482 = vmatpush3.bf16.msra.mxu1 %v8256_v12  ;;  %v1320_v12 = vrot.slane %v1304_v63, %v8904_v41  ;;  %v8355_v63 = vld [vmem:[%s10728_s1 + $0x658] sm:$0xff]  }
  0x6f   :  { %7483 = vmatprep.subr.bf16.mxu1 %v8258_v14  ;;  %v8311_v14 = vld [vmem:[%s10728_s1 + $0x5c0] sm:$0xff]  }
  0x70   :  { %7462 = vmatpush3.bf16.msra.mxu0 %v8259_v15  ;;  %v1341_v15 = vrot.slane %v1313_v8, %v8904_v41  ;;  %v8364_v8 = vld [vmem:[%s10728_s1 + $0x6e8] sm:$0xff]  }
  0x71   :  { %7463 = vmatprep.subr.bf16.mxu0 %v8261_v17  ;;  %v8313_v17 = vld [vmem:[%s10728_s1 + $0x580] sm:$0xff]  }
  0x72   :  { %7484 = vmatpush3.bf16.msra.mxu1 %v8260_v16  ;;  %v8312_v16 = vld [vmem:[%s10728_s1 + $0x500] sm:$0xff]  }
  0x73   :  { %7485 = vmatprep.subr.bf16.mxu1 %v8262_v18  ;;  %v1342_v18 = vcombine.high %v1320_v12, %v1320_v12 }
  0x74   :  { %7464 = vmatpush3.bf16.msra.mxu0 %v8263_v19  ;;  %v8314_v19 = vld [vmem:[%s10728_s1 + $0x548] sm:$0xff]  }
  0x75   :  { %7465 = vmatprep.subr.bf16.mxu0 %v8265_v21  ;;  %v1345_v21 = vcombine.high %v1341_v15, %v1341_v15 }
  0x76   :  { %7486 = vmatpush3.bf16.msra.mxu1 %v8264_v20  ;;  %v8315_v20 = vld [vmem:[%s10728_s1 + $0x5c8] sm:$0xff]  }
  0x77   :  { %7487 = vmatprep.subr.bf16.mxu1 %v8266_v22  ;;  %v8316_v22 = vld [vmem:[%s10728_s1 + $0x508] sm:$0xff]  }
  0x78   :  { %7466 = vmatpush3.bf16.msra.mxu0 %v8267_v23  ;;  %v8317_v23 = vld [vmem:[%s10728_s1 + $0x588] sm:$0xff]  }
  0x79   :  { %7467 = vmatprep.subr.bf16.mxu0 %v8269_v25  ;;  %v8319_v25 = vld [vmem:[%s10728_s1 + $0x5d0] sm:$0xff]  }
  0x7a   :  { %7488 = vmatpush3.bf16.msra.mxu1 %v8268_v24  ;;  %v8318_v24 = vld [vmem:[%s10728_s1 + $0x550] sm:$0xff]  }
  0x7b   :  { %7489 = vmatprep.subr.bf16.mxu1 %v8270_v26  ;;  %v8320_v26 = vld [vmem:[%s10728_s1 + $0x510] sm:$0xff]  }
  0x7c   :  { %7468 = vmatpush3.bf16.msra.mxu0 %v8271_v27  ;;  %v8321_v27 = vld [vmem:[%s10728_s1 + $0x590] sm:$0xff]  }
  0x7d   :  { %7469 = vmatprep.subr.bf16.mxu0 %v8273_v29  ;;  %v8323_v29 = vld [vmem:[%s10728_s1 + $0x5d8] sm:$0xff]  }
  0x7e   :  { %7490 = vmatpush3.bf16.msra.mxu1 %v8272_v28  ;;  %v8322_v28 = vld [vmem:[%s10728_s1 + $0x558] sm:$0xff]  }
  0x7f   :  { %7491 = vmatprep.subr.bf16.mxu1 %v8274_v30  ;;  %v8324_v30 = vld [vmem:[%s10728_s1 + $0x518] sm:$0xff]  }
  0x80   :  { %7470 = vmatpush3.bf16.msra.mxu0 %v8275_v31  ;;  %v8325_v31 = vld [vmem:[%s10728_s1 + $0x598] sm:$0xff]  }
  0x81   :  { %7499 = vmatprep.subr.bf16.mxu0 %v8278_v34  ;;  %v8328_v34 = vld [vmem:[%s10728_s1 + $0x520] sm:$0xff]  }
  0x82   :  { %7492 = vmatpush3.bf16.msra.mxu1 %v8276_v32  ;;  %v8326_v32 = vld [vmem:[%s10728_s1 + $0x560] sm:$0xff]  }
  0x83   :  { %5441 = vmatmul.mubr.bf16.vlgmr.msra.gmra.mrb[12].mxu0 %v1278_v33  ;;  %7521 = vmatprep.subr.bf16.mxu1 %v8279_v35  ;;  %v8327_v33 = vld [vmem:[%s10728_s1 + $0x5e0] sm:$0xff]  }
  0x84   :  { %7500 = vmatpush3.bf16.msra.mxu0 %v8280_v36  ;;  %5520 = vmatprep.mubr.bf16.mxu0 %v1334_v7  ;;  %v8329_v35 = vld [vmem:[%s10728_s1 + $0x5a0] sm:$0xff]   ;;  %v8330_v36 = vld [vmem:[%s10728_s1 + $0x568] sm:$0xff]  }
  0x85   :  { %5481 = vmatmul.mubr.bf16.vlgmr.msra.gmra.mrb[12].mxu1 %v1294_v38  ;;  %7501 = vmatprep.subr.bf16.mxu0 %v8282_v39  ;;  %v8332_v38 = vld [vmem:[%s10728_s1 + $0x528] sm:$0xff]  }
  0x86   :  { %7522 = vmatpush3.bf16.msra.mxu1 %v8281_v37  ;;  %5560 = vmatprep.mubr.bf16.mxu1 %v1344_v11  ;;  %v8331_v37 = vld [vmem:[%s10728_s1 + $0x5e8] sm:$0xff]   ;;  %v8367_v11 = vld [vmem:[%s10728_s1 + $0x670] sm:$0xff]  }
  0x87   :  { %7523 = vmatprep.subr.bf16.mxu1 %v8283_v40  ;;  %v8333_v39 = vld [vmem:[%s10728_s1 + $0x5a8] sm:$0xff]   ;;  %v8334_v40 = vld [vmem:[%s10728_s1 + $0x570] sm:$0xff]  }
  0x88   :  { %7502 = vmatpush3.bf16.msra.mxu0 %v8284_v42  ;;  %v8335_v42 = vld [vmem:[%s10728_s1 + $0x5f0] sm:$0xff]   ;;  %v8363_v7 = vld [vmem:[%s10728_s1 + $0x668] sm:$0xff]  }
  0x89   :  { %7503 = vmatprep.subr.bf16.mxu0 %v8286_v44  ;;  %v8337_v44 = vld [vmem:[%s10728_s1 + $0x5b0] sm:$0xff]  }
  0x8a   :  { %7524 = vmatpush3.bf16.msra.mxu1 %v8285_v43  ;;  %v8336_v43 = vld [vmem:[%s10728_s1 + $0x530] sm:$0xff]  }
  0x8b   :  { %7525 = vmatprep.subr.bf16.mxu1 %v8287_v45  ;;  %v8338_v45 = vld [vmem:[%s10728_s1 + $0x578] sm:$0xff]  }
  0x8c   :  { %7504 = vmatpush3.bf16.msra.mxu0 %v8288_v46  ;;  %v8339_v46 = vld [vmem:[%s10728_s1 + $0x5f8] sm:$0xff]  }
  0x8d   :  { %7505 = vmatprep.subr.bf16.mxu0 %v8290_v48  ;;  %v8341_v48 = vld [vmem:[%s10728_s1 + $0x5b8] sm:$0xff]  }
  0x8e   :  { %7526 = vmatpush3.bf16.msra.mxu1 %v8289_v47  ;;  %v8340_v47 = vld [vmem:[%s10728_s1 + $0x538] sm:$0xff]  }
  0x8f   :  { %7527 = vmatprep.subr.bf16.mxu1 %v8291_v49  ;;  %v1327_v49 = vrot.slane %v9302_v4, %v8904_v41  ;;  %v8360_v4 = vld [vmem:[%s10728_s1 + $0x6e0] sm:$0xff]  }
  0x90   :  { %7506 = vmatpush3.bf16.msra.mxu0 %v8292_v50  ;;  %v8343_v50 = vld [vmem:[%s10728_s1 + $0x640] sm:$0xff]  }
  0x91   :  { %7507 = vmatprep.subr.bf16.mxu0 %v8294_v52  ;;  %v8345_v52 = vld [vmem:[%s10728_s1 + $0x600] sm:$0xff]  }
  0x92   :  { %7528 = vmatpush3.bf16.msra.mxu1 %v8293_v51  ;;  %v8344_v51 = vld [vmem:[%s10728_s1 + $0x6c0] sm:$0xff]  }
  0x93   :  { %7529 = vmatprep.subr.bf16.mxu1 %v8295_v53  ;;  %v8346_v53 = vld [vmem:[%s10728_s1 + $0x680] sm:$0xff]  }
  0x94   :  { %7508 = vmatpush3.bf16.msra.mxu0 %v8296_v54  ;;  %v1343_v54 = vcombine.high %v1327_v49, %v1327_v49 }
  0x95   :  { %7509 = vmatprep.subr.bf16.mxu0 %v8298_v56  ;;  %v8348_v56 = vld [vmem:[%s10728_s1 + $0x6c8] sm:$0xff]  }
  0x96   :  { %7530 = vmatpush3.bf16.msra.mxu1 %v8297_v55  ;;  %v8347_v55 = vld [vmem:[%s10728_s1 + $0x648] sm:$0xff]  }
  0x97   :  { %7531 = vmatprep.subr.bf16.mxu1 %v8299_v57  ;;  %v8349_v57 = vld [vmem:[%s10728_s1 + $0x608] sm:$0xff]  }
  0x98   :  { %7510 = vmatpush3.bf16.msra.mxu0 %v8300_v58  ;;  %v8350_v58 = vld [vmem:[%s10728_s1 + $0x688] sm:$0xff]  }
  0x99   :  { %7511 = vmatprep.subr.bf16.mxu0 %v8302_v60  ;;  %v8352_v60 = vld [vmem:[%s10728_s1 + $0x6d0] sm:$0xff]  }
  0x9a   :  { %7532 = vmatpush3.bf16.msra.mxu1 %v8301_v59  ;;  %v8351_v59 = vld [vmem:[%s10728_s1 + $0x650] sm:$0xff]  }
  0x9b   :  { %7533 = vmatprep.subr.bf16.mxu1 %v8303_v62  ;;  %v8354_v62 = vld [vmem:[%s10728_s1 + $0x690] sm:$0xff]  }
  0x9c   :  { %7512 = vmatpush3.bf16.msra.mxu0 %v8304_v1  ;;  %v8357_v1 = vld [vmem:[%s10728_s1 + $0x618] sm:$0xff]  }
  0x9d   :  { %7513 = vmatprep.subr.bf16.mxu0 %v8306_v5  ;;  %v8361_v5 = vld [vmem:[%s10728_s1 + $0x620] sm:$0xff]  }
  0x9e   :  { %7534 = vmatpush3.bf16.msra.mxu1 %v8305_v2  ;;  %v8358_v2 = vld [vmem:[%s10728_s1 + $0x698] sm:$0xff]  }
  0x9f   :  { %7535 = vmatprep.subr.bf16.mxu1 %v8307_v6  ;;  %v8362_v6 = vld [vmem:[%s10728_s1 + $0x6a0] sm:$0xff]  }
  0xa0   :  { %7514 = vmatpush3.bf16.msra.mxu0 %v8308_v9  ;;  %v8365_v9 = vld [vmem:[%s10728_s1 + $0x628] sm:$0xff]  }
  0xa1   :  { %7543 = vmatprep.subr.bf16.mxu0 %v8310_v13  ;;  %v8368_v13 = vld [vmem:[%s10728_s1 + $0x6f0] sm:$0xff]  }
  0xa2   :  { %7536 = vmatpush3.bf16.msra.mxu1 %v8309_v10  ;;  %v8366_v10 = vld [vmem:[%s10728_s1 + $0x6a8] sm:$0xff]  }
  0xa3   :  { %5521 = vmatmul.mubr.bf16.vlgmr.msra.gmra.mrb[16].mxu0 %v1320_v12  ;;  %7565 = vmatprep.subr.bf16.mxu1 %v8311_v14  ;;  %v25_v12 = vld [vmem:[%s10727_s0 + $0x18] sm:$0xff] }
  0xa4   :  { %7544 = vmatpush3.bf16.msra.mxu0 %v8312_v16  ;;  %5600 = vmatprep.mubr.bf16.mxu0 %v1341_v15  ;;  %v1353_v14 = vrot.slane %v25_v12, %v8904_v41  ;;  %v1346_v15 = vcombine.high %v25_v12, %v25_v12  ;;  %v8369_v16 = vld [vmem:[%s10728_s1 + $0x630] sm:$0xff]   ;;  %v8406_v12 = vld [vmem:[%s10728_s1 + $0x7b8] sm:$0xff]  }
  0xa5   :  { %5561 = vmatmul.mubr.bf16.vlgmr.msra.gmra.mrb[16].mxu1 %v1342_v18  ;;  %7545 = vmatprep.subr.bf16.mxu0 %v8314_v19 }
  0xa6   :  { %7566 = vmatpush3.bf16.msra.mxu1 %v8313_v17  ;;  %5640 = vmatprep.mubr.bf16.mxu1 %v1345_v21  ;;  %v8371_v17 = vld [vmem:[%s10728_s1 + $0x678] sm:$0xff]   ;;  %v1361_v18 = vcombine.high %v1353_v14, %v1353_v14  ;;  %v9508_v19 = vrot.slane %v1346_v15, %v8904_v41  ;;  %v8409_v15 = vld [vmem:[%s10728_s1 + $0x8c0] sm:$0xff]  }
  0xa7   :  { %7567 = vmatprep.subr.bf16.mxu1 %v8315_v20  ;;  %v8370_v20 = vld [vmem:[%s10728_s1 + $0x6b0] sm:$0xff]   ;;  %v8372_v21 = vld [vmem:[%s10728_s1 + $0x6f8] sm:$0xff]  }
  0xa8   :  { %7546 = vmatpush3.bf16.msra.mxu0 %v8316_v22  ;;  %v1383_v22 = vrot.slane %v1361_v18, %v8904_v41 }
  0xa9   :  { %7547 = vmatprep.subr.bf16.mxu0 %v8318_v24  ;;  %v8373_v24 = vld [vmem:[%s10728_s1 + $0x638] sm:$0xff]  }
  0xaa   :  { %7568 = vmatpush3.bf16.msra.mxu1 %v8317_v23  ;;  %v1362_v23 = vcombine.high %v9508_v19, %v9508_v19 }
  0xab   :  { %7569 = vmatprep.subr.bf16.mxu1 %v8319_v25  ;;  %v1393_v25 = vcombine.high %v1383_v22, %v1383_v22 }
  0xac   :  { %7548 = vmatpush3.bf16.msra.mxu0 %v8320_v26  ;;  %v1369_v26 = vrot.slane %v1353_v14, %v8904_v41  ;;  %v8408_v14 = vld [vmem:[%s10728_s1 + $0x840] sm:$0xff]  }
  0xad   :  { %7549 = vmatprep.subr.bf16.mxu0 %v8322_v28  ;;  %v8374_v28 = vld [vmem:[%s10728_s1 + $0x6b8] sm:$0xff]  }
  0xae   :  { %7570 = vmatpush3.bf16.msra.mxu1 %v8321_v27  ;;  %v8375_v27 = vld [vmem:[%s10728_s1 + $0x740] sm:$0xff]  }
  0xaf   :  { %7571 = vmatprep.subr.bf16.mxu1 %v8323_v29  ;;  %v1390_v29 = vrot.slane %v1362_v23, %v8904_v41  ;;  %v8416_v23 = vld [vmem:[%s10728_s1 + $0x850] sm:$0xff]  }
  0xb0   :  { %7550 = vmatpush3.bf16.msra.mxu0 %v8324_v30  ;;  %v8376_v30 = vld [vmem:[%s10728_s1 + $0x7c0] sm:$0xff]  }
  0xb1   :  { %7551 = vmatprep.subr.bf16.mxu0 %v8326_v32  ;;  %v1391_v32 = vcombine.high %v1369_v26, %v1369_v26 }
  0xb2   :  { %7572 = vmatpush3.bf16.msra.mxu1 %v8325_v31  ;;  %v8377_v31 = vld [vmem:[%s10728_s1 + $0x700] sm:$0xff]  }
  0xb3   :  { %7573 = vmatprep.subr.bf16.mxu1 %v8327_v33  ;;  %v8379_v33 = vld [vmem:[%s10728_s1 + $0x748] sm:$0xff]  }
  0xb4   :  { %7552 = vmatpush3.bf16.msra.mxu0 %v8328_v34  ;;  %v8378_v34 = vld [vmem:[%s10728_s1 + $0x780] sm:$0xff]  }
  0xb5   :  { %7553 = vmatprep.subr.bf16.mxu0 %v8330_v36  ;;  %v8380_v36 = vld [vmem:[%s10728_s1 + $0x7c8] sm:$0xff]  }
  0xb6   :  { %7574 = vmatpush3.bf16.msra.mxu1 %v8329_v35  ;;  %v1394_v35 = vcombine.high %v1390_v29, %v1390_v29 }
  0xb7   :  { %7575 = vmatprep.subr.bf16.mxu1 %v8331_v37  ;;  %v8381_v37 = vld [vmem:[%s10728_s1 + $0x708] sm:$0xff]  }
  0xb8   :  { %7554 = vmatpush3.bf16.msra.mxu0 %v8332_v38  ;;  %v8383_v38 = vld [vmem:[%s10728_s1 + $0x750] sm:$0xff]  }
  0xb9   :  { %7555 = vmatprep.subr.bf16.mxu0 %v8334_v40  ;;  %v8384_v40 = vld [vmem:[%s10728_s1 + $0x7d0] sm:$0xff]  }
  0xba   :  { %7576 = vmatpush3.bf16.msra.mxu1 %v8333_v39  ;;  %v8382_v39 = vld [vmem:[%s10728_s1 + $0x788] sm:$0xff]  }
  0xbb   :  { %7577 = vmatprep.subr.bf16.mxu1 %v8335_v42  ;;  %v8385_v42 = vld [vmem:[%s10728_s1 + $0x710] sm:$0xff]  }
  0xbc   :  { %7556 = vmatpush3.bf16.msra.mxu0 %v8336_v43  ;;  %v8387_v43 = vld [vmem:[%s10728_s1 + $0x758] sm:$0xff]  }
  0xbd   :  { %7557 = vmatprep.subr.bf16.mxu0 %v8338_v45  ;;  %v8388_v45 = vld [vmem:[%s10728_s1 + $0x7d8] sm:$0xff]  }
  0xbe   :  { %7578 = vmatpush3.bf16.msra.mxu1 %v8337_v44  ;;  %v8386_v44 = vld [vmem:[%s10728_s1 + $0x790] sm:$0xff]  }
  0xbf   :  { %7579 = vmatprep.subr.bf16.mxu1 %v8339_v46  ;;  %v8389_v46 = vld [vmem:[%s10728_s1 + $0x718] sm:$0xff]  }
  0xc0   :  { %7558 = vmatpush3.bf16.msra.mxu0 %v8340_v47  ;;  %v8390_v47 = vld [vmem:[%s10728_s1 + $0x798] sm:$0xff]  }
  0xc1   :  { %7587 = vmatprep.subr.bf16.mxu0 %v8343_v50  ;;  %v8393_v50 = vld [vmem:[%s10728_s1 + $0x720] sm:$0xff]  }
  0xc2   :  { %7580 = vmatpush3.bf16.msra.mxu1 %v8341_v48  ;;  %v8391_v48 = vld [vmem:[%s10728_s1 + $0x760] sm:$0xff]  }
  0xc3   :  { %5601 = vmatmul.mubr.bf16.vlgmr.msra.gmra.mrb[20].mxu0 %v1327_v49  ;;  %7609 = vmatprep.subr.bf16.mxu1 %v8344_v51  ;;  %v8392_v49 = vld [vmem:[%s10728_s1 + $0x7e0] sm:$0xff]  }
  0xc4   :  { %7588 = vmatpush3.bf16.msra.mxu0 %v8345_v52  ;;  %5680 = vmatprep.mubr.bf16.mxu0 %v1383_v22  ;;  %v8394_v51 = vld [vmem:[%s10728_s1 + $0x7a0] sm:$0xff]   ;;  %v8395_v52 = vld [vmem:[%s10728_s1 + $0x768] sm:$0xff]  }
  0xc5   :  { %5641 = vmatmul.mubr.bf16.vlgmr.msra.gmra.mrb[20].mxu1 %v1343_v54  ;;  %7589 = vmatprep.subr.bf16.mxu0 %v8347_v55  ;;  %v8397_v54 = vld [vmem:[%s10728_s1 + $0x728] sm:$0xff]  }
  0xc6   :  { %7610 = vmatpush3.bf16.msra.mxu1 %v8346_v53  ;;  %5720 = vmatprep.mubr.bf16.mxu1 %v1393_v25  ;;  %v8396_v53 = vld [vmem:[%s10728_s1 + $0x7e8] sm:$0xff]   ;;  %v8418_v25 = vld [vmem:[%s10728_s1 + $0x810] sm:$0xff]  }
  0xc7   :  { %7611 = vmatprep.subr.bf16.mxu1 %v8348_v56  ;;  %v8398_v55 = vld [vmem:[%s10728_s1 + $0x7a8] sm:$0xff]   ;;  %v6737_v56 = vld [vmem:[%s10729_s2] ss:$0 sm:$0xff] }
  0xc8   :  { %7590 = vmatpush3.bf16.msra.mxu0 %v8349_v57  ;;  %v8399_v57 = vld [vmem:[%s10728_s1 + $0x770] sm:$0xff]   ;;  %v8415_v22 = vld [vmem:[%s10728_s1 + $0x888] sm:$0xff]  }
  0xc9   :  { %7591 = vmatprep.subr.bf16.mxu0 %v8351_v59  ;;  %v8400_v59 = vld [vmem:[%s10728_s1 + $0x7f0] sm:$0xff]  }
  0xca   :  { %7612 = vmatpush3.bf16.msra.mxu1 %v8350_v58 }
  0xcb   :  { %7613 = vmatprep.subr.bf16.mxu1 %v8352_v60 }
  0xcc   :  { %7592 = vmatpush3.bf16.msra.mxu0 %v8353_v61  ;;  %v8401_v61 = vld [vmem:[%s10728_s1 + $0x730] sm:$0xff]  }
  0xcd   :  { %7593 = vmatprep.subr.bf16.mxu0 %v8355_v63 }
  0xce   :  { %7614 = vmatpush3.bf16.msra.mxu1 %v8354_v62 }
  0xcf   :  { %7615 = vmatprep.subr.bf16.mxu1 %v8356_v0 }
  0xd0   :  { %7594 = vmatpush3.bf16.msra.mxu0 %v8357_v1  ;;  %v8402_v1 = vld [vmem:[%s10728_s1 + $0x7b0] sm:$0xff]  }
  0xd1   :  { %7595 = vmatprep.subr.bf16.mxu0 %v8359_v3 }
  0xd2   :  { %7616 = vmatpush3.bf16.msra.mxu1 %v8358_v2  ;;  %v8403_v2 = vld [vmem:[%s10728_s1 + $0x778] sm:$0xff]  }
  0xd3   :  { %7617 = vmatprep.subr.bf16.mxu1 %v8360_v4 }
  0xd4   :  { %7596 = vmatpush3.bf16.msra.mxu0 %v8361_v5 }
  0xd5   :  { %7597 = vmatprep.subr.bf16.mxu0 %v8363_v7 }
  0xd6   :  { %7618 = vmatpush3.bf16.msra.mxu1 %v8362_v6 }
  0xd7   :  { %7619 = vmatprep.subr.bf16.mxu1 %v8364_v8  ;;  %v8404_v8 = vld [vmem:[%s10728_s1 + $0x7f8] sm:$0xff]  }
  0xd8   :  { %7598 = vmatpush3.bf16.msra.mxu0 %v8365_v9 }
  0xd9   :  { %7599 = vmatprep.subr.bf16.mxu0 %v8367_v11 }
  0xda   :  { %7620 = vmatpush3.bf16.msra.mxu1 %v8366_v10  ;;  %v8405_v10 = vld [vmem:[%s10728_s1 + $0x738] sm:$0xff]  }
  0xdb   :  { %7621 = vmatprep.subr.bf16.mxu1 %v8368_v13  ;;  %v1376_v13 = vrot.slane %v9508_v19, %v8904_v41  ;;  %v8412_v19 = vld [vmem:[%s10728_s1 + $0x848] sm:$0xff]  }
  0xdc   :  { %7600 = vmatpush3.bf16.msra.mxu0 %v8369_v16  ;;  %v8410_v16 = vld [vmem:[%s10728_s1 + $0x800] sm:$0xff]  }
  0xdd   :  { %7601 = vmatprep.subr.bf16.mxu0 %v8371_v17  ;;  %v8411_v17 = vld [vmem:[%s10728_s1 + $0x880] sm:$0xff]   ;;  %v1392_v18 = vcombine.high %v1376_v13, %v1376_v13 }
  0xde   :  { %7622 = vmatpush3.bf16.msra.mxu1 %v8370_v20  ;;  %v8413_v20 = vld [vmem:[%s10728_s1 + $0x8c8] sm:$0xff]  }
  0xdf   :  { %7623 = vmatprep.subr.bf16.mxu1 %v8372_v21  ;;  %v8414_v21 = vld [vmem:[%s10728_s1 + $0x808] sm:$0xff]  }
  0xe0   :  { %7602 = vmatpush3.bf16.msra.mxu0 %v8373_v24  ;;  %v8417_v24 = vld [vmem:[%s10728_s1 + $0x8d0] sm:$0xff]  }
  0xe1   :  { %7631 = vmatprep.subr.bf16.mxu0 %v8375_v27  ;;  %v8420_v27 = vld [vmem:[%s10728_s1 + $0x858] sm:$0xff]  }
  0xe2   :  { %7624 = vmatpush3.bf16.msra.mxu1 %v8374_v28  ;;  %v8421_v28 = vld [vmem:[%s10728_s1 + $0x8d8] sm:$0xff]  }
  0xe3   :  { %5681 = vmatmul.mubr.bf16.vlgmr.msra.gmra.mrb[24].mxu0 %v1369_v26  ;;  %7653 = vmatprep.subr.bf16.mxu1 %v8376_v30  ;;  %v8419_v26 = vld [vmem:[%s10728_s1 + $0x890] sm:$0xff]   ;;  %v8423_v30 = vld [vmem:[%s10728_s1 + $0x898] sm:$0xff]  }
  0xe4   :  { %7632 = vmatpush3.bf16.msra.mxu0 %v8377_v31  ;;  %5760 = vmatprep.mubr.bf16.mxu0 %v1390_v29  ;;  %v8422_v29 = vld [vmem:[%s10728_s1 + $0x818] sm:$0xff]   ;;  %v8424_v31 = vld [vmem:[%s10728_s1 + $0x860] sm:$0xff]  }
  0xe5   :  { %5721 = vmatmul.mubr.bf16.vlgmr.msra.gmra.mrb[24].mxu1 %v1391_v32  ;;  %7633 = vmatprep.subr.bf16.mxu0 %v8379_v33  ;;  %v8425_v32 = vld [vmem:[%s10728_s1 + $0x8e0] sm:$0xff]  }
  0xe6   :  { %7654 = vmatpush3.bf16.msra.mxu1 %v8378_v34  ;;  %5800 = vmatprep.mubr.bf16.mxu1 %v1394_v35  ;;  %v8426_v33 = vld [vmem:[%s10728_s1 + $0x820] sm:$0xff]   ;;  %v8428_v35 = vld [vmem:[%s10728_s1 + $0x868] sm:$0xff]  }
  0xe7   :  { %7655 = vmatprep.subr.bf16.mxu1 %v8380_v36  ;;  %v8427_v34 = vld [vmem:[%s10728_s1 + $0x8a0] sm:$0xff]   ;;  %v8429_v36 = vld [vmem:[%s10728_s1 + $0x8e8] sm:$0xff]  }
  0xe8   :  { %7634 = vmatpush3.bf16.msra.mxu0 %v8381_v37  ;;  %v8430_v37 = vld [vmem:[%s10728_s1 + $0x828] sm:$0xff]  }
  0xe9   :  { %7635 = vmatprep.subr.bf16.mxu0 %v8383_v38  ;;  %v8431_v38 = vld [vmem:[%s10728_s1 + $0x8a8] sm:$0xff]  }
  0xea   :  { %7656 = vmatpush3.bf16.msra.mxu1 %v8382_v39  ;;  %v8432_v39 = vld [vmem:[%s10728_s1 + $0x870] sm:$0xff]  }
  0xeb   :  { %7657 = vmatprep.subr.bf16.mxu1 %v8384_v40  ;;  %v8433_v40 = vld [vmem:[%s10728_s1 + $0x8f0] sm:$0xff]  }
  0xec   :  { %7636 = vmatpush3.bf16.msra.mxu0 %v8385_v42 }
  0xed   :  { %7637 = vmatprep.subr.bf16.mxu0 %v8387_v43  ;;  %v8434_v43 = vld [vmem:[%s10728_s1 + $0x830] sm:$0xff]  }
  0xee   :  { %7658 = vmatpush3.bf16.msra.mxu1 %v8386_v44 }
  0xef   :  { %7659 = vmatprep.subr.bf16.mxu1 %v8388_v45  ;;  %v26_v45 = vld [vmem:[%s10727_s0 + $0x20] sm:$0xff] }
  0xf0   :  { %7638 = vmatpush3.bf16.msra.mxu0 %v8389_v46 }
  0xf1   :  { %7639 = vmatprep.subr.bf16.mxu0 %v8391_v48 }
  0xf2   :  { %7660 = vmatpush3.bf16.msra.mxu1 %v8390_v47 }
  0xf3   :  { %7661 = vmatprep.subr.bf16.mxu1 %v8392_v49  ;;  %v8435_v49 = vld [vmem:[%s10728_s1 + $0x8b0] sm:$0xff]  }
  0xf4   :  { %7640 = vmatpush3.bf16.msra.mxu0 %v8393_v50  ;;  %v8436_v50 = vld [vmem:[%s10728_s1 + $0x878] sm:$0xff]  }
  0xf5   :  { %7641 = vmatprep.subr.bf16.mxu0 %v8395_v52  ;;  %v1395_v52 = vcombine.high %v26_v45, %v26_v45 }
  0xf6   :  { %7662 = vmatpush3.bf16.msra.mxu1 %v8394_v51  ;;  %v7339_v58 = vpop.f32.mrb[0].mxu0  ;;  %v1402_v51 = vrot.slane %v26_v45, %v8904_v41 }
  0xf7   :  { %v7340_v60 = vpop.f32.mrb[1].mxu0  ;;  %7663 = vmatprep.subr.bf16.mxu1 %v8396_v53  ;;  %v7361_v62 = vpop.f32.mrb[0].mxu1 }
  0xf8   :  { %v7341_v63 = vadd.f32 %v7340_v60, %v7339_v58  ;;  %v7342_v0 = vpop.f32.mrb[2].mxu0  ;;  %7642 = vmatpush3.bf16.msra.mxu0 %v8397_v54  ;;  %v7362_v3 = vpop.f32.mrb[1].mxu1  ;;  %v8437_v58 = vld [vmem:[%s10728_s1 + $0x8f8] sm:$0xff]  }
  0xf9   :  { %v7343_v4 = vpop.f32.mrb[3].mxu0  ;;  %7643 = vmatprep.subr.bf16.mxu0 %v8399_v57  ;;  %v7363_v6 = vadd.f32 %v7362_v3, %v7361_v62  ;;  %v7364_v7 = vpop.f32.mrb[2].mxu1  ;;  %v9729_v62 = vrot.slane %v1395_v52, %v8904_v41  ;;  %v8439_v0 = vld [vmem:[%s10728_s1 + $0x8b8] sm:$0xff]   ;;  %v8440_v3 = vld [vmem:[%s10728_s1 + $0x940] sm:$0xff]  }
  0xfa   :  { %v5203_v5 = vadd.f32 %v7341_v63, %v6737_v56  ;;  %7664 = vmatpush3.bf16.msra.mxu1 %v8398_v55  ;;  %v7365_v9 = vpop.f32.mrb[3].mxu1  ;;  %v8442_v7 = vld [vmem:[%s10728_s1 + $0x900] sm:$0xff]   ;;  %v8471_v52 = vld [vmem:[%s10728_s1 + $0x9b8] sm:$0xff]  }
  0xfb   :  { %7665 = vmatprep.subr.bf16.mxu1 %v8400_v59  ;;  %v1410_v59 = vcombine.high %v1402_v51, %v1402_v51  ;;  %v1411_v4 = vcombine.high %v9729_v62, %v9729_v62  ;;  %v8443_v9 = vld [vmem:[%s10728_s1 + $0x980] sm:$0xff]  }
  0xfc   :  { %v9623_v11 = vadd.f32 %v7363_v6, %v5203_v5  ;;  %7644 = vmatpush3.bf16.msra.mxu0 %v8401_v61  ;;  %v8438_v61 = vld [vmem:[%s10728_s1 + $0x838] sm:$0xff]   ;;  %v8441_v6 = vld [vmem:[%s10728_s1 + $0x9c0] sm:$0xff]  }
  0xfd   :  { %7645 = vmatprep.subr.bf16.mxu0 %v8403_v2  ;;  %v1418_v2 = vrot.slane %v1402_v51, %v8904_v41 }
  0xfe   :  { %7666 = vmatpush3.bf16.msra.mxu1 %v8402_v1  ;;  %v1432_v1 = vrot.slane %v1410_v59, %v8904_v41  ;;  %v8477_v59 = vld [vmem:[%s10728_s1 + $0xa48] sm:$0xff]  }
  0xff   :  { %7667 = vmatprep.subr.bf16.mxu1 %v8404_v8  ;;  %v1439_v8 = vrot.slane %v1411_v4, %v8904_v41  ;;  %v8486_v4 = vld [vmem:[%s10728_s1 + $0xad8] sm:$0xff]  }
 0x100   :  { %7646 = vmatpush3.bf16.msra.mxu0 %v8405_v10  ;;  %v1442_v5 = vcombine.high %v1432_v1, %v1432_v1  ;;  %v1440_v10 = vcombine.high %v1418_v2, %v1418_v2 }
 0x101   :  { %7675 = vmatprep.subr.bf16.mxu0 %v8408_v14  ;;  %v8446_v14 = vld [vmem:[%s10728_s1 + $0x908] sm:$0xff]  }
 0x102   :  { %7668 = vmatpush3.bf16.msra.mxu1 %v8406_v12  ;;  %v8445_v12 = vld [vmem:[%s10728_s1 + $0x9c8] sm:$0xff]  }
 0x103   :  { %5761 = vmatmul.mubr.bf16.vlgmr.msra.gmra.mrb[28].mxu0 %v1376_v13  ;;  %7697 = vmatprep.subr.bf16.mxu1 %v8409_v15  ;;  %v1443_v13 = vcombine.high %v1439_v8, %v1439_v8  ;;  %v8447_v15 = vld [vmem:[%s10728_s1 + $0x988] sm:$0xff]  }
 0x104   :  { %7676 = vmatpush3.bf16.msra.mxu0 %v8410_v16  ;;  %5840 = vmatprep.mubr.bf16.mxu0 %v1432_v1  ;;  %v8448_v16 = vld [vmem:[%s10728_s1 + $0x950] sm:$0xff]  }
 0x105   :  { %5801 = vmatmul.mubr.bf16.vlgmr.msra.gmra.mrb[28].mxu1 %v1392_v18  ;;  %7677 = vmatprep.subr.bf16.mxu0 %v8412_v19  ;;  %v8450_v18 = vld [vmem:[%s10728_s1 + $0x910] sm:$0xff]  }
 0x106   :  { %7698 = vmatpush3.bf16.msra.mxu1 %v8411_v17  ;;  %5880 = vmatprep.mubr.bf16.mxu1 %v1442_v5  ;;  %v8449_v17 = vld [vmem:[%s10728_s1 + $0x9d0] sm:$0xff]   ;;  %v8487_v5 = vld [vmem:[%s10728_s1 + $0xa18] sm:$0xff]  }
 0x107   :  { %7699 = vmatprep.subr.bf16.mxu1 %v8413_v20  ;;  %v8451_v19 = vld [vmem:[%s10728_s1 + $0x990] sm:$0xff]   ;;  %v8452_v20 = vld [vmem:[%s10728_s1 + $0x958] sm:$0xff]  }
 0x108   :  { %7678 = vmatpush3.bf16.msra.mxu0 %v8414_v21  ;;  %v8453_v21 = vld [vmem:[%s10728_s1 + $0x9d8] sm:$0xff]   ;;  %v8483_v1 = vld [vmem:[%s10728_s1 + $0xa10] sm:$0xff]  }
 0x109   :  { %7679 = vmatprep.subr.bf16.mxu0 %v8416_v23  ;;  %v8455_v23 = vld [vmem:[%s10728_s1 + $0x998] sm:$0xff]  }
 0x10a   :  { %7700 = vmatpush3.bf16.msra.mxu1 %v8415_v22  ;;  %v8454_v22 = vld [vmem:[%s10728_s1 + $0x918] sm:$0xff]  }
 0x10b   :  { %7701 = vmatprep.subr.bf16.mxu1 %v8417_v24  ;;  %v8456_v24 = vld [vmem:[%s10728_s1 + $0x960] sm:$0xff]  }
 0x10c   :  { %7680 = vmatpush3.bf16.msra.mxu0 %v8418_v25  ;;  %v8457_v25 = vld [vmem:[%s10728_s1 + $0x9e0] sm:$0xff]  }
 0x10d   :  { %7681 = vmatprep.subr.bf16.mxu0 %v8420_v27  ;;  %v8459_v27 = vld [vmem:[%s10728_s1 + $0x9a0] sm:$0xff]  }
 0x10e   :  { %7702 = vmatpush3.bf16.msra.mxu1 %v8419_v26  ;;  %v8458_v26 = vld [vmem:[%s10728_s1 + $0x920] sm:$0xff]  }
 0x10f   :  { %7703 = vmatprep.subr.bf16.mxu1 %v8421_v28  ;;  %v8460_v28 = vld [vmem:[%s10728_s1 + $0x968] sm:$0xff]  }
 0x110   :  { %7682 = vmatpush3.bf16.msra.mxu0 %v8422_v29  ;;  %v8461_v29 = vld [vmem:[%s10728_s1 + $0x9e8] sm:$0xff]  }
 0x111   :  { %7683 = vmatprep.subr.bf16.mxu0 %v8424_v31  ;;  %v8463_v31 = vld [vmem:[%s10728_s1 + $0x9a8] sm:$0xff]  }
 0x112   :  { %7704 = vmatpush3.bf16.msra.mxu1 %v8423_v30  ;;  %v8462_v30 = vld [vmem:[%s10728_s1 + $0x928] sm:$0xff]  }
 0x113   :  { %7705 = vmatprep.subr.bf16.mxu1 %v8425_v32  ;;  %v8464_v32 = vld [vmem:[%s10728_s1 + $0x970] sm:$0xff]  }
 0x114   :  { %7684 = vmatpush3.bf16.msra.mxu0 %v8426_v33 }
 0x115   :  { %7685 = vmatprep.subr.bf16.mxu0 %v8428_v35 }
 0x116   :  { %7706 = vmatpush3.bf16.msra.mxu1 %v8427_v34  ;;  %v7383_v42 = vpop.f32.mrb[4].mxu0  ;;  %v8465_v34 = vld [vmem:[%s10728_s1 + $0x9f0] sm:$0xff]  }
 0x117   :  { %v7384_v44 = vpop.f32.mrb[5].mxu0  ;;  %7707 = vmatprep.subr.bf16.mxu1 %v8429_v36  ;;  %v7405_v46 = vpop.f32.mrb[4].mxu1  ;;  %v8466_v36 = vld [vmem:[%s10728_s1 + $0x930] sm:$0xff]  }
 0x118   :  { %v7385_v47 = vadd.f32 %v7384_v44, %v7383_v42  ;;  %v7386_v48 = vpop.f32.mrb[6].mxu0  ;;  %7686 = vmatpush3.bf16.msra.mxu0 %v8430_v37  ;;  %v7406_v53 = vpop.f32.mrb[5].mxu1  ;;  %v8468_v42 = vld [vmem:[%s10728_s1 + $0x978] sm:$0xff]  }
 0x119   :  { %v7387_v54 = vpop.f32.mrb[7].mxu0  ;;  %7687 = vmatprep.subr.bf16.mxu0 %v8432_v39  ;;  %v7407_v56 = vadd.f32 %v7406_v53, %v7405_v46  ;;  %v7408_v57 = vpop.f32.mrb[6].mxu1  ;;  %v8469_v48 = vld [vmem:[%s10728_s1 + $0x9f8] sm:$0xff]   ;;  %v1425_v53 = vrot.slane %v9729_v62, %v8904_v41  ;;  %v8480_v62 = vld [vmem:[%s10728_s1 + $0xa88] sm:$0xff]  }
 0x11a   :  { %v5283_v55 = vadd.f32 %v7385_v47, %v9623_v11  ;;  %7708 = vmatpush3.bf16.msra.mxu1 %v8431_v38  ;;  %v7409_v60 = vpop.f32.mrb[7].mxu1  ;;  %v8444_v11 = vld [vmem:[%s10728_s1 + $0x948] sm:$0xff]   ;;  %v8473_v54 = vld [vmem:[%s10728_s1 + $0xa40] sm:$0xff]  }
 0x11b   :  { %7709 = vmatprep.subr.bf16.mxu1 %v8433_v40  ;;  %v8467_v40 = vld [vmem:[%s10728_s1 + $0x9b0] sm:$0xff]   ;;  %v8476_v57 = vld [vmem:[%s10728_s1 + $0xa80] sm:$0xff]   ;;  %v8478_v60 = vld [vmem:[%s10728_s1 + $0xac8] sm:$0xff]  }
 0x11c   :  { %v9731_v63 = vadd.f32 %v7407_v56, %v5283_v55  ;;  %7688 = vmatpush3.bf16.msra.mxu0 %v8434_v43  ;;  %v8474_v55 = vld [vmem:[%s10728_s1 + $0xac0] sm:$0xff]  }
 0x11d   :  { %7689 = vmatprep.subr.bf16.mxu0 %v8436_v50  ;;  %v8470_v50 = vld [vmem:[%s10728_s1 + $0x938] sm:$0xff]   ;;  %v8475_v56 = vld [vmem:[%s10728_s1 + $0xa00] sm:$0xff]  }
 0x11e   :  { %7710 = vmatpush3.bf16.msra.mxu1 %v8435_v49 }
 0x11f   :  { %7711 = vmatprep.subr.bf16.mxu1 %v8437_v58  ;;  %v1441_v58 = vcombine.high %v1425_v53, %v1425_v53 }
 0x120   :  { %7690 = vmatpush3.bf16.msra.mxu0 %v8438_v61  ;;  %v8479_v61 = vld [vmem:[%s10728_s1 + $0xa08] sm:$0xff]  }
 0x121   :  { %7719 = vmatprep.subr.bf16.mxu0 %v8440_v3  ;;  %v8485_v3 = vld [vmem:[%s10728_s1 + $0xa58] sm:$0xff]  }
 0x122   :  { %7712 = vmatpush3.bf16.msra.mxu1 %v8439_v0  ;;  %v8482_v0 = vld [vmem:[%s10728_s1 + $0xad0] sm:$0xff]  }
 0x123   :  { %5841 = vmatmul.mubr.bf16.vlgmr.msra.gmra.mrb[32].mxu0 %v1418_v2  ;;  %7741 = vmatprep.subr.bf16.mxu1 %v8441_v6  ;;  %v8484_v2 = vld [vmem:[%s10728_s1 + $0xa90] sm:$0xff]   ;;  %v8488_v6 = vld [vmem:[%s10728_s1 + $0xa98] sm:$0xff]  }
 0x124   :  { %7720 = vmatpush3.bf16.msra.mxu0 %v8442_v7  ;;  %5920 = vmatprep.mubr.bf16.mxu0 %v1439_v8  ;;  %v8489_v7 = vld [vmem:[%s10728_s1 + $0xa60] sm:$0xff]  }
 0x125   :  { %5881 = vmatmul.mubr.bf16.vlgmr.msra.gmra.mrb[32].mxu1 %v1440_v10  ;;  %7721 = vmatprep.subr.bf16.mxu0 %v8444_v11  ;;  %v8490_v8 = vld [vmem:[%s10728_s1 + $0xae0] sm:$0xff]   ;;  %v8493_v11 = vld [vmem:[%s10728_s1 + $0xa68] sm:$0xff]  }
 0x126   :  { %7742 = vmatpush3.bf16.msra.mxu1 %v8443_v9  ;;  %5960 = vmatprep.mubr.bf16.mxu1 %v1443_v13  ;;  %v8491_v9 = vld [vmem:[%s10728_s1 + $0xa20] sm:$0xff]   ;;  %v8495_v13 = vld [vmem:[%s10728_s1 + $0xa28] sm:$0xff]  }
 0x127   :  { %7743 = vmatprep.subr.bf16.mxu1 %v8445_v12  ;;  %v8492_v10 = vld [vmem:[%s10728_s1 + $0xaa0] sm:$0xff]   ;;  %v8494_v12 = vld [vmem:[%s10728_s1 + $0xae8] sm:$0xff]  }
 0x128   :  { %7722 = vmatpush3.bf16.msra.mxu0 %v8446_v14  ;;  %v8496_v14 = vld [vmem:[%s10728_s1 + $0xaa8] sm:$0xff]  }
 0x129   :  { %7723 = vmatprep.subr.bf16.mxu0 %v8448_v16 }
 0x12a   :  { %7744 = vmatpush3.bf16.msra.mxu1 %v8447_v15  ;;  %v8497_v15 = vld [vmem:[%s10728_s1 + $0xa70] sm:$0xff]  }
 0x12b   :  { %7745 = vmatprep.subr.bf16.mxu1 %v8449_v17  ;;  %v8498_v17 = vld [vmem:[%s10728_s1 + $0xaf0] sm:$0xff]  }
 0x12c   :  { %7724 = vmatpush3.bf16.msra.mxu0 %v8450_v18 }
 0x12d   :  { %7725 = vmatprep.subr.bf16.mxu0 %v8452_v20 }
 0x12e   :  { %7746 = vmatpush3.bf16.msra.mxu1 %v8451_v19  ;;  %v8499_v19 = vld [vmem:[%s10728_s1 + $0xa30] sm:$0xff]  }
 0x12f   :  { %7747 = vmatprep.subr.bf16.mxu1 %v8453_v21 }
 0x130   :  { %7726 = vmatpush3.bf16.msra.mxu0 %v8454_v22 }
 0x131   :  { %7727 = vmatprep.subr.bf16.mxu0 %v8456_v24  ;;  %v8501_v24 = vld [vmem:[%s10728_s1 + $0xa78] sm:$0xff]  }
 0x132   :  { %7748 = vmatpush3.bf16.msra.mxu1 %v8455_v23  ;;  %v8500_v23 = vld [vmem:[%s10728_s1 + $0xab0] sm:$0xff]  }
 0x133   :  { %7749 = vmatprep.subr.bf16.mxu1 %v8457_v25  ;;  %v27_v25 = vld [vmem:[%s10727_s0 + $0x28] sm:$0xff] }
 0x134   :  { %7728 = vmatpush3.bf16.msra.mxu0 %v8458_v26 }
 0x135   :  { %7729 = vmatprep.subr.bf16.mxu0 %v8460_v28  ;;  %v1451_v28 = vrot.slane %v27_v25, %v8904_v41 }
 0x136   :  { %7750 = vmatpush3.bf16.msra.mxu1 %v8459_v27  ;;  %v7427_v33 = vpop.f32.mrb[8].mxu0 }
 0x137   :  { %v7428_v35 = vpop.f32.mrb[9].mxu0  ;;  %7751 = vmatprep.subr.bf16.mxu1 %v8461_v29  ;;  %v1444_v29 = vcombine.high %v27_v25, %v27_v25  ;;  %v8535_v25 = vld [vmem:[%s10728_s1 + $0xb38] sm:$0xff]  }
 0x138   :  { %v7449_v37 = vpop.f32.mrb[8].mxu1  ;;  %v7429_v38 = vadd.f32 %v7428_v35, %v7427_v33  ;;  %v7430_v39 = vpop.f32.mrb[10].mxu0  ;;  %7730 = vmatpush3.bf16.msra.mxu0 %v8462_v30  ;;  %v8502_v33 = vld [vmem:[%s10728_s1 + $0xaf8] sm:$0xff]  }
 0x139   :  { %v7450_v43 = vpop.f32.mrb[9].mxu1  ;;  %v7431_v44 = vpop.f32.mrb[11].mxu0  ;;  %7731 = vmatprep.subr.bf16.mxu0 %v8464_v32  ;;  %v8503_v35 = vld [vmem:[%s10728_s1 + $0xa38] sm:$0xff]  }
 0x13a   :  { %v5363_v45 = vadd.f32 %v7429_v38, %v9731_v63  ;;  %v7451_v46 = vadd.f32 %v7450_v43, %v7449_v37  ;;  %v7452_v47 = vpop.f32.mrb[10].mxu1  ;;  %7752 = vmatpush3.bf16.msra.mxu1 %v8463_v31  ;;  %v8481_v63 = vld [vmem:[%s10728_s1 + $0xa50] sm:$0xff]   ;;  %v9941_v37 = vrot.slane %v1444_v29, %v8904_v41  ;;  %v8504_v39 = vld [vmem:[%s10728_s1 + $0xab8] sm:$0xff]   ;;  %v8505_v43 = vld [vmem:[%s10728_s1 + $0xb40] sm:$0xff]  }
 0x13b   :  { %v7453_v49 = vpop.f32.mrb[11].mxu1  ;;  %7753 = vmatprep.subr.bf16.mxu1 %v8465_v34  ;;  %v8507_v47 = vld [vmem:[%s10728_s1 + $0xb00] sm:$0xff]  }
 0x13c   :  { %v9835_v51 = vadd.f32 %v7451_v46, %v5363_v45  ;;  %7732 = vmatpush3.bf16.msra.mxu0 %v8466_v36  ;;  %v1459_v36 = vcombine.high %v1451_v28, %v1451_v28  ;;  %v1460_v44 = vcombine.high %v9941_v37, %v9941_v37  ;;  %v8506_v45 = vld [vmem:[%s10728_s1 + $0xbc0] sm:$0xff]  }
 0x13d   :  { %7733 = vmatprep.subr.bf16.mxu0 %v8468_v42  ;;  %v1467_v42 = vrot.slane %v1451_v28, %v8904_v41  ;;  %v8508_v49 = vld [vmem:[%s10728_s1 + $0xb80] sm:$0xff]   ;;  %v1474_v28 = vrot.slane %v9941_v37, %v8904_v41  ;;  %v8545_v37 = vld [vmem:[%s10728_s1 + $0xc88] sm:$0xff]  }
 0x13e   :  { %7754 = vmatpush3.bf16.msra.mxu1 %v8467_v40  ;;  %v1481_v40 = vrot.slane %v1459_v36, %v8904_v41  ;;  %v8538_v29 = vld [vmem:[%s10728_s1 + $0xc40] sm:$0xff]   ;;  %v8544_v36 = vld [vmem:[%s10728_s1 + $0xc08] sm:$0xff]  }
 0x13f   :  { %7755 = vmatprep.subr.bf16.mxu1 %v8469_v48  ;;  %v1488_v48 = vrot.slane %v1460_v44, %v8904_v41  ;;  %v8551_v44 = vld [vmem:[%s10728_s1 + $0xcd8] sm:$0xff]  }
 0x140   :  { %7734 = vmatpush3.bf16.msra.mxu0 %v8470_v50  ;;  %v1491_v46 = vcombine.high %v1481_v40, %v1481_v40  ;;  %v1489_v50 = vcombine.high %v1467_v42, %v1467_v42 }
 0x141   :  { %7763 = vmatprep.subr.bf16.mxu0 %v8473_v54  ;;  %v8511_v54 = vld [vmem:[%s10728_s1 + $0xb08] sm:$0xff]  }
 0x142   :  { %7756 = vmatpush3.bf16.msra.mxu1 %v8471_v52  ;;  %v8510_v52 = vld [vmem:[%s10728_s1 + $0xbc8] sm:$0xff]  }
 0x143   :  { %5921 = vmatmul.mubr.bf16.vlgmr.msra.gmra.mrb[36].mxu0 %v1425_v53  ;;  %7785 = vmatprep.subr.bf16.mxu1 %v8474_v55  ;;  %v1492_v53 = vcombine.high %v1488_v48, %v1488_v48  ;;  %v8512_v55 = vld [vmem:[%s10728_s1 + $0xb88] sm:$0xff]  }
 0x144   :  { %7764 = vmatpush3.bf16.msra.mxu0 %v8475_v56  ;;  %6000 = vmatprep.mubr.bf16.mxu0 %v1481_v40  ;;  %v8513_v56 = vld [vmem:[%s10728_s1 + $0xb50] sm:$0xff]  }
 0x145   :  { %5961 = vmatmul.mubr.bf16.vlgmr.msra.gmra.mrb[36].mxu1 %v1441_v58  ;;  %7765 = vmatprep.subr.bf16.mxu0 %v8477_v59  ;;  %v8515_v58 = vld [vmem:[%s10728_s1 + $0xb10] sm:$0xff]  }
 0x146   :  { %7786 = vmatpush3.bf16.msra.mxu1 %v8476_v57  ;;  %6040 = vmatprep.mubr.bf16.mxu1 %v1491_v46  ;;  %v8514_v57 = vld [vmem:[%s10728_s1 + $0xbd0] sm:$0xff]   ;;  %v8553_v46 = vld [vmem:[%s10728_s1 + $0xc98] sm:$0xff]  }
 0x147   :  { %7787 = vmatprep.subr.bf16.mxu1 %v8478_v60  ;;  %v8516_v59 = vld [vmem:[%s10728_s1 + $0xb90] sm:$0xff]   ;;  %v8517_v60 = vld [vmem:[%s10728_s1 + $0xb58] sm:$0xff]  }
 0x148   :  { %7766 = vmatpush3.bf16.msra.mxu0 %v8479_v61  ;;  %v8518_v61 = vld [vmem:[%s10728_s1 + $0xbd8] sm:$0xff]   ;;  %v8548_v40 = vld [vmem:[%s10728_s1 + $0xc10] sm:$0xff]  }
 0x149   :  { %7767 = vmatprep.subr.bf16.mxu0 %v8481_v63  ;;  %v8520_v63 = vld [vmem:[%s10728_s1 + $0xb98] sm:$0xff]  }
 0x14a   :  { %7788 = vmatpush3.bf16.msra.mxu1 %v8480_v62  ;;  %v8519_v62 = vld [vmem:[%s10728_s1 + $0xb18] sm:$0xff]  }
 0x14b   :  { %7789 = vmatprep.subr.bf16.mxu1 %v8482_v0  ;;  %v8521_v0 = vld [vmem:[%s10728_s1 + $0xb60] sm:$0xff]  }
 0x14c   :  { %7768 = vmatpush3.bf16.msra.mxu0 %v8483_v1  ;;  %v8522_v1 = vld [vmem:[%s10728_s1 + $0xbe0] sm:$0xff]  }
 0x14d   :  { %7769 = vmatprep.subr.bf16.mxu0 %v8485_v3  ;;  %v8524_v3 = vld [vmem:[%s10728_s1 + $0xba0] sm:$0xff]  }
 0x14e   :  { %7790 = vmatpush3.bf16.msra.mxu1 %v8484_v2  ;;  %v8523_v2 = vld [vmem:[%s10728_s1 + $0xb20] sm:$0xff]  }
 0x14f   :  { %7791 = vmatprep.subr.bf16.mxu1 %v8486_v4  ;;  %v8525_v4 = vld [vmem:[%s10728_s1 + $0xb68] sm:$0xff]  }
 0x150   :  { %7770 = vmatpush3.bf16.msra.mxu0 %v8487_v5  ;;  %v8526_v5 = vld [vmem:[%s10728_s1 + $0xbe8] sm:$0xff]  }
 0x151   :  { %7771 = vmatprep.subr.bf16.mxu0 %v8489_v7  ;;  %v8528_v7 = vld [vmem:[%s10728_s1 + $0xba8] sm:$0xff]  }
 0x152   :  { %7792 = vmatpush3.bf16.msra.mxu1 %v8488_v6  ;;  %v8527_v6 = vld [vmem:[%s10728_s1 + $0xb28] sm:$0xff]  }
 0x153   :  { %7793 = vmatprep.subr.bf16.mxu1 %v8490_v8  ;;  %v8529_v8 = vld [vmem:[%s10728_s1 + $0xb70] sm:$0xff]  }
 0x154   :  { %7772 = vmatpush3.bf16.msra.mxu0 %v8491_v9 }
 0x155   :  { %7773 = vmatprep.subr.bf16.mxu0 %v8493_v11 }
 0x156   :  { %7794 = vmatpush3.bf16.msra.mxu1 %v8492_v10  ;;  %v7471_v16 = vpop.f32.mrb[12].mxu0  ;;  %v8530_v10 = vld [vmem:[%s10728_s1 + $0xbf0] sm:$0xff]  }
 0x157   :  { %v7472_v18 = vpop.f32.mrb[13].mxu0  ;;  %7795 = vmatprep.subr.bf16.mxu1 %v8494_v12  ;;  %v8531_v12 = vld [vmem:[%s10728_s1 + $0xb30] sm:$0xff]  }
 0x158   :  { %v7493_v20 = vpop.f32.mrb[12].mxu1  ;;  %v7473_v21 = vadd.f32 %v7472_v18, %v7471_v16  ;;  %v7474_v22 = vpop.f32.mrb[14].mxu0  ;;  %7774 = vmatpush3.bf16.msra.mxu0 %v8495_v13  ;;  %v8532_v16 = vld [vmem:[%s10728_s1 + $0xbb0] sm:$0xff]  }
 0x159   :  { %v7494_v26 = vpop.f32.mrb[13].mxu1  ;;  %v7475_v27 = vpop.f32.mrb[15].mxu0  ;;  %7775 = vmatprep.subr.bf16.mxu0 %v8497_v15 }
 0x15a   :  { %v5443_v30 = vadd.f32 %v7473_v21, %v9835_v51  ;;  %v7495_v31 = vadd.f32 %v7494_v26, %v7493_v20  ;;  %v7496_v32 = vpop.f32.mrb[14].mxu1  ;;  %7796 = vmatpush3.bf16.msra.mxu1 %v8496_v14  ;;  %v8509_v51 = vld [vmem:[%s10728_s1 + $0xb48] sm:$0xff]   ;;  %v8536_v27 = vld [vmem:[%s10728_s1 + $0xbb8] sm:$0xff]  }
 0x15b   :  { %v7497_v34 = vpop.f32.mrb[15].mxu1  ;;  %7797 = vmatprep.subr.bf16.mxu1 %v8498_v17  ;;  %v8533_v17 = vld [vmem:[%s10728_s1 + $0xb78] sm:$0xff]   ;;  %v8541_v32 = vld [vmem:[%s10728_s1 + $0xc80] sm:$0xff]  }
 0x15c   :  { %v9943_v38 = vadd.f32 %v7495_v31, %v5443_v30  ;;  %7776 = vmatpush3.bf16.msra.mxu0 %v8499_v19  ;;  %v8539_v30 = vld [vmem:[%s10728_s1 + $0xcc0] sm:$0xff]   ;;  %v8542_v34 = vld [vmem:[%s10728_s1 + $0xc48] sm:$0xff]  }
 0x15d   :  { %7777 = vmatprep.subr.bf16.mxu0 %v8501_v24  ;;  %v8540_v31 = vld [vmem:[%s10728_s1 + $0xc00] sm:$0xff]  }
 0x15e   :  { %7798 = vmatpush3.bf16.msra.mxu1 %v8500_v23  ;;  %v8534_v23 = vld [vmem:[%s10728_s1 + $0xbf8] sm:$0xff]  }
 0x15f   :  { %7799 = vmatprep.subr.bf16.mxu1 %v8502_v33  ;;  %v1490_v33 = vcombine.high %v1474_v28, %v1474_v28 }
 0x160   :  { %7778 = vmatpush3.bf16.msra.mxu0 %v8503_v35  ;;  %v8543_v35 = vld [vmem:[%s10728_s1 + $0xcc8] sm:$0xff]  }
 0x161   :  { %7807 = vmatprep.subr.bf16.mxu0 %v8505_v43  ;;  %v8550_v43 = vld [vmem:[%s10728_s1 + $0xc58] sm:$0xff]  }
 0x162   :  { %7800 = vmatpush3.bf16.msra.mxu1 %v8504_v39  ;;  %v8547_v39 = vld [vmem:[%s10728_s1 + $0xcd0] sm:$0xff]  }
 0x163   :  { %6001 = vmatmul.mubr.bf16.vlgmr.msra.gmra.mrb[40].mxu0 %v1467_v42  ;;  %7829 = vmatprep.subr.bf16.mxu1 %v8506_v45  ;;  %v8549_v42 = vld [vmem:[%s10728_s1 + $0xc90] sm:$0xff]   ;;  %v8552_v45 = vld [vmem:[%s10728_s1 + $0xc18] sm:$0xff]  }
 0x164   :  { %7808 = vmatpush3.bf16.msra.mxu0 %v8507_v47  ;;  %6080 = vmatprep.mubr.bf16.mxu0 %v1488_v48  ;;  %v8554_v47 = vld [vmem:[%s10728_s1 + $0xc60] sm:$0xff]  }
 0x165   :  { %6041 = vmatmul.mubr.bf16.vlgmr.msra.gmra.mrb[40].mxu1 %v1489_v50  ;;  %7809 = vmatprep.subr.bf16.mxu0 %v8509_v51  ;;  %v8555_v48 = vld [vmem:[%s10728_s1 + $0xce0] sm:$0xff]   ;;  %v8558_v51 = vld [vmem:[%s10728_s1 + $0xc68] sm:$0xff]  }
 0x166   :  { %7830 = vmatpush3.bf16.msra.mxu1 %v8508_v49  ;;  %6120 = vmatprep.mubr.bf16.mxu1 %v1492_v53  ;;  %v8556_v49 = vld [vmem:[%s10728_s1 + $0xc20] sm:$0xff]   ;;  %v8560_v53 = vld [vmem:[%s10728_s1 + $0xc28] sm:$0xff]  }
 0x167   :  { %7831 = vmatprep.subr.bf16.mxu1 %v8510_v52  ;;  %v8557_v50 = vld [vmem:[%s10728_s1 + $0xca0] sm:$0xff]   ;;  %v8559_v52 = vld [vmem:[%s10728_s1 + $0xce8] sm:$0xff]  }
 0x168   :  { %7810 = vmatpush3.bf16.msra.mxu0 %v8511_v54  ;;  %v8561_v54 = vld [vmem:[%s10728_s1 + $0xca8] sm:$0xff]  }
 0x169   :  { %7811 = vmatprep.subr.bf16.mxu0 %v8513_v56 }
 0x16a   :  { %7832 = vmatpush3.bf16.msra.mxu1 %v8512_v55  ;;  %v8562_v55 = vld [vmem:[%s10728_s1 + $0xc70] sm:$0xff]  }
 0x16b   :  { %7833 = vmatprep.subr.bf16.mxu1 %v8514_v57  ;;  %v8563_v57 = vld [vmem:[%s10728_s1 + $0xcf0] sm:$0xff]  }
 0x16c   :  { %7812 = vmatpush3.bf16.msra.mxu0 %v8515_v58 }
 0x16d   :  { %7813 = vmatprep.subr.bf16.mxu0 %v8517_v60 }
 0x16e   :  { %7834 = vmatpush3.bf16.msra.mxu1 %v8516_v59  ;;  %v8564_v59 = vld [vmem:[%s10728_s1 + $0xc30] sm:$0xff]  }
 0x16f   :  { %7835 = vmatprep.subr.bf16.mxu1 %v8518_v61 }
 0x170   :  { %7814 = vmatpush3.bf16.msra.mxu0 %v8519_v62 }
 0x171   :  { %7815 = vmatprep.subr.bf16.mxu0 %v8521_v0 }
 0x172   :  { %7836 = vmatpush3.bf16.msra.mxu1 %v8520_v63  ;;  %v8565_v63 = vld [vmem:[%s10728_s1 + $0xcb0] sm:$0xff]  }
 0x173   :  { %7837 = vmatprep.subr.bf16.mxu1 %v8522_v1 }
 0x174   :  { %7816 = vmatpush3.bf16.msra.mxu0 %v8523_v2  ;;  %v8566_v2 = vld [vmem:[%s10728_s1 + $0xc78] sm:$0xff]  }
 0x175   :  { %7817 = vmatprep.subr.bf16.mxu0 %v8525_v4 }
 0x176   :  { %7838 = vmatpush3.bf16.msra.mxu1 %v8524_v3  ;;  %v7515_v9 = vpop.f32.mrb[16].mxu0  ;;  %v28_v3 = vld [vmem:[%s10727_s0 + $0x30] sm:$0xff] }
 0x177   :  { %v7516_v11 = vpop.f32.mrb[17].mxu0  ;;  %7839 = vmatprep.subr.bf16.mxu1 %v8526_v5 }
 0x178   :  { %v7537_v13 = vpop.f32.mrb[16].mxu1  ;;  %v7517_v14 = vadd.f32 %v7516_v11, %v7515_v9  ;;  %v7518_v15 = vpop.f32.mrb[18].mxu0  ;;  %7818 = vmatpush3.bf16.msra.mxu0 %v8527_v6  ;;  %v1493_v9 = vcombine.high %v28_v3, %v28_v3  ;;  %v8568_v11 = vld [vmem:[%s10728_s1 + $0xc38] sm:$0xff]  }
 0x179   :  { %v7538_v18 = vpop.f32.mrb[17].mxu1  ;;  %v7519_v19 = vpop.f32.mrb[19].mxu0  ;;  %7819 = vmatprep.subr.bf16.mxu0 %v8529_v8  ;;  %v1500_v8 = vrot.slane %v28_v3, %v8904_v41  ;;  %v8601_v3 = vld [vmem:[%s10728_s1 + $0xdb8] sm:$0xff]  }
 0x17a   :  { %v5523_v20 = vadd.f32 %v7517_v14, %v9943_v38  ;;  %v7539_v21 = vadd.f32 %v7538_v18, %v7537_v13  ;;  %v7540_v22 = vpop.f32.mrb[18].mxu1  ;;  %7840 = vmatpush3.bf16.msra.mxu1 %v8528_v7  ;;  %v8546_v38 = vld [vmem:[%s10728_s1 + $0xc50] sm:$0xff]   ;;  %v8567_v7 = vld [vmem:[%s10728_s1 + $0xcf8] sm:$0xff]   ;;  %v10158_v15 = vrot.slane %v1493_v9, %v8904_v41  ;;  %v8571_v19 = vld [vmem:[%s10728_s1 + $0xdc0] sm:$0xff]  }
 0x17b   :  { %v7541_v24 = vpop.f32.mrb[19].mxu1  ;;  %7841 = vmatprep.subr.bf16.mxu1 %v8530_v10  ;;  %v8569_v13 = vld [vmem:[%s10728_s1 + $0xcb8] sm:$0xff]   ;;  %v1508_v14 = vcombine.high %v1500_v8, %v1500_v8 }
 0x17c   :  { %v10047_v26 = vadd.f32 %v7539_v21, %v5523_v20  ;;  %7820 = vmatpush3.bf16.msra.mxu0 %v8531_v12  ;;  %v1509_v20 = vcombine.high %v10158_v15, %v10158_v15  ;;  %v8572_v21 = vld [vmem:[%s10728_s1 + $0xd00] sm:$0xff]  }
 0x17d   :  { %7821 = vmatprep.subr.bf16.mxu0 %v8533_v17  ;;  %v8570_v17 = vld [vmem:[%s10728_s1 + $0xd40] sm:$0xff]   ;;  %v1530_v18 = vrot.slane %v1508_v14, %v8904_v41  ;;  %v8611_v14 = vld [vmem:[%s10728_s1 + $0xe50] sm:$0xff]  }
 0x17e   :  { %7842 = vmatpush3.bf16.msra.mxu1 %v8532_v16  ;;  %v1516_v16 = vrot.slane %v1500_v8, %v8904_v41  ;;  %v1537_v24 = vrot.slane %v1509_v20, %v8904_v41  ;;  %v8606_v8 = vld [vmem:[%s10728_s1 + $0xe80] sm:$0xff]   ;;  %v8617_v20 = vld [vmem:[%s10728_s1 + $0xe18] sm:$0xff]  }
 0x17f   :  { %7843 = vmatprep.subr.bf16.mxu1 %v8534_v23  ;;  %v1540_v22 = vcombine.high %v1530_v18, %v1530_v18  ;;  %v8573_v23 = vld [vmem:[%s10728_s1 + $0xd80] sm:$0xff]  }
 0x180   :  { %7822 = vmatpush3.bf16.msra.mxu0 %v8535_v25  ;;  %v1538_v25 = vcombine.high %v1516_v16, %v1516_v16 }
 0x181   :  { %7851 = vmatprep.subr.bf16.mxu0 %v8538_v29  ;;  %v8576_v29 = vld [vmem:[%s10728_s1 + $0xd08] sm:$0xff]  }
 0x182   :  { %7844 = vmatpush3.bf16.msra.mxu1 %v8536_v27  ;;  %v8575_v27 = vld [vmem:[%s10728_s1 + $0xdc8] sm:$0xff]  }
 0x183   :  { %6081 = vmatmul.mubr.bf16.vlgmr.msra.gmra.mrb[44].mxu0 %v1474_v28  ;;  %7873 = vmatprep.subr.bf16.mxu1 %v8539_v30  ;;  %v1541_v28 = vcombine.high %v1537_v24, %v1537_v24  ;;  %v8577_v30 = vld [vmem:[%s10728_s1 + $0xd88] sm:$0xff]  }
 0x184   :  { %7852 = vmatpush3.bf16.msra.mxu0 %v8540_v31  ;;  %6160 = vmatprep.mubr.bf16.mxu0 %v1530_v18  ;;  %v8578_v31 = vld [vmem:[%s10728_s1 + $0xd50] sm:$0xff]   ;;  %v8615_v18 = vld [vmem:[%s10728_s1 + $0xe58] sm:$0xff]  }
 0x185   :  { %6121 = vmatmul.mubr.bf16.vlgmr.msra.gmra.mrb[44].mxu1 %v1490_v33  ;;  %7853 = vmatprep.subr.bf16.mxu0 %v8542_v34  ;;  %v8580_v33 = vld [vmem:[%s10728_s1 + $0xd10] sm:$0xff]  }
 0x186   :  { %7874 = vmatpush3.bf16.msra.mxu1 %v8541_v32  ;;  %6200 = vmatprep.mubr.bf16.mxu1 %v1540_v22  ;;  %v8579_v32 = vld [vmem:[%s10728_s1 + $0xdd0] sm:$0xff]   ;;  %v8619_v22 = vld [vmem:[%s10728_s1 + $0xe60] sm:$0xff]  }
 0x187   :  { %7875 = vmatprep.subr.bf16.mxu1 %v8543_v35  ;;  %v8581_v34 = vld [vmem:[%s10728_s1 + $0xd90] sm:$0xff]   ;;  %v8582_v35 = vld [vmem:[%s10728_s1 + $0xd58] sm:$0xff]  }
 0x188   :  { %7854 = vmatpush3.bf16.msra.mxu0 %v8544_v36  ;;  %v8583_v36 = vld [vmem:[%s10728_s1 + $0xdd8] sm:$0xff]  }
 0x189   :  { %7855 = vmatprep.subr.bf16.mxu0 %v8546_v38  ;;  %v8585_v38 = vld [vmem:[%s10728_s1 + $0xd98] sm:$0xff]  }
 0x18a   :  { %7876 = vmatpush3.bf16.msra.mxu1 %v8545_v37  ;;  %v8584_v37 = vld [vmem:[%s10728_s1 + $0xd18] sm:$0xff]  }
 0x18b   :  { %7877 = vmatprep.subr.bf16.mxu1 %v8547_v39  ;;  %v8586_v39 = vld [vmem:[%s10728_s1 + $0xd60] sm:$0xff]  }
 0x18c   :  { %7856 = vmatpush3.bf16.msra.mxu0 %v8548_v40  ;;  %v8587_v40 = vld [vmem:[%s10728_s1 + $0xde0] sm:$0xff]  }
 0x18d   :  { %7857 = vmatprep.subr.bf16.mxu0 %v8550_v43  ;;  %v8589_v43 = vld [vmem:[%s10728_s1 + $0xda0] sm:$0xff]  }
 0x18e   :  { %7878 = vmatpush3.bf16.msra.mxu1 %v8549_v42  ;;  %v8588_v42 = vld [vmem:[%s10728_s1 + $0xd20] sm:$0xff]  }
 0x18f   :  { %7879 = vmatprep.subr.bf16.mxu1 %v8551_v44  ;;  %v8590_v44 = vld [vmem:[%s10728_s1 + $0xd68] sm:$0xff]  }
 0x190   :  { %7858 = vmatpush3.bf16.msra.mxu0 %v8552_v45  ;;  %v8591_v45 = vld [vmem:[%s10728_s1 + $0xde8] sm:$0xff]  }
 0x191   :  { %7859 = vmatprep.subr.bf16.mxu0 %v8554_v47  ;;  %v8593_v47 = vld [vmem:[%s10728_s1 + $0xda8] sm:$0xff]  }
 0x192   :  { %7880 = vmatpush3.bf16.msra.mxu1 %v8553_v46  ;;  %v8592_v46 = vld [vmem:[%s10728_s1 + $0xd28] sm:$0xff]  }
 0x193   :  { %7881 = vmatprep.subr.bf16.mxu1 %v8555_v48  ;;  %v8594_v48 = vld [vmem:[%s10728_s1 + $0xd70] sm:$0xff]  }
 0x194   :  { %7860 = vmatpush3.bf16.msra.mxu0 %v8556_v49 }
 0x195   :  { %7861 = vmatprep.subr.bf16.mxu0 %v8558_v51 }
 0x196   :  { %7882 = vmatpush3.bf16.msra.mxu1 %v8557_v50  ;;  %v7559_v56 = vpop.f32.mrb[20].mxu0  ;;  %v8595_v50 = vld [vmem:[%s10728_s1 + $0xdf0] sm:$0xff]  }
 0x197   :  { %v7560_v58 = vpop.f32.mrb[21].mxu0  ;;  %7883 = vmatprep.subr.bf16.mxu1 %v8559_v52  ;;  %v8596_v52 = vld [vmem:[%s10728_s1 + $0xd30] sm:$0xff]  }
 0x198   :  { %v7581_v60 = vpop.f32.mrb[20].mxu1  ;;  %v7561_v61 = vadd.f32 %v7560_v58, %v7559_v56  ;;  %v7562_v62 = vpop.f32.mrb[22].mxu0  ;;  %7862 = vmatpush3.bf16.msra.mxu0 %v8560_v53  ;;  %v8597_v56 = vld [vmem:[%s10728_s1 + $0xdb0] sm:$0xff]  }
 0x199   :  { %v7582_v0 = vpop.f32.mrb[21].mxu1  ;;  %v7563_v1 = vpop.f32.mrb[23].mxu0  ;;  %7863 = vmatprep.subr.bf16.mxu0 %v8562_v55 }
 0x19a   :  { %v5603_v4 = vadd.f32 %v7561_v61, %v10047_v26  ;;  %v7583_v5 = vadd.f32 %v7582_v0, %v7581_v60  ;;  %v7584_v6 = vpop.f32.mrb[22].mxu1  ;;  %7884 = vmatpush3.bf16.msra.mxu1 %v8561_v54  ;;  %v8574_v26 = vld [vmem:[%s10728_s1 + $0xd48] sm:$0xff]   ;;  %v8600_v1 = vld [vmem:[%s10728_s1 + $0xd38] sm:$0xff]  }
 0x19b   :  { %v7585_v10 = vpop.f32.mrb[23].mxu1  ;;  %7885 = vmatprep.subr.bf16.mxu1 %v8563_v57  ;;  %v8598_v57 = vld [vmem:[%s10728_s1 + $0xd78] sm:$0xff]   ;;  %v8604_v6 = vld [vmem:[%s10728_s1 + $0xec0] sm:$0xff]  }
 0x19c   :  { %v10152_v12 = vadd.f32 %v7583_v5, %v5603_v4  ;;  %7864 = vmatpush3.bf16.msra.mxu0 %v8564_v59  ;;  %v1523_v4 = vrot.slane %v10158_v15, %v8904_v41  ;;  %v8603_v5 = vld [vmem:[%s10728_s1 + $0xe40] sm:$0xff]   ;;  %v8607_v10 = vld [vmem:[%s10728_s1 + $0xe48] sm:$0xff]   ;;  %v8612_v15 = vld [vmem:[%s10728_s1 + $0xed0] sm:$0xff]  }
 0x19d   :  { %7865 = vmatprep.subr.bf16.mxu0 %v8566_v2 }
 0x19e   :  { %7886 = vmatpush3.bf16.msra.mxu1 %v8565_v63  ;;  %v8599_v63 = vld [vmem:[%s10728_s1 + $0xdf8] sm:$0xff]   ;;  %v1539_v9 = vcombine.high %v1523_v4, %v1523_v4 }
 0x19f   :  { %7887 = vmatprep.subr.bf16.mxu1 %v8567_v7  ;;  %v8605_v7 = vld [vmem:[%s10728_s1 + $0xe00] sm:$0xff]  }
 0x1a0   :  { %7866 = vmatpush3.bf16.msra.mxu0 %v8568_v11  ;;  %v8608_v11 = vld [vmem:[%s10728_s1 + $0xec8] sm:$0xff]  }
 0x1a1   :  { %7895 = vmatprep.subr.bf16.mxu0 %v8570_v17  ;;  %v8614_v17 = vld [vmem:[%s10728_s1 + $0xe90] sm:$0xff]  }
 0x1a2   :  { %7888 = vmatpush3.bf16.msra.mxu1 %v8569_v13  ;;  %v8610_v13 = vld [vmem:[%s10728_s1 + $0xe88] sm:$0xff]  }
 0x1a3   :  { %6161 = vmatmul.mubr.bf16.vlgmr.msra.gmra.mrb[48].mxu0 %v1516_v16  ;;  %7917 = vmatprep.subr.bf16.mxu1 %v8571_v19  ;;  %v8613_v16 = vld [vmem:[%s10728_s1 + $0xe10] sm:$0xff]   ;;  %v8616_v19 = vld [vmem:[%s10728_s1 + $0xed8] sm:$0xff]  }
 0x1a4   :  { %7896 = vmatpush3.bf16.msra.mxu0 %v8572_v21  ;;  %6240 = vmatprep.mubr.bf16.mxu0 %v1537_v24  ;;  %v8618_v21 = vld [vmem:[%s10728_s1 + $0xe98] sm:$0xff]   ;;  %v8621_v24 = vld [vmem:[%s10728_s1 + $0xe20] sm:$0xff]  }
 0x1a5   :  { %6201 = vmatmul.mubr.bf16.vlgmr.msra.gmra.mrb[48].mxu1 %v1538_v25  ;;  %7897 = vmatprep.subr.bf16.mxu0 %v8574_v26  ;;  %v8622_v25 = vld [vmem:[%s10728_s1 + $0xea0] sm:$0xff]   ;;  %v8623_v26 = vld [vmem:[%s10728_s1 + $0xe68] sm:$0xff]  }
 0x1a6   :  { %7918 = vmatpush3.bf16.msra.mxu1 %v8573_v23  ;;  %6280 = vmatprep.mubr.bf16.mxu1 %v1541_v28  ;;  %v8620_v23 = vld [vmem:[%s10728_s1 + $0xee0] sm:$0xff]   ;;  %v8625_v28 = vld [vmem:[%s10728_s1 + $0xe28] sm:$0xff]  }
 0x1a7   :  { %7919 = vmatprep.subr.bf16.mxu1 %v8575_v27  ;;  %v8624_v27 = vld [vmem:[%s10728_s1 + $0xee8] sm:$0xff]  }
 0x1a8   :  { %7898 = vmatpush3.bf16.msra.mxu0 %v8576_v29  ;;  %v8626_v29 = vld [vmem:[%s10728_s1 + $0xea8] sm:$0xff]  }
 0x1a9   :  { %7899 = vmatprep.subr.bf16.mxu0 %v8578_v31 }
 0x1aa   :  { %7920 = vmatpush3.bf16.msra.mxu1 %v8577_v30  ;;  %v8627_v30 = vld [vmem:[%s10728_s1 + $0xe70] sm:$0xff]  }
 0x1ab   :  { %7921 = vmatprep.subr.bf16.mxu1 %v8579_v32  ;;  %v8628_v32 = vld [vmem:[%s10728_s1 + $0xef0] sm:$0xff]  }
 0x1ac   :  { %7900 = vmatpush3.bf16.msra.mxu0 %v8580_v33 }
 0x1ad   :  { %7901 = vmatprep.subr.bf16.mxu0 %v8582_v35 }
 0x1ae   :  { %7922 = vmatpush3.bf16.msra.mxu1 %v8581_v34  ;;  %v8629_v34 = vld [vmem:[%s10728_s1 + $0xe30] sm:$0xff]  }
 0x1af   :  { %7923 = vmatprep.subr.bf16.mxu1 %v8583_v36 }
 0x1b0   :  { %7902 = vmatpush3.bf16.msra.mxu0 %v8584_v37 }
 0x1b1   :  { %7903 = vmatprep.subr.bf16.mxu0 %v8586_v39 }
 0x1b2   :  { %7924 = vmatpush3.bf16.msra.mxu1 %v8585_v38  ;;  %v8630_v38 = vld [vmem:[%s10728_s1 + $0xeb0] sm:$0xff]  }
 0x1b3   :  { %7925 = vmatprep.subr.bf16.mxu1 %v8587_v40 }
 0x1b4   :  { %7904 = vmatpush3.bf16.msra.mxu0 %v8588_v42  ;;  %v8631_v42 = vld [vmem:[%s10728_s1 + $0xe78] sm:$0xff]  }
 0x1b5   :  { %7905 = vmatprep.subr.bf16.mxu0 %v8590_v44 }
 0x1b6   :  { %7926 = vmatpush3.bf16.msra.mxu1 %v8589_v43  ;;  %v7603_v49 = vpop.f32.mrb[24].mxu0  ;;  %v8632_v43 = vld [vmem:[%s10728_s1 + $0xef8] sm:$0xff]  }
 0x1b7   :  { %v7604_v51 = vpop.f32.mrb[25].mxu0  ;;  %7927 = vmatprep.subr.bf16.mxu1 %v8591_v45 }
 0x1b8   :  { %v7625_v53 = vpop.f32.mrb[24].mxu1  ;;  %v7605_v54 = vadd.f32 %v7604_v51, %v7603_v49  ;;  %v7606_v55 = vpop.f32.mrb[26].mxu0  ;;  %7906 = vmatpush3.bf16.msra.mxu0 %v8592_v46  ;;  %v8633_v49 = vld [vmem:[%s10728_s1 + $0xe38] sm:$0xff]  }
 0x1b9   :  { %v7626_v58 = vpop.f32.mrb[25].mxu1  ;;  %v7607_v59 = vpop.f32.mrb[27].mxu0  ;;  %7907 = vmatprep.subr.bf16.mxu0 %v8594_v48 }
 0x1ba   :  { %v5683_v60 = vadd.f32 %v7605_v54, %v10152_v12  ;;  %v7627_v61 = vadd.f32 %v7626_v58, %v7625_v53  ;;  %v7628_v62 = vpop.f32.mrb[26].mxu1  ;;  %7928 = vmatpush3.bf16.msra.mxu1 %v8593_v47  ;;  %v8609_v12 = vld [vmem:[%s10728_s1 + $0xe08] sm:$0xff]   ;;  %v29_v47 = vld [vmem:[%s10727_s0 + $0x38] sm:$0xff]  ;;  %v8636_v58 = vld [vmem:[%s10728_s1 + $0xfc0] sm:$0xff]  }
 0x1bb   :  { %v7629_v0 = vpop.f32.mrb[27].mxu1  ;;  %7929 = vmatprep.subr.bf16.mxu1 %v8595_v50  ;;  %v1549_v50 = vrot.slane %v29_v47, %v8904_v41  ;;  %v1542_v51 = vcombine.high %v29_v47, %v29_v47  ;;  %v8634_v53 = vld [vmem:[%s10728_s1 + $0xeb8] sm:$0xff]   ;;  %v8638_v62 = vld [vmem:[%s10728_s1 + $0xf80] sm:$0xff]  }
 0x1bc   :  { %v10259_v2 = vadd.f32 %v7627_v61, %v5683_v60  ;;  %7908 = vmatpush3.bf16.msra.mxu0 %v8596_v52  ;;  %v8637_v60 = vld [vmem:[%s10728_s1 + $0xf00] sm:$0xff]  }
 0x1bd   :  { %7909 = vmatprep.subr.bf16.mxu0 %v8598_v57  ;;  %v1557_v54 = vcombine.high %v1549_v50, %v1549_v50  ;;  %v1565_v55 = vrot.slane %v1549_v50, %v8904_v41  ;;  %v10374_v57 = vrot.slane %v1542_v51, %v8904_v41  ;;  %v8670_v47 = vld [vmem:[%s10728_s1 + $0x1000] sm:$0xff]   ;;  %v8672_v50 = vld [vmem:[%s10728_s1 + $0x1048] sm:$0xff]  }
 0x1be   :  { %7930 = vmatpush3.bf16.msra.mxu1 %v8597_v56  ;;  %v8635_v56 = vld [vmem:[%s10728_s1 + $0xf40] sm:$0xff]   ;;  %v8673_v51 = vld [vmem:[%s10728_s1 + $0x10c8] sm:$0xff]  }
 0x1bf   :  { %7931 = vmatprep.subr.bf16.mxu1 %v8599_v63  ;;  %v1579_v59 = vrot.slane %v1557_v54, %v8904_v41  ;;  %v1558_v61 = vcombine.high %v10374_v57, %v10374_v57  ;;  %v1587_v0 = vcombine.high %v1565_v55, %v1565_v55  ;;  %v8676_v54 = vld [vmem:[%s10728_s1 + $0x1050] sm:$0xff]  }
 0x1c0   :  { %7910 = vmatpush3.bf16.msra.mxu0 %v8600_v1  ;;  %v8639_v1 = vld [vmem:[%s10728_s1 + $0xf48] sm:$0xff]  }
 0x1c1   :  { %7939 = vmatprep.subr.bf16.mxu0 %v8603_v5  ;;  %v1589_v63 = vcombine.high %v1579_v59, %v1579_v59 }
 0x1c2   :  { %7932 = vmatpush3.bf16.msra.mxu1 %v8601_v3  ;;  %v8640_v3 = vld [vmem:[%s10728_s1 + $0xfc8] sm:$0xff]  }
 0x1c3   :  { %6241 = vmatmul.mubr.bf16.vlgmr.msra.gmra.mrb[52].mxu0 %v1523_v4  ;;  %7961 = vmatprep.subr.bf16.mxu1 %v8604_v6  ;;  %v8641_v4 = vld [vmem:[%s10728_s1 + $0xf08] sm:$0xff]  }
 0x1c4   :  { %7940 = vmatpush3.bf16.msra.mxu0 %v8605_v7  ;;  %6320 = vmatprep.mubr.bf16.mxu0 %v1579_v59  ;;  %v8642_v6 = vld [vmem:[%s10728_s1 + $0xf88] sm:$0xff]   ;;  %v8643_v7 = vld [vmem:[%s10728_s1 + $0xf50] sm:$0xff]   ;;  %v8681_v59 = vld [vmem:[%s10728_s1 + $0x10d8] sm:$0xff]  }
 0x1c5   :  { %6281 = vmatmul.mubr.bf16.vlgmr.msra.gmra.mrb[52].mxu1 %v1539_v9  ;;  %7941 = vmatprep.subr.bf16.mxu0 %v8607_v10  ;;  %v8645_v9 = vld [vmem:[%s10728_s1 + $0xf10] sm:$0xff]  }
 0x1c6   :  { %7962 = vmatpush3.bf16.msra.mxu1 %v8606_v8  ;;  %6360 = vmatprep.mubr.bf16.mxu1 %v1589_v63  ;;  %v8644_v8 = vld [vmem:[%s10728_s1 + $0xfd0] sm:$0xff]   ;;  %v8685_v63 = vld [vmem:[%s10728_s1 + $0x10e0] sm:$0xff]  }
 0x1c7   :  { %7963 = vmatprep.subr.bf16.mxu1 %v8608_v11  ;;  %v8646_v10 = vld [vmem:[%s10728_s1 + $0xf90] sm:$0xff]   ;;  %v8647_v11 = vld [vmem:[%s10728_s1 + $0xf58] sm:$0xff]  }
 0x1c8   :  { %7942 = vmatpush3.bf16.msra.mxu0 %v8609_v12  ;;  %v8648_v12 = vld [vmem:[%s10728_s1 + $0xfd8] sm:$0xff]  }
 0x1c9   :  { %7943 = vmatprep.subr.bf16.mxu0 %v8611_v14  ;;  %v8650_v14 = vld [vmem:[%s10728_s1 + $0xf98] sm:$0xff]  }
 0x1ca   :  { %7964 = vmatpush3.bf16.msra.mxu1 %v8610_v13  ;;  %v8649_v13 = vld [vmem:[%s10728_s1 + $0xf18] sm:$0xff]  }
 0x1cb   :  { %7965 = vmatprep.subr.bf16.mxu1 %v8612_v15  ;;  %v8651_v15 = vld [vmem:[%s10728_s1 + $0xf60] sm:$0xff]  }
 0x1cc   :  { %7944 = vmatpush3.bf16.msra.mxu0 %v8613_v16  ;;  %v8652_v16 = vld [vmem:[%s10728_s1 + $0xfe0] sm:$0xff]  }
 0x1cd   :  { %7945 = vmatprep.subr.bf16.mxu0 %v8615_v18  ;;  %v8654_v18 = vld [vmem:[%s10728_s1 + $0xfa0] sm:$0xff]  }
 0x1ce   :  { %7966 = vmatpush3.bf16.msra.mxu1 %v8614_v17  ;;  %v8653_v17 = vld [vmem:[%s10728_s1 + $0xf20] sm:$0xff]  }
 0x1cf   :  { %7967 = vmatprep.subr.bf16.mxu1 %v8616_v19  ;;  %v8655_v19 = vld [vmem:[%s10728_s1 + $0xf68] sm:$0xff]  }
 0x1d0   :  { %7946 = vmatpush3.bf16.msra.mxu0 %v8617_v20  ;;  %v8656_v20 = vld [vmem:[%s10728_s1 + $0xfe8] sm:$0xff]  }
 0x1d1   :  { %7947 = vmatprep.subr.bf16.mxu0 %v8619_v22  ;;  %v8658_v22 = vld [vmem:[%s10728_s1 + $0xfa8] sm:$0xff]  }
 0x1d2   :  { %7968 = vmatpush3.bf16.msra.mxu1 %v8618_v21  ;;  %v8657_v21 = vld [vmem:[%s10728_s1 + $0xf28] sm:$0xff]  }
 0x1d3   :  { %7969 = vmatprep.subr.bf16.mxu1 %v8620_v23  ;;  %v8659_v23 = vld [vmem:[%s10728_s1 + $0xf70] sm:$0xff]  }
 0x1d4   :  { %7948 = vmatpush3.bf16.msra.mxu0 %v8621_v24 }
 0x1d5   :  { %7949 = vmatprep.subr.bf16.mxu0 %v8623_v26 }
 0x1d6   :  { %7970 = vmatpush3.bf16.msra.mxu1 %v8622_v25  ;;  %v7647_v31 = vpop.f32.mrb[28].mxu0  ;;  %v8660_v25 = vld [vmem:[%s10728_s1 + $0xff0] sm:$0xff]  }
 0x1d7   :  { %v7648_v33 = vpop.f32.mrb[29].mxu0  ;;  %7971 = vmatprep.subr.bf16.mxu1 %v8624_v27  ;;  %v8661_v27 = vld [vmem:[%s10728_s1 + $0xf30] sm:$0xff]  }
 0x1d8   :  { %v7669_v35 = vpop.f32.mrb[28].mxu1  ;;  %v7649_v36 = vadd.f32 %v7648_v33, %v7647_v31  ;;  %v7650_v37 = vpop.f32.mrb[30].mxu0  ;;  %7950 = vmatpush3.bf16.msra.mxu0 %v8625_v28  ;;  %v8662_v31 = vld [vmem:[%s10728_s1 + $0xfb0] sm:$0xff]  }
 0x1d9   :  { %v7670_v39 = vpop.f32.mrb[29].mxu1  ;;  %v7651_v40 = vpop.f32.mrb[31].mxu0  ;;  %7951 = vmatprep.subr.bf16.mxu0 %v8627_v30 }
 0x1da   :  { %v5763_v44 = vadd.f32 %v7649_v36, %v10259_v2  ;;  %v7671_v45 = vadd.f32 %v7670_v39, %v7669_v35  ;;  %v7672_v46 = vpop.f32.mrb[30].mxu1  ;;  %7972 = vmatpush3.bf16.msra.mxu1 %v8626_v29  ;;  %v1586_v2 = vrot.slane %v1558_v61, %v8904_v41  ;;  %v8665_v40 = vld [vmem:[%s10728_s1 + $0xf38] sm:$0xff]  }
 0x1db   :  { %v7673_v48 = vpop.f32.mrb[31].mxu1  ;;  %7973 = vmatprep.subr.bf16.mxu1 %v8628_v32  ;;  %v8663_v32 = vld [vmem:[%s10728_s1 + $0xf78] sm:$0xff]   ;;  %v8669_v46 = vld [vmem:[%s10728_s1 + $0x10c0] sm:$0xff]  }
 0x1dc   :  { %v10364_v52 = vadd.f32 %v7671_v45, %v5763_v44  ;;  %7952 = vmatpush3.bf16.msra.mxu0 %v8629_v34  ;;  %v1590_v5 = vcombine.high %v1586_v2, %v1586_v2  ;;  %v1572_v44 = vrot.slane %v10374_v57, %v8904_v41  ;;  %v8668_v45 = vld [vmem:[%s10728_s1 + $0x1040] sm:$0xff]   ;;  %v8679_v57 = vld [vmem:[%s10728_s1 + $0x1090] sm:$0xff]   ;;  %v8683_v61 = vld [vmem:[%s10728_s1 + $0x1098] sm:$0xff]  }
 0x1dd   :  { %7953 = vmatprep.subr.bf16.mxu0 %v8631_v42  ;;  %v8671_v48 = vld [vmem:[%s10728_s1 + $0x1080] sm:$0xff]  }
 0x1de   :  { %7974 = vmatpush3.bf16.msra.mxu1 %v8630_v38  ;;  %v8664_v38 = vld [vmem:[%s10728_s1 + $0xff8] sm:$0xff]  }
 0x1df   :  { %7975 = vmatprep.subr.bf16.mxu1 %v8632_v43  ;;  %v8666_v43 = vld [vmem:[%s10728_s1 + $0xfb8] sm:$0xff]  }
 0x1e0   :  { %7954 = vmatpush3.bf16.msra.mxu0 %v8633_v49  ;;  %v1588_v49 = vcombine.high %v1572_v44, %v1572_v44 }
 0x1e1   :  { %7983 = vmatprep.subr.bf16.mxu0 %v8635_v56  ;;  %v8678_v56 = vld [vmem:[%s10728_s1 + $0x1010] sm:$0xff]  }
 0x1e2   :  { %7976 = vmatpush3.bf16.msra.mxu1 %v8634_v53  ;;  %v8675_v53 = vld [vmem:[%s10728_s1 + $0x1088] sm:$0xff]  }
 0x1e3   :  { %6321 = vmatmul.mubr.bf16.vlgmr.msra.gmra.mrb[56].mxu0 %v1565_v55  ;;  %8005 = vmatprep.subr.bf16.mxu1 %v8636_v58  ;;  %v8677_v55 = vld [vmem:[%s10728_s1 + $0x10d0] sm:$0xff]   ;;  %v8680_v58 = vld [vmem:[%s10728_s1 + $0x1058] sm:$0xff]  }
 0x1e4   :  { %7984 = vmatpush3.bf16.msra.mxu0 %v8637_v60  ;;  %6400 = vmatprep.mubr.bf16.mxu0 %v1586_v2  ;;  %v8682_v60 = vld [vmem:[%s10728_s1 + $0x1018] sm:$0xff]   ;;  %v8688_v2 = vld [vmem:[%s10728_s1 + $0x1068] sm:$0xff]  }
 0x1e5   :  { %6361 = vmatmul.mubr.bf16.vlgmr.msra.gmra.mrb[56].mxu1 %v1587_v0  ;;  %7985 = vmatprep.subr.bf16.mxu0 %v8639_v1  ;;  %v8686_v0 = vld [vmem:[%s10728_s1 + $0x1020] sm:$0xff]  }
 0x1e6   :  { %8006 = vmatpush3.bf16.msra.mxu1 %v8638_v62  ;;  %6440 = vmatprep.mubr.bf16.mxu1 %v1590_v5  ;;  %v8684_v62 = vld [vmem:[%s10728_s1 + $0x1060] sm:$0xff]   ;;  %v8691_v5 = vld [vmem:[%s10728_s1 + $0x10a8] sm:$0xff]  }
 0x1e7   :  { %8007 = vmatprep.subr.bf16.mxu1 %v8640_v3  ;;  %v8687_v1 = vld [vmem:[%s10728_s1 + $0x10a0] sm:$0xff]   ;;  %v8689_v3 = vld [vmem:[%s10728_s1 + $0x10e8] sm:$0xff]  }
 0x1e8   :  { %7986 = vmatpush3.bf16.msra.mxu0 %v8641_v4  ;;  %v8690_v4 = vld [vmem:[%s10728_s1 + $0x1028] sm:$0xff]  }
 0x1e9   :  { %7987 = vmatprep.subr.bf16.mxu0 %v8643_v7 }
 0x1ea   :  { %8008 = vmatpush3.bf16.msra.mxu1 %v8642_v6  ;;  %v8692_v6 = vld [vmem:[%s10728_s1 + $0x1070] sm:$0xff]  }
 0x1eb   :  { %8009 = vmatprep.subr.bf16.mxu1 %v8644_v8  ;;  %v8693_v8 = vld [vmem:[%s10728_s1 + $0x10f0] sm:$0xff]  }
 0x1ec   :  { %7988 = vmatpush3.bf16.msra.mxu0 %v8645_v9 }
 0x1ed   :  { %7989 = vmatprep.subr.bf16.mxu0 %v8647_v11 }
 0x1ee   :  { %8010 = vmatpush3.bf16.msra.mxu1 %v8646_v10  ;;  %v8694_v10 = vld [vmem:[%s10728_s1 + $0x1030] sm:$0xff]  }
 0x1ef   :  { %8011 = vmatprep.subr.bf16.mxu1 %v8648_v12 }
 0x1f0   :  { %7990 = vmatpush3.bf16.msra.mxu0 %v8649_v13 }
 0x1f1   :  { %7991 = vmatprep.subr.bf16.mxu0 %v8651_v15 }
 0x1f2   :  { %8012 = vmatpush3.bf16.msra.mxu1 %v8650_v14  ;;  %v8695_v14 = vld [vmem:[%s10728_s1 + $0x10b0] sm:$0xff]  }
 0x1f3   :  { %8013 = vmatprep.subr.bf16.mxu1 %v8652_v16 }
 0x1f4   :  { %7992 = vmatpush3.bf16.msra.mxu0 %v8653_v17  ;;  %v8696_v17 = vld [vmem:[%s10728_s1 + $0x1078] sm:$0xff]  }
 0x1f5   :  { %7993 = vmatprep.subr.bf16.mxu0 %v8655_v19 }
 0x1f6   :  { %8014 = vmatpush3.bf16.msra.mxu1 %v8654_v18  ;;  %v7691_v24 = vpop.f32.mrb[32].mxu0  ;;  %v8697_v18 = vld [vmem:[%s10728_s1 + $0x10f8] sm:$0xff]  }
 0x1f7   :  { %v7692_v26 = vpop.f32.mrb[33].mxu0  ;;  %8015 = vmatprep.subr.bf16.mxu1 %v8656_v20 }
 0x1f8   :  { %v7713_v28 = vpop.f32.mrb[32].mxu1  ;;  %v7693_v29 = vadd.f32 %v7692_v26, %v7691_v24  ;;  %v7694_v30 = vpop.f32.mrb[34].mxu0  ;;  %7994 = vmatpush3.bf16.msra.mxu0 %v8657_v21  ;;  %v30_v24 = vld [vmem:[%s10727_s0 + $0x40] sm:$0xff]  ;;  %v8699_v26 = vld [vmem:[%s10728_s1 + $0x10b8] sm:$0xff]  }
 0x1f9   :  { %v7714_v33 = vpop.f32.mrb[33].mxu1  ;;  %v7695_v34 = vpop.f32.mrb[35].mxu0  ;;  %7995 = vmatprep.subr.bf16.mxu0 %v8659_v23 }
 0x1fa   :  { %v5843_v35 = vadd.f32 %v7693_v29, %v10364_v52  ;;  %v7715_v36 = vadd.f32 %v7714_v33, %v7713_v28  ;;  %v7716_v37 = vpop.f32.mrb[34].mxu1  ;;  %8016 = vmatpush3.bf16.msra.mxu1 %v8658_v22  ;;  %v8674_v52 = vld [vmem:[%s10728_s1 + $0x1008] sm:$0xff]   ;;  %v8698_v22 = vld [vmem:[%s10728_s1 + $0x1038] sm:$0xff]   ;;  %v1591_v28 = vcombine.high %v30_v24, %v30_v24  ;;  %v8700_v29 = vld [vmem:[%s10728_s1 + $0x1140] sm:$0xff]  }
 0x1fb   :  { %v7717_v39 = vpop.f32.mrb[35].mxu1  ;;  %8017 = vmatprep.subr.bf16.mxu1 %v8660_v25  ;;  %v8702_v34 = vld [vmem:[%s10728_s1 + $0x1100] sm:$0xff]  }
 0x1fc   :  { %v10471_v42 = vadd.f32 %v7715_v36, %v5843_v35  ;;  %7996 = vmatpush3.bf16.msra.mxu0 %v8661_v27  ;;  %v1598_v27 = vrot.slane %v30_v24, %v8904_v41  ;;  %v10589_v33 = vrot.slane %v1591_v28, %v8904_v41  ;;  %v8703_v36 = vld [vmem:[%s10728_s1 + $0x1180] sm:$0xff]   ;;  %v8704_v39 = vld [vmem:[%s10728_s1 + $0x1148] sm:$0xff]  }
 0x1fd   :  { %7997 = vmatprep.subr.bf16.mxu0 %v8663_v32  ;;  %v8701_v32 = vld [vmem:[%s10728_s1 + $0x11c0] sm:$0xff]  }
 0x1fe   :  { %8018 = vmatpush3.bf16.msra.mxu1 %v8662_v31  ;;  %v1606_v30 = vcombine.high %v1598_v27, %v1598_v27  ;;  %v1614_v31 = vrot.slane %v1598_v27, %v8904_v41  ;;  %v1607_v37 = vcombine.high %v10589_v33, %v10589_v33 }
 0x1ff   :  { %8019 = vmatprep.subr.bf16.mxu1 %v8664_v38 }
 0x200   :  { %7998 = vmatpush3.bf16.msra.mxu0 %v8665_v40  ;;  %v1628_v35 = vrot.slane %v1606_v30, %v8904_v41  ;;  %v1636_v38 = vcombine.high %v1614_v31, %v1614_v31 }
 0x201   :  { %8027 = vmatprep.subr.bf16.mxu0 %v8668_v45  ;;  %v8707_v45 = vld [vmem:[%s10728_s1 + $0x1188] sm:$0xff]  }
 0x202   :  { %8020 = vmatpush3.bf16.msra.mxu1 %v8666_v43  ;;  %v1638_v40 = vcombine.high %v1628_v35, %v1628_v35  ;;  %v1635_v43 = vrot.slane %v1607_v37, %v8904_v41 }
 0x203   :  { %6401 = vmatmul.mubr.bf16.vlgmr.msra.gmra.mrb[60].mxu0 %v1572_v44  ;;  %8049 = vmatprep.subr.bf16.mxu1 %v8669_v46  ;;  %v8706_v44 = vld [vmem:[%s10728_s1 + $0x1108] sm:$0xff]  }
 0x204   :  { %8028 = vmatpush3.bf16.msra.mxu0 %v8670_v47  ;;  %6480 = vmatprep.mubr.bf16.mxu0 %v1628_v35  ;;  %v1639_v46 = vcombine.high %v1635_v43, %v1635_v43  ;;  %v8708_v47 = vld [vmem:[%s10728_s1 + $0x1150] sm:$0xff]  }
 0x205   :  { %6441 = vmatmul.mubr.bf16.vlgmr.msra.gmra.mrb[60].mxu1 %v1588_v49  ;;  %8029 = vmatprep.subr.bf16.mxu0 %v8672_v50  ;;  %v8710_v49 = vld [vmem:[%s10728_s1 + $0x1110] sm:$0xff]  }
 0x206   :  { %8050 = vmatpush3.bf16.msra.mxu1 %v8671_v48  ;;  %6520 = vmatprep.mubr.bf16.mxu1 %v1638_v40  ;;  %v8709_v48 = vld [vmem:[%s10728_s1 + $0x11d0] sm:$0xff]  }
 0x207   :  { %8051 = vmatprep.subr.bf16.mxu1 %v8673_v51  ;;  %v8711_v50 = vld [vmem:[%s10728_s1 + $0x1190] sm:$0xff]   ;;  %v8712_v51 = vld [vmem:[%s10728_s1 + $0x1158] sm:$0xff]  }
 0x208   :  { %8030 = vmatpush3.bf16.msra.mxu0 %v8674_v52  ;;  %v8713_v52 = vld [vmem:[%s10728_s1 + $0x11d8] sm:$0xff]  }
 0x209   :  { %8031 = vmatprep.subr.bf16.mxu0 %v8676_v54  ;;  %v8715_v54 = vld [vmem:[%s10728_s1 + $0x1198] sm:$0xff]  }
 0x20a   :  { %8052 = vmatpush3.bf16.msra.mxu1 %v8675_v53  ;;  %v8714_v53 = vld [vmem:[%s10728_s1 + $0x1118] sm:$0xff]  }
 0x20b   :  { %8053 = vmatprep.subr.bf16.mxu1 %v8677_v55  ;;  %v8716_v55 = vld [vmem:[%s10728_s1 + $0x1160] sm:$0xff]  }
 0x20c   :  { %8032 = vmatpush3.bf16.msra.mxu0 %v8678_v56  ;;  %v8717_v56 = vld [vmem:[%s10728_s1 + $0x11e0] sm:$0xff]  }
 0x20d   :  { %8033 = vmatprep.subr.bf16.mxu0 %v8680_v58  ;;  %v8719_v58 = vld [vmem:[%s10728_s1 + $0x11a0] sm:$0xff]  }
 0x20e   :  { %8054 = vmatpush3.bf16.msra.mxu1 %v8679_v57  ;;  %v8718_v57 = vld [vmem:[%s10728_s1 + $0x1120] sm:$0xff]  }
 0x20f   :  { %8055 = vmatprep.subr.bf16.mxu1 %v8681_v59  ;;  %v8720_v59 = vld [vmem:[%s10728_s1 + $0x1168] sm:$0xff]  }
 0x210   :  { %8034 = vmatpush3.bf16.msra.mxu0 %v8682_v60  ;;  %v8721_v60 = vld [vmem:[%s10728_s1 + $0x11e8] sm:$0xff]  }
 0x211   :  { %8035 = vmatprep.subr.bf16.mxu0 %v8684_v62  ;;  %v8723_v62 = vld [vmem:[%s10728_s1 + $0x11a8] sm:$0xff]  }
 0x212   :  { %8056 = vmatpush3.bf16.msra.mxu1 %v8683_v61  ;;  %v8722_v61 = vld [vmem:[%s10728_s1 + $0x1128] sm:$0xff]  }
 0x213   :  { %8057 = vmatprep.subr.bf16.mxu1 %v8685_v63  ;;  %v8724_v63 = vld [vmem:[%s10728_s1 + $0x1170] sm:$0xff]  }
 0x214   :  { %8036 = vmatpush3.bf16.msra.mxu0 %v8686_v0 }
 0x215   :  { %8037 = vmatprep.subr.bf16.mxu0 %v8688_v2 }
 0x216   :  { %8058 = vmatpush3.bf16.msra.mxu1 %v8687_v1  ;;  %v7735_v7 = vpop.f32.mrb[36].mxu0  ;;  %v8725_v1 = vld [vmem:[%s10728_s1 + $0x11f0] sm:$0xff]  }
 0x217   :  { %v7736_v9 = vpop.f32.mrb[37].mxu0  ;;  %8059 = vmatprep.subr.bf16.mxu1 %v8689_v3  ;;  %v8726_v3 = vld [vmem:[%s10728_s1 + $0x1130] sm:$0xff]  }
 0x218   :  { %v7757_v11 = vpop.f32.mrb[36].mxu1  ;;  %v7737_v12 = vadd.f32 %v7736_v9, %v7735_v7  ;;  %v7738_v13 = vpop.f32.mrb[38].mxu0  ;;  %8038 = vmatpush3.bf16.msra.mxu0 %v8690_v4  ;;  %v8727_v7 = vld [vmem:[%s10728_s1 + $0x11b0] sm:$0xff]  }
 0x219   :  { %v7758_v15 = vpop.f32.mrb[37].mxu1  ;;  %v7739_v16 = vpop.f32.mrb[39].mxu0  ;;  %8039 = vmatprep.subr.bf16.mxu0 %v8692_v6 }
 0x21a   :  { %v5923_v19 = vadd.f32 %v7737_v12, %v10471_v42  ;;  %v7759_v20 = vadd.f32 %v7758_v15, %v7757_v11  ;;  %v7760_v21 = vpop.f32.mrb[38].mxu1  ;;  %8060 = vmatpush3.bf16.msra.mxu1 %v8691_v5  ;;  %v8705_v42 = vld [vmem:[%s10728_s1 + $0x11c8] sm:$0xff]   ;;  %v8730_v16 = vld [vmem:[%s10728_s1 + $0x1138] sm:$0xff]  }
 0x21b   :  { %v7761_v23 = vpop.f32.mrb[39].mxu1  ;;  %8061 = vmatprep.subr.bf16.mxu1 %v8693_v8  ;;  %v8728_v8 = vld [vmem:[%s10728_s1 + $0x1178] sm:$0xff]  }
 0x21c   :  { %v10575_v25 = vadd.f32 %v7759_v20, %v5923_v19  ;;  %8040 = vmatpush3.bf16.msra.mxu0 %v8694_v10  ;;  %v1621_v19 = vrot.slane %v10589_v33, %v8904_v41 }
 0x21d   :  { %8041 = vmatprep.subr.bf16.mxu0 %v8696_v17 }
 0x21e   :  { %8062 = vmatpush3.bf16.msra.mxu1 %v8695_v14  ;;  %v8729_v14 = vld [vmem:[%s10728_s1 + $0x11f8] sm:$0xff]   ;;  %v1637_v20 = vcombine.high %v1621_v19, %v1621_v19 }
 0x21f   :  { %8063 = vmatprep.subr.bf16.mxu1 %v8697_v18  ;;  %v8731_v18 = vld [vmem:[%s10728_s1 + $0x11b8] sm:$0xff]  }
 0x220   :  { %8042 = vmatpush3.bf16.msra.mxu0 %v8698_v22 }
 0x221   :  { %8071 = vmatprep.subr.bf16.mxu0 %v8700_v29 }
 0x222   :  { %8064 = vmatpush3.bf16.msra.mxu1 %v8699_v26 }
 0x223   :  { %6481 = vmatmul.mubr.bf16.vlgmr.msra.gmra.mrb[64].mxu0 %v1614_v31  ;;  %8093 = vmatprep.subr.bf16.mxu1 %v8701_v32 }
 0x224   :  { %8072 = vmatpush3.bf16.msra.mxu0 %v8702_v34  ;;  %6560 = vmatprep.mubr.bf16.mxu0 %v1635_v43 }
 0x225   :  { %6521 = vmatmul.mubr.bf16.vlgmr.msra.gmra.mrb[64].mxu1 %v1636_v38  ;;  %8073 = vmatprep.subr.bf16.mxu0 %v8704_v39 }
 0x226   :  { %8094 = vmatpush3.bf16.msra.mxu1 %v8703_v36  ;;  %6600 = vmatprep.mubr.bf16.mxu1 %v1639_v46 }
 0x227   :  { %8095 = vmatprep.subr.bf16.mxu1 %v8705_v42 }
 0x228   :  { %8074 = vmatpush3.bf16.msra.mxu0 %v8706_v44 }
 0x229   :  { %8075 = vmatprep.subr.bf16.mxu0 %v8708_v47 }
 0x22a   :  { %8096 = vmatpush3.bf16.msra.mxu1 %v8707_v45 }
 0x22b   :  { %8097 = vmatprep.subr.bf16.mxu1 %v8709_v48 }
 0x22c   :  { %8076 = vmatpush3.bf16.msra.mxu0 %v8710_v49 }
 0x22d   :  { %8077 = vmatprep.subr.bf16.mxu0 %v8712_v51 }
 0x22e   :  { %8098 = vmatpush3.bf16.msra.mxu1 %v8711_v50 }
 0x22f   :  { %8099 = vmatprep.subr.bf16.mxu1 %v8713_v52 }
 0x230   :  { %8078 = vmatpush3.bf16.msra.mxu0 %v8714_v53 }
 0x231   :  { %8079 = vmatprep.subr.bf16.mxu0 %v8716_v55 }
 0x232   :  { %8100 = vmatpush3.bf16.msra.mxu1 %v8715_v54 }
 0x233   :  { %8101 = vmatprep.subr.bf16.mxu1 %v8717_v56 }
 0x234   :  { %8080 = vmatpush3.bf16.msra.mxu0 %v8718_v57 }
 0x235   :  { %8081 = vmatprep.subr.bf16.mxu0 %v8720_v59 }
 0x236   :  { %8102 = vmatpush3.bf16.msra.mxu1 %v8719_v58  ;;  %v7779_v0 = vpop.f32.mrb[40].mxu0 }
 0x237   :  { %v7780_v2 = vpop.f32.mrb[41].mxu0  ;;  %8103 = vmatprep.subr.bf16.mxu1 %v8721_v60 }
 0x238   :  { %v7801_v4 = vpop.f32.mrb[40].mxu1  ;;  %v7781_v5 = vadd.f32 %v7780_v2, %v7779_v0  ;;  %v7782_v6 = vpop.f32.mrb[42].mxu0  ;;  %8082 = vmatpush3.bf16.msra.mxu0 %v8722_v61 }
 0x239   :  { %v7802_v9 = vpop.f32.mrb[41].mxu1  ;;  %v7783_v10 = vpop.f32.mrb[43].mxu0  ;;  %8083 = vmatprep.subr.bf16.mxu0 %v8724_v63 }
 0x23a   :  { %v6003_v11 = vadd.f32 %v7781_v5, %v10575_v25  ;;  %v7803_v12 = vadd.f32 %v7802_v9, %v7801_v4  ;;  %v7804_v13 = vpop.f32.mrb[42].mxu1  ;;  %8104 = vmatpush3.bf16.msra.mxu1 %v8723_v62 }
 0x23b   :  { %v7805_v15 = vpop.f32.mrb[43].mxu1  ;;  %8105 = vmatprep.subr.bf16.mxu1 %v8725_v1 }
 0x23c   :  { %v6043_v17 = vadd.f32 %v7803_v12, %v6003_v11  ;;  %8084 = vmatpush3.bf16.msra.mxu0 %v8726_v3 }
 0x23d   :  { %8085 = vmatprep.subr.bf16.mxu0 %v8728_v8 }
 0x23e   :  { %8106 = vmatpush3.bf16.msra.mxu1 %v8727_v7 }
 0x23f   :  { %8107 = vmatprep.subr.bf16.mxu1 %v8729_v14 }
 0x240   :  { %8086 = vmatpush3.bf16.msra.mxu0 %v8730_v16 }
 0x241   :  { %10 = vsyncpa [#allocation3], 0  ;;  %v8733_v45 = vld [vmem:[%s10730_s3] sm:$0xff]   ;;  %v8766_v46 = vmov 0.0   ;;  %v8734_v47 = vld [vmem:[%s10730_s3 + $0x8] sm:$0xff]   ;;  %vm8767_vm0 = vmmov 0  }
 0x242   :  { %8108 = vmatpush3.bf16.msra.mxu1 %v8731_v18  ;;  %8124 = vmatprep.subr.bf16.mxu0 %v8766_v46  ;;  %v8735_v48 = vld [vmem:[%s10730_s3 + $0x10] sm:$0xff]   ;;  %v8736_v49 = vld [vmem:[%s10730_s3 + $0x18] sm:$0xff]   ;;  %v8737_v50 = vld [vmem:[%s10730_s3 + $0x20] sm:$0xff]   ;;  %s8768_s27 = smov [#allocation2]   ;;  %vm6721_vm1 = vcmask 74752  }
 0x243   :  { %6561 = vmatmul.mubr.bf16.vlgmr.msra.gmra.mrb[68].mxu0 %v1621_v19  ;;  %v8738_v53 = vld [vmem:[%s10730_s3 + $0x28] sm:$0xff]   ;;  %v8739_v63 = vld [vmem:[%s10730_s3 + $0x30] sm:$0xff]   ;;  %v8740_v1 = vld [vmem:[%s10730_s3 + $0x38] sm:$0xff]   ;;  %s6729_s28 = sshll.u32 %s8768_s27, 4  ;;  %s6730_s28 = int_to_ptr.vmem [resolvable:$true] %s6729_s28 }
 0x244   :  { %8125 = vmatpush3.bf16.msra.mxu0 %v8733_v45  ;;  %8140 = vmatprep.mubr.msk.bf16.mxu0 %vm8767_vm0, %v8766_v46  ;;  %s8741_s29 = scalar_lea.vmem %s6730_s28, 32  ;;  %p8746_p1 = scmp.lt.s32.totalorder %s6730_s28, %s6730_s28 }
 0x245   :  { %6601 = vmatmul.mubr.bf16.vlgmr.msra.gmra.mrb[68].mxu1 %v1637_v20  ;;  %8126 = vmatprep.subr.bf16.mxu0 %v8766_v46  ;;  %p8742_p0 = scmp.ne.s32.totalorder %s6730_s28, %s8741_s29  ;;  %p8747_p2 = scmp.lt.s32.totalorder %s8741_s29, %s8741_s29 }
 0x247   :  { %p8748_p3 = por %p8747_p2, %p8746_p1 }
 0x248   :  { %8127 = vmatpush3.bf16.msra.mxu0 %v8734_v47 }
 0x249   :  { %8128 = vmatprep.subr.bf16.mxu0 %v8766_v46  ;;  %p8749_p4 = pnand %p8748_p3, %p8742_p0 }
 0x24c   :  { %8129 = vmatpush3.bf16.msra.mxu0 %v8735_v48 }
 0x24d   :  { %8130 = vmatprep.subr.bf16.mxu0 %v8766_v46 }
 0x250   :  { %8131 = vmatpush3.bf16.msra.mxu0 %v8736_v49 }
 0x251   :  { %8132 = vmatprep.subr.bf16.mxu0 %v8766_v46 }
 0x254   :  { %8133 = vmatpush3.bf16.msra.mxu0 %v8737_v50 }
 0x255   :  { %8134 = vmatprep.subr.bf16.mxu0 %v8766_v46 }
 0x256   :  { %v7823_v21 = vpop.f32.mrb[44].mxu0 }
 0x257   :  { %v7824_v22 = vpop.f32.mrb[45].mxu0 }
 0x258   :  { %v7845_v23 = vpop.f32.mrb[44].mxu1  ;;  %v7825_v24 = vadd.f32 %v7824_v22, %v7823_v21  ;;  %v7826_v25 = vpop.f32.mrb[46].mxu0  ;;  %8135 = vmatpush3.bf16.msra.mxu0 %v8738_v53 }
 0x259   :  { %v7846_v26 = vpop.f32.mrb[45].mxu1  ;;  %v7827_v27 = vpop.f32.mrb[47].mxu0  ;;  %8136 = vmatprep.subr.bf16.mxu0 %v8766_v46 }
 0x25a   :  { %v6083_v28 = vadd.f32 %v7825_v24, %v6043_v17  ;;  %v7847_v29 = vadd.f32 %v7846_v26, %v7845_v23  ;;  %v7848_v30 = vpop.f32.mrb[46].mxu1 }
 0x25b   :  { %v7849_v31 = vpop.f32.mrb[47].mxu1 }
 0x25c   :  { %v6123_v41 = vadd.f32 %v7847_v29, %v6083_v28  ;;  %8137 = vmatpush3.bf16.msra.mxu0 %v8739_v63 }
 0x25d   :  { %8138 = vmatprep.subr.bf16.mxu0 %v8766_v46 }
 0x260   :  { %8139 = vmatpush3.bf16.msra.mxu0 %v8740_v1 }
 0x276   :  { %v7867_v32 = vpop.f32.mrb[48].mxu0 }
 0x277   :  { %v7868_v33 = vpop.f32.mrb[49].mxu0 }
 0x278   :  { %v7889_v34 = vpop.f32.mrb[48].mxu1  ;;  %v7869_v35 = vadd.f32 %v7868_v33, %v7867_v32  ;;  %v7870_v36 = vpop.f32.mrb[50].mxu0 }
 0x279   :  { %v7890_v37 = vpop.f32.mrb[49].mxu1  ;;  %v7871_v38 = vpop.f32.mrb[51].mxu0 }
 0x27a   :  { %v6163_v39 = vadd.f32 %v7869_v35, %v6123_v41  ;;  %v7891_v40 = vadd.f32 %v7890_v37, %v7889_v34  ;;  %v7892_v42 = vpop.f32.mrb[50].mxu1 }
 0x27b   :  { %v7893_v43 = vpop.f32.mrb[51].mxu1 }
 0x27c   :  { %v6203_v44 = vadd.f32 %v7891_v40, %v6163_v39 }
 0x296   :  { %v7911_v51 = vpop.f32.mrb[52].mxu0 }
 0x297   :  { %v7912_v52 = vpop.f32.mrb[53].mxu0 }
 0x298   :  { %v7933_v54 = vpop.f32.mrb[52].mxu1  ;;  %v7913_v55 = vadd.f32 %v7912_v52, %v7911_v51  ;;  %v7914_v56 = vpop.f32.mrb[54].mxu0  ;;  %v7314_v52 = vld [vmem:[%s10731_s4] ss:$0 sm:$0xff] }
 0x299   :  { %v7934_v57 = vpop.f32.mrb[53].mxu1  ;;  %v7915_v58 = vpop.f32.mrb[55].mxu0 }
 0x29a   :  { %v6243_v59 = vadd.f32 %v7913_v55, %v6203_v44  ;;  %v7935_v60 = vadd.f32 %v7934_v57, %v7933_v54  ;;  %v7936_v61 = vpop.f32.mrb[54].mxu1 }
 0x29b   :  { %v7937_v62 = vpop.f32.mrb[55].mxu1 }
 0x29c   :  { %v6283_v0 = vadd.f32 %v7935_v60, %v6243_v59 }
 0x2b6   :  { %v7955_v2 = vpop.f32.mrb[56].mxu0 }
 0x2b7   :  { %v7956_v3 = vpop.f32.mrb[57].mxu0 }
 0x2b8   :  { %v7977_v4 = vpop.f32.mrb[56].mxu1  ;;  %v7957_v5 = vadd.f32 %v7956_v3, %v7955_v2  ;;  %v7958_v6 = vpop.f32.mrb[58].mxu0 }
 0x2b9   :  { %v7978_v7 = vpop.f32.mrb[57].mxu1  ;;  %v7959_v8 = vpop.f32.mrb[59].mxu0 }
 0x2ba   :  { %v6323_v9 = vadd.f32 %v7957_v5, %v6283_v0  ;;  %v7979_v10 = vadd.f32 %v7978_v7, %v7977_v4  ;;  %v7980_v11 = vpop.f32.mrb[58].mxu1 }
 0x2bb   :  { %v7981_v12 = vpop.f32.mrb[59].mxu1 }
 0x2bc   :  { %v6363_v13 = vadd.f32 %v7979_v10, %v6323_v9 }
 0x2d6   :  { %v7999_v14 = vpop.f32.mrb[60].mxu0 }
 0x2d7   :  { %v8000_v15 = vpop.f32.mrb[61].mxu0 }
 0x2d8   :  { %v8021_v16 = vpop.f32.mrb[60].mxu1  ;;  %v8001_v17 = vadd.f32 %v8000_v15, %v7999_v14  ;;  %v8002_v18 = vpop.f32.mrb[62].mxu0 }
 0x2d9   :  { %v8022_v19 = vpop.f32.mrb[61].mxu1  ;;  %v8003_v20 = vpop.f32.mrb[63].mxu0 }
 0x2da   :  { %v6403_v21 = vadd.f32 %v8001_v17, %v6363_v13  ;;  %v8023_v22 = vadd.f32 %v8022_v19, %v8021_v16  ;;  %v8024_v23 = vpop.f32.mrb[62].mxu1 }
 0x2db   :  { %v8025_v24 = vpop.f32.mrb[63].mxu1 }
 0x2dc   :  { %v6443_v25 = vadd.f32 %v8023_v22, %v6403_v21 }
 0x2f6   :  { %v8043_v26 = vpop.f32.mrb[64].mxu0 }
 0x2f7   :  { %v8044_v27 = vpop.f32.mrb[65].mxu0 }
 0x2f8   :  { %v8065_v28 = vpop.f32.mrb[64].mxu1  ;;  %v8045_v29 = vadd.f32 %v8044_v27, %v8043_v26  ;;  %v8046_v30 = vpop.f32.mrb[66].mxu0 }
 0x2f9   :  { %v8066_v31 = vpop.f32.mrb[65].mxu1  ;;  %v8047_v41 = vpop.f32.mrb[67].mxu0 }
 0x2fa   :  { %v6483_v32 = vadd.f32 %v8045_v29, %v6443_v25  ;;  %v8067_v33 = vadd.f32 %v8066_v31, %v8065_v28  ;;  %v8068_v34 = vpop.f32.mrb[66].mxu1 }
 0x2fb   :  { %v8069_v35 = vpop.f32.mrb[67].mxu1 }
 0x2fc   :  { %v6523_v36 = vadd.f32 %v8067_v33, %v6483_v32 }
 0x316   :  { %v8087_v37 = vpop.f32.mrb[68].mxu0 }
 0x317   :  { %v8088_v38 = vpop.f32.mrb[69].mxu0 }
 0x318   :  { %v8109_v39 = vpop.f32.mrb[68].mxu1  ;;  %v8089_v40 = vadd.f32 %v8088_v38, %v8087_v37  ;;  %v8090_v42 = vpop.f32.mrb[70].mxu0 }
 0x319   :  { %v8110_v43 = vpop.f32.mrb[69].mxu1  ;;  %v8091_v44 = vpop.f32.mrb[71].mxu0 }
 0x31a   :  { %v6563_v45 = vadd.f32 %v8089_v40, %v6523_v36  ;;  %v8111_v46 = vadd.f32 %v8110_v43, %v8109_v39  ;;  %v8112_v47 = vpop.f32.mrb[70].mxu1 }
 0x31b   :  { %v8113_v48 = vpop.f32.mrb[71].mxu1 }
 0x31c   :  { %v6603_v49 = vadd.f32 %v8111_v46, %v6563_v45 }
 0x31e   :  { %v6608_v50 = vmax.f32 %v6603_v49, 0.0 }
 0x320   :  { %v6609_v51 = vpack.c.bf16 %v6608_v50, %v6608_v50 }
 0x322   :  { %8141 = vmatmul.mubr.bf16.vlgmr.msra.gmra.mrb[72].mxu0 %v6609_v51 }
 0x3f5   :  { %v6715_v53 = vpop.f32.mrb[72].mxu0 }
 0x3f6   :  { %v6716_v54 = vadd.f32 %v7314_v52, %v6715_v53  ;;  %v8142_v55 = vpop.f32.mrb[73].mxu0 }
 0x3f7   :  { %v6718_v56 = vpop.f32.mrb[74].mxu0 }
 0x3f8   :  { %v8143_v57 = vpop.f32.mrb[75].mxu0  ;;  %6722 = vst.msk [vmem:[#allocation2] sm:$0x3] %vm6721_vm1, %v6716_v54 }
 0x3f9   :  { %8752 = shalt.err (!%p8749_p4)
}
 0x3fa   :  { %s8753_s4 = scalar_lea.hbm %s10732_s5, 32 }
 0x3fb   :  { %p8754_p5 = scmp.ne.s32.totalorder %s10732_s5, %s8753_s4  ;;  %p8757_p6 = scmp.lt.u32.totalorder %s8753_s4, %s10732_s5 }
 0x3fd   :  { %p8759_p7 = pnand %p8757_p6, %p8754_p5 }
 0x3ff   :  { %8762 = shalt.err (!%p8759_p7)
}
 0x400   :  { %6732 = dma.vmem_to_hbm [thread:$0]  %s6730_s28, 32, %s10732_s5, [#allocation3]  }
 0x401   :  { %8763 = dma.done.wait [#allocation3], 32  }
 0x402   :  { %8764 = vsyncadd [#allocation3], 4294967264 }
 0x403   :  { %6736 = vsyncpa [#allocation3], 1 }

// kernel: forward.2
= control target key start
LH: loop header
LB: loop body
LE: loop exit
PB: predicated region body
PF: predicated region fallthrough
CT: control target
= control target key end

     0   :  { %s14647_s18 = smov 0   ;;  %s18518_s0 = inlined_call_operand.vmem [shape: bf16[2,3600,25], index: 0, kind: input, shape index: {}]   ;;  %s18519_s1 = inlined_call_operand.vmem [shape: bf16[25,64], index: 1, kind: input, shape index: {}]   ;;  %s18520_s2 = inlined_call_operand.vmem [shape: f32[1,64], index: 2, kind: input, shape index: {}]   ;;  %s18521_s3 = inlined_call_operand.vmem [shape: bf16[25,64,64], index: 3, kind: input, shape index: {}]   ;;  %s18522_s4 = inlined_call_operand.vmem [shape: f32[1,64], index: 4, kind: input, shape index: {}]   ;;  %s18523_s5 = inlined_call_operand.vmem [shape: bf16[2,144,64], index: 5, kind: output, shape index: {}]  }
   0x1 LB: > { %s10534_s19 = sadd.s32 4294967295, %s14612_s18   ;;  %p10538_p0 = scmp.ge.s32.totalorder %s14612_s18, 1  ;;  %s14612_s18 = sphi %s14647_s18, %s15_s18  }
   0x2   : > { %p187_p1 = scmp.lt.s32.totalorder %s14612_s18, 3 }
   0x4   : > { %p188_p2 = pnand %p10538_p0, %p187_p1 }
   0x5   : > { %v14263_v0 = vld [vmem:[%s18519_s1] sm:$0xff] (!%p188_p2)   ;;  %v14614_v1 = vmov (!%p188_p2), 0.0   ;;  %v14264_v2 = vld [vmem:[%s18519_s1 + $0x8] sm:$0x1f] (!%p188_p2)   ;;  %vm339_vm0 = vcmask (!%p188_p2), 1043456   ;;  %vm340_vm1 = vcmask (!%p188_p2), 1044480  }
   0x6   : > { %191 = sbr.rel (%p188_p2) target bundleno = 2401 (0x961), region = 40  ;;  %12150 = vmatprep.subr.bf16.mxu0 (!%p188_p2), %v14614_v1  ;;  %12190 = vmatprep.subr.bf16.mxu1 (!%p188_p2), %v14614_v1  ;;  %p215_p3 = scmp.lt.s32.totalorder (!%p188_p2), %s10534_s19, 1  ;;  %v14615_v3 = vmov (!%p188_p2), 65535   ;;  %vm14616_vm2 = vmmov (!%p188_p2), 0   ;;  %v14283_v7 = vld [vmem:[%s18521_s3 + $0x20] sm:$0xff] (!%p188_p2)   ;;  %vm311_vm3 = vcmask (!%p188_p2), 203776  }
   0x7   : > { %12151 = vmatpush3.bf16.msra.mxu0 (!%p188_p2), %v14263_v0  ;;  %12191 = vmatpush3.bf16.msra.mxu1 (!%p188_p2), %v14263_v0  ;;  %v341_v4 = vsel (!%p188_p2), %vm339_vm0, 4294967295, %v14615_v3  ;;  %v14287_v8 = vld [vmem:[%s18521_s3] sm:$0xff] (!%p188_p2)   ;;  %v14284_v11 = vld [vmem:[%s18521_s3 + $0x28] sm:$0xff] (!%p188_p2)   ;;  %v14285_v14 = vld [vmem:[%s18521_s3 + $0x30] sm:$0xff] (!%p188_p2)   ;;  %vm741_vm4 = vcmask (!%p188_p2), 523264   ;;  %vm10460_vm5 = vcmask (!%p188_p2), 519168  }
   0x8   : > { %12152 = vmatprep.subr.bf16.mxu0 (!%p188_p2), %v14614_v1  ;;  %12192 = vmatprep.subr.bf16.mxu1 (!%p188_p2), %v14614_v1  ;;  %v342_v5 = vsel (!%p188_p2), %vm340_vm1, %v341_v4, 0  ;;  %v14286_v15 = vld [vmem:[%s18521_s3 + $0x38] sm:$0xff] (!%p188_p2)   ;;  %v14288_v18 = vld [vmem:[%s18521_s3 + $0x8] sm:$0xff] (!%p188_p2)   ;;  %v14289_v31 = vld [vmem:[%s18521_s3 + $0x10] sm:$0xff] (!%p188_p2)  }
   0x9   : > { %12154 = vmatprep.mubr.msk.bf16.mxu0 (!%p188_p2), %vm14616_vm2, %v14614_v1  ;;  %12194 = vmatprep.mubr.msk.bf16.mxu1 (!%p188_p2), %vm14616_vm2, %v14614_v1  ;;  %v14671_v6 = vand.u32 (!%p188_p2), %v14264_v2, %v342_v5  ;;  %v14290_v32 = vld [vmem:[%s18521_s3 + $0x18] sm:$0xff] (!%p188_p2)   ;;  %v14790_v33 = vld [vmem:[%s18520_s2] ss:$0 sm:$0xff] (!%p188_p2) }
   0xa   : > { %v14805_v60 = vld [vmem:[%s18519_s1] sm:$0xff] (!%p188_p2)  }
   0xb   : > { %12153 = vmatpush3.bf16.msra.mxu0 (!%p188_p2), %v14671_v6  ;;  %12193 = vmatpush3.bf16.msra.mxu1 (!%p188_p2), %v14671_v6 }
   0xc   : > { %12230 = vmatprep.subr.bf16.mxu0 (!%p188_p2), %v14614_v1  ;;  %12274 = vmatprep.subr.bf16.mxu1 (!%p188_p2), %v14614_v1 }
   0xd   : > { %s18525_s19 = smov (!%p215_p3, %s10534_s19), 1 }
   0xe   : > { %s14250_s24 = smul.u32 1800, %s18525_s19 }
   0xf   : > { %s14251_s20 = smul.u32 72, %s18525_s19 }
  0x10   : > { %s14682_s29 = scalar_lea.vmem %s18518_s0, %s14250_s24 }
  0x11   : > { %v14265_v9 = vld [vmem:[%s14682_s29] sm:$0xff]   ;;  %v14266_v10 = vld [vmem:[%s14682_s29 + $0x48] sm:$0xff]   ;;  %v14268_v13 = vld [vmem:[%s14682_s29 + $0x50] sm:$0xff]  }
  0x12   : > { %12155 = vmatmul.mubr.msk.bf16.vlgmr.msra.gmra.mrb[0].mxu0 %vm311_vm3, %v14265_v9  ;;  %12195 = vmatmul.mubr.msk.bf16.vlgmr.msra.gmra.mrb[0].mxu1 %vm311_vm3, %v14266_v10  ;;  %v14267_v12 = vld [vmem:[%s14682_s29 + $0x8] sm:$0xff]   ;;  %v14269_v16 = vld [vmem:[%s14682_s29 + $0x10] sm:$0xff]   ;;  %v14270_v17 = vld [vmem:[%s14682_s29 + $0x58] sm:$0xff]  }
  0x13   : > { %12158 = vmatprep.mubr.msk.bf16.mxu0 %vm14616_vm2, %v14614_v1  ;;  %12198 = vmatprep.mubr.msk.bf16.mxu1 %vm14616_vm2, %v14614_v1  ;;  %v14271_v19 = vld [vmem:[%s14682_s29 + $0x18] sm:$0xff]   ;;  %v14272_v20 = vld [vmem:[%s14682_s29 + $0x60] sm:$0xff]   ;;  %v14274_v22 = vld [vmem:[%s14682_s29 + $0x68] sm:$0xff]  }
  0x14   : > { %12231 = vmatpush3.bf16.msra.mxu0 %v14283_v7  ;;  %12275 = vmatpush3.bf16.msra.mxu1 %v14287_v8  ;;  %v14273_v21 = vld [vmem:[%s14682_s29 + $0x20] sm:$0xff]   ;;  %v14275_v23 = vld [vmem:[%s14682_s29 + $0x28] sm:$0xff]   ;;  %v14276_v24 = vld [vmem:[%s14682_s29 + $0x70] sm:$0xff]  }
  0x15   : > { %12232 = vmatprep.subr.bf16.mxu0 %v14614_v1  ;;  %12276 = vmatprep.subr.bf16.mxu1 %v14614_v1  ;;  %v14277_v25 = vld [vmem:[%s14682_s29 + $0x30] sm:$0xff]   ;;  %v14278_v26 = vld [vmem:[%s14682_s29 + $0x78] sm:$0xff]   ;;  %v14280_v28 = vld [vmem:[%s14682_s29 + $0x80] sm:$0xff]  }
  0x16   : > { %v14279_v27 = vld [vmem:[%s14682_s29 + $0x38] sm:$0xff]   ;;  %v14281_v29 = vld [vmem:[%s14682_s29 + $0x40] sm:$0xff]   ;;  %v14282_v30 = vld [vmem:[%s14682_s29 + $0x88] sm:$0xff]  }
  0x18   : > { %12233 = vmatpush3.bf16.msra.mxu0 %v14284_v11  ;;  %12277 = vmatpush3.bf16.msra.mxu1 %v14288_v18 }
  0x19   : > { %12234 = vmatprep.subr.bf16.mxu0 %v14614_v1  ;;  %12278 = vmatprep.subr.bf16.mxu1 %v14614_v1 }
  0x1a   : > { %12159 = vmatmul.mubr.msk.bf16.gmra.mrb[4].mxu0 %vm311_vm3, %v14267_v12  ;;  %12199 = vmatmul.mubr.msk.bf16.gmra.mrb[4].mxu1 %vm311_vm3, %v14268_v13 }
  0x1b   : > { %12162 = vmatprep.mubr.msk.bf16.mxu0 %vm14616_vm2, %v14614_v1  ;;  %12202 = vmatprep.mubr.msk.bf16.mxu1 %vm14616_vm2, %v14614_v1 }
  0x1c   : > { %12235 = vmatpush3.bf16.msra.mxu0 %v14285_v14  ;;  %12279 = vmatpush3.bf16.msra.mxu1 %v14289_v31 }
  0x1d   : > { %12236 = vmatprep.subr.bf16.mxu0 %v14614_v1  ;;  %12280 = vmatprep.subr.bf16.mxu1 %v14614_v1 }
  0x20   : > { %12237 = vmatpush3.bf16.msra.mxu0 %v14286_v15  ;;  %12281 = vmatpush3.bf16.msra.mxu1 %v14290_v32 }
  0x21   : > { %12318 = vmatprep.subr.bf16.mxu0 %v14614_v1  ;;  %12358 = vmatprep.subr.bf16.mxu1 %v14614_v1 }
  0x22   : > { %12163 = vmatmul.mubr.msk.bf16.gmra.mrb[8].mxu0 %vm311_vm3, %v14269_v16  ;;  %12203 = vmatmul.mubr.msk.bf16.gmra.mrb[8].mxu1 %vm311_vm3, %v14270_v17 }
  0x23   : > { %12166 = vmatprep.mubr.msk.bf16.mxu0 %vm14616_vm2, %v14614_v1  ;;  %12206 = vmatprep.mubr.msk.bf16.mxu1 %vm14616_vm2, %v14614_v1 }
  0x2a   : > { %12167 = vmatmul.mubr.msk.bf16.gmra.mrb[12].mxu0 %vm311_vm3, %v14271_v19  ;;  %12207 = vmatmul.mubr.msk.bf16.gmra.mrb[12].mxu1 %vm311_vm3, %v14272_v20 }
  0x2b   : > { %12170 = vmatprep.mubr.msk.bf16.mxu0 %vm14616_vm2, %v14614_v1  ;;  %12210 = vmatprep.mubr.msk.bf16.mxu1 %vm14616_vm2, %v14614_v1 }
  0x32   : > { %12171 = vmatmul.mubr.msk.bf16.gmra.mrb[16].mxu0 %vm311_vm3, %v14273_v21  ;;  %12211 = vmatmul.mubr.msk.bf16.gmra.mrb[16].mxu1 %vm311_vm3, %v14274_v22 }
  0x33   : > { %12174 = vmatprep.mubr.msk.bf16.mxu0 %vm14616_vm2, %v14614_v1  ;;  %12214 = vmatprep.mubr.msk.bf16.mxu1 %vm14616_vm2, %v14614_v1 }
  0x3a   : > { %12175 = vmatmul.mubr.msk.bf16.gmra.mrb[20].mxu0 %vm311_vm3, %v14275_v23  ;;  %12215 = vmatmul.mubr.msk.bf16.gmra.mrb[20].mxu1 %vm311_vm3, %v14276_v24 }
  0x3b   : > { %12178 = vmatprep.mubr.msk.bf16.mxu0 %vm14616_vm2, %v14614_v1  ;;  %12218 = vmatprep.mubr.msk.bf16.mxu1 %vm14616_vm2, %v14614_v1 }
  0x42   : > { %12179 = vmatmul.mubr.msk.bf16.gmra.mrb[24].mxu0 %vm311_vm3, %v14277_v25  ;;  %12219 = vmatmul.mubr.msk.bf16.gmra.mrb[24].mxu1 %vm311_vm3, %v14278_v26 }
  0x43   : > { %12182 = vmatprep.mubr.msk.bf16.mxu0 %vm14616_vm2, %v14614_v1  ;;  %12222 = vmatprep.mubr.msk.bf16.mxu1 %vm14616_vm2, %v14614_v1 }
  0x4a   : > { %12183 = vmatmul.mubr.msk.bf16.gmra.mrb[28].mxu0 %vm311_vm3, %v14279_v27  ;;  %12223 = vmatmul.mubr.msk.bf16.gmra.mrb[28].mxu1 %vm311_vm3, %v14280_v28 }
  0x4b   : > { %12186 = vmatprep.mubr.msk.bf16.mxu0 %vm14616_vm2, %v14614_v1  ;;  %12226 = vmatprep.mubr.msk.bf16.mxu1 %vm14616_vm2, %v14614_v1 }
  0x52   : > { %12187 = vmatmul.mubr.msk.bf16.gmra.mrb[32].mxu0 %vm311_vm3, %v14281_v29  ;;  %12227 = vmatmul.mubr.msk.bf16.gmra.mrb[32].mxu1 %vm311_vm3, %v14282_v30 }
  0x53   : > { %12238 = vmatprep.mubr.msk.bf16.mxu0 %vm14616_vm2, %v14614_v1  ;;  %12282 = vmatprep.mubr.msk.bf16.mxu1 %vm14616_vm2, %v14614_v1 }
  0xe5   : > { %v380_v34 = vpop.f32.mrb[0].mxu0  ;;  %v610_v36 = vpop.f32.mrb[0].mxu1 }
  0xe6   : > { %v381_v35 = vadd.f32 %v14790_v33, %v380_v34  ;;  %v12156_v37 = vpop.f32.mrb[1].mxu0  ;;  %v611_v38 = vadd.f32 %v14790_v33, %v610_v36  ;;  %v12196_v39 = vpop.f32.mrb[1].mxu1 }
  0xe7   : > { %v383_v40 = vpop.f32.mrb[2].mxu0  ;;  %v613_v43 = vpop.f32.mrb[2].mxu1 }
  0xe8   : > { %v451_v41 = vmax.f32 %v381_v35, 0.0  ;;  %v384_v42 = vadd.f32 %v14790_v33, %v383_v40  ;;  %v12157_v44 = vpop.f32.mrb[3].mxu0  ;;  %v614_v45 = vadd.f32 %v14790_v33, %v613_v43  ;;  %v12197_v46 = vpop.f32.mrb[3].mxu1  ;;  %v681_v48 = vmax.f32 %v611_v38, 0.0 }
  0xea   : > { %v452_v47 = vmax.f32 %v384_v42, 0.0  ;;  %v682_v49 = vmax.f32 %v614_v45, 0.0 }
  0xec   : > { %v469_v50 = vpack.c.bf16 %v452_v47, %v451_v41  ;;  %v699_v51 = vpack.c.bf16 %v682_v49, %v681_v48 }
  0xed   : > { %v388_v52 = vpop.f32.mrb[4].mxu0  ;;  %v618_v54 = vpop.f32.mrb[4].mxu1 }
  0xee   : > { %v389_v53 = vadd.f32 %v14790_v33, %v388_v52  ;;  %v12160_v55 = vpop.f32.mrb[5].mxu0  ;;  %12283 = vmatmul.mubr.msk.bf16.vlgmr.msra.gmra.mrb[36].mxu1 %vm741_vm4, %v469_v50  ;;  %v619_v56 = vadd.f32 %v14790_v33, %v618_v54  ;;  %v12200_v57 = vpop.f32.mrb[5].mxu1  ;;  %12239 = vmatmul.mubr.msk.bf16.vlgmr.msra.gmra.mrb[36].mxu0 %vm741_vm4, %v699_v51 }
  0xef   : > { %v391_v58 = vpop.f32.mrb[6].mxu0  ;;  %12286 = vmatprep.mubr.msk.bf16.mxu1 %vm14616_vm2, %v14614_v1  ;;  %12319 = vmatpush3.bf16.msra.mxu0 %v14805_v60  ;;  %v621_v62 = vpop.f32.mrb[6].mxu1 }
  0xf0   : > { %v453_v59 = vmax.f32 %v389_v53, 0.0  ;;  %v392_v61 = vadd.f32 %v14790_v33, %v391_v58  ;;  %v12161_v63 = vpop.f32.mrb[7].mxu0  ;;  %12242 = vmatprep.mubr.msk.bf16.mxu0 %vm14616_vm2, %v14614_v1  ;;  %v622_v0 = vadd.f32 %v14790_v33, %v621_v62  ;;  %v12201_v2 = vpop.f32.mrb[7].mxu1  ;;  %12320 = vmatprep.subr.bf16.mxu0 %v14614_v1  ;;  %v683_v4 = vmax.f32 %v619_v56, 0.0 }
  0xf2   : > { %v454_v3 = vmax.f32 %v392_v61, 0.0  ;;  %v684_v5 = vmax.f32 %v622_v0, 0.0 }
  0xf3   : > { %12321 = vmatpush3.bf16.msra.mxu0 %v14671_v6 }
  0xf4   : > { %v470_v7 = vpack.c.bf16 %v454_v3, %v453_v59  ;;  %v700_v8 = vpack.c.bf16 %v684_v5, %v683_v4  ;;  %12402 = vmatprep.subr.bf16.mxu0 %v14614_v1 }
  0xf5   : > { %v396_v9 = vpop.f32.mrb[8].mxu0  ;;  %v626_v11 = vpop.f32.mrb[8].mxu1 }
  0xf6   : > { %v397_v10 = vadd.f32 %v14790_v33, %v396_v9  ;;  %v12164_v12 = vpop.f32.mrb[9].mxu0  ;;  %12287 = vmatmul.mubr.msk.bf16.gmra.mrb[40].mxu1 %vm741_vm4, %v470_v7  ;;  %v627_v13 = vadd.f32 %v14790_v33, %v626_v11  ;;  %v12204_v14 = vpop.f32.mrb[9].mxu1  ;;  %12243 = vmatmul.mubr.msk.bf16.gmra.mrb[40].mxu0 %vm741_vm4, %v700_v8 }
  0xf7   : > { %v399_v15 = vpop.f32.mrb[10].mxu0  ;;  %12290 = vmatprep.mubr.msk.bf16.mxu1 %vm14616_vm2, %v14614_v1  ;;  %v629_v18 = vpop.f32.mrb[10].mxu1  ;;  %12246 = vmatprep.mubr.msk.bf16.mxu0 %vm14616_vm2, %v14614_v1 }
  0xf8   : > { %v455_v16 = vmax.f32 %v397_v10, 0.0  ;;  %v400_v17 = vadd.f32 %v14790_v33, %v399_v15  ;;  %v12165_v19 = vpop.f32.mrb[11].mxu0  ;;  %v630_v20 = vadd.f32 %v14790_v33, %v629_v18  ;;  %v12205_v21 = vpop.f32.mrb[11].mxu1  ;;  %v685_v23 = vmax.f32 %v627_v13, 0.0 }
  0xfa   : > { %v456_v22 = vmax.f32 %v400_v17, 0.0  ;;  %v686_v24 = vmax.f32 %v630_v20, 0.0 }
  0xfc   : > { %v471_v25 = vpack.c.bf16 %v456_v22, %v455_v16  ;;  %v701_v26 = vpack.c.bf16 %v686_v24, %v685_v23 }
  0xfd   : > { %v404_v27 = vpop.f32.mrb[12].mxu0  ;;  %v634_v29 = vpop.f32.mrb[12].mxu1 }
  0xfe   : > { %v405_v28 = vadd.f32 %v14790_v33, %v404_v27  ;;  %v12168_v30 = vpop.f32.mrb[13].mxu0  ;;  %12291 = vmatmul.mubr.msk.bf16.gmra.mrb[44].mxu1 %vm741_vm4, %v471_v25  ;;  %v635_v31 = vadd.f32 %v14790_v33, %v634_v29  ;;  %v12208_v32 = vpop.f32.mrb[13].mxu1  ;;  %12247 = vmatmul.mubr.msk.bf16.gmra.mrb[44].mxu0 %vm741_vm4, %v701_v26 }
  0xff   : > { %v407_v34 = vpop.f32.mrb[14].mxu0  ;;  %12294 = vmatprep.mubr.msk.bf16.mxu1 %vm14616_vm2, %v14614_v1  ;;  %v637_v37 = vpop.f32.mrb[14].mxu1  ;;  %12250 = vmatprep.mubr.msk.bf16.mxu0 %vm14616_vm2, %v14614_v1 }
 0x100   : > { %v457_v35 = vmax.f32 %v405_v28, 0.0  ;;  %v408_v36 = vadd.f32 %v14790_v33, %v407_v34  ;;  %v12169_v38 = vpop.f32.mrb[15].mxu0  ;;  %v638_v39 = vadd.f32 %v14790_v33, %v637_v37  ;;  %v12209_v40 = vpop.f32.mrb[15].mxu1  ;;  %v687_v42 = vmax.f32 %v635_v31, 0.0 }
 0x102   : > { %v458_v41 = vmax.f32 %v408_v36, 0.0  ;;  %v688_v43 = vmax.f32 %v638_v39, 0.0 }
 0x104   : > { %v472_v44 = vpack.c.bf16 %v458_v41, %v457_v35  ;;  %v702_v45 = vpack.c.bf16 %v688_v43, %v687_v42 }
 0x105   : > { %v412_v46 = vpop.f32.mrb[16].mxu0  ;;  %v642_v48 = vpop.f32.mrb[16].mxu1 }
 0x106   : > { %v413_v47 = vadd.f32 %v14790_v33, %v412_v46  ;;  %v12172_v49 = vpop.f32.mrb[17].mxu0  ;;  %12295 = vmatmul.mubr.msk.bf16.gmra.mrb[48].mxu1 %vm741_vm4, %v472_v44  ;;  %v643_v50 = vadd.f32 %v14790_v33, %v642_v48  ;;  %v12212_v51 = vpop.f32.mrb[17].mxu1  ;;  %12251 = vmatmul.mubr.msk.bf16.gmra.mrb[48].mxu0 %vm741_vm4, %v702_v45 }
 0x107   : > { %v415_v52 = vpop.f32.mrb[18].mxu0  ;;  %12298 = vmatprep.mubr.msk.bf16.mxu1 %vm14616_vm2, %v14614_v1  ;;  %v645_v55 = vpop.f32.mrb[18].mxu1  ;;  %12254 = vmatprep.mubr.msk.bf16.mxu0 %vm14616_vm2, %v14614_v1 }
 0x108   : > { %v459_v53 = vmax.f32 %v413_v47, 0.0  ;;  %v416_v54 = vadd.f32 %v14790_v33, %v415_v52  ;;  %v12173_v56 = vpop.f32.mrb[19].mxu0  ;;  %v646_v57 = vadd.f32 %v14790_v33, %v645_v55  ;;  %v12213_v58 = vpop.f32.mrb[19].mxu1  ;;  %v689_v61 = vmax.f32 %v643_v50, 0.0 }
 0x10a   : > { %v460_v59 = vmax.f32 %v416_v54, 0.0  ;;  %v690_v62 = vmax.f32 %v646_v57, 0.0 }
 0x10c   : > { %v473_v63 = vpack.c.bf16 %v460_v59, %v459_v53  ;;  %v703_v0 = vpack.c.bf16 %v690_v62, %v689_v61 }
 0x10d   : > { %v420_v2 = vpop.f32.mrb[20].mxu0  ;;  %v650_v4 = vpop.f32.mrb[20].mxu1 }
 0x10e   : > { %v421_v3 = vadd.f32 %v14790_v33, %v420_v2  ;;  %v12176_v5 = vpop.f32.mrb[21].mxu0  ;;  %12299 = vmatmul.mubr.msk.bf16.gmra.mrb[52].mxu1 %vm741_vm4, %v473_v63  ;;  %v651_v7 = vadd.f32 %v14790_v33, %v650_v4  ;;  %v12216_v8 = vpop.f32.mrb[21].mxu1  ;;  %12255 = vmatmul.mubr.msk.bf16.gmra.mrb[52].mxu0 %vm741_vm4, %v703_v0 }
 0x10f   : > { %v423_v9 = vpop.f32.mrb[22].mxu0  ;;  %12302 = vmatprep.mubr.msk.bf16.mxu1 %vm14616_vm2, %v14614_v1  ;;  %v653_v12 = vpop.f32.mrb[22].mxu1  ;;  %12258 = vmatprep.mubr.msk.bf16.mxu0 %vm14616_vm2, %v14614_v1 }
 0x110   : > { %v461_v10 = vmax.f32 %v421_v3, 0.0  ;;  %v424_v11 = vadd.f32 %v14790_v33, %v423_v9  ;;  %v12177_v13 = vpop.f32.mrb[23].mxu0  ;;  %v654_v14 = vadd.f32 %v14790_v33, %v653_v12  ;;  %v12217_v15 = vpop.f32.mrb[23].mxu1  ;;  %v691_v17 = vmax.f32 %v651_v7, 0.0 }
 0x111   : > { %v14291_v15 = vld [vmem:[%s14682_s29 + $0x90] sm:$0xff]  }
 0x112   : > { %v462_v16 = vmax.f32 %v424_v11, 0.0  ;;  %v692_v18 = vmax.f32 %v654_v14, 0.0 }
 0x114   : > { %v474_v19 = vpack.c.bf16 %v462_v16, %v461_v10  ;;  %v704_v20 = vpack.c.bf16 %v692_v18, %v691_v17  ;;  %v14292_v16 = vld [vmem:[%s14682_s29 + $0x98] sm:$0xff]   ;;  %v14293_v17 = vld [vmem:[%s14682_s29 + $0xa0] sm:$0xff]   ;;  %v14294_v18 = vld [vmem:[%s14682_s29 + $0xa8] sm:$0xff]  }
 0x115   : > { %v428_v21 = vpop.f32.mrb[24].mxu0  ;;  %v658_v23 = vpop.f32.mrb[24].mxu1 }
 0x116   : > { %v429_v22 = vadd.f32 %v14790_v33, %v428_v21  ;;  %v12180_v24 = vpop.f32.mrb[25].mxu0  ;;  %12303 = vmatmul.mubr.msk.bf16.gmra.mrb[56].mxu1 %vm741_vm4, %v474_v19  ;;  %v659_v25 = vadd.f32 %v14790_v33, %v658_v23  ;;  %v12220_v26 = vpop.f32.mrb[25].mxu1  ;;  %12259 = vmatmul.mubr.msk.bf16.gmra.mrb[56].mxu0 %vm741_vm4, %v704_v20  ;;  %v14310_v19 = vld [vmem:[%s18521_s3 + $0x40] sm:$0xff]   ;;  %v14295_v20 = vld [vmem:[%s14682_s29 + $0xb0] sm:$0xff]   ;;  %v14296_v21 = vld [vmem:[%s14682_s29 + $0xb8] sm:$0xff]  }
 0x117   : > { %v431_v27 = vpop.f32.mrb[26].mxu0  ;;  %12306 = vmatprep.mubr.msk.bf16.mxu1 %vm14616_vm2, %v14614_v1  ;;  %v661_v30 = vpop.f32.mrb[26].mxu1  ;;  %12262 = vmatprep.mubr.msk.bf16.mxu0 %vm14616_vm2, %v14614_v1  ;;  %v14297_v23 = vld [vmem:[%s14682_s29 + $0xc0] sm:$0xff]   ;;  %v14298_v24 = vld [vmem:[%s14682_s29 + $0xc8] sm:$0xff]   ;;  %v14299_v26 = vld [vmem:[%s14682_s29 + $0xd0] sm:$0xff]  }
 0x118   : > { %v463_v28 = vmax.f32 %v429_v22, 0.0  ;;  %v432_v29 = vadd.f32 %v14790_v33, %v431_v27  ;;  %v12181_v31 = vpop.f32.mrb[27].mxu0  ;;  %v662_v32 = vadd.f32 %v14790_v33, %v661_v30  ;;  %v12221_v34 = vpop.f32.mrb[27].mxu1  ;;  %v693_v36 = vmax.f32 %v659_v25, 0.0  ;;  %12359 = vmatpush3.bf16.msra.mxu1 %v14310_v19  ;;  %v14313_v22 = vld [vmem:[%s18521_s3 + $0x48] sm:$0xff]   ;;  %v14316_v25 = vld [vmem:[%s18521_s3 + $0x50] sm:$0xff]  }
 0x119   : > { %12360 = vmatprep.subr.bf16.mxu1 %v14614_v1  ;;  %v14300_v27 = vld [vmem:[%s14682_s29 + $0xd8] sm:$0xff]   ;;  %v14302_v30 = vld [vmem:[%s14682_s29 + $0xe8] sm:$0xff]   ;;  %v14303_v31 = vld [vmem:[%s14682_s29 + $0xf0] sm:$0xff]  }
 0x11a   : > { %v464_v35 = vmax.f32 %v432_v29, 0.0  ;;  %v694_v37 = vmax.f32 %v662_v32, 0.0  ;;  %v14301_v29 = vld [vmem:[%s14682_s29 + $0xe0] sm:$0xff]   ;;  %v14304_v32 = vld [vmem:[%s14682_s29 + $0xf8] sm:$0xff]  }
 0x11b   : > { %v14305_v34 = vld [vmem:[%s14682_s29 + $0x100] sm:$0xff]  }
 0x11c   : > { %v475_v38 = vpack.c.bf16 %v464_v35, %v463_v28  ;;  %v705_v39 = vpack.c.bf16 %v694_v37, %v693_v36  ;;  %12361 = vmatpush3.bf16.msra.mxu1 %v14313_v22  ;;  %v14320_v28 = vld [vmem:[%s18521_s3 + $0x58] sm:$0xff]   ;;  %v14306_v35 = vld [vmem:[%s14682_s29 + $0x108] sm:$0xff]   ;;  %v14307_v36 = vld [vmem:[%s14682_s29 + $0x110] sm:$0xff]  }
 0x11d   : > { %v436_v40 = vpop.f32.mrb[28].mxu0  ;;  %v666_v42 = vpop.f32.mrb[28].mxu1  ;;  %12362 = vmatprep.subr.bf16.mxu1 %v14614_v1  ;;  %v14308_v37 = vld [vmem:[%s14682_s29 + $0x118] sm:$0xff]  }
 0x11e   : > { %v437_v41 = vadd.f32 %v14790_v33, %v436_v40  ;;  %v12184_v43 = vpop.f32.mrb[29].mxu0  ;;  %12307 = vmatmul.mubr.msk.bf16.gmra.mrb[60].mxu1 %vm741_vm4, %v475_v38  ;;  %v667_v44 = vadd.f32 %v14790_v33, %v666_v42  ;;  %v12224_v45 = vpop.f32.mrb[29].mxu1  ;;  %12263 = vmatmul.mubr.msk.bf16.gmra.mrb[60].mxu0 %vm741_vm4, %v705_v39 }
 0x11f   : > { %v439_v46 = vpop.f32.mrb[30].mxu0  ;;  %12310 = vmatprep.mubr.msk.bf16.mxu1 %vm14616_vm2, %v14614_v1  ;;  %v669_v49 = vpop.f32.mrb[30].mxu1  ;;  %12266 = vmatprep.mubr.msk.bf16.mxu0 %vm14616_vm2, %v14614_v1 }
 0x120   : > { %v465_v47 = vmax.f32 %v437_v41, 0.0  ;;  %v440_v48 = vadd.f32 %v14790_v33, %v439_v46  ;;  %v12185_v50 = vpop.f32.mrb[31].mxu0  ;;  %v670_v51 = vadd.f32 %v14790_v33, %v669_v49  ;;  %v12225_v52 = vpop.f32.mrb[31].mxu1  ;;  %v695_v54 = vmax.f32 %v667_v44, 0.0  ;;  %12363 = vmatpush3.bf16.msra.mxu1 %v14316_v25  ;;  %v14309_v44 = vld [vmem:[%s14682_s29 + $0x120] sm:$0xff]  }
 0x121   : > { %12364 = vmatprep.subr.bf16.mxu1 %v14614_v1 }
 0x122   : > { %v466_v53 = vmax.f32 %v440_v48, 0.0  ;;  %v696_v55 = vmax.f32 %v670_v51, 0.0 }
 0x124   : > { %v476_v56 = vpack.c.bf16 %v466_v53, %v465_v47  ;;  %v706_v57 = vpack.c.bf16 %v696_v55, %v695_v54  ;;  %12365 = vmatpush3.bf16.msra.mxu1 %v14320_v28  ;;  %v14311_v55 = vld [vmem:[%s14682_s29 + $0x128] sm:$0xff]  }
 0x125   : > { %v444_v58 = vpop.f32.mrb[32].mxu0  ;;  %v674_v61 = vpop.f32.mrb[32].mxu1  ;;  %12442 = vmatprep.subr.bf16.mxu1 %v14614_v1 }
 0x126   : > { %v445_v59 = vadd.f32 %v14790_v33, %v444_v58  ;;  %v12188_v62 = vpop.f32.mrb[33].mxu0  ;;  %12311 = vmatmul.mubr.msk.bf16.gmra.mrb[64].mxu1 %vm741_vm4, %v476_v56  ;;  %v675_v63 = vadd.f32 %v14790_v33, %v674_v61  ;;  %v12228_v0 = vpop.f32.mrb[33].mxu1  ;;  %12267 = vmatmul.mubr.msk.bf16.gmra.mrb[64].mxu0 %vm741_vm4, %v706_v57 }
 0x127   : > { %v447_v2 = vpop.f32.mrb[34].mxu0  ;;  %12314 = vmatprep.mubr.msk.bf16.mxu1 %vm14616_vm2, %v14614_v1  ;;  %v677_v5 = vpop.f32.mrb[34].mxu1  ;;  %12270 = vmatprep.mubr.msk.bf16.mxu0 %vm14616_vm2, %v14614_v1 }
 0x128   : > { %v467_v3 = vmax.f32 %v445_v59, 0.0  ;;  %v448_v4 = vadd.f32 %v14790_v33, %v447_v2  ;;  %v12189_v7 = vpop.f32.mrb[35].mxu0  ;;  %v678_v8 = vadd.f32 %v14790_v33, %v677_v5  ;;  %v12229_v9 = vpop.f32.mrb[35].mxu1  ;;  %v697_v11 = vmax.f32 %v675_v63, 0.0 }
 0x12a   : > { %v468_v10 = vmax.f32 %v448_v4, 0.0  ;;  %v698_v12 = vmax.f32 %v678_v8, 0.0  ;;  %v14312_v4 = vld [vmem:[%s14682_s29 + $0x130] sm:$0xff]  }
 0x12c   : > { %v477_v13 = vpack.c.bf16 %v468_v10, %v467_v3  ;;  %v707_v14 = vpack.c.bf16 %v698_v12, %v697_v11 }
 0x12e   : > { %12315 = vmatmul.mubr.msk.bf16.gmra.mrb[68].mxu1 %vm741_vm4, %v477_v13  ;;  %12271 = vmatmul.mubr.msk.bf16.gmra.mrb[68].mxu0 %vm741_vm4, %v707_v14 }
 0x12f   : > { %12366 = vmatprep.mubr.msk.bf16.mxu1 %vm14616_vm2, %v14614_v1  ;;  %12322 = vmatprep.mubr.msk.bf16.mxu0 %vm14616_vm2, %v14614_v1 }
 0x136   : > { %12323 = vmatmul.mubr.msk.bf16.vlgmr.msra.gmra.mrb[72].mxu0 %vm311_vm3, %v14291_v15 }
 0x137   : > { %12403 = vmatpush3.bf16.msra.mxu0 %v14805_v60  ;;  %12326 = vmatprep.mubr.msk.bf16.mxu0 %vm14616_vm2, %v14614_v1 }
 0x138   : > { %12404 = vmatprep.subr.bf16.mxu0 %v14614_v1 }
 0x13b   : > { %12405 = vmatpush3.bf16.msra.mxu0 %v14671_v6 }
 0x13c   : > { %12486 = vmatprep.subr.bf16.mxu0 %v14614_v1 }
 0x13e   : > { %12327 = vmatmul.mubr.msk.bf16.gmra.mrb[76].mxu0 %vm311_vm3, %v14292_v16  ;;  %v14314_v16 = vld [vmem:[%s14682_s29 + $0x138] sm:$0xff]  }
 0x13f   : > { %12330 = vmatprep.mubr.msk.bf16.mxu0 %vm14616_vm2, %v14614_v1 }
 0x146   : > { %12331 = vmatmul.mubr.msk.bf16.gmra.mrb[80].mxu0 %vm311_vm3, %v14293_v17 }
 0x147   : > { %12334 = vmatprep.mubr.msk.bf16.mxu0 %vm14616_vm2, %v14614_v1 }
 0x14e   : > { %12335 = vmatmul.mubr.msk.bf16.gmra.mrb[84].mxu0 %vm311_vm3, %v14294_v18 }
 0x14f   : > { %12338 = vmatprep.mubr.msk.bf16.mxu0 %vm14616_vm2, %v14614_v1 }
 0x156   : > { %12339 = vmatmul.mubr.msk.bf16.gmra.mrb[88].mxu0 %vm311_vm3, %v14295_v20 }
 0x157   : > { %12342 = vmatprep.mubr.msk.bf16.mxu0 %vm14616_vm2, %v14614_v1 }
 0x15e   : > { %12343 = vmatmul.mubr.msk.bf16.gmra.mrb[92].mxu0 %vm311_vm3, %v14296_v21 }
 0x15f   : > { %12346 = vmatprep.mubr.msk.bf16.mxu0 %vm14616_vm2, %v14614_v1 }
 0x166   : > { %12347 = vmatmul.mubr.msk.bf16.gmra.mrb[96].mxu0 %vm311_vm3, %v14297_v23 }
 0x167   : > { %12350 = vmatprep.mubr.msk.bf16.mxu0 %vm14616_vm2, %v14614_v1 }
 0x16e   : > { %12351 = vmatmul.mubr.msk.bf16.gmra.mrb[100].mxu0 %vm311_vm3, %v14298_v24 }
 0x16f   : > { %12354 = vmatprep.mubr.msk.bf16.mxu0 %vm14616_vm2, %v14614_v1 }
 0x176   : > { %12355 = vmatmul.mubr.msk.bf16.gmra.mrb[104].mxu0 %vm311_vm3, %v14299_v26 }
 0x177   : > { %12406 = vmatprep.mubr.msk.bf16.mxu0 %vm14616_vm2, %v14614_v1 }
 0x17e   : > { %12407 = vmatmul.mubr.msk.bf16.vlgmr.msra.gmra.mrb[108].mxu0 %vm311_vm3, %v14300_v27  ;;  %v14315_v27 = vld [vmem:[%s14682_s29 + $0x140] sm:$0xff]  }
 0x17f   : > { %12487 = vmatpush3.bf16.msra.mxu0 %v14805_v60  ;;  %12410 = vmatprep.mubr.msk.bf16.mxu0 %vm14616_vm2, %v14614_v1 }
 0x180   : > { %12488 = vmatprep.subr.bf16.mxu0 %v14614_v1 }
 0x183   : > { %12489 = vmatpush3.bf16.msra.mxu0 %v14671_v6 }
 0x184   : > { %12570 = vmatprep.subr.bf16.mxu0 %v14614_v1 }
 0x186   : > { %12411 = vmatmul.mubr.msk.bf16.gmra.mrb[112].mxu0 %vm311_vm3, %v14301_v29 }
 0x187   : > { %12414 = vmatprep.mubr.msk.bf16.mxu0 %vm14616_vm2, %v14614_v1 }
 0x18e   : > { %12415 = vmatmul.mubr.msk.bf16.gmra.mrb[116].mxu0 %vm311_vm3, %v14302_v30 }
 0x18f   : > { %12418 = vmatprep.mubr.msk.bf16.mxu0 %vm14616_vm2, %v14614_v1 }
 0x196   : > { %12419 = vmatmul.mubr.msk.bf16.gmra.mrb[120].mxu0 %vm311_vm3, %v14303_v31 }
 0x197   : > { %12422 = vmatprep.mubr.msk.bf16.mxu0 %vm14616_vm2, %v14614_v1 }
 0x19e   : > { %12423 = vmatmul.mubr.msk.bf16.gmra.mrb[124].mxu0 %vm311_vm3, %v14304_v32 }
 0x19f   : > { %12426 = vmatprep.mubr.msk.bf16.mxu0 %vm14616_vm2, %v14614_v1 }
 0x1a6   : > { %12427 = vmatmul.mubr.msk.bf16.gmra.mrb[128].mxu0 %vm311_vm3, %v14305_v34 }
 0x1a7   : > { %12430 = vmatprep.mubr.msk.bf16.mxu0 %vm14616_vm2, %v14614_v1 }
 0x1ae   : > { %12431 = vmatmul.mubr.msk.bf16.gmra.mrb[132].mxu0 %vm311_vm3, %v14306_v35 }
 0x1af   : > { %12434 = vmatprep.mubr.msk.bf16.mxu0 %vm14616_vm2, %v14614_v1 }
 0x1b6   : > { %12435 = vmatmul.mubr.msk.bf16.gmra.mrb[136].mxu0 %vm311_vm3, %v14307_v36 }
 0x1b7   : > { %12438 = vmatprep.mubr.msk.bf16.mxu0 %vm14616_vm2, %v14614_v1 }
 0x1be   : > { %12439 = vmatmul.mubr.msk.bf16.gmra.mrb[140].mxu0 %vm311_vm3, %v14308_v37 }
 0x1bf   : > { %12490 = vmatprep.mubr.msk.bf16.mxu0 %vm14616_vm2, %v14614_v1 }
 0x1c1   : > { %v959_v38 = vpop.f32.mrb[36].mxu1  ;;  %v803_v39 = vpop.f32.mrb[36].mxu0 }
 0x1c2   : > { %v12284_v40 = vpop.f32.mrb[37].mxu1  ;;  %v14987_v41 = vadd.f32 %v959_v38, %v803_v39  ;;  %v12240_v42 = vpop.f32.mrb[37].mxu0  ;;  %v14317_v39 = vld [vmem:[%s14682_s29 + $0x148] sm:$0xff]  }
 0x1c3   : > { %v962_v43 = vpop.f32.mrb[38].mxu1  ;;  %v806_v45 = vpop.f32.mrb[38].mxu0 }
 0x1c4   : > { %v12285_v46 = vpop.f32.mrb[39].mxu1  ;;  %v14990_v47 = vadd.f32 %v962_v43, %v806_v45  ;;  %v12241_v48 = vpop.f32.mrb[39].mxu0 }
 0x1c6   : > { %12491 = vmatmul.mubr.msk.bf16.vlgmr.msra.gmra.mrb[144].mxu0 %vm311_vm3, %v14309_v44 }
 0x1c7   : > { %12571 = vmatpush3.bf16.msra.mxu0 %v14805_v60  ;;  %12494 = vmatprep.mubr.msk.bf16.mxu0 %vm14616_vm2, %v14614_v1 }
 0x1c8   : > { %12572 = vmatprep.subr.bf16.mxu0 %v14614_v1 }
 0x1c9   : > { %v967_v49 = vpop.f32.mrb[40].mxu1  ;;  %v811_v50 = vpop.f32.mrb[40].mxu0 }
 0x1ca   : > { %v12288_v51 = vpop.f32.mrb[41].mxu1  ;;  %v14997_v52 = vadd.f32 %v967_v49, %v811_v50  ;;  %v12244_v53 = vpop.f32.mrb[41].mxu0 }
 0x1cb   : > { %v970_v54 = vpop.f32.mrb[42].mxu1  ;;  %v814_v56 = vpop.f32.mrb[42].mxu0  ;;  %12573 = vmatpush3.bf16.msra.mxu0 %v14671_v6  ;;  %v14318_v53 = vld [vmem:[%s14682_s29 + $0x150] sm:$0xff]  }
 0x1cc   : > { %v12289_v57 = vpop.f32.mrb[43].mxu1  ;;  %v15001_v58 = vadd.f32 %v970_v54, %v814_v56  ;;  %v12245_v59 = vpop.f32.mrb[43].mxu0  ;;  %12654 = vmatprep.subr.bf16.mxu0 %v14614_v1 }
 0x1ce   : > { %12495 = vmatmul.mubr.msk.bf16.gmra.mrb[148].mxu0 %vm311_vm3, %v14311_v55 }
 0x1cf   : > { %12498 = vmatprep.mubr.msk.bf16.mxu0 %vm14616_vm2, %v14614_v1 }
 0x1d1   : > { %v975_v61 = vpop.f32.mrb[44].mxu1  ;;  %v819_v62 = vpop.f32.mrb[44].mxu0 }
 0x1d2   : > { %v12292_v63 = vpop.f32.mrb[45].mxu1  ;;  %v15007_v0 = vadd.f32 %v975_v61, %v819_v62  ;;  %v12248_v2 = vpop.f32.mrb[45].mxu0 }
 0x1d3   : > { %v978_v3 = vpop.f32.mrb[46].mxu1  ;;  %v822_v5 = vpop.f32.mrb[46].mxu0 }
 0x1d4   : > { %v12293_v7 = vpop.f32.mrb[47].mxu1  ;;  %v15010_v8 = vadd.f32 %v978_v3, %v822_v5  ;;  %v12249_v9 = vpop.f32.mrb[47].mxu0 }
 0x1d6   : > { %12499 = vmatmul.mubr.msk.bf16.gmra.mrb[152].mxu0 %vm311_vm3, %v14312_v4  ;;  %v14319_v4 = vld [vmem:[%s14682_s29 + $0x158] sm:$0xff]  }
 0x1d7   : > { %12502 = vmatprep.mubr.msk.bf16.mxu0 %vm14616_vm2, %v14614_v1 }
 0x1d9   : > { %v983_v10 = vpop.f32.mrb[48].mxu1  ;;  %v827_v11 = vpop.f32.mrb[48].mxu0 }
 0x1da   : > { %v12296_v12 = vpop.f32.mrb[49].mxu1  ;;  %v15015_v13 = vadd.f32 %v983_v10, %v827_v11  ;;  %v12252_v14 = vpop.f32.mrb[49].mxu0 }
 0x1db   : > { %v986_v15 = vpop.f32.mrb[50].mxu1  ;;  %v830_v17 = vpop.f32.mrb[50].mxu0 }
 0x1dc   : > { %v12297_v18 = vpop.f32.mrb[51].mxu1  ;;  %v15018_v19 = vadd.f32 %v986_v15, %v830_v17  ;;  %v12253_v20 = vpop.f32.mrb[51].mxu0 }
 0x1dd   : > { %v14321_v18 = vld [vmem:[%s14682_s29 + $0x160] sm:$0xff]  }
 0x1de   : > { %12503 = vmatmul.mubr.msk.bf16.gmra.mrb[156].mxu0 %vm311_vm3, %v14314_v16 }
 0x1df   : > { %12506 = vmatprep.mubr.msk.bf16.mxu0 %vm14616_vm2, %v14614_v1 }
 0x1e1   : > { %v991_v21 = vpop.f32.mrb[52].mxu1  ;;  %v835_v22 = vpop.f32.mrb[52].mxu0 }
 0x1e2   : > { %v12300_v23 = vpop.f32.mrb[53].mxu1  ;;  %v15023_v24 = vadd.f32 %v991_v21, %v835_v22  ;;  %v12256_v25 = vpop.f32.mrb[53].mxu0 }
 0x1e3   : > { %v994_v26 = vpop.f32.mrb[54].mxu1  ;;  %v838_v28 = vpop.f32.mrb[54].mxu0 }
 0x1e4   : > { %v12301_v29 = vpop.f32.mrb[55].mxu1  ;;  %v15026_v30 = vadd.f32 %v994_v26, %v838_v28  ;;  %v12257_v31 = vpop.f32.mrb[55].mxu0  ;;  %v14322_v28 = vld [vmem:[%s14682_s29 + $0x168] sm:$0xff]  }
 0x1e6   : > { %12507 = vmatmul.mubr.msk.bf16.gmra.mrb[160].mxu0 %vm311_vm3, %v14315_v27 }
 0x1e7   : > { %12510 = vmatprep.mubr.msk.bf16.mxu0 %vm14616_vm2, %v14614_v1 }
 0x1e9   : > { %v999_v32 = vpop.f32.mrb[56].mxu1  ;;  %v843_v34 = vpop.f32.mrb[56].mxu0 }
 0x1ea   : > { %v12304_v35 = vpop.f32.mrb[57].mxu1  ;;  %v15031_v36 = vadd.f32 %v999_v32, %v843_v34  ;;  %v12260_v37 = vpop.f32.mrb[57].mxu0 }
 0x1eb   : > { %v1002_v38 = vpop.f32.mrb[58].mxu1  ;;  %v846_v40 = vpop.f32.mrb[58].mxu0  ;;  %v14323_v37 = vld [vmem:[%s18521_s3 + $0x60] sm:$0xff]  }
 0x1ec   : > { %v12305_v42 = vpop.f32.mrb[59].mxu1  ;;  %v15034_v43 = vadd.f32 %v1002_v38, %v846_v40  ;;  %v12261_v44 = vpop.f32.mrb[59].mxu0 }
 0x1ed   : > { %v14324_v44 = vld [vmem:[%s14682_s29 + $0x170] sm:$0xff]  }
 0x1ee   : > { %12511 = vmatmul.mubr.msk.bf16.gmra.mrb[164].mxu0 %vm311_vm3, %v14317_v39 }
 0x1ef   : > { %12514 = vmatprep.mubr.msk.bf16.mxu0 %vm14616_vm2, %v14614_v1 }
 0x1f1   : > { %v1007_v45 = vpop.f32.mrb[60].mxu1  ;;  %v851_v46 = vpop.f32.mrb[60].mxu0 }
 0x1f2   : > { %v12308_v48 = vpop.f32.mrb[61].mxu1  ;;  %v15039_v49 = vadd.f32 %v1007_v45, %v851_v46  ;;  %v12264_v50 = vpop.f32.mrb[61].mxu0 }
 0x1f3   : > { %v1010_v51 = vpop.f32.mrb[62].mxu1  ;;  %v854_v54 = vpop.f32.mrb[62].mxu0 }
 0x1f4   : > { %v12309_v55 = vpop.f32.mrb[63].mxu1  ;;  %v15042_v56 = vadd.f32 %v1010_v51, %v854_v54  ;;  %v12265_v57 = vpop.f32.mrb[63].mxu0 }
 0x1f6   : > { %12515 = vmatmul.mubr.msk.bf16.gmra.mrb[168].mxu0 %vm311_vm3, %v14318_v53  ;;  %v14329_v53 = vld [vmem:[%s18521_s3 + $0x70] sm:$0xff]  }
 0x1f7   : > { %12518 = vmatprep.mubr.msk.bf16.mxu0 %vm14616_vm2, %v14614_v1 }
 0x1f9   : > { %v1015_v59 = vpop.f32.mrb[64].mxu1  ;;  %v859_v61 = vpop.f32.mrb[64].mxu0 }
 0x1fa   : > { %v12312_v62 = vpop.f32.mrb[65].mxu1  ;;  %v15047_v63 = vadd.f32 %v1015_v59, %v859_v61  ;;  %v12268_v2 = vpop.f32.mrb[65].mxu0  ;;  %v14325_v61 = vld [vmem:[%s14682_s29 + $0x178] sm:$0xff]  }
 0x1fb   : > { %v1018_v3 = vpop.f32.mrb[66].mxu1  ;;  %v862_v5 = vpop.f32.mrb[66].mxu0  ;;  %v14333_v2 = vld [vmem:[%s18521_s3 + $0x78] sm:$0xff]  }
 0x1fc   : > { %v12313_v7 = vpop.f32.mrb[67].mxu1  ;;  %v15050_v9 = vadd.f32 %v1018_v3, %v862_v5  ;;  %v12269_v10 = vpop.f32.mrb[67].mxu0 }
 0x1fe   : > { %12519 = vmatmul.mubr.msk.bf16.gmra.mrb[172].mxu0 %vm311_vm3, %v14319_v4 }
 0x1ff   : > { %12522 = vmatprep.mubr.msk.bf16.mxu0 %vm14616_vm2, %v14614_v1 }
 0x201   : > { %v1023_v11 = vpop.f32.mrb[68].mxu1  ;;  %v867_v12 = vpop.f32.mrb[68].mxu0 }
 0x202   : > { %v12316_v14 = vpop.f32.mrb[69].mxu1  ;;  %v15055_v15 = vadd.f32 %v1023_v11, %v867_v12  ;;  %v12272_v16 = vpop.f32.mrb[69].mxu0 }
 0x203   : > { %v1026_v17 = vpop.f32.mrb[70].mxu1  ;;  %v870_v20 = vpop.f32.mrb[70].mxu0  ;;  %v14327_v16 = vld [vmem:[%s14682_s29 + $0x180] sm:$0xff]  }
 0x204   : > { %v12317_v21 = vpop.f32.mrb[71].mxu1  ;;  %v15058_v22 = vadd.f32 %v1026_v17, %v870_v20  ;;  %v12273_v23 = vpop.f32.mrb[71].mxu0 }
 0x206   : > { %12523 = vmatmul.mubr.msk.bf16.gmra.mrb[176].mxu0 %vm311_vm3, %v14321_v18 }
 0x207   : > { %12574 = vmatprep.mubr.msk.bf16.mxu0 %vm14616_vm2, %v14614_v1 }
 0x209   : > { %v1154_v25 = vpop.f32.mrb[72].mxu0 }
 0x20a   : > { %v1155_v26 = vadd.f32 %v14790_v33, %v1154_v25  ;;  %v12324_v27 = vpop.f32.mrb[73].mxu0 }
 0x20b   : > { %v1157_v29 = vpop.f32.mrb[74].mxu0 }
 0x20c   : > { %v1158_v31 = vadd.f32 %v14790_v33, %v1157_v29  ;;  %v12325_v32 = vpop.f32.mrb[75].mxu0  ;;  %v1225_v34 = vmax.f32 %v1155_v26, 0.0  ;;  %v14328_v29 = vld [vmem:[%s14682_s29 + $0x188] sm:$0xff]  }
 0x20d   : > { %v15124_v32 = vld [vmem:[%s18520_s2] ss:$0 sm:$0xff] }
 0x20e   : > { %v1226_v35 = vmax.f32 %v1158_v31, 0.0  ;;  %12575 = vmatmul.mubr.msk.bf16.vlgmr.msra.gmra.mrb[180].mxu0 %vm311_vm3, %v14322_v28 }
 0x20f   : > { %12655 = vmatpush3.bf16.msra.mxu0 %v14805_v60  ;;  %12578 = vmatprep.mubr.msk.bf16.mxu0 %vm14616_vm2, %v14614_v1  ;;  %v14326_v60 = vld [vmem:[%s18521_s3 + $0x68] sm:$0xff]  }
 0x210   : > { %v1243_v38 = vpack.c.bf16 %v1226_v35, %v1225_v34  ;;  %12656 = vmatprep.subr.bf16.mxu0 %v14614_v1 }
 0x211   : > { %v1162_v39 = vpop.f32.mrb[76].mxu0 }
 0x212   : > { %v1163_v40 = vadd.f32 %v14790_v33, %v1162_v39  ;;  %v12328_v42 = vpop.f32.mrb[77].mxu0  ;;  %12367 = vmatmul.mubr.msk.bf16.vlgmr.msra.gmra.mrb[72].mxu1 %vm741_vm4, %v1243_v38 }
 0x213   : > { %12443 = vmatpush3.bf16.msra.mxu1 %v14323_v37  ;;  %v1165_v45 = vpop.f32.mrb[78].mxu0  ;;  %12370 = vmatprep.mubr.msk.bf16.mxu1 %vm14616_vm2, %v14614_v1 }
 0x214   : > { %v1166_v46 = vadd.f32 %v14790_v33, %v1165_v45  ;;  %v12329_v48 = vpop.f32.mrb[79].mxu0  ;;  %12444 = vmatprep.subr.bf16.mxu1 %v14614_v1  ;;  %12657 = vmatpush3.bf16.msra.mxu0 %v14671_v6  ;;  %v1227_v50 = vmax.f32 %v1163_v40, 0.0 }
 0x215   : > { %12738 = vmatprep.subr.bf16.mxu0 %v14614_v1 }
 0x216   : > { %v1228_v51 = vmax.f32 %v1166_v46, 0.0  ;;  %12579 = vmatmul.mubr.msk.bf16.gmra.mrb[184].mxu0 %vm311_vm3, %v14324_v44  ;;  %v14330_v44 = vld [vmem:[%s14682_s29 + $0x190] sm:$0xff]  }
 0x217   : > { %12582 = vmatprep.mubr.msk.bf16.mxu0 %vm14616_vm2, %v14614_v1  ;;  %12445 = vmatpush3.bf16.msra.mxu1 %v14326_v60 }
 0x218   : > { %v1244_v54 = vpack.c.bf16 %v1228_v51, %v1227_v50  ;;  %12446 = vmatprep.subr.bf16.mxu1 %v14614_v1 }
 0x219   : > { %v1170_v55 = vpop.f32.mrb[80].mxu0 }
 0x21a   : > { %v1171_v57 = vadd.f32 %v14790_v33, %v1170_v55  ;;  %v12332_v59 = vpop.f32.mrb[81].mxu0  ;;  %12371 = vmatmul.mubr.msk.bf16.gmra.mrb[76].mxu1 %vm741_vm4, %v1244_v54 }
 0x21b   : > { %v1173_v62 = vpop.f32.mrb[82].mxu0  ;;  %12374 = vmatprep.mubr.msk.bf16.mxu1 %vm14616_vm2, %v14614_v1  ;;  %12447 = vmatpush3.bf16.msra.mxu1 %v14329_v53 }
 0x21c   : > { %v1174_v3 = vadd.f32 %v14790_v33, %v1173_v62  ;;  %v12333_v4 = vpop.f32.mrb[83].mxu0  ;;  %12448 = vmatprep.subr.bf16.mxu1 %v14614_v1  ;;  %v1229_v5 = vmax.f32 %v1171_v57, 0.0  ;;  %v14331_v57 = vld [vmem:[%s14682_s29 + $0x198] sm:$0xff]  }
 0x21e   : > { %v1230_v7 = vmax.f32 %v1174_v3, 0.0  ;;  %12583 = vmatmul.mubr.msk.bf16.gmra.mrb[188].mxu0 %vm311_vm3, %v14325_v61 }
 0x21f   : > { %12586 = vmatprep.mubr.msk.bf16.mxu0 %vm14616_vm2, %v14614_v1  ;;  %12449 = vmatpush3.bf16.msra.mxu1 %v14333_v2 }
 0x220   : > { %v1245_v10 = vpack.c.bf16 %v1230_v7, %v1229_v5  ;;  %12526 = vmatprep.subr.bf16.mxu1 %v14614_v1 }
 0x221   : > { %v1178_v11 = vpop.f32.mrb[84].mxu0 }
 0x222   : > { %v1179_v12 = vadd.f32 %v14790_v33, %v1178_v11  ;;  %v12336_v14 = vpop.f32.mrb[85].mxu0  ;;  %12375 = vmatmul.mubr.msk.bf16.gmra.mrb[80].mxu1 %vm741_vm4, %v1245_v10  ;;  %v14332_v11 = vld [vmem:[%s14682_s29 + $0x1a0] sm:$0xff]  }
 0x223   : > { %v1181_v17 = vpop.f32.mrb[86].mxu0  ;;  %12378 = vmatprep.mubr.msk.bf16.mxu1 %vm14616_vm2, %v14614_v1 }
 0x224   : > { %v1182_v18 = vadd.f32 %v14790_v33, %v1181_v17  ;;  %v12337_v20 = vpop.f32.mrb[87].mxu0  ;;  %v1231_v21 = vmax.f32 %v1179_v12, 0.0 }
 0x226   : > { %v1232_v23 = vmax.f32 %v1182_v18, 0.0  ;;  %12587 = vmatmul.mubr.msk.bf16.gmra.mrb[192].mxu0 %vm311_vm3, %v14327_v16 }
 0x227   : > { %12590 = vmatprep.mubr.msk.bf16.mxu0 %vm14616_vm2, %v14614_v1 }
 0x228   : > { %v1246_v25 = vpack.c.bf16 %v1232_v23, %v1231_v21 }
 0x229   : > { %v1186_v26 = vpop.f32.mrb[88].mxu0 }
 0x22a   : > { %v1187_v27 = vadd.f32 %v14790_v33, %v1186_v26  ;;  %v12340_v28 = vpop.f32.mrb[89].mxu0  ;;  %12379 = vmatmul.mubr.msk.bf16.gmra.mrb[84].mxu1 %vm741_vm4, %v1246_v25  ;;  %v14334_v26 = vld [vmem:[%s14682_s29 + $0x1a8] sm:$0xff]  }
 0x22b   : > { %v1189_v31 = vpop.f32.mrb[90].mxu0  ;;  %12382 = vmatprep.mubr.msk.bf16.mxu1 %vm14616_vm2, %v14614_v1 }
 0x22c   : > { %v1190_v34 = vadd.f32 %v15124_v32, %v1189_v31  ;;  %v12341_v35 = vpop.f32.mrb[91].mxu0  ;;  %v1233_v37 = vmax.f32 %v1187_v27, 0.0 }
 0x22e   : > { %v1234_v38 = vmax.f32 %v1190_v34, 0.0  ;;  %12591 = vmatmul.mubr.msk.bf16.gmra.mrb[196].mxu0 %vm311_vm3, %v14328_v29 }
 0x22f   : > { %12594 = vmatprep.mubr.msk.bf16.mxu0 %vm14616_vm2, %v14614_v1 }
 0x230   : > { %v1247_v33 = vpack.c.bf16 %v1234_v38, %v1233_v37 }
 0x231   : > { %v1194_v39 = vpop.f32.mrb[92].mxu0 }
 0x232   : > { %v1195_v40 = vadd.f32 %v15124_v32, %v1194_v39  ;;  %v12344_v42 = vpop.f32.mrb[93].mxu0  ;;  %12383 = vmatmul.mubr.msk.bf16.gmra.mrb[88].mxu1 %vm741_vm4, %v1247_v33  ;;  %v14335_v39 = vld [vmem:[%s14682_s29 + $0x1b0] sm:$0xff]  }
 0x233   : > { %v1197_v45 = vpop.f32.mrb[94].mxu0  ;;  %12386 = vmatprep.mubr.msk.bf16.mxu1 %vm14616_vm2, %v14614_v1 }
 0x234   : > { %v1198_v60 = vadd.f32 %v15124_v32, %v1197_v45  ;;  %v12345_v46 = vpop.f32.mrb[95].mxu0  ;;  %v1235_v48 = vmax.f32 %v1195_v40, 0.0 }
 0x235   : > { %v15176_v46 = vld [vmem:[%s18519_s1] sm:$0xff]  }
 0x236   : > { %v1236_v50 = vmax.f32 %v1198_v60, 0.0  ;;  %12595 = vmatmul.mubr.msk.bf16.gmra.mrb[200].mxu0 %vm311_vm3, %v14330_v44 }
 0x237   : > { %12598 = vmatprep.mubr.msk.bf16.mxu0 %vm14616_vm2, %v14614_v1 }
 0x238   : > { %v1248_v51 = vpack.c.bf16 %v1236_v50, %v1235_v48  ;;  %v14336_v48 = vld [vmem:[%s18521_s3 + $0x80] sm:$0xff]  }
 0x239   : > { %v1202_v53 = vpop.f32.mrb[96].mxu0 }
 0x23a   : > { %v1203_v54 = vadd.f32 %v15124_v32, %v1202_v53  ;;  %v12348_v55 = vpop.f32.mrb[97].mxu0  ;;  %12387 = vmatmul.mubr.msk.bf16.gmra.mrb[92].mxu1 %vm741_vm4, %v1248_v51 }
 0x23b   : > { %v1205_v59 = vpop.f32.mrb[98].mxu0  ;;  %12390 = vmatprep.mubr.msk.bf16.mxu1 %vm14616_vm2, %v14614_v1  ;;  %v14337_v55 = vld [vmem:[%s14682_s29 + $0x1b8] sm:$0xff]  }
 0x23c   : > { %v1206_v61 = vadd.f32 %v15124_v32, %v1205_v59  ;;  %v12349_v62 = vpop.f32.mrb[99].mxu0  ;;  %v1237_v2 = vmax.f32 %v1203_v54, 0.0  ;;  %v14339_v59 = vld [vmem:[%s18521_s3 + $0x88] sm:$0xff]  }
 0x23e   : > { %v1238_v3 = vmax.f32 %v1206_v61, 0.0  ;;  %12599 = vmatmul.mubr.msk.bf16.gmra.mrb[204].mxu0 %vm311_vm3, %v14331_v57 }
 0x23f   : > { %12602 = vmatprep.mubr.msk.bf16.mxu0 %vm14616_vm2, %v14614_v1 }
 0x240   : > { %v1249_v4 = vpack.c.bf16 %v1238_v3, %v1237_v2 }
 0x241   : > { %v1210_v5 = vpop.f32.mrb[100].mxu0 }
 0x242   : > { %v1211_v7 = vadd.f32 %v15124_v32, %v1210_v5  ;;  %v12352_v10 = vpop.f32.mrb[101].mxu0  ;;  %12391 = vmatmul.mubr.msk.bf16.gmra.mrb[96].mxu1 %vm741_vm4, %v1249_v4  ;;  %v14342_v4 = vld [vmem:[%s18521_s3 + $0x90] sm:$0xff]  }
 0x243   : > { %v1213_v12 = vpop.f32.mrb[102].mxu0  ;;  %12394 = vmatprep.mubr.msk.bf16.mxu1 %vm14616_vm2, %v14614_v1 }
 0x244   : > { %v1214_v14 = vadd.f32 %v15124_v32, %v1213_v12  ;;  %v12353_v16 = vpop.f32.mrb[103].mxu0  ;;  %v1239_v17 = vmax.f32 %v1211_v7, 0.0  ;;  %v14338_v12 = vld [vmem:[%s14682_s29 + $0x1c0] sm:$0xff]  }
 0x245   : > { %v14346_v16 = vld [vmem:[%s18521_s3 + $0x98] sm:$0xff]  }
 0x246   : > { %v1240_v18 = vmax.f32 %v1214_v14, 0.0  ;;  %12603 = vmatmul.mubr.msk.bf16.gmra.mrb[208].mxu0 %vm311_vm3, %v14332_v11 }
 0x247   : > { %12606 = vmatprep.mubr.msk.bf16.mxu0 %vm14616_vm2, %v14614_v1 }
 0x248   : > { %v1250_v20 = vpack.c.bf16 %v1240_v18, %v1239_v17 }
 0x249   : > { %v1218_v21 = vpop.f32.mrb[104].mxu0 }
 0x24a   : > { %v1219_v23 = vadd.f32 %v15124_v32, %v1218_v21  ;;  %v12356_v25 = vpop.f32.mrb[105].mxu0  ;;  %12395 = vmatmul.mubr.msk.bf16.gmra.mrb[100].mxu1 %vm741_vm4, %v1250_v20 }
 0x24b   : > { %v1221_v27 = vpop.f32.mrb[106].mxu0  ;;  %12398 = vmatprep.mubr.msk.bf16.mxu1 %vm14616_vm2, %v14614_v1 }
 0x24c   : > { %v1222_v28 = vadd.f32 %v15124_v32, %v1221_v27  ;;  %v12357_v29 = vpop.f32.mrb[107].mxu0  ;;  %v1241_v31 = vmax.f32 %v1219_v23, 0.0 }
 0x24e   : > { %v1242_v34 = vmax.f32 %v1222_v28, 0.0  ;;  %12607 = vmatmul.mubr.msk.bf16.gmra.mrb[212].mxu0 %vm311_vm3, %v14334_v26  ;;  %v14340_v28 = vld [vmem:[%s14682_s29 + $0x1c8] sm:$0xff]  }
 0x24f   : > { %12658 = vmatprep.mubr.msk.bf16.mxu0 %vm14616_vm2, %v14614_v1 }
 0x250   : > { %v1251_v35 = vpack.c.bf16 %v1242_v34, %v1241_v31 }
 0x251   : > { %v1559_v37 = vpop.f32.mrb[108].mxu0 }
 0x252   : > { %v1560_v38 = vadd.f32 %v15124_v32, %v1559_v37  ;;  %12399 = vmatmul.mubr.msk.bf16.gmra.mrb[104].mxu1 %vm741_vm4, %v1251_v35  ;;  %v12408_v33 = vpop.f32.mrb[109].mxu0 }
 0x253   : > { %v1562_v40 = vpop.f32.mrb[110].mxu0  ;;  %12450 = vmatprep.mubr.msk.bf16.mxu1 %vm14616_vm2, %v14614_v1 }
 0x254   : > { %v1563_v42 = vadd.f32 %v15124_v32, %v1562_v40  ;;  %v12409_v44 = vpop.f32.mrb[111].mxu0  ;;  %v1630_v45 = vmax.f32 %v1560_v38, 0.0 }
 0x256   : > { %v1631_v60 = vmax.f32 %v1563_v42, 0.0  ;;  %12659 = vmatmul.mubr.msk.bf16.vlgmr.msra.gmra.mrb[216].mxu0 %vm311_vm3, %v14335_v39  ;;  %v14341_v42 = vld [vmem:[%s14682_s29 + $0x1d0] sm:$0xff]  }
 0x257   : > { %12739 = vmatpush3.bf16.msra.mxu0 %v15176_v46  ;;  %12662 = vmatprep.mubr.msk.bf16.mxu0 %vm14616_vm2, %v14614_v1 }
 0x258   : > { %v1648_v50 = vpack.c.bf16 %v1631_v60, %v1630_v45  ;;  %12740 = vmatprep.subr.bf16.mxu0 %v14614_v1 }
 0x259   : > { %v1567_v51 = vpop.f32.mrb[112].mxu0 }
 0x25a   : > { %v1568_v53 = vadd.f32 %v15124_v32, %v1567_v51  ;;  %v12412_v54 = vpop.f32.mrb[113].mxu0  ;;  %12451 = vmatmul.mubr.msk.bf16.vlgmr.msra.gmra.mrb[108].mxu1 %vm741_vm4, %v1648_v50 }
 0x25b   : > { %12527 = vmatpush3.bf16.msra.mxu1 %v14336_v48  ;;  %v1570_v57 = vpop.f32.mrb[114].mxu0  ;;  %12454 = vmatprep.mubr.msk.bf16.mxu1 %vm14616_vm2, %v14614_v1 }
 0x25c   : > { %v1571_v61 = vadd.f32 %v15124_v32, %v1570_v57  ;;  %v12413_v62 = vpop.f32.mrb[115].mxu0  ;;  %12528 = vmatprep.subr.bf16.mxu1 %v14614_v1  ;;  %12741 = vmatpush3.bf16.msra.mxu0 %v14671_v6  ;;  %v1632_v2 = vmax.f32 %v1568_v53, 0.0  ;;  %v14343_v57 = vld [vmem:[%s14682_s29 + $0x1d8] sm:$0xff]  }
 0x25d   : > { %12822 = vmatprep.subr.bf16.mxu0 %v14614_v1 }
 0x25e   : > { %v1633_v3 = vmax.f32 %v1571_v61, 0.0  ;;  %12663 = vmatmul.mubr.msk.bf16.gmra.mrb[220].mxu0 %vm311_vm3, %v14337_v55 }
 0x25f   : > { %12666 = vmatprep.mubr.msk.bf16.mxu0 %vm14616_vm2, %v14614_v1  ;;  %12529 = vmatpush3.bf16.msra.mxu1 %v14339_v59 }
 0x260   : > { %v1649_v5 = vpack.c.bf16 %v1633_v3, %v1632_v2  ;;  %12530 = vmatprep.subr.bf16.mxu1 %v14614_v1 }
 0x261   : > { %v1575_v7 = vpop.f32.mrb[116].mxu0 }
 0x262   : > { %v1576_v10 = vadd.f32 %v15124_v32, %v1575_v7  ;;  %v12416_v11 = vpop.f32.mrb[117].mxu0  ;;  %12455 = vmatmul.mubr.msk.bf16.gmra.mrb[112].mxu1 %vm741_vm4, %v1649_v5 }
 0x263   : > { %v1578_v14 = vpop.f32.mrb[118].mxu0  ;;  %12458 = vmatprep.mubr.msk.bf16.mxu1 %vm14616_vm2, %v14614_v1  ;;  %12531 = vmatpush3.bf16.msra.mxu1 %v14342_v4  ;;  %v14344_v11 = vld [vmem:[%s14682_s29 + $0x1e0] sm:$0xff]  }
 0x264   : > { %v1579_v17 = vadd.f32 %v15124_v32, %v1578_v14  ;;  %v12417_v18 = vpop.f32.mrb[119].mxu0  ;;  %12532 = vmatprep.subr.bf16.mxu1 %v14614_v1  ;;  %v1634_v20 = vmax.f32 %v1576_v10, 0.0 }
 0x266   : > { %v1635_v21 = vmax.f32 %v1579_v17, 0.0  ;;  %12667 = vmatmul.mubr.msk.bf16.gmra.mrb[224].mxu0 %vm311_vm3, %v14338_v12 }
 0x267   : > { %12670 = vmatprep.mubr.msk.bf16.mxu0 %vm14616_vm2, %v14614_v1  ;;  %12533 = vmatpush3.bf16.msra.mxu1 %v14346_v16 }
 0x268   : > { %v1650_v23 = vpack.c.bf16 %v1635_v21, %v1634_v20  ;;  %12610 = vmatprep.subr.bf16.mxu1 %v14614_v1 }
 0x269   : > { %v1583_v25 = vpop.f32.mrb[120].mxu0 }
 0x26a   : > { %v1584_v26 = vadd.f32 %v15124_v32, %v1583_v25  ;;  %v12420_v27 = vpop.f32.mrb[121].mxu0  ;;  %12459 = vmatmul.mubr.msk.bf16.gmra.mrb[116].mxu1 %vm741_vm4, %v1650_v23 }
 0x26b   : > { %v1586_v29 = vpop.f32.mrb[122].mxu0  ;;  %12462 = vmatprep.mubr.msk.bf16.mxu1 %vm14616_vm2, %v14614_v1 }
 0x26c   : > { %v1587_v31 = vadd.f32 %v15124_v32, %v1586_v29  ;;  %v12421_v34 = vpop.f32.mrb[123].mxu0  ;;  %v1636_v35 = vmax.f32 %v1584_v26, 0.0  ;;  %v14345_v26 = vld [vmem:[%s14682_s29 + $0x1e8] sm:$0xff]  }
 0x26e   : > { %v1637_v37 = vmax.f32 %v1587_v31, 0.0  ;;  %12671 = vmatmul.mubr.msk.bf16.gmra.mrb[228].mxu0 %vm311_vm3, %v14340_v28 }
 0x26f   : > { %12674 = vmatprep.mubr.msk.bf16.mxu0 %vm14616_vm2, %v14614_v1 }
 0x270   : > { %v1651_v38 = vpack.c.bf16 %v1637_v37, %v1636_v35 }
 0x271   : > { %v1591_v33 = vpop.f32.mrb[124].mxu0 }
 0x272   : > { %v1592_v39 = vadd.f32 %v15124_v32, %v1591_v33  ;;  %v12424_v40 = vpop.f32.mrb[125].mxu0  ;;  %12463 = vmatmul.mubr.msk.bf16.gmra.mrb[120].mxu1 %vm741_vm4, %v1651_v38 }
 0x273   : > { %v1594_v44 = vpop.f32.mrb[126].mxu0  ;;  %12466 = vmatprep.mubr.msk.bf16.mxu1 %vm14616_vm2, %v14614_v1 }
 0x274   : > { %v1595_v45 = vadd.f32 %v15124_v32, %v1594_v44  ;;  %v12425_v60 = vpop.f32.mrb[127].mxu0  ;;  %v1638_v48 = vmax.f32 %v1592_v39, 0.0  ;;  %v14347_v39 = vld [vmem:[%s14682_s29 + $0x1f0] sm:$0xff]  }
 0x276   : > { %v1639_v50 = vmax.f32 %v1595_v45, 0.0  ;;  %12675 = vmatmul.mubr.msk.bf16.gmra.mrb[232].mxu0 %vm311_vm3, %v14341_v42 }
 0x277   : > { %12678 = vmatprep.mubr.msk.bf16.mxu0 %vm14616_vm2, %v14614_v1 }
 0x278   : > { %v1652_v51 = vpack.c.bf16 %v1639_v50, %v1638_v48 }
 0x279   : > { %v1599_v53 = vpop.f32.mrb[128].mxu0 }
 0x27a   : > { %v1600_v54 = vadd.f32 %v15124_v32, %v1599_v53  ;;  %v12428_v55 = vpop.f32.mrb[129].mxu0  ;;  %12467 = vmatmul.mubr.msk.bf16.gmra.mrb[124].mxu1 %vm741_vm4, %v1652_v51 }
 0x27b   : > { %v1602_v59 = vpop.f32.mrb[130].mxu0  ;;  %12470 = vmatprep.mubr.msk.bf16.mxu1 %vm14616_vm2, %v14614_v1 }
 0x27c   : > { %v1603_v61 = vadd.f32 %v15124_v32, %v1602_v59  ;;  %v12429_v62 = vpop.f32.mrb[131].mxu0  ;;  %v1640_v2 = vmax.f32 %v1600_v54, 0.0  ;;  %v14348_v54 = vld [vmem:[%s14682_s29 + $0x1f8] sm:$0xff]  }
 0x27e   : > { %v1641_v3 = vmax.f32 %v1603_v61, 0.0  ;;  %12679 = vmatmul.mubr.msk.bf16.gmra.mrb[236].mxu0 %vm311_vm3, %v14343_v57 }
 0x27f   : > { %12682 = vmatprep.mubr.msk.bf16.mxu0 %vm14616_vm2, %v14614_v1 }
 0x280   : > { %v1653_v4 = vpack.c.bf16 %v1641_v3, %v1640_v2  ;;  %v14349_v2 = vld [vmem:[%s18521_s3 + $0xa0] sm:$0xff]  }
 0x281   : > { %v1607_v5 = vpop.f32.mrb[132].mxu0 }
 0x282   : > { %v1608_v7 = vadd.f32 %v15124_v32, %v1607_v5  ;;  %v12432_v10 = vpop.f32.mrb[133].mxu0  ;;  %12471 = vmatmul.mubr.msk.bf16.gmra.mrb[128].mxu1 %vm741_vm4, %v1653_v4 }
 0x283   : > { %v1610_v12 = vpop.f32.mrb[134].mxu0  ;;  %12474 = vmatprep.mubr.msk.bf16.mxu1 %vm14616_vm2, %v14614_v1  ;;  %v14350_v10 = vld [vmem:[%s14682_s29 + $0x200] sm:$0xff]  }
 0x284   : > { %v1611_v14 = vadd.f32 %v15124_v32, %v1610_v12  ;;  %v12433_v16 = vpop.f32.mrb[135].mxu0  ;;  %v1642_v17 = vmax.f32 %v1608_v7, 0.0  ;;  %v14352_v12 = vld [vmem:[%s18521_s3 + $0xa8] sm:$0xff]  }
 0x286   : > { %v1643_v18 = vmax.f32 %v1611_v14, 0.0  ;;  %12683 = vmatmul.mubr.msk.bf16.gmra.mrb[240].mxu0 %vm311_vm3, %v14344_v11 }
 0x287   : > { %12686 = vmatprep.mubr.msk.bf16.mxu0 %vm14616_vm2, %v14614_v1 }
 0x288   : > { %v1654_v20 = vpack.c.bf16 %v1643_v18, %v1642_v17 }
 0x289   : > { %v1615_v21 = vpop.f32.mrb[136].mxu0 }
 0x28a   : > { %v1616_v23 = vadd.f32 %v15124_v32, %v1615_v21  ;;  %v12436_v25 = vpop.f32.mrb[137].mxu0  ;;  %12475 = vmatmul.mubr.msk.bf16.gmra.mrb[132].mxu1 %vm741_vm4, %v1654_v20  ;;  %v14355_v20 = vld [vmem:[%s18521_s3 + $0xb0] sm:$0xff]  }
 0x28b   : > { %v1618_v27 = vpop.f32.mrb[138].mxu0  ;;  %12478 = vmatprep.mubr.msk.bf16.mxu1 %vm14616_vm2, %v14614_v1 }
 0x28c   : > { %v1619_v28 = vadd.f32 %v15124_v32, %v1618_v27  ;;  %v12437_v29 = vpop.f32.mrb[139].mxu0  ;;  %v1644_v31 = vmax.f32 %v1616_v23, 0.0  ;;  %v14351_v27 = vld [vmem:[%s14682_s29 + $0x208] sm:$0xff]  }
 0x28d   : > { %v14359_v29 = vld [vmem:[%s18521_s3 + $0xb8] sm:$0xff]  }
 0x28e   : > { %v1645_v34 = vmax.f32 %v1619_v28, 0.0  ;;  %12687 = vmatmul.mubr.msk.bf16.gmra.mrb[244].mxu0 %vm311_vm3, %v14345_v26 }
 0x28f   : > { %12690 = vmatprep.mubr.msk.bf16.mxu0 %vm14616_vm2, %v14614_v1 }
 0x290   : > { %v1655_v35 = vpack.c.bf16 %v1645_v34, %v1644_v31 }
 0x291   : > { %v1623_v37 = vpop.f32.mrb[140].mxu0 }
 0x292   : > { %v1624_v38 = vadd.f32 %v15124_v32, %v1623_v37  ;;  %v12440_v33 = vpop.f32.mrb[141].mxu0  ;;  %12479 = vmatmul.mubr.msk.bf16.gmra.mrb[136].mxu1 %vm741_vm4, %v1655_v35 }
 0x293   : > { %v1626_v40 = vpop.f32.mrb[142].mxu0  ;;  %12482 = vmatprep.mubr.msk.bf16.mxu1 %vm14616_vm2, %v14614_v1 }
 0x294   : > { %v1627_v42 = vadd.f32 %v15124_v32, %v1626_v40  ;;  %v12441_v44 = vpop.f32.mrb[143].mxu0  ;;  %v1646_v45 = vmax.f32 %v1624_v38, 0.0 }
 0x296   : > { %v1647_v60 = vmax.f32 %v1627_v42, 0.0  ;;  %12691 = vmatmul.mubr.msk.bf16.gmra.mrb[248].mxu0 %vm311_vm3, %v14347_v39  ;;  %v14353_v42 = vld [vmem:[%s14682_s29 + $0x210] sm:$0xff]  }
 0x297   : > { %12742 = vmatprep.mubr.msk.bf16.mxu0 %vm14616_vm2, %v14614_v1 }
 0x298   : > { %v1656_v48 = vpack.c.bf16 %v1647_v60, %v1646_v45 }
 0x299   : > { %v1964_v50 = vpop.f32.mrb[144].mxu0 }
 0x29a   : > { %v1965_v51 = vadd.f32 %v15124_v32, %v1964_v50  ;;  %12483 = vmatmul.mubr.msk.bf16.gmra.mrb[140].mxu1 %vm741_vm4, %v1656_v48  ;;  %v12492_v53 = vpop.f32.mrb[145].mxu0 }
 0x29b   : > { %v1967_v55 = vpop.f32.mrb[146].mxu0  ;;  %12534 = vmatprep.mubr.msk.bf16.mxu1 %vm14616_vm2, %v14614_v1 }
 0x29c   : > { %v1968_v57 = vadd.f32 %v15124_v32, %v1967_v55  ;;  %v12493_v59 = vpop.f32.mrb[147].mxu0  ;;  %v2035_v61 = vmax.f32 %v1965_v51, 0.0 }
 0x29e   : > { %v2036_v62 = vmax.f32 %v1968_v57, 0.0  ;;  %12743 = vmatmul.mubr.msk.bf16.vlgmr.msra.gmra.mrb[252].mxu0 %vm311_vm3, %v14348_v54  ;;  %v14354_v57 = vld [vmem:[%s14682_s29 + $0x218] sm:$0xff]  }
 0x29f   : > { %12823 = vmatpush3.bf16.msra.mxu0 %v15176_v46  ;;  %12746 = vmatprep.mubr.msk.bf16.mxu0 %vm14616_vm2, %v14614_v1 }
 0x2a0   : > { %v2053_v3 = vpack.c.bf16 %v2036_v62, %v2035_v61  ;;  %12824 = vmatprep.subr.bf16.mxu0 %v14614_v1 }
 0x2a1   : > { %v1972_v4 = vpop.f32.mrb[148].mxu0 }
 0x2a2   : > { %v1973_v5 = vadd.f32 %v15124_v32, %v1972_v4  ;;  %v12496_v7 = vpop.f32.mrb[149].mxu0  ;;  %12535 = vmatmul.mubr.msk.bf16.vlgmr.msra.gmra.mrb[144].mxu1 %vm741_vm4, %v2053_v3 }
 0x2a3   : > { %12611 = vmatpush3.bf16.msra.mxu1 %v14349_v2  ;;  %v1975_v11 = vpop.f32.mrb[150].mxu0  ;;  %12538 = vmatprep.mubr.msk.bf16.mxu1 %vm14616_vm2, %v14614_v1 }
 0x2a4   : > { %v1976_v14 = vadd.f32 %v15124_v32, %v1975_v11  ;;  %v12497_v16 = vpop.f32.mrb[151].mxu0  ;;  %12612 = vmatprep.subr.bf16.mxu1 %v14614_v1  ;;  %12825 = vmatpush3.bf16.msra.mxu0 %v14671_v6  ;;  %v2037_v17 = vmax.f32 %v1973_v5, 0.0  ;;  %v14356_v11 = vld [vmem:[%s14682_s29 + $0x220] sm:$0xff]  }
 0x2a5   : > { %12906 = vmatprep.subr.bf16.mxu0 %v14614_v1 }
 0x2a6   : > { %v2038_v18 = vmax.f32 %v1976_v14, 0.0  ;;  %12747 = vmatmul.mubr.msk.bf16.gmra.mrb[0].mxu0 %vm311_vm3, %v14350_v10 }
 0x2a7   : > { %12750 = vmatprep.mubr.msk.bf16.mxu0 %vm14616_vm2, %v14614_v1  ;;  %12613 = vmatpush3.bf16.msra.mxu1 %v14352_v12 }
 0x2a8   : > { %v2054_v21 = vpack.c.bf16 %v2038_v18, %v2037_v17  ;;  %12614 = vmatprep.subr.bf16.mxu1 %v14614_v1 }
 0x2a9   : > { %v1980_v23 = vpop.f32.mrb[152].mxu0 }
 0x2aa   : > { %v1981_v25 = vadd.f32 %v15124_v32, %v1980_v23  ;;  %v12500_v26 = vpop.f32.mrb[153].mxu0  ;;  %12539 = vmatmul.mubr.msk.bf16.gmra.mrb[148].mxu1 %vm741_vm4, %v2054_v21 }
 0x2ab   : > { %v1983_v28 = vpop.f32.mrb[154].mxu0  ;;  %12542 = vmatprep.mubr.msk.bf16.mxu1 %vm14616_vm2, %v14614_v1  ;;  %12615 = vmatpush3.bf16.msra.mxu1 %v14355_v20  ;;  %v14357_v26 = vld [vmem:[%s14682_s29 + $0x228] sm:$0xff]  }
 0x2ac   : > { %v1984_v31 = vadd.f32 %v15124_v32, %v1983_v28  ;;  %v12501_v34 = vpop.f32.mrb[155].mxu0  ;;  %12616 = vmatprep.subr.bf16.mxu1 %v14614_v1  ;;  %v2039_v35 = vmax.f32 %v1981_v25, 0.0 }
 0x2ae   : > { %v2040_v37 = vmax.f32 %v1984_v31, 0.0  ;;  %12751 = vmatmul.mubr.msk.bf16.gmra.mrb[4].mxu0 %vm311_vm3, %v14351_v27 }
 0x2af   : > { %12754 = vmatprep.mubr.msk.bf16.mxu0 %vm14616_vm2, %v14614_v1  ;;  %12617 = vmatpush3.bf16.msra.mxu1 %v14359_v29 }
 0x2b0   : > { %v2055_v38 = vpack.c.bf16 %v2040_v37, %v2039_v35  ;;  %12694 = vmatprep.subr.bf16.mxu1 %v14614_v1 }
 0x2b1   : > { %v1988_v33 = vpop.f32.mrb[156].mxu0 }
 0x2b2   : > { %v1989_v39 = vadd.f32 %v15124_v32, %v1988_v33  ;;  %v12504_v40 = vpop.f32.mrb[157].mxu0  ;;  %12543 = vmatmul.mubr.msk.bf16.gmra.mrb[152].mxu1 %vm741_vm4, %v2055_v38 }
 0x2b3   : > { %v1991_v44 = vpop.f32.mrb[158].mxu0  ;;  %12546 = vmatprep.mubr.msk.bf16.mxu1 %vm14616_vm2, %v14614_v1 }
 0x2b4   : > { %v1992_v45 = vadd.f32 %v15124_v32, %v1991_v44  ;;  %v12505_v60 = vpop.f32.mrb[159].mxu0  ;;  %v2041_v48 = vmax.f32 %v1989_v39, 0.0  ;;  %v14358_v39 = vld [vmem:[%s14682_s29 + $0x230] sm:$0xff]  }
 0x2b6   : > { %v2042_v50 = vmax.f32 %v1992_v45, 0.0  ;;  %12755 = vmatmul.mubr.msk.bf16.gmra.mrb[8].mxu0 %vm311_vm3, %v14353_v42 }
 0x2b7   : > { %12758 = vmatprep.mubr.msk.bf16.mxu0 %vm14616_vm2, %v14614_v1 }
 0x2b8   : > { %v2056_v51 = vpack.c.bf16 %v2042_v50, %v2041_v48 }
 0x2b9   : > { %v1996_v53 = vpop.f32.mrb[160].mxu0 }
 0x2ba   : > { %v1997_v54 = vadd.f32 %v15124_v32, %v1996_v53  ;;  %v12508_v55 = vpop.f32.mrb[161].mxu0  ;;  %12547 = vmatmul.mubr.msk.bf16.gmra.mrb[156].mxu1 %vm741_vm4, %v2056_v51 }
 0x2bb   : > { %v1999_v59 = vpop.f32.mrb[162].mxu0  ;;  %12550 = vmatprep.mubr.msk.bf16.mxu1 %vm14616_vm2, %v14614_v1 }
 0x2bc   : > { %v2000_v61 = vadd.f32 %v15124_v32, %v1999_v59  ;;  %v12509_v62 = vpop.f32.mrb[163].mxu0  ;;  %v2043_v2 = vmax.f32 %v1997_v54, 0.0  ;;  %v14360_v54 = vld [vmem:[%s14682_s29 + $0x238] sm:$0xff]  }
 0x2be   : > { %v2044_v3 = vmax.f32 %v2000_v61, 0.0  ;;  %12759 = vmatmul.mubr.msk.bf16.gmra.mrb[12].mxu0 %vm311_vm3, %v14354_v57 }
 0x2bf   : > { %12762 = vmatprep.mubr.msk.bf16.mxu0 %vm14616_vm2, %v14614_v1 }
 0x2c0   : > { %v2057_v4 = vpack.c.bf16 %v2044_v3, %v2043_v2 }
 0x2c1   : > { %v2004_v5 = vpop.f32.mrb[164].mxu0 }
 0x2c2   : > { %v2005_v7 = vadd.f32 %v15124_v32, %v2004_v5  ;;  %v12512_v10 = vpop.f32.mrb[165].mxu0  ;;  %12551 = vmatmul.mubr.msk.bf16.gmra.mrb[160].mxu1 %vm741_vm4, %v2057_v4 }
 0x2c3   : > { %v2007_v12 = vpop.f32.mrb[166].mxu0  ;;  %12554 = vmatprep.mubr.msk.bf16.mxu1 %vm14616_vm2, %v14614_v1 }
 0x2c4   : > { %v2008_v14 = vadd.f32 %v15124_v32, %v2007_v12  ;;  %v12513_v16 = vpop.f32.mrb[167].mxu0  ;;  %v2045_v17 = vmax.f32 %v2005_v7, 0.0  ;;  %v14361_v7 = vld [vmem:[%s14682_s29 + $0x240] sm:$0xff]  }
 0x2c6   : > { %v2046_v18 = vmax.f32 %v2008_v14, 0.0  ;;  %12763 = vmatmul.mubr.msk.bf16.gmra.mrb[16].mxu0 %vm311_vm3, %v14356_v11 }
 0x2c7   : > { %12766 = vmatprep.mubr.msk.bf16.mxu0 %vm14616_vm2, %v14614_v1 }
 0x2c8   : > { %v2058_v20 = vpack.c.bf16 %v2046_v18, %v2045_v17 }
 0x2c9   : > { %v2012_v21 = vpop.f32.mrb[168].mxu0 }
 0x2ca   : > { %v2013_v23 = vadd.f32 %v15124_v32, %v2012_v21  ;;  %v12516_v25 = vpop.f32.mrb[169].mxu0  ;;  %12555 = vmatmul.mubr.msk.bf16.gmra.mrb[164].mxu1 %vm741_vm4, %v2058_v20 }
 0x2cb   : > { %v2015_v27 = vpop.f32.mrb[170].mxu0  ;;  %12558 = vmatprep.mubr.msk.bf16.mxu1 %vm14616_vm2, %v14614_v1 }
 0x2cc   : > { %v2016_v28 = vadd.f32 %v15124_v32, %v2015_v27  ;;  %v12517_v29 = vpop.f32.mrb[171].mxu0  ;;  %v2047_v31 = vmax.f32 %v2013_v23, 0.0  ;;  %v14362_v23 = vld [vmem:[%s18521_s3 + $0xc0] sm:$0xff]  }
 0x2ce   : > { %v2048_v34 = vmax.f32 %v2016_v28, 0.0  ;;  %12767 = vmatmul.mubr.msk.bf16.gmra.mrb[20].mxu0 %vm311_vm3, %v14357_v26 }
 0x2cf   : > { %12770 = vmatprep.mubr.msk.bf16.mxu0 %vm14616_vm2, %v14614_v1 }
 0x2d0   : > { %v2059_v35 = vpack.c.bf16 %v2048_v34, %v2047_v31  ;;  %v14363_v31 = vld [vmem:[%s14682_s29 + $0x248] sm:$0xff]  }
 0x2d1   : > { %v2020_v37 = vpop.f32.mrb[172].mxu0 }
 0x2d2   : > { %v2021_v38 = vadd.f32 %v15124_v32, %v2020_v37  ;;  %v12520_v33 = vpop.f32.mrb[173].mxu0  ;;  %12559 = vmatmul.mubr.msk.bf16.gmra.mrb[168].mxu1 %vm741_vm4, %v2059_v35 }
 0x2d3   : > { %v2023_v40 = vpop.f32.mrb[174].mxu0  ;;  %12562 = vmatprep.mubr.msk.bf16.mxu1 %vm14616_vm2, %v14614_v1 }
 0x2d4   : > { %v2024_v42 = vadd.f32 %v15124_v32, %v2023_v40  ;;  %v12521_v44 = vpop.f32.mrb[175].mxu0  ;;  %v2049_v45 = vmax.f32 %v2021_v38, 0.0 }
 0x2d6   : > { %v2050_v60 = vmax.f32 %v2024_v42, 0.0  ;;  %12771 = vmatmul.mubr.msk.bf16.gmra.mrb[24].mxu0 %vm311_vm3, %v14358_v39 }
 0x2d7   : > { %12774 = vmatprep.mubr.msk.bf16.mxu0 %vm14616_vm2, %v14614_v1 }
 0x2d8   : > { %v2060_v48 = vpack.c.bf16 %v2050_v60, %v2049_v45  ;;  %v14368_v45 = vld [vmem:[%s18521_s3 + $0xd0] sm:$0xff]  }
 0x2d9   : > { %v2028_v50 = vpop.f32.mrb[176].mxu0 }
 0x2da   : > { %v2029_v51 = vadd.f32 %v15124_v32, %v2028_v50  ;;  %v12524_v53 = vpop.f32.mrb[177].mxu0  ;;  %12563 = vmatmul.mubr.msk.bf16.gmra.mrb[172].mxu1 %vm741_vm4, %v2060_v48 }
 0x2db   : > { %v2031_v55 = vpop.f32.mrb[178].mxu0  ;;  %12566 = vmatprep.mubr.msk.bf16.mxu1 %vm14616_vm2, %v14614_v1 }
 0x2dc   : > { %v2032_v57 = vadd.f32 %v15124_v32, %v2031_v55  ;;  %v12525_v59 = vpop.f32.mrb[179].mxu0  ;;  %v2051_v61 = vmax.f32 %v2029_v51, 0.0 }
 0x2de   : > { %v2052_v62 = vmax.f32 %v2032_v57, 0.0  ;;  %12775 = vmatmul.mubr.msk.bf16.gmra.mrb[28].mxu0 %vm311_vm3, %v14360_v54  ;;  %v14364_v54 = vld [vmem:[%s14682_s29 + $0x250] sm:$0xff]  }
 0x2df   : > { %12826 = vmatprep.mubr.msk.bf16.mxu0 %vm14616_vm2, %v14614_v1 }
 0x2e0   : > { %v2061_v2 = vpack.c.bf16 %v2052_v62, %v2051_v61 }
 0x2e1   : > { %v2369_v3 = vpop.f32.mrb[180].mxu0 }
 0x2e2   : > { %v2370_v4 = vadd.f32 %v15124_v32, %v2369_v3  ;;  %12567 = vmatmul.mubr.msk.bf16.gmra.mrb[176].mxu1 %vm741_vm4, %v2061_v2  ;;  %v12576_v5 = vpop.f32.mrb[181].mxu0 }
 0x2e3   : > { %v2372_v10 = vpop.f32.mrb[182].mxu0  ;;  %12618 = vmatprep.mubr.msk.bf16.mxu1 %vm14616_vm2, %v14614_v1 }
 0x2e4   : > { %v2373_v11 = vadd.f32 %v15124_v32, %v2372_v10  ;;  %v12577_v12 = vpop.f32.mrb[183].mxu0  ;;  %v2440_v16 = vmax.f32 %v2370_v4, 0.0 }
 0x2e5   : > { %v1346_v14 = vpop.f32.mrb[72].mxu1 }
 0x2e6   : > { %v2441_v17 = vmax.f32 %v2373_v11, 0.0  ;;  %v15380_v18 = vadd.f32 %v1346_v14, %v14987_v41  ;;  %v12368_v20 = vpop.f32.mrb[73].mxu1  ;;  %12827 = vmatmul.mubr.msk.bf16.vlgmr.msra.gmra.mrb[32].mxu0 %vm311_vm3, %v14361_v7 }
 0x2e7   : > { %12907 = vmatpush3.bf16.msra.mxu0 %v15176_v46  ;;  %v1349_v21 = vpop.f32.mrb[74].mxu1  ;;  %12830 = vmatprep.mubr.msk.bf16.mxu0 %vm14616_vm2, %v14614_v1 }
 0x2e8   : > { %v2458_v25 = vpack.c.bf16 %v2441_v17, %v2440_v16  ;;  %v15390_v26 = vadd.f32 %v1349_v21, %v14990_v47  ;;  %v12369_v27 = vpop.f32.mrb[75].mxu1  ;;  %12908 = vmatprep.subr.bf16.mxu0 %v14614_v1  ;;  %v14365_v47 = vld [vmem:[%s18521_s3 + $0xc8] sm:$0xff]   ;;  %v14366_v16 = vld [vmem:[%s14682_s29 + $0x258] sm:$0xff]  }
 0x2e9   : > { %v2377_v41 = vpop.f32.mrb[184].mxu0 }
 0x2ea   : > { %v2378_v28 = vadd.f32 %v15124_v32, %v2377_v41  ;;  %v12580_v29 = vpop.f32.mrb[185].mxu0  ;;  %12619 = vmatmul.mubr.msk.bf16.vlgmr.msra.gmra.mrb[180].mxu1 %vm741_vm4, %v2458_v25 }
 0x2eb   : > { %12695 = vmatpush3.bf16.msra.mxu1 %v14362_v23  ;;  %v2380_v34 = vpop.f32.mrb[186].mxu0  ;;  %12622 = vmatprep.mubr.msk.bf16.mxu1 %vm14616_vm2, %v14614_v1 }
 0x2ec   : > { %v2381_v35 = vadd.f32 %v15124_v32, %v2380_v34  ;;  %v12581_v37 = vpop.f32.mrb[187].mxu0  ;;  %12696 = vmatprep.subr.bf16.mxu1 %v14614_v1  ;;  %12909 = vmatpush3.bf16.msra.mxu0 %v14671_v6  ;;  %v2442_v33 = vmax.f32 %v2378_v28, 0.0 }
 0x2ed   : > { %v1354_v38 = vpop.f32.mrb[76].mxu1  ;;  %12990 = vmatprep.subr.bf16.mxu0 %v14614_v1 }
 0x2ee   : > { %v2443_v39 = vmax.f32 %v2381_v35, 0.0  ;;  %v15406_v40 = vadd.f32 %v1354_v38, %v14997_v52  ;;  %v12372_v42 = vpop.f32.mrb[77].mxu1  ;;  %12831 = vmatmul.mubr.msk.bf16.gmra.mrb[36].mxu0 %vm311_vm3, %v14363_v31 }
 0x2ef   : > { %v1357_v44 = vpop.f32.mrb[78].mxu1  ;;  %12834 = vmatprep.mubr.msk.bf16.mxu0 %vm14616_vm2, %v14614_v1  ;;  %12697 = vmatpush3.bf16.msra.mxu1 %v14365_v47 }
 0x2f0   : > { %v2459_v60 = vpack.c.bf16 %v2443_v39, %v2442_v33  ;;  %v15415_v48 = vadd.f32 %v1357_v44, %v15001_v58  ;;  %v12373_v50 = vpop.f32.mrb[79].mxu1  ;;  %12698 = vmatprep.subr.bf16.mxu1 %v14614_v1  ;;  %v14372_v58 = vld [vmem:[%s18521_s3 + $0xd8] sm:$0xff]  }
 0x2f1   : > { %v2385_v52 = vpop.f32.mrb[188].mxu0 }
 0x2f2   : > { %v2386_v51 = vadd.f32 %v15124_v32, %v2385_v52  ;;  %v12584_v53 = vpop.f32.mrb[189].mxu0  ;;  %12623 = vmatmul.mubr.msk.bf16.gmra.mrb[184].mxu1 %vm741_vm4, %v2459_v60 }
 0x2f3   : > { %v2388_v55 = vpop.f32.mrb[190].mxu0  ;;  %12626 = vmatprep.mubr.msk.bf16.mxu1 %vm14616_vm2, %v14614_v1  ;;  %12699 = vmatpush3.bf16.msra.mxu1 %v14368_v45 }
 0x2f4   : > { %v2389_v57 = vadd.f32 %v15124_v32, %v2388_v55  ;;  %v12585_v59 = vpop.f32.mrb[191].mxu0  ;;  %12700 = vmatprep.subr.bf16.mxu1 %v14614_v1  ;;  %v2444_v62 = vmax.f32 %v2386_v51, 0.0 }
 0x2f5   : > { %v1362_v61 = vpop.f32.mrb[80].mxu1 }
 0x2f6   : > { %v2445_v2 = vmax.f32 %v2389_v57, 0.0  ;;  %v15429_v3 = vadd.f32 %v1362_v61, %v15007_v0  ;;  %v12376_v4 = vpop.f32.mrb[81].mxu1  ;;  %12835 = vmatmul.mubr.msk.bf16.gmra.mrb[40].mxu0 %vm311_vm3, %v14364_v54 }
 0x2f7   : > { %v1365_v5 = vpop.f32.mrb[82].mxu1  ;;  %12838 = vmatprep.mubr.msk.bf16.mxu0 %vm14616_vm2, %v14614_v1  ;;  %12701 = vmatpush3.bf16.msra.mxu1 %v14372_v58 }
 0x2f8   : > { %v2460_v7 = vpack.c.bf16 %v2445_v2, %v2444_v62  ;;  %v15435_v10 = vadd.f32 %v1365_v5, %v15010_v8  ;;  %v12377_v11 = vpop.f32.mrb[83].mxu1  ;;  %12778 = vmatprep.subr.bf16.mxu1 %v14614_v1 }
 0x2f9   : > { %v2393_v12 = vpop.f32.mrb[192].mxu0 }
 0x2fa   : > { %v2394_v14 = vadd.f32 %v15124_v32, %v2393_v12  ;;  %v12588_v0 = vpop.f32.mrb[193].mxu0  ;;  %12627 = vmatmul.mubr.msk.bf16.gmra.mrb[188].mxu1 %vm741_vm4, %v2460_v7 }
 0x2fb   : > { %v2396_v17 = vpop.f32.mrb[194].mxu0  ;;  %12630 = vmatprep.mubr.msk.bf16.mxu1 %vm14616_vm2, %v14614_v1 }
 0x2fc   : > { %v2397_v20 = vadd.f32 %v15124_v32, %v2396_v17  ;;  %v12589_v21 = vpop.f32.mrb[195].mxu0  ;;  %v2446_v23 = vmax.f32 %v2394_v14, 0.0 }
 0x2fd   : > { %v1370_v8 = vpop.f32.mrb[84].mxu1 }
 0x2fe   : > { %v2447_v25 = vmax.f32 %v2397_v20, 0.0  ;;  %v15445_v27 = vadd.f32 %v1370_v8, %v15015_v13  ;;  %v12380_v41 = vpop.f32.mrb[85].mxu1  ;;  %12839 = vmatmul.mubr.msk.bf16.gmra.mrb[44].mxu0 %vm311_vm3, %v14366_v16  ;;  %v14367_v13 = vld [vmem:[%s14682_s29 + $0x260] sm:$0xff]  }
 0x2ff   : > { %v1373_v28 = vpop.f32.mrb[86].mxu1  ;;  %12842 = vmatprep.mubr.msk.bf16.mxu0 %vm14616_vm2, %v14614_v1 }
 0x300   : > { %v2461_v29 = vpack.c.bf16 %v2447_v25, %v2446_v23  ;;  %v15451_v31 = vadd.f32 %v1373_v28, %v15018_v19  ;;  %v12381_v34 = vpop.f32.mrb[87].mxu1 }
 0x301   : > { %v2401_v47 = vpop.f32.mrb[196].mxu0 }
 0x302   : > { %v2402_v35 = vadd.f32 %v15124_v32, %v2401_v47  ;;  %v12592_v37 = vpop.f32.mrb[197].mxu0  ;;  %12631 = vmatmul.mubr.msk.bf16.gmra.mrb[192].mxu1 %vm741_vm4, %v2461_v29 }
 0x303   : > { %v2404_v38 = vpop.f32.mrb[198].mxu0  ;;  %12634 = vmatprep.mubr.msk.bf16.mxu1 %vm14616_vm2, %v14614_v1 }
 0x304   : > { %v2405_v33 = vadd.f32 %v15124_v32, %v2404_v38  ;;  %v12593_v39 = vpop.f32.mrb[199].mxu0  ;;  %v2448_v44 = vmax.f32 %v2402_v35, 0.0 }
 0x305   : > { %v1378_v42 = vpop.f32.mrb[88].mxu1 }
 0x306   : > { %v2449_v19 = vmax.f32 %v2405_v33, 0.0  ;;  %v15460_v45 = vadd.f32 %v1378_v42, %v15023_v24  ;;  %v12384_v60 = vpop.f32.mrb[89].mxu1  ;;  %12843 = vmatmul.mubr.msk.bf16.gmra.mrb[48].mxu0 %vm311_vm3, %v14367_v13  ;;  %v14369_v24 = vld [vmem:[%s14682_s29 + $0x268] sm:$0xff]  }
 0x307   : > { %v1381_v50 = vpop.f32.mrb[90].mxu1  ;;  %12846 = vmatprep.mubr.msk.bf16.mxu0 %vm14616_vm2, %v14614_v1 }
 0x308   : > { %v2462_v52 = vpack.c.bf16 %v2449_v19, %v2448_v44  ;;  %v15466_v51 = vadd.f32 %v1381_v50, %v15026_v30  ;;  %v12385_v53 = vpop.f32.mrb[91].mxu1 }
 0x309   : > { %v2409_v54 = vpop.f32.mrb[200].mxu0 }
 0x30a   : > { %v2410_v55 = vadd.f32 %v15124_v32, %v2409_v54  ;;  %v12596_v58 = vpop.f32.mrb[201].mxu0  ;;  %12635 = vmatmul.mubr.msk.bf16.gmra.mrb[196].mxu1 %vm741_vm4, %v2462_v52 }
 0x30b   : > { %v2412_v57 = vpop.f32.mrb[202].mxu0  ;;  %12638 = vmatprep.mubr.msk.bf16.mxu1 %vm14616_vm2, %v14614_v1  ;;  %v15516_v58 = vld [vmem:[%s18520_s2] ss:$0 sm:$0xff] }
 0x30c   : > { %v2413_v59 = vadd.f32 %v15124_v32, %v2412_v57  ;;  %v12597_v61 = vpop.f32.mrb[203].mxu0  ;;  %v2450_v2 = vmax.f32 %v2410_v55, 0.0  ;;  %v14373_v57 = vld [vmem:[%s14682_s29 + $0x280] sm:$0xff]  }
 0x30d   : > { %v1386_v62 = vpop.f32.mrb[92].mxu1 }
 0x30e   : > { %v2451_v30 = vmax.f32 %v2413_v59, 0.0  ;;  %v15475_v4 = vadd.f32 %v1386_v62, %v15031_v36  ;;  %v12388_v5 = vpop.f32.mrb[93].mxu1  ;;  %12847 = vmatmul.mubr.msk.bf16.gmra.mrb[52].mxu0 %vm311_vm3, %v14369_v24  ;;  %v14370_v36 = vld [vmem:[%s14682_s29 + $0x270] sm:$0xff]  }
 0x30f   : > { %v1389_v7 = vpop.f32.mrb[94].mxu1  ;;  %12850 = vmatprep.mubr.msk.bf16.mxu0 %vm14616_vm2, %v14614_v1 }
 0x310   : > { %v2463_v11 = vpack.c.bf16 %v2451_v30, %v2450_v2  ;;  %v15481_v12 = vadd.f32 %v1389_v7, %v15034_v43  ;;  %v12389_v14 = vpop.f32.mrb[95].mxu1 }
 0x311   : > { %v2417_v0 = vpop.f32.mrb[204].mxu0 }
 0x312   : > { %v2418_v16 = vadd.f32 %v15124_v32, %v2417_v0  ;;  %v12600_v17 = vpop.f32.mrb[205].mxu0  ;;  %12639 = vmatmul.mubr.msk.bf16.gmra.mrb[200].mxu1 %vm741_vm4, %v2463_v11 }
 0x313   : > { %v2420_v20 = vpop.f32.mrb[206].mxu0  ;;  %12642 = vmatprep.mubr.msk.bf16.mxu1 %vm14616_vm2, %v14614_v1 }
 0x314   : > { %v2421_v21 = vadd.f32 %v15124_v32, %v2420_v20  ;;  %v12601_v8 = vpop.f32.mrb[207].mxu0  ;;  %v2452_v25 = vmax.f32 %v2418_v16, 0.0 }
 0x315   : > { %v1394_v23 = vpop.f32.mrb[96].mxu1 }
 0x316   : > { %v2453_v43 = vmax.f32 %v2421_v21, 0.0  ;;  %v15490_v41 = vadd.f32 %v1394_v23, %v15039_v49  ;;  %v12392_v28 = vpop.f32.mrb[97].mxu1  ;;  %12851 = vmatmul.mubr.msk.bf16.gmra.mrb[56].mxu0 %vm311_vm3, %v14370_v36  ;;  %v14371_v49 = vld [vmem:[%s14682_s29 + $0x278] sm:$0xff]  }
 0x317   : > { %v1397_v29 = vpop.f32.mrb[98].mxu1  ;;  %12854 = vmatprep.mubr.msk.bf16.mxu0 %vm14616_vm2, %v14614_v1 }
 0x318   : > { %v2464_v34 = vpack.c.bf16 %v2453_v43, %v2452_v25  ;;  %v15496_v47 = vadd.f32 %v1397_v29, %v15042_v56  ;;  %v12393_v35 = vpop.f32.mrb[99].mxu1 }
 0x319   : > { %v2425_v37 = vpop.f32.mrb[208].mxu0  ;;  %v14375_v35 = vld [vmem:[%s18521_s3 + $0xe0] sm:$0xff]  }
 0x31a   : > { %v2426_v13 = vadd.f32 %v15124_v32, %v2425_v37  ;;  %v12604_v38 = vpop.f32.mrb[209].mxu0  ;;  %12643 = vmatmul.mubr.msk.bf16.gmra.mrb[204].mxu1 %vm741_vm4, %v2464_v34 }
 0x31b   : > { %v2428_v33 = vpop.f32.mrb[210].mxu0  ;;  %12646 = vmatprep.mubr.msk.bf16.mxu1 %vm14616_vm2, %v14614_v1 }
 0x31c   : > { %v2429_v39 = vadd.f32 %v15124_v32, %v2428_v33  ;;  %v12605_v42 = vpop.f32.mrb[211].mxu0  ;;  %v2454_v19 = vmax.f32 %v2426_v13, 0.0 }
 0x31d   : > { %v1402_v44 = vpop.f32.mrb[100].mxu1 }
 0x31e   : > { %v2455_v56 = vmax.f32 %v2429_v39, 0.0  ;;  %v15505_v60 = vadd.f32 %v1402_v44, %v15047_v63  ;;  %v12396_v50 = vpop.f32.mrb[101].mxu1  ;;  %12855 = vmatmul.mubr.msk.bf16.gmra.mrb[60].mxu0 %vm311_vm3, %v14371_v49 }
 0x31f   : > { %v1405_v52 = vpop.f32.mrb[102].mxu1  ;;  %12858 = vmatprep.mubr.msk.bf16.mxu0 %vm14616_vm2, %v14614_v1 }
 0x320   : > { %v2465_v53 = vpack.c.bf16 %v2455_v56, %v2454_v19  ;;  %v15511_v54 = vadd.f32 %v1405_v52, %v15050_v9  ;;  %v12397_v32 = vpop.f32.mrb[103].mxu1 }
 0x321   : > { %v2433_v55 = vpop.f32.mrb[212].mxu0 }
 0x322   : > { %v2434_v63 = vadd.f32 %v15516_v58, %v2433_v55  ;;  %v12608_v24 = vpop.f32.mrb[213].mxu0  ;;  %12647 = vmatmul.mubr.msk.bf16.gmra.mrb[208].mxu1 %vm741_vm4, %v2465_v53  ;;  %v14381_v55 = vld [vmem:[%s18521_s3 + $0xf0] sm:$0xff]  }
 0x323   : > { %v2436_v59 = vpop.f32.mrb[214].mxu0  ;;  %12650 = vmatprep.mubr.msk.bf16.mxu1 %vm14616_vm2, %v14614_v1 }
 0x324   : > { %v2437_v9 = vadd.f32 %v15516_v58, %v2436_v59  ;;  %v12609_v61 = vpop.f32.mrb[215].mxu0  ;;  %v2456_v2 = vmax.f32 %v2434_v63, 0.0 }
 0x325   : > { %v1410_v62 = vpop.f32.mrb[104].mxu1  ;;  %v14377_v61 = vld [vmem:[%s14682_s29 + $0x298] sm:$0xff]  }
 0x326   : > { %v2457_v30 = vmax.f32 %v2437_v9, 0.0  ;;  %v15525_v5 = vadd.f32 %v1410_v62, %v15055_v15  ;;  %v12400_v7 = vpop.f32.mrb[105].mxu1  ;;  %12859 = vmatmul.mubr.msk.bf16.gmra.mrb[64].mxu0 %vm311_vm3, %v14373_v57  ;;  %v14374_v15 = vld [vmem:[%s14682_s29 + $0x288] sm:$0xff]  }
 0x327   : > { %v1413_v11 = vpop.f32.mrb[106].mxu1  ;;  %12910 = vmatprep.mubr.msk.bf16.mxu0 %vm14616_vm2, %v14614_v1 }
 0x328   : > { %v2466_v14 = vpack.c.bf16 %v2457_v30, %v2456_v2  ;;  %v15531_v0 = vadd.f32 %v1413_v11, %v15058_v22  ;;  %v12401_v16 = vpop.f32.mrb[107].mxu1 }
 0x329   : > { %v2774_v17 = vpop.f32.mrb[216].mxu0 }
 0x32a   : > { %v2775_v36 = vadd.f32 %v15516_v58, %v2774_v17  ;;  %12651 = vmatmul.mubr.msk.bf16.gmra.mrb[212].mxu1 %vm741_vm4, %v2466_v14  ;;  %v12660_v20 = vpop.f32.mrb[217].mxu0 }
 0x32b   : > { %v2777_v21 = vpop.f32.mrb[218].mxu0  ;;  %12702 = vmatprep.mubr.msk.bf16.mxu1 %vm14616_vm2, %v14614_v1 }
 0x32c   : > { %v2778_v8 = vadd.f32 %v15516_v58, %v2777_v21  ;;  %v12661_v23 = vpop.f32.mrb[219].mxu0  ;;  %v2845_v43 = vmax.f32 %v2775_v36, 0.0 }
 0x32d   : > { %v1751_v25 = vpop.f32.mrb[108].mxu1 }
 0x32e   : > { %v2846_v28 = vmax.f32 %v2778_v8, 0.0  ;;  %v15540_v22 = vadd.f32 %v1751_v25, %v15380_v18  ;;  %v12452_v29 = vpop.f32.mrb[109].mxu1  ;;  %12911 = vmatmul.mubr.msk.bf16.vlgmr.msra.gmra.mrb[68].mxu0 %vm311_vm3, %v14374_v15  ;;  %v14379_v25 = vld [vmem:[%s14682_s29 + $0x2a0] sm:$0xff]  }
 0x32f   : > { %12991 = vmatpush3.bf16.msra.mxu0 %v15176_v46  ;;  %v1754_v34 = vpop.f32.mrb[110].mxu1  ;;  %12914 = vmatprep.mubr.msk.bf16.mxu0 %vm14616_vm2, %v14614_v1  ;;  %v14376_v46 = vld [vmem:[%s14682_s29 + $0x290] sm:$0xff]  }
 0x330   : > { %v2863_v37 = vpack.c.bf16 %v2846_v28, %v2845_v43  ;;  %v15550_v13 = vadd.f32 %v1754_v34, %v15390_v26  ;;  %v12453_v38 = vpop.f32.mrb[111].mxu1  ;;  %12992 = vmatprep.subr.bf16.mxu0 %v14614_v1  ;;  %v14378_v26 = vld [vmem:[%s18521_s3 + $0xe8] sm:$0xff]  }
 0x331   : > { %v2782_v18 = vpop.f32.mrb[220].mxu0 }
 0x332   : > { %v2783_v49 = vadd.f32 %v15516_v58, %v2782_v18  ;;  %v12664_v33 = vpop.f32.mrb[221].mxu0  ;;  %12703 = vmatmul.mubr.msk.bf16.vlgmr.msra.gmra.mrb[216].mxu1 %vm741_vm4, %v2863_v37 }
 0x333   : > { %12779 = vmatpush3.bf16.msra.mxu1 %v14375_v35  ;;  %v2785_v39 = vpop.f32.mrb[222].mxu0  ;;  %12706 = vmatprep.mubr.msk.bf16.mxu1 %vm14616_vm2, %v14614_v1 }
 0x334   : > { %v2786_v42 = vadd.f32 %v15516_v58, %v2785_v39  ;;  %v12665_v44 = vpop.f32.mrb[223].mxu0  ;;  %12780 = vmatprep.subr.bf16.mxu1 %v14614_v1  ;;  %12993 = vmatpush3.bf16.msra.mxu0 %v14671_v6  ;;  %v2847_v56 = vmax.f32 %v2783_v49, 0.0 }
 0x335   : > { %v1759_v19 = vpop.f32.mrb[112].mxu1  ;;  %13074 = vmatprep.subr.bf16.mxu0 %v14614_v1 }
 0x336   : > { %v2848_v50 = vmax.f32 %v2786_v42, 0.0  ;;  %v15566_v52 = vadd.f32 %v1759_v19, %v15406_v40  ;;  %v12456_v53 = vpop.f32.mrb[113].mxu1  ;;  %12915 = vmatmul.mubr.msk.bf16.gmra.mrb[72].mxu0 %vm311_vm3, %v14376_v46 }
 0x337   : > { %v1762_v32 = vpop.f32.mrb[114].mxu1  ;;  %12918 = vmatprep.mubr.msk.bf16.mxu0 %vm14616_vm2, %v14614_v1  ;;  %12781 = vmatpush3.bf16.msra.mxu1 %v14378_v26 }
 0x338   : > { %v2864_v63 = vpack.c.bf16 %v2848_v50, %v2847_v56  ;;  %v15575_v24 = vadd.f32 %v1762_v32, %v15415_v48  ;;  %v12457_v57 = vpop.f32.mrb[115].mxu1  ;;  %12782 = vmatprep.subr.bf16.mxu1 %v14614_v1  ;;  %v14385_v48 = vld [vmem:[%s18521_s3 + $0xf8] sm:$0xff]  }
 0x339   : > { %v2790_v40 = vpop.f32.mrb[224].mxu0 }
 0x33a   : > { %v2791_v59 = vadd.f32 %v15516_v58, %v2790_v40  ;;  %v12668_v9 = vpop.f32.mrb[225].mxu0  ;;  %12707 = vmatmul.mubr.msk.bf16.gmra.mrb[220].mxu1 %vm741_vm4, %v2864_v63 }
 0x33b   : > { %v2793_v62 = vpop.f32.mrb[226].mxu0  ;;  %12710 = vmatprep.mubr.msk.bf16.mxu1 %vm14616_vm2, %v14614_v1  ;;  %12783 = vmatpush3.bf16.msra.mxu1 %v14381_v55 }
 0x33c   : > { %v2794_v2 = vadd.f32 %v15516_v58, %v2793_v62  ;;  %v12669_v30 = vpop.f32.mrb[227].mxu0  ;;  %12784 = vmatprep.subr.bf16.mxu1 %v14614_v1  ;;  %v2849_v11 = vmax.f32 %v2791_v59, 0.0 }
 0x33d   : > { %v1767_v7 = vpop.f32.mrb[116].mxu1 }
 0x33e   : > { %v2850_v14 = vmax.f32 %v2794_v2, 0.0  ;;  %v15589_v16 = vadd.f32 %v1767_v7, %v15429_v3  ;;  %v12460_v17 = vpop.f32.mrb[117].mxu1  ;;  %12919 = vmatmul.mubr.msk.bf16.gmra.mrb[76].mxu0 %vm311_vm3, %v14377_v61 }
 0x33f   : > { %v1770_v36 = vpop.f32.mrb[118].mxu1  ;;  %12922 = vmatprep.mubr.msk.bf16.mxu0 %vm14616_vm2, %v14614_v1  ;;  %12785 = vmatpush3.bf16.msra.mxu1 %v14385_v48 }
 0x340   : > { %v2865_v20 = vpack.c.bf16 %v2850_v14, %v2849_v11  ;;  %v15595_v15 = vadd.f32 %v1770_v36, %v15435_v10  ;;  %v12461_v21 = vpop.f32.mrb[119].mxu1  ;;  %12862 = vmatprep.subr.bf16.mxu1 %v14614_v1 }
 0x341   : > { %v2798_v8 = vpop.f32.mrb[228].mxu0 }
 0x342   : > { %v2799_v23 = vadd.f32 %v15516_v58, %v2798_v8  ;;  %v12672_v3 = vpop.f32.mrb[229].mxu0  ;;  %12711 = vmatmul.mubr.msk.bf16.gmra.mrb[224].mxu1 %vm741_vm4, %v2865_v20 }
 0x343   : > { %v2801_v43 = vpop.f32.mrb[230].mxu0  ;;  %12714 = vmatprep.mubr.msk.bf16.mxu1 %vm14616_vm2, %v14614_v1 }
 0x344   : > { %v2802_v28 = vadd.f32 %v15516_v58, %v2801_v43  ;;  %v12673_v29 = vpop.f32.mrb[231].mxu0  ;;  %v2851_v34 = vmax.f32 %v2799_v23, 0.0 }
 0x345   : > { %v1775_v10 = vpop.f32.mrb[120].mxu1 }
 0x346   : > { %v2852_v35 = vmax.f32 %v2802_v28, 0.0  ;;  %v15605_v37 = vadd.f32 %v1775_v10, %v15445_v27  ;;  %v12464_v38 = vpop.f32.mrb[121].mxu1  ;;  %12923 = vmatmul.mubr.msk.bf16.gmra.mrb[80].mxu0 %vm311_vm3, %v14379_v25  ;;  %v14380_v27 = vld [vmem:[%s14682_s29 + $0x2a8] sm:$0xff]  }
 0x347   : > { %v1778_v18 = vpop.f32.mrb[122].mxu1  ;;  %12926 = vmatprep.mubr.msk.bf16.mxu0 %vm14616_vm2, %v14614_v1 }
 0x348   : > { %v2866_v49 = vpack.c.bf16 %v2852_v35, %v2851_v34  ;;  %v15611_v33 = vadd.f32 %v1778_v18, %v15451_v31  ;;  %v12465_v46 = vpop.f32.mrb[123].mxu1 }
 0x349   : > { %v2806_v39 = vpop.f32.mrb[232].mxu0 }
 0x34a   : > { %v2807_v26 = vadd.f32 %v15516_v58, %v2806_v39  ;;  %v12676_v42 = vpop.f32.mrb[233].mxu0  ;;  %12715 = vmatmul.mubr.msk.bf16.gmra.mrb[228].mxu1 %vm741_vm4, %v2866_v49 }
 0x34b   : > { %v2809_v44 = vpop.f32.mrb[234].mxu0  ;;  %12718 = vmatprep.mubr.msk.bf16.mxu1 %vm14616_vm2, %v14614_v1 }
 0x34c   : > { %v2810_v19 = vadd.f32 %v15516_v58, %v2809_v44  ;;  %v12677_v56 = vpop.f32.mrb[235].mxu0  ;;  %v2853_v53 = vmax.f32 %v2807_v26, 0.0 }
 0x34d   : > { %v1783_v50 = vpop.f32.mrb[124].mxu1 }
 0x34e   : > { %v2854_v31 = vmax.f32 %v2810_v19, 0.0  ;;  %v15620_v32 = vadd.f32 %v1783_v50, %v15460_v45  ;;  %v12468_v55 = vpop.f32.mrb[125].mxu1  ;;  %12927 = vmatmul.mubr.msk.bf16.gmra.mrb[84].mxu0 %vm311_vm3, %v14380_v27  ;;  %v14382_v45 = vld [vmem:[%s14682_s29 + $0x2b0] sm:$0xff]  }
 0x34f   : > { %v1786_v63 = vpop.f32.mrb[126].mxu1  ;;  %12930 = vmatprep.mubr.msk.bf16.mxu0 %vm14616_vm2, %v14614_v1 }
 0x350   : > { %v2867_v57 = vpack.c.bf16 %v2854_v31, %v2853_v53  ;;  %v15626_v40 = vadd.f32 %v1786_v63, %v15466_v51  ;;  %v12469_v59 = vpop.f32.mrb[127].mxu1 }
 0x351   : > { %v2814_v9 = vpop.f32.mrb[236].mxu0 }
 0x352   : > { %v2815_v61 = vadd.f32 %v15516_v58, %v2814_v9  ;;  %v12680_v62 = vpop.f32.mrb[237].mxu0  ;;  %12719 = vmatmul.mubr.msk.bf16.gmra.mrb[232].mxu1 %vm741_vm4, %v2867_v57 }
 0x353   : > { %v2817_v48 = vpop.f32.mrb[238].mxu0  ;;  %12722 = vmatprep.mubr.msk.bf16.mxu1 %vm14616_vm2, %v14614_v1 }
 0x354   : > { %v2818_v2 = vadd.f32 %v15516_v58, %v2817_v48  ;;  %v12681_v30 = vpop.f32.mrb[239].mxu0  ;;  %v2855_v11 = vmax.f32 %v2815_v61, 0.0 }
 0x355   : > { %v1791_v7 = vpop.f32.mrb[128].mxu1 }
 0x356   : > { %v2856_v51 = vmax.f32 %v2818_v2, 0.0  ;;  %v15635_v14 = vadd.f32 %v1791_v7, %v15475_v4  ;;  %v12472_v17 = vpop.f32.mrb[129].mxu1  ;;  %12931 = vmatmul.mubr.msk.bf16.gmra.mrb[88].mxu0 %vm311_vm3, %v14382_v45  ;;  %v14383_v4 = vld [vmem:[%s14682_s29 + $0x2b8] sm:$0xff]  }
 0x357   : > { %v1794_v36 = vpop.f32.mrb[130].mxu1  ;;  %12934 = vmatprep.mubr.msk.bf16.mxu0 %vm14616_vm2, %v14614_v1 }
 0x358   : > { %v2868_v20 = vpack.c.bf16 %v2856_v51, %v2855_v11  ;;  %v15641_v21 = vadd.f32 %v1794_v36, %v15481_v12  ;;  %v12473_v8 = vpop.f32.mrb[131].mxu1 }
 0x359   : > { %v2822_v23 = vpop.f32.mrb[240].mxu0 }
 0x35a   : > { %v2823_v3 = vadd.f32 %v15516_v58, %v2822_v23  ;;  %v12684_v25 = vpop.f32.mrb[241].mxu0  ;;  %12723 = vmatmul.mubr.msk.bf16.gmra.mrb[236].mxu1 %vm741_vm4, %v2868_v20 }
 0x35b   : > { %v2825_v43 = vpop.f32.mrb[242].mxu0  ;;  %12726 = vmatprep.mubr.msk.bf16.mxu1 %vm14616_vm2, %v14614_v1 }
 0x35c   : > { %v2826_v28 = vadd.f32 %v15516_v58, %v2825_v43  ;;  %v12685_v29 = vpop.f32.mrb[243].mxu0  ;;  %v2857_v34 = vmax.f32 %v2823_v3, 0.0 }
 0x35d   : > { %v1799_v10 = vpop.f32.mrb[132].mxu1 }
 0x35e   : > { %v2858_v12 = vmax.f32 %v2826_v28, 0.0  ;;  %v15650_v35 = vadd.f32 %v1799_v10, %v15490_v41  ;;  %v12476_v38 = vpop.f32.mrb[133].mxu1  ;;  %12935 = vmatmul.mubr.msk.bf16.gmra.mrb[92].mxu0 %vm311_vm3, %v14383_v4  ;;  %v14384_v41 = vld [vmem:[%s14682_s29 + $0x2c0] sm:$0xff]  }
 0x35f   : > { %v1802_v18 = vpop.f32.mrb[134].mxu1  ;;  %12938 = vmatprep.mubr.msk.bf16.mxu0 %vm14616_vm2, %v14614_v1 }
 0x360   : > { %v2869_v49 = vpack.c.bf16 %v2858_v12, %v2857_v34  ;;  %v15656_v46 = vadd.f32 %v1802_v18, %v15496_v47  ;;  %v12477_v39 = vpop.f32.mrb[135].mxu1  ;;  %v15701_v18 = vld [vmem:[%s18519_s1] sm:$0xff]  }
 0x361   : > { %v2830_v26 = vpop.f32.mrb[244].mxu0  ;;  %v14388_v39 = vld [vmem:[%s18521_s3 + $0x100] sm:$0xff]  }
 0x362   : > { %v2831_v42 = vadd.f32 %v15516_v58, %v2830_v26  ;;  %v12688_v27 = vpop.f32.mrb[245].mxu0  ;;  %12727 = vmatmul.mubr.msk.bf16.gmra.mrb[240].mxu1 %vm741_vm4, %v2869_v49 }
 0x363   : > { %v2833_v44 = vpop.f32.mrb[246].mxu0  ;;  %12730 = vmatprep.mubr.msk.bf16.mxu1 %vm14616_vm2, %v14614_v1 }
 0x364   : > { %v2834_v19 = vadd.f32 %v15516_v58, %v2833_v44  ;;  %v12689_v56 = vpop.f32.mrb[247].mxu0  ;;  %v2859_v53 = vmax.f32 %v2831_v42, 0.0 }
 0x365   : > { %v1807_v50 = vpop.f32.mrb[136].mxu1 }
 0x366   : > { %v2860_v47 = vmax.f32 %v2834_v19, 0.0  ;;  %v15665_v31 = vadd.f32 %v1807_v50, %v15505_v60  ;;  %v12480_v55 = vpop.f32.mrb[137].mxu1  ;;  %12939 = vmatmul.mubr.msk.bf16.gmra.mrb[96].mxu0 %vm311_vm3, %v14384_v41  ;;  %v14386_v60 = vld [vmem:[%s14682_s29 + $0x2c8] sm:$0xff]   ;;  %v14389_v19 = vld [vmem:[%s14682_s29 + $0x2d8] sm:$0xff]  }
 0x367   : > { %v1810_v63 = vpop.f32.mrb[138].mxu1  ;;  %12942 = vmatprep.mubr.msk.bf16.mxu0 %vm14616_vm2, %v14614_v1 }
 0x368   : > { %v2870_v57 = vpack.c.bf16 %v2860_v47, %v2859_v53  ;;  %v15671_v59 = vadd.f32 %v1810_v63, %v15511_v54  ;;  %v12481_v9 = vpop.f32.mrb[139].mxu1 }
 0x369   : > { %v2838_v61 = vpop.f32.mrb[248].mxu0 }
 0x36a   : > { %v2839_v62 = vadd.f32 %v15516_v58, %v2838_v61  ;;  %v12692_v45 = vpop.f32.mrb[249].mxu0  ;;  %12731 = vmatmul.mubr.msk.bf16.gmra.mrb[244].mxu1 %vm741_vm4, %v2870_v57 }
 0x36b   : > { %v2841_v48 = vpop.f32.mrb[250].mxu0  ;;  %12734 = vmatprep.mubr.msk.bf16.mxu1 %vm14616_vm2, %v14614_v1 }
 0x36c   : > { %v2842_v2 = vadd.f32 %v15516_v58, %v2841_v48  ;;  %v12693_v30 = vpop.f32.mrb[251].mxu0  ;;  %v2861_v11 = vmax.f32 %v2839_v62, 0.0  ;;  %v14394_v62 = vld [vmem:[%s18521_s3 + $0x110] sm:$0xff]  }
 0x36d   : > { %v1815_v7 = vpop.f32.mrb[140].mxu1 }
 0x36e   : > { %v2862_v54 = vmax.f32 %v2842_v2, 0.0  ;;  %v15680_v51 = vadd.f32 %v1815_v7, %v15525_v5  ;;  %v12484_v17 = vpop.f32.mrb[141].mxu1  ;;  %12943 = vmatmul.mubr.msk.bf16.gmra.mrb[100].mxu0 %vm311_vm3, %v14386_v60  ;;  %v14387_v5 = vld [vmem:[%s14682_s29 + $0x2d0] sm:$0xff]   ;;  %v14390_v7 = vld [vmem:[%s14682_s29 + $0x2e0] sm:$0xff]  }
 0x36f   : > { %v1818_v36 = vpop.f32.mrb[142].mxu1  ;;  %12994 = vmatprep.mubr.msk.bf16.mxu0 %vm14616_vm2, %v14614_v1 }
 0x370   : > { %v2871_v20 = vpack.c.bf16 %v2862_v54, %v2861_v11  ;;  %v15686_v8 = vadd.f32 %v1818_v36, %v15531_v0  ;;  %v12485_v23 = vpop.f32.mrb[143].mxu1 }
 0x371   : > { %v3179_v3 = vpop.f32.mrb[252].mxu0 }
 0x372   : > { %v3180_v25 = vadd.f32 %v15516_v58, %v3179_v3  ;;  %12735 = vmatmul.mubr.msk.bf16.gmra.mrb[248].mxu1 %vm741_vm4, %v2871_v20  ;;  %v12744_v4 = vpop.f32.mrb[253].mxu0 }
 0x373   : > { %v3182_v43 = vpop.f32.mrb[254].mxu0  ;;  %12786 = vmatprep.mubr.msk.bf16.mxu1 %vm14616_vm2, %v14614_v1 }
 0x374   : > { %v3183_v28 = vadd.f32 %v15516_v58, %v3182_v43  ;;  %v12745_v29 = vpop.f32.mrb[255].mxu0  ;;  %v3250_v34 = vmax.f32 %v3180_v25, 0.0 }
 0x375   : > { %v2156_v10 = vpop.f32.mrb[144].mxu1 }
 0x376   : > { %v3251_v12 = vmax.f32 %v3183_v28, 0.0  ;;  %v15695_v0 = vadd.f32 %v2156_v10, %v15540_v22  ;;  %v12536_v38 = vpop.f32.mrb[145].mxu1  ;;  %12995 = vmatmul.mubr.msk.bf16.vlgmr.msra.gmra.mrb[104].mxu0 %vm311_vm3, %v14387_v5 }
 0x377   : > { %13075 = vmatpush3.bf16.msra.mxu0 %v15701_v18  ;;  %v2159_v49 = vpop.f32.mrb[146].mxu1  ;;  %12998 = vmatprep.mubr.msk.bf16.mxu0 %vm14616_vm2, %v14614_v1 }
 0x378   : > { %v3268_v22 = vpack.c.bf16 %v3251_v12, %v3250_v34  ;;  %v15710_v26 = vadd.f32 %v2159_v49, %v15550_v13  ;;  %v12537_v42 = vpop.f32.mrb[147].mxu1  ;;  %13076 = vmatprep.subr.bf16.mxu0 %v14614_v1  ;;  %v14391_v13 = vld [vmem:[%s18521_s3 + $0x108] sm:$0xff]  }
 0x379   : > { %v3187_v27 = vpop.f32.mrb[0].mxu0  ;;  %v14392_v34 = vld [vmem:[%s14682_s29 + $0x2e8] sm:$0xff]  }
 0x37a   : > { %v3188_v41 = vadd.f32 %v15516_v58, %v3187_v27  ;;  %v12748_v44 = vpop.f32.mrb[1].mxu0  ;;  %12787 = vmatmul.mubr.msk.bf16.vlgmr.msra.gmra.mrb[252].mxu1 %vm741_vm4, %v3268_v22 }
 0x37b   : > { %12863 = vmatpush3.bf16.msra.mxu1 %v14388_v39  ;;  %v3190_v56 = vpop.f32.mrb[2].mxu0  ;;  %12790 = vmatprep.mubr.msk.bf16.mxu1 %vm14616_vm2, %v14614_v1 }
 0x37c   : > { %v3191_v50 = vadd.f32 %v15516_v58, %v3190_v56  ;;  %v12749_v53 = vpop.f32.mrb[3].mxu0  ;;  %12864 = vmatprep.subr.bf16.mxu1 %v14614_v1  ;;  %13077 = vmatpush3.bf16.msra.mxu0 %v14671_v6  ;;  %v3252_v55 = vmax.f32 %v3188_v41, 0.0 }
 0x37d   : > { %v2164_v47 = vpop.f32.mrb[148].mxu1  ;;  %13158 = vmatprep.subr.bf16.mxu0 %v14614_v1 }
 0x37e   : > { %v3253_v63 = vmax.f32 %v3191_v50, 0.0  ;;  %v15726_v57 = vadd.f32 %v2164_v47, %v15566_v52  ;;  %v12540_v9 = vpop.f32.mrb[149].mxu1  ;;  %12999 = vmatmul.mubr.msk.bf16.gmra.mrb[108].mxu0 %vm311_vm3, %v14389_v19 }
 0x37f   : > { %v2167_v61 = vpop.f32.mrb[150].mxu1  ;;  %13002 = vmatprep.mubr.msk.bf16.mxu0 %vm14616_vm2, %v14614_v1  ;;  %12865 = vmatpush3.bf16.msra.mxu1 %v14391_v13 }
 0x380   : > { %v3269_v45 = vpack.c.bf16 %v3253_v63, %v3252_v55  ;;  %v15735_v60 = vadd.f32 %v2167_v61, %v15575_v24  ;;  %v12541_v48 = vpop.f32.mrb[151].mxu1  ;;  %12866 = vmatprep.subr.bf16.mxu1 %v14614_v1  ;;  %v14398_v24 = vld [vmem:[%s18521_s3 + $0x118] sm:$0xff]  }
 0x381   : > { %v3195_v52 = vpop.f32.mrb[4].mxu0 }
 0x382   : > { %v3196_v2 = vadd.f32 %v15516_v58, %v3195_v52  ;;  %v12752_v30 = vpop.f32.mrb[5].mxu0  ;;  %12791 = vmatmul.mubr.msk.bf16.gmra.mrb[0].mxu1 %vm741_vm4, %v3269_v45 }
 0x383   : > { %v3198_v11 = vpop.f32.mrb[6].mxu0  ;;  %12794 = vmatprep.mubr.msk.bf16.mxu1 %vm14616_vm2, %v14614_v1  ;;  %12867 = vmatpush3.bf16.msra.mxu1 %v14394_v62 }
 0x384   : > { %v3199_v54 = vadd.f32 %v15516_v58, %v3198_v11  ;;  %v12753_v17 = vpop.f32.mrb[7].mxu0  ;;  %12868 = vmatprep.subr.bf16.mxu1 %v14614_v1  ;;  %v3254_v20 = vmax.f32 %v3196_v2, 0.0 }
 0x385   : > { %v2172_v36 = vpop.f32.mrb[152].mxu1 }
 0x386   : > { %v3255_v23 = vmax.f32 %v3199_v54, 0.0  ;;  %v15749_v3 = vadd.f32 %v2172_v36, %v15589_v16  ;;  %v12544_v25 = vpop.f32.mrb[153].mxu1  ;;  %13003 = vmatmul.mubr.msk.bf16.gmra.mrb[112].mxu0 %vm311_vm3, %v14390_v7 }
 0x387   : > { %v2175_v4 = vpop.f32.mrb[154].mxu1  ;;  %13006 = vmatprep.mubr.msk.bf16.mxu0 %vm14616_vm2, %v14614_v1  ;;  %12869 = vmatpush3.bf16.msra.mxu1 %v14398_v24 }
 0x388   : > { %v3270_v5 = vpack.c.bf16 %v3255_v23, %v3254_v20  ;;  %v15755_v43 = vadd.f32 %v2175_v4, %v15595_v15  ;;  %v12545_v28 = vpop.f32.mrb[155].mxu1  ;;  %12946 = vmatprep.subr.bf16.mxu1 %v14614_v1 }
 0x389   : > { %v3203_v29 = vpop.f32.mrb[8].mxu0 }
 0x38a   : > { %v3204_v10 = vadd.f32 %v15516_v58, %v3203_v29  ;;  %v12756_v16 = vpop.f32.mrb[9].mxu0  ;;  %12795 = vmatmul.mubr.msk.bf16.gmra.mrb[4].mxu1 %vm741_vm4, %v3270_v5 }
 0x38b   : > { %v3206_v12 = vpop.f32.mrb[10].mxu0  ;;  %12798 = vmatprep.mubr.msk.bf16.mxu1 %vm14616_vm2, %v14614_v1 }
 0x38c   : > { %v3207_v38 = vadd.f32 %v15516_v58, %v3206_v12  ;;  %v12757_v49 = vpop.f32.mrb[11].mxu0  ;;  %v3256_v39 = vmax.f32 %v3204_v10, 0.0 }
 0x38d   : > { %v2180_v15 = vpop.f32.mrb[156].mxu1 }
 0x38e   : > { %v3257_v22 = vmax.f32 %v3207_v38, 0.0  ;;  %v15765_v42 = vadd.f32 %v2180_v15, %v15605_v37  ;;  %v12548_v27 = vpop.f32.mrb[157].mxu1  ;;  %13007 = vmatmul.mubr.msk.bf16.gmra.mrb[116].mxu0 %vm311_vm3, %v14392_v34  ;;  %v14393_v37 = vld [vmem:[%s14682_s29 + $0x2f0] sm:$0xff]  }
 0x38f   : > { %v2183_v41 = vpop.f32.mrb[158].mxu1  ;;  %13010 = vmatprep.mubr.msk.bf16.mxu0 %vm14616_vm2, %v14614_v1 }
 0x390   : > { %v3271_v44 = vpack.c.bf16 %v3257_v22, %v3256_v39  ;;  %v15771_v19 = vadd.f32 %v2183_v41, %v15611_v33  ;;  %v12549_v56 = vpop.f32.mrb[159].mxu1 }
 0x391   : > { %v3211_v13 = vpop.f32.mrb[12].mxu0 }
 0x392   : > { %v3212_v50 = vadd.f32 %v15516_v58, %v3211_v13  ;;  %v12760_v53 = vpop.f32.mrb[13].mxu0  ;;  %12799 = vmatmul.mubr.msk.bf16.gmra.mrb[8].mxu1 %vm741_vm4, %v3271_v44 }
 0x393   : > { %v3214_v47 = vpop.f32.mrb[14].mxu0  ;;  %12802 = vmatprep.mubr.msk.bf16.mxu1 %vm14616_vm2, %v14614_v1 }
 0x394   : > { %v3215_v55 = vadd.f32 %v15516_v58, %v3214_v47  ;;  %v12761_v63 = vpop.f32.mrb[15].mxu0  ;;  %v3258_v61 = vmax.f32 %v3212_v50, 0.0 }
 0x395   : > { %v2188_v9 = vpop.f32.mrb[160].mxu1 }
 0x396   : > { %v3259_v33 = vmax.f32 %v3215_v55, 0.0  ;;  %v15780_v62 = vadd.f32 %v2188_v9, %v15620_v32  ;;  %v12552_v45 = vpop.f32.mrb[161].mxu1  ;;  %13011 = vmatmul.mubr.msk.bf16.gmra.mrb[120].mxu0 %vm311_vm3, %v14393_v37  ;;  %v14395_v32 = vld [vmem:[%s14682_s29 + $0x2f8] sm:$0xff]  }
 0x397   : > { %v2191_v48 = vpop.f32.mrb[162].mxu1  ;;  %13014 = vmatprep.mubr.msk.bf16.mxu0 %vm14616_vm2, %v14614_v1 }
 0x398   : > { %v3272_v52 = vpack.c.bf16 %v3259_v33, %v3258_v61  ;;  %v15786_v2 = vadd.f32 %v2191_v48, %v15626_v40  ;;  %v12553_v30 = vpop.f32.mrb[163].mxu1 }
 0x399   : > { %v3219_v7 = vpop.f32.mrb[16].mxu0 }
 0x39a   : > { %v3220_v11 = vadd.f32 %v15516_v58, %v3219_v7  ;;  %v12764_v24 = vpop.f32.mrb[17].mxu0  ;;  %12803 = vmatmul.mubr.msk.bf16.gmra.mrb[12].mxu1 %vm741_vm4, %v3272_v52 }
 0x39b   : > { %v3222_v54 = vpop.f32.mrb[18].mxu0  ;;  %12806 = vmatprep.mubr.msk.bf16.mxu1 %vm14616_vm2, %v14614_v1 }
 0x39c   : > { %v3223_v17 = vadd.f32 %v15516_v58, %v3222_v54  ;;  %v12765_v36 = vpop.f32.mrb[19].mxu0  ;;  %v3260_v23 = vmax.f32 %v3220_v11, 0.0 }
 0x39d   : > { %v2196_v20 = vpop.f32.mrb[164].mxu1 }
 0x39e   : > { %v3261_v40 = vmax.f32 %v3223_v17, 0.0  ;;  %v15795_v25 = vadd.f32 %v2196_v20, %v15635_v14  ;;  %v12556_v4 = vpop.f32.mrb[165].mxu1  ;;  %13015 = vmatmul.mubr.msk.bf16.gmra.mrb[124].mxu0 %vm311_vm3, %v14395_v32  ;;  %v14396_v14 = vld [vmem:[%s14682_s29 + $0x300] sm:$0xff]  }
 0x39f   : > { %v2199_v5 = vpop.f32.mrb[166].mxu1  ;;  %13018 = vmatprep.mubr.msk.bf16.mxu0 %vm14616_vm2, %v14614_v1 }
 0x3a0   : > { %v3273_v28 = vpack.c.bf16 %v3261_v40, %v3260_v23  ;;  %v15801_v29 = vadd.f32 %v2199_v5, %v15641_v21  ;;  %v12557_v10 = vpop.f32.mrb[167].mxu1 }
 0x3a1   : > { %v3227_v16 = vpop.f32.mrb[20].mxu0 }
 0x3a2   : > { %v3228_v34 = vadd.f32 %v15516_v58, %v3227_v16  ;;  %v12768_v12 = vpop.f32.mrb[21].mxu0  ;;  %12807 = vmatmul.mubr.msk.bf16.gmra.mrb[16].mxu1 %vm741_vm4, %v3273_v28 }
 0x3a3   : > { %v3230_v38 = vpop.f32.mrb[22].mxu0  ;;  %12810 = vmatprep.mubr.msk.bf16.mxu1 %vm14616_vm2, %v14614_v1 }
 0x3a4   : > { %v3231_v49 = vadd.f32 %v15516_v58, %v3230_v38  ;;  %v12769_v15 = vpop.f32.mrb[23].mxu0  ;;  %v3262_v22 = vmax.f32 %v3228_v34, 0.0 }
 0x3a5   : > { %v2204_v39 = vpop.f32.mrb[168].mxu1 }
 0x3a6   : > { %v3263_v21 = vmax.f32 %v3231_v49, 0.0  ;;  %v15810_v27 = vadd.f32 %v2204_v39, %v15650_v35  ;;  %v12560_v41 = vpop.f32.mrb[169].mxu1  ;;  %13019 = vmatmul.mubr.msk.bf16.gmra.mrb[128].mxu0 %vm311_vm3, %v14396_v14  ;;  %v14397_v35 = vld [vmem:[%s14682_s29 + $0x308] sm:$0xff]  }
 0x3a7   : > { %v2207_v44 = vpop.f32.mrb[170].mxu1  ;;  %13022 = vmatprep.mubr.msk.bf16.mxu0 %vm14616_vm2, %v14614_v1 }
 0x3a8   : > { %v3274_v56 = vpack.c.bf16 %v3263_v21, %v3262_v22  ;;  %v15816_v13 = vadd.f32 %v2207_v44, %v15656_v46  ;;  %v12561_v50 = vpop.f32.mrb[171].mxu1 }
 0x3a9   : > { %v3235_v53 = vpop.f32.mrb[24].mxu0  ;;  %v14401_v50 = vld [vmem:[%s18521_s3 + $0x120] sm:$0xff]  }
 0x3aa   : > { %v3236_v37 = vadd.f32 %v15516_v58, %v3235_v53  ;;  %v12772_v47 = vpop.f32.mrb[25].mxu0  ;;  %12811 = vmatmul.mubr.msk.bf16.gmra.mrb[20].mxu1 %vm741_vm4, %v3274_v56 }
 0x3ab   : > { %v3238_v55 = vpop.f32.mrb[26].mxu0  ;;  %12814 = vmatprep.mubr.msk.bf16.mxu1 %vm14616_vm2, %v14614_v1 }
 0x3ac   : > { %v3239_v63 = vadd.f32 %v15516_v58, %v3238_v55  ;;  %v12773_v9 = vpop.f32.mrb[27].mxu0  ;;  %v3264_v33 = vmax.f32 %v3236_v37, 0.0 }
 0x3ad   : > { %v2212_v61 = vpop.f32.mrb[172].mxu1 }
 0x3ae   : > { %v3265_v46 = vmax.f32 %v3239_v63, 0.0  ;;  %v15825_v45 = vadd.f32 %v2212_v61, %v15665_v31  ;;  %v12564_v48 = vpop.f32.mrb[173].mxu1  ;;  %13023 = vmatmul.mubr.msk.bf16.gmra.mrb[132].mxu0 %vm311_vm3, %v14397_v35  ;;  %v14399_v31 = vld [vmem:[%s14682_s29 + $0x310] sm:$0xff]   ;;  %v14402_v63 = vld [vmem:[%s14682_s29 + $0x320] sm:$0xff]  }
 0x3af   : > { %v2215_v52 = vpop.f32.mrb[174].mxu1  ;;  %13026 = vmatprep.mubr.msk.bf16.mxu0 %vm14616_vm2, %v14614_v1 }
 0x3b0   : > { %v3275_v30 = vpack.c.bf16 %v3265_v46, %v3264_v33  ;;  %v15831_v7 = vadd.f32 %v2215_v52, %v15671_v59  ;;  %v12565_v11 = vpop.f32.mrb[175].mxu1 }
 0x3b1   : > { %v3243_v24 = vpop.f32.mrb[28].mxu0 }
 0x3b2   : > { %v3244_v32 = vadd.f32 %v15516_v58, %v3243_v24  ;;  %v12776_v54 = vpop.f32.mrb[29].mxu0  ;;  %12815 = vmatmul.mubr.msk.bf16.gmra.mrb[24].mxu1 %vm741_vm4, %v3275_v30 }
 0x3b3   : > { %v3246_v17 = vpop.f32.mrb[30].mxu0  ;;  %12818 = vmatprep.mubr.msk.bf16.mxu1 %vm14616_vm2, %v14614_v1 }
 0x3b4   : > { %v3247_v36 = vadd.f32 %v15516_v58, %v3246_v17  ;;  %v12777_v20 = vpop.f32.mrb[31].mxu0  ;;  %v3266_v40 = vmax.f32 %v3244_v32, 0.0  ;;  %v14407_v32 = vld [vmem:[%s18521_s3 + $0x130] sm:$0xff]  }
 0x3b5   : > { %v2220_v23 = vpop.f32.mrb[176].mxu1 }
 0x3b6   : > { %v3267_v59 = vmax.f32 %v3247_v36, 0.0  ;;  %v15840_v4 = vadd.f32 %v2220_v23, %v15680_v51  ;;  %v12568_v5 = vpop.f32.mrb[177].mxu1  ;;  %13027 = vmatmul.mubr.msk.bf16.gmra.mrb[136].mxu0 %vm311_vm3, %v14399_v31  ;;  %v14400_v51 = vld [vmem:[%s14682_s29 + $0x318] sm:$0xff]   ;;  %v14403_v23 = vld [vmem:[%s14682_s29 + $0x328] sm:$0xff]  }
 0x3b7   : > { %v2223_v28 = vpop.f32.mrb[178].mxu1  ;;  %13078 = vmatprep.mubr.msk.bf16.mxu0 %vm14616_vm2, %v14614_v1 }
 0x3b8   : > { %v3276_v10 = vpack.c.bf16 %v3267_v59, %v3266_v40  ;;  %v15846_v16 = vadd.f32 %v2223_v28, %v15686_v8  ;;  %v12569_v34 = vpop.f32.mrb[179].mxu1 }
 0x3b9   : > { %v3584_v12 = vpop.f32.mrb[32].mxu0 }
 0x3ba   : > { %v3585_v14 = vadd.f32 %v15516_v58, %v3584_v12  ;;  %12819 = vmatmul.mubr.msk.bf16.gmra.mrb[28].mxu1 %vm741_vm4, %v3276_v10  ;;  %v12828_v38 = vpop.f32.mrb[33].mxu0 }
 0x3bb   : > { %v3587_v49 = vpop.f32.mrb[34].mxu0  ;;  %12870 = vmatprep.mubr.msk.bf16.mxu1 %vm14616_vm2, %v14614_v1 }
 0x3bc   : > { %v3588_v15 = vadd.f32 %v15516_v58, %v3587_v49  ;;  %v12829_v39 = vpop.f32.mrb[35].mxu0  ;;  %v3655_v21 = vmax.f32 %v3585_v14, 0.0 }
 0x3bd   : > { %v2561_v22 = vpop.f32.mrb[180].mxu1 }
 0x3be   : > { %v3656_v41 = vmax.f32 %v3588_v15, 0.0  ;;  %v15855_v8 = vadd.f32 %v2561_v22, %v15695_v0  ;;  %v12620_v44 = vpop.f32.mrb[181].mxu1  ;;  %13079 = vmatmul.mubr.msk.bf16.vlgmr.msra.gmra.mrb[140].mxu0 %vm311_vm3, %v14400_v51 }
 0x3bf   : > { %13159 = vmatpush3.bf16.msra.mxu0 %v15701_v18  ;;  %v2564_v56 = vpop.f32.mrb[182].mxu1  ;;  %13082 = vmatprep.mubr.msk.bf16.mxu0 %vm14616_vm2, %v14614_v1 }
 0x3c0   : > { %v3673_v53 = vpack.c.bf16 %v3656_v41, %v3655_v21  ;;  %v15865_v37 = vadd.f32 %v2564_v56, %v15710_v26  ;;  %v12621_v47 = vpop.f32.mrb[183].mxu1  ;;  %13160 = vmatprep.subr.bf16.mxu0 %v14614_v1  ;;  %v14404_v26 = vld [vmem:[%s18521_s3 + $0x128] sm:$0xff]   ;;  %v14405_v21 = vld [vmem:[%s14682_s29 + $0x330] sm:$0xff]  }
 0x3c1   : > { %v3592_v0 = vpop.f32.mrb[36].mxu0 }
 0x3c2   : > { %v3593_v35 = vadd.f32 %v15516_v58, %v3592_v0  ;;  %v12832_v55 = vpop.f32.mrb[37].mxu0  ;;  %12871 = vmatmul.mubr.msk.bf16.vlgmr.msra.gmra.mrb[32].mxu1 %vm741_vm4, %v3673_v53 }
 0x3c3   : > { %12947 = vmatpush3.bf16.msra.mxu1 %v14401_v50  ;;  %v3595_v9 = vpop.f32.mrb[38].mxu0  ;;  %12874 = vmatprep.mubr.msk.bf16.mxu1 %vm14616_vm2, %v14614_v1 }
 0x3c4   : > { %v3596_v61 = vadd.f32 %v15516_v58, %v3595_v9  ;;  %v12833_v33 = vpop.f32.mrb[39].mxu0  ;;  %12948 = vmatprep.subr.bf16.mxu1 %v14614_v1  ;;  %13161 = vmatpush3.bf16.msra.mxu0 %v14671_v6  ;;  %v3657_v48 = vmax.f32 %v3593_v35, 0.0 }
 0x3c5   : > { %v2569_v46 = vpop.f32.mrb[184].mxu1  ;;  %13242 = vmatprep.subr.bf16.mxu0 %v14614_v1 }
 0x3c6   : > { %v3658_v52 = vmax.f32 %v3596_v61, 0.0  ;;  %v15881_v30 = vadd.f32 %v2569_v46, %v15726_v57  ;;  %v12624_v11 = vpop.f32.mrb[185].mxu1  ;;  %13083 = vmatmul.mubr.msk.bf16.gmra.mrb[144].mxu0 %vm311_vm3, %v14402_v63 }
 0x3c7   : > { %v2572_v24 = vpop.f32.mrb[186].mxu1  ;;  %13086 = vmatprep.mubr.msk.bf16.mxu0 %vm14616_vm2, %v14614_v1  ;;  %12949 = vmatpush3.bf16.msra.mxu1 %v14404_v26 }
 0x3c8   : > { %v3674_v54 = vpack.c.bf16 %v3658_v52, %v3657_v48  ;;  %v15890_v31 = vadd.f32 %v2572_v24, %v15735_v60  ;;  %v12625_v17 = vpop.f32.mrb[187].mxu1  ;;  %12950 = vmatprep.subr.bf16.mxu1 %v14614_v1  ;;  %v14411_v60 = vld [vmem:[%s18521_s3 + $0x138] sm:$0xff]   ;;  %v15936_v48 = vld [vmem:[%s18520_s2] ss:$0 sm:$0xff] }
 0x3c9   : > { %v3600_v57 = vpop.f32.mrb[40].mxu0 }
 0x3ca   : > { %v3601_v36 = vadd.f32 %v15516_v58, %v3600_v57  ;;  %v12836_v20 = vpop.f32.mrb[41].mxu0  ;;  %12875 = vmatmul.mubr.msk.bf16.gmra.mrb[36].mxu1 %vm741_vm4, %v3674_v54 }
 0x3cb   : > { %v3603_v40 = vpop.f32.mrb[42].mxu0  ;;  %12878 = vmatprep.mubr.msk.bf16.mxu1 %vm14616_vm2, %v14614_v1  ;;  %12951 = vmatpush3.bf16.msra.mxu1 %v14407_v32 }
 0x3cc   : > { %v3604_v59 = vadd.f32 %v15516_v58, %v3603_v40  ;;  %v12837_v5 = vpop.f32.mrb[43].mxu0  ;;  %12952 = vmatprep.subr.bf16.mxu1 %v14614_v1  ;;  %v3659_v10 = vmax.f32 %v3601_v36, 0.0 }
 0x3cd   : > { %v2577_v28 = vpop.f32.mrb[188].mxu1 }
 0x3ce   : > { %v3660_v34 = vmax.f32 %v3604_v59, 0.0  ;;  %v15904_v12 = vadd.f32 %v2577_v28, %v15749_v3  ;;  %v12628_v14 = vpop.f32.mrb[189].mxu1  ;;  %13087 = vmatmul.mubr.msk.bf16.gmra.mrb[148].mxu0 %vm311_vm3, %v14403_v23 }
 0x3cf   : > { %v2580_v38 = vpop.f32.mrb[190].mxu1  ;;  %13090 = vmatprep.mubr.msk.bf16.mxu0 %vm14616_vm2, %v14614_v1  ;;  %12953 = vmatpush3.bf16.msra.mxu1 %v14411_v60 }
 0x3d0   : > { %v3675_v51 = vpack.c.bf16 %v3660_v34, %v3659_v10  ;;  %v15910_v49 = vadd.f32 %v2580_v38, %v15755_v43  ;;  %v12629_v15 = vpop.f32.mrb[191].mxu1  ;;  %13030 = vmatprep.subr.bf16.mxu1 %v14614_v1 }
 0x3d1   : > { %v3608_v39 = vpop.f32.mrb[44].mxu0 }
 0x3d2   : > { %v3609_v22 = vadd.f32 %v15516_v58, %v3608_v39  ;;  %v12840_v3 = vpop.f32.mrb[45].mxu0  ;;  %12879 = vmatmul.mubr.msk.bf16.gmra.mrb[40].mxu1 %vm741_vm4, %v3675_v51 }
 0x3d3   : > { %v3611_v41 = vpop.f32.mrb[46].mxu0  ;;  %12882 = vmatprep.mubr.msk.bf16.mxu1 %vm14616_vm2, %v14614_v1 }
 0x3d4   : > { %v3612_v44 = vadd.f32 %v15516_v58, %v3611_v41  ;;  %v12841_v56 = vpop.f32.mrb[47].mxu0  ;;  %v3661_v50 = vmax.f32 %v3609_v22, 0.0 }
 0x3d5   : > { %v2585_v43 = vpop.f32.mrb[192].mxu1 }
 0x3d6   : > { %v3662_v53 = vmax.f32 %v3612_v44, 0.0  ;;  %v15920_v47 = vadd.f32 %v2585_v43, %v15765_v42  ;;  %v12632_v0 = vpop.f32.mrb[193].mxu1  ;;  %13091 = vmatmul.mubr.msk.bf16.gmra.mrb[152].mxu0 %vm311_vm3, %v14405_v21  ;;  %v14406_v42 = vld [vmem:[%s14682_s29 + $0x338] sm:$0xff]  }
 0x3d7   : > { %v2588_v35 = vpop.f32.mrb[194].mxu1  ;;  %13094 = vmatprep.mubr.msk.bf16.mxu0 %vm14616_vm2, %v14614_v1 }
 0x3d8   : > { %v3676_v55 = vpack.c.bf16 %v3662_v53, %v3661_v50  ;;  %v15926_v63 = vadd.f32 %v2588_v35, %v15771_v19  ;;  %v12633_v9 = vpop.f32.mrb[195].mxu1 }
 0x3d9   : > { %v3616_v26 = vpop.f32.mrb[48].mxu0 }
 0x3da   : > { %v3617_v61 = vadd.f32 %v15516_v58, %v3616_v26  ;;  %v12844_v33 = vpop.f32.mrb[49].mxu0  ;;  %12883 = vmatmul.mubr.msk.bf16.gmra.mrb[44].mxu1 %vm741_vm4, %v3676_v55 }
 0x3db   : > { %v3619_v46 = vpop.f32.mrb[50].mxu0  ;;  %12886 = vmatprep.mubr.msk.bf16.mxu1 %vm14616_vm2, %v14614_v1 }
 0x3dc   : > { %v3620_v19 = vadd.f32 %v15936_v48, %v3619_v46  ;;  %v12845_v52 = vpop.f32.mrb[51].mxu0  ;;  %v3663_v24 = vmax.f32 %v3617_v61, 0.0 }
 0x3dd   : > { %v2593_v11 = vpop.f32.mrb[196].mxu1 }
 0x3de   : > { %v3664_v58 = vmax.f32 %v3620_v19, 0.0  ;;  %v15940_v32 = vadd.f32 %v2593_v11, %v15780_v62  ;;  %v12636_v54 = vpop.f32.mrb[197].mxu1  ;;  %13095 = vmatmul.mubr.msk.bf16.gmra.mrb[156].mxu0 %vm311_vm3, %v14406_v42  ;;  %v14408_v62 = vld [vmem:[%s14682_s29 + $0x340] sm:$0xff]  }
 0x3df   : > { %v2596_v17 = vpop.f32.mrb[198].mxu1  ;;  %13098 = vmatprep.mubr.msk.bf16.mxu0 %vm14616_vm2, %v14614_v1 }
 0x3e0   : > { %v3677_v57 = vpack.c.bf16 %v3664_v58, %v3663_v24  ;;  %v15946_v36 = vadd.f32 %v2596_v17, %v15786_v2  ;;  %v12637_v20 = vpop.f32.mrb[199].mxu1 }
 0x3e1   : > { %v3624_v23 = vpop.f32.mrb[52].mxu0 }
 0x3e2   : > { %v3625_v40 = vadd.f32 %v15936_v48, %v3624_v23  ;;  %v12848_v60 = vpop.f32.mrb[53].mxu0  ;;  %12887 = vmatmul.mubr.msk.bf16.gmra.mrb[48].mxu1 %vm741_vm4, %v3677_v57 }
 0x3e3   : > { %v3627_v59 = vpop.f32.mrb[54].mxu0  ;;  %12890 = vmatprep.mubr.msk.bf16.mxu1 %vm14616_vm2, %v14614_v1 }
 0x3e4   : > { %v3628_v5 = vadd.f32 %v15936_v48, %v3627_v59  ;;  %v12849_v28 = vpop.f32.mrb[55].mxu0  ;;  %v3665_v34 = vmax.f32 %v3625_v40, 0.0 }
 0x3e5   : > { %v2601_v10 = vpop.f32.mrb[200].mxu1 }
 0x3e6   : > { %v3666_v2 = vmax.f32 %v3628_v5, 0.0  ;;  %v15955_v14 = vadd.f32 %v2601_v10, %v15795_v25  ;;  %v12640_v38 = vpop.f32.mrb[201].mxu1  ;;  %13099 = vmatmul.mubr.msk.bf16.gmra.mrb[160].mxu0 %vm311_vm3, %v14408_v62  ;;  %v14409_v25 = vld [vmem:[%s14682_s29 + $0x348] sm:$0xff]  }
 0x3e7   : > { %v2604_v51 = vpop.f32.mrb[202].mxu1  ;;  %13102 = vmatprep.mubr.msk.bf16.mxu0 %vm14616_vm2, %v14614_v1 }
 0x3e8   : > { %v3678_v15 = vpack.c.bf16 %v3666_v2, %v3665_v34  ;;  %v15961_v39 = vadd.f32 %v2604_v51, %v15801_v29  ;;  %v12641_v22 = vpop.f32.mrb[203].mxu1 }
 0x3e9   : > { %v3632_v3 = vpop.f32.mrb[56].mxu0 }
 0x3ea   : > { %v3633_v21 = vadd.f32 %v15936_v48, %v3632_v3  ;;  %v12852_v41 = vpop.f32.mrb[57].mxu0  ;;  %12891 = vmatmul.mubr.msk.bf16.gmra.mrb[52].mxu1 %vm741_vm4, %v3678_v15 }
 0x3eb   : > { %v3635_v44 = vpop.f32.mrb[58].mxu0  ;;  %12894 = vmatprep.mubr.msk.bf16.mxu1 %vm14616_vm2, %v14614_v1 }
 0x3ec   : > { %v3636_v56 = vadd.f32 %v15936_v48, %v3635_v44  ;;  %v12853_v43 = vpop.f32.mrb[59].mxu0  ;;  %v3667_v53 = vmax.f32 %v3633_v21, 0.0 }
 0x3ed   : > { %v2609_v50 = vpop.f32.mrb[204].mxu1 }
 0x3ee   : > { %v3668_v29 = vmax.f32 %v3636_v56, 0.0  ;;  %v15970_v0 = vadd.f32 %v2609_v50, %v15810_v27  ;;  %v12644_v35 = vpop.f32.mrb[205].mxu1  ;;  %13103 = vmatmul.mubr.msk.bf16.gmra.mrb[164].mxu0 %vm311_vm3, %v14409_v25  ;;  %v14410_v27 = vld [vmem:[%s14682_s29 + $0x350] sm:$0xff]  }
 0x3ef   : > { %v2612_v55 = vpop.f32.mrb[206].mxu1  ;;  %13106 = vmatprep.mubr.msk.bf16.mxu0 %vm14616_vm2, %v14614_v1 }
 0x3f0   : > { %v3679_v9 = vpack.c.bf16 %v3668_v29, %v3667_v53  ;;  %v15976_v26 = vadd.f32 %v2612_v55, %v15816_v13  ;;  %v12645_v61 = vpop.f32.mrb[207].mxu1 }
 0x3f1   : > { %v3640_v33 = vpop.f32.mrb[60].mxu0  ;;  %v14414_v61 = vld [vmem:[%s18521_s3 + $0x140] sm:$0xff]  }
 0x3f2   : > { %v3641_v42 = vadd.f32 %v15936_v48, %v3640_v33  ;;  %v12856_v46 = vpop.f32.mrb[61].mxu0  ;;  %12895 = vmatmul.mubr.msk.bf16.gmra.mrb[56].mxu1 %vm741_vm4, %v3679_v9 }
 0x3f3   : > { %v3643_v19 = vpop.f32.mrb[62].mxu0  ;;  %12898 = vmatprep.mubr.msk.bf16.mxu1 %vm14616_vm2, %v14614_v1 }
 0x3f4   : > { %v3644_v52 = vadd.f32 %v15936_v48, %v3643_v19  ;;  %v12857_v11 = vpop.f32.mrb[63].mxu0  ;;  %v3669_v58 = vmax.f32 %v3641_v42, 0.0 }
 0x3f5   : > { %v2617_v24 = vpop.f32.mrb[208].mxu1 }
 0x3f6   : > { %v3670_v13 = vmax.f32 %v3644_v52, 0.0  ;;  %v15985_v54 = vadd.f32 %v2617_v24, %v15825_v45  ;;  %v12648_v17 = vpop.f32.mrb[209].mxu1  ;;  %13107 = vmatmul.mubr.msk.bf16.gmra.mrb[168].mxu0 %vm311_vm3, %v14410_v27  ;;  %v14412_v45 = vld [vmem:[%s14682_s29 + $0x358] sm:$0xff]  }
 0x3f7   : > { %v2620_v57 = vpop.f32.mrb[210].mxu1  ;;  %13110 = vmatprep.mubr.msk.bf16.mxu0 %vm14616_vm2, %v14614_v1 }
 0x3f8   : > { %v3680_v20 = vpack.c.bf16 %v3670_v13, %v3669_v58  ;;  %v15991_v23 = vadd.f32 %v2620_v57, %v15831_v7  ;;  %v12649_v40 = vpop.f32.mrb[211].mxu1 }
 0x3f9   : > { %v3648_v60 = vpop.f32.mrb[64].mxu0 }
 0x3fa   : > { %v3649_v62 = vadd.f32 %v15936_v48, %v3648_v60  ;;  %v12860_v59 = vpop.f32.mrb[65].mxu0  ;;  %12899 = vmatmul.mubr.msk.bf16.gmra.mrb[60].mxu1 %vm741_vm4, %v3680_v20  ;;  %v14420_v60 = vld [vmem:[%s18521_s3 + $0x150] sm:$0xff]  }
 0x3fb   : > { %v3651_v5 = vpop.f32.mrb[66].mxu0  ;;  %12902 = vmatprep.mubr.msk.bf16.mxu1 %vm14616_vm2, %v14614_v1 }
 0x3fc   : > { %v3652_v28 = vadd.f32 %v15936_v48, %v3651_v5  ;;  %v12861_v10 = vpop.f32.mrb[67].mxu0  ;;  %v3671_v2 = vmax.f32 %v3649_v62, 0.0 }
 0x3fd   : > { %v2625_v34 = vpop.f32.mrb[212].mxu1  ;;  %v14416_v10 = vld [vmem:[%s14682_s29 + $0x370] sm:$0xff]  }
 0x3fe   : > { %v3672_v7 = vmax.f32 %v3652_v28, 0.0  ;;  %v16000_v38 = vadd.f32 %v2625_v34, %v15840_v4  ;;  %v12652_v51 = vpop.f32.mrb[213].mxu1  ;;  %13111 = vmatmul.mubr.msk.bf16.gmra.mrb[172].mxu0 %vm311_vm3, %v14412_v45  ;;  %v14413_v4 = vld [vmem:[%s14682_s29 + $0x360] sm:$0xff]  }
 0x3ff   : > { %v2628_v15 = vpop.f32.mrb[214].mxu1  ;;  %13162 = vmatprep.mubr.msk.bf16.mxu0 %vm14616_vm2, %v14614_v1 }
 0x400   : > { %v3681_v22 = vpack.c.bf16 %v3672_v7, %v3671_v2  ;;  %v16006_v3 = vadd.f32 %v2628_v15, %v15846_v16  ;;  %v12653_v21 = vpop.f32.mrb[215].mxu1 }
 0x401   : > { %v3989_v41 = vpop.f32.mrb[68].mxu0 }
 0x402   : > { %v3990_v25 = vadd.f32 %v15936_v48, %v3989_v41  ;;  %12903 = vmatmul.mubr.msk.bf16.gmra.mrb[64].mxu1 %vm741_vm4, %v3681_v22  ;;  %v12912_v44 = vpop.f32.mrb[69].mxu0 }
 0x403   : > { %v3992_v56 = vpop.f32.mrb[70].mxu0  ;;  %12954 = vmatprep.mubr.msk.bf16.mxu1 %vm14616_vm2, %v14614_v1 }
 0x404   : > { %v3993_v43 = vadd.f32 %v15936_v48, %v3992_v56  ;;  %v12913_v50 = vpop.f32.mrb[71].mxu0  ;;  %v4060_v29 = vmax.f32 %v3990_v25, 0.0 }
 0x405   : > { %v2966_v53 = vpop.f32.mrb[216].mxu1 }
 0x406   : > { %v4061_v35 = vmax.f32 %v3993_v43, 0.0  ;;  %v16015_v16 = vadd.f32 %v2966_v53, %v15855_v8  ;;  %v12704_v55 = vpop.f32.mrb[217].mxu1  ;;  %13163 = vmatmul.mubr.msk.bf16.vlgmr.msra.gmra.mrb[176].mxu0 %vm311_vm3, %v14413_v4  ;;  %v14418_v53 = vld [vmem:[%s14682_s29 + $0x378] sm:$0xff]  }
 0x407   : > { %13243 = vmatpush3.bf16.msra.mxu0 %v15701_v18  ;;  %v2969_v9 = vpop.f32.mrb[218].mxu1  ;;  %13166 = vmatprep.mubr.msk.bf16.mxu0 %vm14616_vm2, %v14614_v1  ;;  %v14415_v18 = vld [vmem:[%s14682_s29 + $0x368] sm:$0xff]  }
 0x408   : > { %v4078_v33 = vpack.c.bf16 %v4061_v35, %v4060_v29  ;;  %v16025_v42 = vadd.f32 %v2969_v9, %v15865_v37  ;;  %v12705_v46 = vpop.f32.mrb[219].mxu1  ;;  %13244 = vmatprep.subr.bf16.mxu0 %v14614_v1  ;;  %v14417_v37 = vld [vmem:[%s18521_s3 + $0x148] sm:$0xff]  }
 0x409   : > { %v3997_v8 = vpop.f32.mrb[72].mxu0 }
 0x40a   : > { %v3998_v27 = vadd.f32 %v15936_v48, %v3997_v8  ;;  %v12916_v19 = vpop.f32.mrb[73].mxu0  ;;  %12955 = vmatmul.mubr.msk.bf16.vlgmr.msra.gmra.mrb[68].mxu1 %vm741_vm4, %v4078_v33 }
 0x40b   : > { %13031 = vmatpush3.bf16.msra.mxu1 %v14414_v61  ;;  %v4000_v52 = vpop.f32.mrb[74].mxu0  ;;  %12958 = vmatprep.mubr.msk.bf16.mxu1 %vm14616_vm2, %v14614_v1 }
 0x40c   : > { %v4001_v11 = vadd.f32 %v15936_v48, %v4000_v52  ;;  %v12917_v24 = vpop.f32.mrb[75].mxu0  ;;  %13032 = vmatprep.subr.bf16.mxu1 %v14614_v1  ;;  %13245 = vmatpush3.bf16.msra.mxu0 %v14671_v6  ;;  %v4062_v13 = vmax.f32 %v3998_v27, 0.0 }
 0x40d   : > { %v2974_v58 = vpop.f32.mrb[220].mxu1  ;;  %13326 = vmatprep.subr.bf16.mxu0 %v14614_v1 }
 0x40e   : > { %v4063_v17 = vmax.f32 %v4001_v11, 0.0  ;;  %v16041_v57 = vadd.f32 %v2974_v58, %v15881_v30  ;;  %v12708_v20 = vpop.f32.mrb[221].mxu1  ;;  %13167 = vmatmul.mubr.msk.bf16.gmra.mrb[180].mxu0 %vm311_vm3, %v14415_v18 }
 0x40f   : > { %v2977_v40 = vpop.f32.mrb[222].mxu1  ;;  %13170 = vmatprep.mubr.msk.bf16.mxu0 %vm14616_vm2, %v14614_v1  ;;  %13033 = vmatpush3.bf16.msra.mxu1 %v14417_v37 }
 0x410   : > { %v4079_v62 = vpack.c.bf16 %v4063_v17, %v4062_v13  ;;  %v16050_v59 = vadd.f32 %v2977_v40, %v15890_v31  ;;  %v12709_v45 = vpop.f32.mrb[223].mxu1  ;;  %13034 = vmatprep.subr.bf16.mxu1 %v14614_v1  ;;  %v14424_v31 = vld [vmem:[%s18521_s3 + $0x158] sm:$0xff]  }
 0x411   : > { %v4005_v30 = vpop.f32.mrb[76].mxu0 }
 0x412   : > { %v4006_v5 = vadd.f32 %v15936_v48, %v4005_v30  ;;  %v12920_v28 = vpop.f32.mrb[77].mxu0  ;;  %12959 = vmatmul.mubr.msk.bf16.gmra.mrb[72].mxu1 %vm741_vm4, %v4079_v62 }
 0x413   : > { %v4008_v34 = vpop.f32.mrb[78].mxu0  ;;  %12962 = vmatprep.mubr.msk.bf16.mxu1 %vm14616_vm2, %v14614_v1  ;;  %13035 = vmatpush3.bf16.msra.mxu1 %v14420_v60 }
 0x414   : > { %v4009_v2 = vadd.f32 %v15936_v48, %v4008_v34  ;;  %v12921_v7 = vpop.f32.mrb[79].mxu0  ;;  %13036 = vmatprep.subr.bf16.mxu1 %v14614_v1  ;;  %v4064_v15 = vmax.f32 %v4006_v5, 0.0 }
 0x415   : > { %v2982_v51 = vpop.f32.mrb[224].mxu1 }
 0x416   : > { %v4065_v22 = vmax.f32 %v4009_v2, 0.0  ;;  %v16064_v21 = vadd.f32 %v2982_v51, %v15904_v12  ;;  %v12712_v41 = vpop.f32.mrb[225].mxu1  ;;  %13171 = vmatmul.mubr.msk.bf16.gmra.mrb[184].mxu0 %vm311_vm3, %v14416_v10 }
 0x417   : > { %v2985_v25 = vpop.f32.mrb[226].mxu1  ;;  %13174 = vmatprep.mubr.msk.bf16.mxu0 %vm14616_vm2, %v14614_v1  ;;  %13037 = vmatpush3.bf16.msra.mxu1 %v14424_v31 }
 0x418   : > { %v4080_v44 = vpack.c.bf16 %v4065_v22, %v4064_v15  ;;  %v16070_v4 = vadd.f32 %v2985_v25, %v15910_v49  ;;  %v12713_v56 = vpop.f32.mrb[227].mxu1  ;;  %13114 = vmatprep.subr.bf16.mxu1 %v14614_v1 }
 0x419   : > { %v4013_v43 = vpop.f32.mrb[80].mxu0 }
 0x41a   : > { %v4014_v50 = vadd.f32 %v15936_v48, %v4013_v43  ;;  %v12924_v12 = vpop.f32.mrb[81].mxu0  ;;  %12963 = vmatmul.mubr.msk.bf16.gmra.mrb[76].mxu1 %vm741_vm4, %v4080_v44 }
 0x41b   : > { %v4016_v29 = vpop.f32.mrb[82].mxu0  ;;  %12966 = vmatprep.mubr.msk.bf16.mxu1 %vm14616_vm2, %v14614_v1 }
 0x41c   : > { %v4017_v35 = vadd.f32 %v15936_v48, %v4016_v29  ;;  %v12925_v55 = vpop.f32.mrb[83].mxu0  ;;  %v4066_v9 = vmax.f32 %v4014_v50, 0.0 }
 0x41d   : > { %v2990_v49 = vpop.f32.mrb[228].mxu1 }
 0x41e   : > { %v4067_v61 = vmax.f32 %v4017_v35, 0.0  ;;  %v16080_v33 = vadd.f32 %v2990_v49, %v15920_v47  ;;  %v12716_v46 = vpop.f32.mrb[229].mxu1  ;;  %13175 = vmatmul.mubr.msk.bf16.gmra.mrb[188].mxu0 %vm311_vm3, %v14418_v53  ;;  %v14419_v47 = vld [vmem:[%s14682_s29 + $0x380] sm:$0xff]  }
 0x41f   : > { %v2993_v8 = vpop.f32.mrb[230].mxu1  ;;  %13178 = vmatprep.mubr.msk.bf16.mxu0 %vm14616_vm2, %v14614_v1 }
 0x420   : > { %v4081_v27 = vpack.c.bf16 %v4067_v61, %v4066_v9  ;;  %v16086_v19 = vadd.f32 %v2993_v8, %v15926_v63  ;;  %v12717_v18 = vpop.f32.mrb[231].mxu1 }
 0x421   : > { %v4021_v52 = vpop.f32.mrb[84].mxu0 }
 0x422   : > { %v4022_v37 = vadd.f32 %v15936_v48, %v4021_v52  ;;  %v12928_v11 = vpop.f32.mrb[85].mxu0  ;;  %12967 = vmatmul.mubr.msk.bf16.gmra.mrb[80].mxu1 %vm741_vm4, %v4081_v27 }
 0x423   : > { %v4024_v24 = vpop.f32.mrb[86].mxu0  ;;  %12970 = vmatprep.mubr.msk.bf16.mxu1 %vm14616_vm2, %v14614_v1 }
 0x424   : > { %v4025_v58 = vadd.f32 %v15936_v48, %v4024_v24  ;;  %v12929_v13 = vpop.f32.mrb[87].mxu0  ;;  %v4068_v20 = vmax.f32 %v4022_v37, 0.0 }
 0x425   : > { %v2998_v17 = vpop.f32.mrb[232].mxu1 }
 0x426   : > { %v4069_v63 = vmax.f32 %v4025_v58, 0.0  ;;  %v16095_v40 = vadd.f32 %v2998_v17, %v15940_v32  ;;  %v12720_v60 = vpop.f32.mrb[233].mxu1  ;;  %13179 = vmatmul.mubr.msk.bf16.gmra.mrb[192].mxu0 %vm311_vm3, %v14419_v47  ;;  %v14421_v32 = vld [vmem:[%s14682_s29 + $0x388] sm:$0xff]  }
 0x427   : > { %v3001_v62 = vpop.f32.mrb[234].mxu1  ;;  %13182 = vmatprep.mubr.msk.bf16.mxu0 %vm14616_vm2, %v14614_v1 }
 0x428   : > { %v4082_v45 = vpack.c.bf16 %v4069_v63, %v4068_v20  ;;  %v16101_v30 = vadd.f32 %v3001_v62, %v15946_v36  ;;  %v12721_v5 = vpop.f32.mrb[235].mxu1 }
 0x429   : > { %v4029_v28 = vpop.f32.mrb[88].mxu0 }
 0x42a   : > { %v4030_v10 = vadd.f32 %v15936_v48, %v4029_v28  ;;  %v12932_v34 = vpop.f32.mrb[89].mxu0  ;;  %12971 = vmatmul.mubr.msk.bf16.gmra.mrb[84].mxu1 %vm741_vm4, %v4082_v45 }
 0x42b   : > { %v4032_v31 = vpop.f32.mrb[90].mxu0  ;;  %12974 = vmatprep.mubr.msk.bf16.mxu1 %vm14616_vm2, %v14614_v1 }
 0x42c   : > { %v4033_v2 = vadd.f32 %v15936_v48, %v4032_v31  ;;  %v12933_v7 = vpop.f32.mrb[91].mxu0  ;;  %v4070_v15 = vmax.f32 %v4030_v10, 0.0 }
 0x42d   : > { %v3006_v51 = vpop.f32.mrb[236].mxu1 }
 0x42e   : > { %v4071_v36 = vmax.f32 %v4033_v2, 0.0  ;;  %v16110_v22 = vadd.f32 %v3006_v51, %v15955_v14  ;;  %v12724_v41 = vpop.f32.mrb[237].mxu1  ;;  %13183 = vmatmul.mubr.msk.bf16.gmra.mrb[196].mxu0 %vm311_vm3, %v14421_v32  ;;  %v14422_v14 = vld [vmem:[%s14682_s29 + $0x390] sm:$0xff]  }
 0x42f   : > { %v3009_v25 = vpop.f32.mrb[238].mxu1  ;;  %13186 = vmatprep.mubr.msk.bf16.mxu0 %vm14616_vm2, %v14614_v1 }
 0x430   : > { %v4083_v44 = vpack.c.bf16 %v4071_v36, %v4070_v15  ;;  %v16116_v56 = vadd.f32 %v3009_v25, %v15961_v39  ;;  %v12725_v43 = vpop.f32.mrb[239].mxu1 }
 0x431   : > { %v4037_v50 = vpop.f32.mrb[92].mxu0 }
 0x432   : > { %v4038_v12 = vadd.f32 %v15936_v48, %v4037_v50  ;;  %v12936_v53 = vpop.f32.mrb[93].mxu0  ;;  %12975 = vmatmul.mubr.msk.bf16.gmra.mrb[88].mxu1 %vm741_vm4, %v4083_v44 }
 0x433   : > { %v4040_v29 = vpop.f32.mrb[94].mxu0  ;;  %12978 = vmatprep.mubr.msk.bf16.mxu1 %vm14616_vm2, %v14614_v1 }
 0x434   : > { %v4041_v35 = vadd.f32 %v15936_v48, %v4040_v29  ;;  %v12937_v55 = vpop.f32.mrb[95].mxu0  ;;  %v4072_v9 = vmax.f32 %v4038_v12, 0.0 }
 0x435   : > { %v3014_v49 = vpop.f32.mrb[240].mxu1 }
 0x436   : > { %v4073_v39 = vmax.f32 %v4041_v35, 0.0  ;;  %v16125_v61 = vadd.f32 %v3014_v49, %v15970_v0  ;;  %v12728_v46 = vpop.f32.mrb[241].mxu1  ;;  %13187 = vmatmul.mubr.msk.bf16.gmra.mrb[200].mxu0 %vm311_vm3, %v14422_v14  ;;  %v14423_v0 = vld [vmem:[%s14682_s29 + $0x398] sm:$0xff]  }
 0x437   : > { %v3017_v8 = vpop.f32.mrb[242].mxu1  ;;  %13190 = vmatprep.mubr.msk.bf16.mxu0 %vm14616_vm2, %v14614_v1 }
 0x438   : > { %v4084_v27 = vpack.c.bf16 %v4073_v39, %v4072_v9  ;;  %v16131_v18 = vadd.f32 %v3017_v8, %v15976_v26  ;;  %v12729_v52 = vpop.f32.mrb[243].mxu1  ;;  %v16176_v8 = vld [vmem:[%s18519_s1] sm:$0xff]  }
 0x439   : > { %v4045_v37 = vpop.f32.mrb[96].mxu0  ;;  %v14427_v52 = vld [vmem:[%s18521_s3 + $0x160] sm:$0xff]  }
 0x43a   : > { %v4046_v11 = vadd.f32 %v15936_v48, %v4045_v37  ;;  %v12940_v47 = vpop.f32.mrb[97].mxu0  ;;  %12979 = vmatmul.mubr.msk.bf16.gmra.mrb[92].mxu1 %vm741_vm4, %v4084_v27 }
 0x43b   : > { %v4048_v24 = vpop.f32.mrb[98].mxu0  ;;  %12982 = vmatprep.mubr.msk.bf16.mxu1 %vm14616_vm2, %v14614_v1 }
 0x43c   : > { %v4049_v58 = vadd.f32 %v15936_v48, %v4048_v24  ;;  %v12941_v13 = vpop.f32.mrb[99].mxu0  ;;  %v4074_v20 = vmax.f32 %v4046_v11, 0.0 }
 0x43d   : > { %v3022_v17 = vpop.f32.mrb[244].mxu1 }
 0x43e   : > { %v4075_v26 = vmax.f32 %v4049_v58, 0.0  ;;  %v16140_v63 = vadd.f32 %v3022_v17, %v15985_v54  ;;  %v12732_v60 = vpop.f32.mrb[245].mxu1  ;;  %13191 = vmatmul.mubr.msk.bf16.gmra.mrb[204].mxu0 %vm311_vm3, %v14423_v0  ;;  %v14425_v54 = vld [vmem:[%s14682_s29 + $0x3a0] sm:$0xff]   ;;  %v14428_v58 = vld [vmem:[%s14682_s29 + $0x3b0] sm:$0xff]  }
 0x43f   : > { %v3025_v62 = vpop.f32.mrb[246].mxu1  ;;  %13194 = vmatprep.mubr.msk.bf16.mxu0 %vm14616_vm2, %v14614_v1 }
 0x440   : > { %v4085_v45 = vpack.c.bf16 %v4075_v26, %v4074_v20  ;;  %v16146_v5 = vadd.f32 %v3025_v62, %v15991_v23  ;;  %v12733_v28 = vpop.f32.mrb[247].mxu1 }
 0x441   : > { %v4053_v10 = vpop.f32.mrb[100].mxu0 }
 0x442   : > { %v4054_v34 = vadd.f32 %v15936_v48, %v4053_v10  ;;  %v12944_v32 = vpop.f32.mrb[101].mxu0  ;;  %12983 = vmatmul.mubr.msk.bf16.gmra.mrb[96].mxu1 %vm741_vm4, %v4085_v45 }
 0x443   : > { %v4056_v31 = vpop.f32.mrb[102].mxu0  ;;  %12986 = vmatprep.mubr.msk.bf16.mxu1 %vm14616_vm2, %v14614_v1 }
 0x444   : > { %v4057_v2 = vadd.f32 %v15936_v48, %v4056_v31  ;;  %v12945_v7 = vpop.f32.mrb[103].mxu0  ;;  %v4076_v15 = vmax.f32 %v4054_v34, 0.0  ;;  %v14433_v34 = vld [vmem:[%s18521_s3 + $0x170] sm:$0xff]  }
 0x445   : > { %v3030_v51 = vpop.f32.mrb[248].mxu1 }
 0x446   : > { %v4077_v23 = vmax.f32 %v4057_v2, 0.0  ;;  %v16155_v36 = vadd.f32 %v3030_v51, %v16000_v38  ;;  %v12736_v41 = vpop.f32.mrb[249].mxu1  ;;  %13195 = vmatmul.mubr.msk.bf16.gmra.mrb[208].mxu0 %vm311_vm3, %v14425_v54  ;;  %v14426_v38 = vld [vmem:[%s14682_s29 + $0x3a8] sm:$0xff]   ;;  %v14429_v51 = vld [vmem:[%s14682_s29 + $0x3b8] sm:$0xff]  }
 0x447   : > { %v3033_v25 = vpop.f32.mrb[250].mxu1  ;;  %13246 = vmatprep.mubr.msk.bf16.mxu0 %vm14616_vm2, %v14614_v1 }
 0x448   : > { %v4086_v44 = vpack.c.bf16 %v4077_v23, %v4076_v15  ;;  %v16161_v43 = vadd.f32 %v3033_v25, %v16006_v3  ;;  %v12737_v50 = vpop.f32.mrb[251].mxu1 }
 0x449   : > { %v4394_v12 = vpop.f32.mrb[104].mxu0 }
 0x44a   : > { %v4395_v53 = vadd.f32 %v15936_v48, %v4394_v12  ;;  %12987 = vmatmul.mubr.msk.bf16.gmra.mrb[100].mxu1 %vm741_vm4, %v4086_v44  ;;  %v12996_v14 = vpop.f32.mrb[105].mxu0 }
 0x44b   : > { %v4397_v29 = vpop.f32.mrb[106].mxu0  ;;  %13038 = vmatprep.mubr.msk.bf16.mxu1 %vm14616_vm2, %v14614_v1 }
 0x44c   : > { %v4398_v35 = vadd.f32 %v15936_v48, %v4397_v29  ;;  %v12997_v55 = vpop.f32.mrb[107].mxu0  ;;  %v4465_v9 = vmax.f32 %v4395_v53, 0.0 }
 0x44d   : > { %v3371_v49 = vpop.f32.mrb[252].mxu1 }
 0x44e   : > { %v4466_v39 = vmax.f32 %v4398_v35, 0.0  ;;  %v16170_v3 = vadd.f32 %v3371_v49, %v16015_v16  ;;  %v12788_v46 = vpop.f32.mrb[253].mxu1  ;;  %13247 = vmatmul.mubr.msk.bf16.vlgmr.msra.gmra.mrb[212].mxu0 %vm311_vm3, %v14426_v38 }
 0x44f   : > { %13327 = vmatpush3.bf16.msra.mxu0 %v16176_v8  ;;  %v3374_v27 = vpop.f32.mrb[254].mxu1  ;;  %13250 = vmatprep.mubr.msk.bf16.mxu0 %vm14616_vm2, %v14614_v1 }
 0x450   : > { %v4483_v16 = vpack.c.bf16 %v4466_v39, %v4465_v9  ;;  %v16185_v37 = vadd.f32 %v3374_v27, %v16025_v42  ;;  %v12789_v11 = vpop.f32.mrb[255].mxu1  ;;  %13328 = vmatprep.subr.bf16.mxu0 %v14614_v1  ;;  %v14430_v42 = vld [vmem:[%s18521_s3 + $0x168] sm:$0xff]   ;;  %v14431_v9 = vld [vmem:[%s14682_s29 + $0x3c0] sm:$0xff]  }
 0x451   : > { %v4402_v47 = vpop.f32.mrb[108].mxu0 }
 0x452   : > { %v4403_v0 = vadd.f32 %v15936_v48, %v4402_v47  ;;  %v13000_v24 = vpop.f32.mrb[109].mxu0  ;;  %13039 = vmatmul.mubr.msk.bf16.vlgmr.msra.gmra.mrb[104].mxu1 %vm741_vm4, %v4483_v16 }
 0x453   : > { %13115 = vmatpush3.bf16.msra.mxu1 %v14427_v52  ;;  %v4405_v13 = vpop.f32.mrb[110].mxu0  ;;  %13042 = vmatprep.mubr.msk.bf16.mxu1 %vm14616_vm2, %v14614_v1 }
 0x454   : > { %v4406_v17 = vadd.f32 %v15936_v48, %v4405_v13  ;;  %v13001_v20 = vpop.f32.mrb[111].mxu0  ;;  %13116 = vmatprep.subr.bf16.mxu1 %v14614_v1  ;;  %13329 = vmatpush3.bf16.msra.mxu0 %v14671_v6  ;;  %v4467_v60 = vmax.f32 %v4403_v0, 0.0 }
 0x455   : > { %v3379_v26 = vpop.f32.mrb[0].mxu1  ;;  %13410 = vmatprep.subr.bf16.mxu0 %v14614_v1 }
 0x456   : > { %v4468_v62 = vmax.f32 %v4406_v17, 0.0  ;;  %v16201_v45 = vadd.f32 %v3379_v26, %v16041_v57  ;;  %v12792_v28 = vpop.f32.mrb[1].mxu1  ;;  %13251 = vmatmul.mubr.msk.bf16.gmra.mrb[216].mxu0 %vm311_vm3, %v14428_v58 }
 0x457   : > { %v3382_v10 = vpop.f32.mrb[2].mxu1  ;;  %13254 = vmatprep.mubr.msk.bf16.mxu0 %vm14616_vm2, %v14614_v1  ;;  %13117 = vmatpush3.bf16.msra.mxu1 %v14430_v42 }
 0x458   : > { %v4484_v32 = vpack.c.bf16 %v4468_v62, %v4467_v60  ;;  %v16210_v54 = vadd.f32 %v3382_v10, %v16050_v59  ;;  %v12793_v31 = vpop.f32.mrb[3].mxu1  ;;  %13118 = vmatprep.subr.bf16.mxu1 %v14614_v1  ;;  %v14437_v59 = vld [vmem:[%s18521_s3 + $0x178] sm:$0xff]  }
 0x459   : > { %v4410_v57 = vpop.f32.mrb[112].mxu0 }
 0x45a   : > { %v4411_v2 = vadd.f32 %v15936_v48, %v4410_v57  ;;  %v13004_v7 = vpop.f32.mrb[113].mxu0  ;;  %13043 = vmatmul.mubr.msk.bf16.gmra.mrb[108].mxu1 %vm741_vm4, %v4484_v32 }
 0x45b   : > { %v4413_v15 = vpop.f32.mrb[114].mxu0  ;;  %13046 = vmatprep.mubr.msk.bf16.mxu1 %vm14616_vm2, %v14614_v1  ;;  %13119 = vmatpush3.bf16.msra.mxu1 %v14433_v34 }
 0x45c   : > { %v4414_v23 = vadd.f32 %v15936_v48, %v4413_v15  ;;  %v13005_v41 = vpop.f32.mrb[115].mxu0  ;;  %13120 = vmatprep.subr.bf16.mxu1 %v14614_v1  ;;  %v4469_v44 = vmax.f32 %v4411_v2, 0.0 }
 0x45d   : > { %v3387_v25 = vpop.f32.mrb[4].mxu1 }
 0x45e   : > { %v4470_v50 = vmax.f32 %v4414_v23, 0.0  ;;  %v16224_v12 = vadd.f32 %v3387_v25, %v16064_v21  ;;  %v12796_v53 = vpop.f32.mrb[5].mxu1  ;;  %13255 = vmatmul.mubr.msk.bf16.gmra.mrb[220].mxu0 %vm311_vm3, %v14429_v51 }
 0x45f   : > { %v3390_v14 = vpop.f32.mrb[6].mxu1  ;;  %13258 = vmatprep.mubr.msk.bf16.mxu0 %vm14616_vm2, %v14614_v1  ;;  %13121 = vmatpush3.bf16.msra.mxu1 %v14437_v59 }
 0x460   : > { %v4485_v38 = vpack.c.bf16 %v4470_v50, %v4469_v44  ;;  %v16230_v29 = vadd.f32 %v3390_v14, %v16070_v4  ;;  %v12797_v35 = vpop.f32.mrb[7].mxu1  ;;  %13198 = vmatprep.subr.bf16.mxu1 %v14614_v1 }
 0x461   : > { %v4418_v55 = vpop.f32.mrb[116].mxu0 }
 0x462   : > { %v4419_v49 = vadd.f32 %v15936_v48, %v4418_v55  ;;  %v13008_v21 = vpop.f32.mrb[117].mxu0  ;;  %13047 = vmatmul.mubr.msk.bf16.gmra.mrb[112].mxu1 %vm741_vm4, %v4485_v38 }
 0x463   : > { %v4421_v39 = vpop.f32.mrb[118].mxu0  ;;  %13050 = vmatprep.mubr.msk.bf16.mxu1 %vm14616_vm2, %v14614_v1 }
 0x464   : > { %v4422_v46 = vadd.f32 %v15936_v48, %v4421_v39  ;;  %v13009_v27 = vpop.f32.mrb[119].mxu0  ;;  %v4471_v52 = vmax.f32 %v4419_v49, 0.0 }
 0x465   : > { %v3395_v4 = vpop.f32.mrb[8].mxu1 }
 0x466   : > { %v4472_v16 = vmax.f32 %v4422_v46, 0.0  ;;  %v16240_v11 = vadd.f32 %v3395_v4, %v16080_v33  ;;  %v12800_v47 = vpop.f32.mrb[9].mxu1  ;;  %13259 = vmatmul.mubr.msk.bf16.gmra.mrb[224].mxu0 %vm311_vm3, %v14431_v9  ;;  %v14432_v33 = vld [vmem:[%s14682_s29 + $0x3c8] sm:$0xff]  }
 0x467   : > { %v3398_v0 = vpop.f32.mrb[10].mxu1  ;;  %13262 = vmatprep.mubr.msk.bf16.mxu0 %vm14616_vm2, %v14614_v1 }
 0x468   : > { %v4486_v24 = vpack.c.bf16 %v4472_v16, %v4471_v52  ;;  %v16246_v58 = vadd.f32 %v3398_v0, %v16086_v19  ;;  %v12801_v13 = vpop.f32.mrb[11].mxu1 }
 0x469   : > { %v4426_v42 = vpop.f32.mrb[120].mxu0 }
 0x46a   : > { %v4427_v17 = vadd.f32 %v15936_v48, %v4426_v42  ;;  %v13012_v20 = vpop.f32.mrb[121].mxu0  ;;  %13051 = vmatmul.mubr.msk.bf16.gmra.mrb[116].mxu1 %vm741_vm4, %v4486_v24 }
 0x46b   : > { %v4429_v26 = vpop.f32.mrb[122].mxu0  ;;  %13054 = vmatprep.mubr.msk.bf16.mxu1 %vm14616_vm2, %v14614_v1 }
 0x46c   : > { %v4430_v60 = vadd.f32 %v15936_v48, %v4429_v26  ;;  %v13013_v62 = vpop.f32.mrb[123].mxu0  ;;  %v4473_v10 = vmax.f32 %v4427_v17, 0.0 }
 0x46d   : > { %v3403_v28 = vpop.f32.mrb[12].mxu1 }
 0x46e   : > { %v4474_v19 = vmax.f32 %v4430_v60, 0.0  ;;  %v16255_v34 = vadd.f32 %v3403_v28, %v16095_v40  ;;  %v12804_v32 = vpop.f32.mrb[13].mxu1  ;;  %13263 = vmatmul.mubr.msk.bf16.gmra.mrb[228].mxu0 %vm311_vm3, %v14432_v33  ;;  %v14434_v40 = vld [vmem:[%s14682_s29 + $0x3d0] sm:$0xff]  }
 0x46f   : > { %v3406_v31 = vpop.f32.mrb[14].mxu1  ;;  %13266 = vmatprep.mubr.msk.bf16.mxu0 %vm14616_vm2, %v14614_v1 }
 0x470   : > { %v4487_v57 = vpack.c.bf16 %v4474_v19, %v4473_v10  ;;  %v16261_v2 = vadd.f32 %v3406_v31, %v16101_v30  ;;  %v12805_v7 = vpop.f32.mrb[15].mxu1 }
 0x471   : > { %v4434_v51 = vpop.f32.mrb[124].mxu0 }
 0x472   : > { %v4435_v15 = vadd.f32 %v15936_v48, %v4434_v51  ;;  %v13016_v59 = vpop.f32.mrb[125].mxu0  ;;  %13055 = vmatmul.mubr.msk.bf16.gmra.mrb[120].mxu1 %vm741_vm4, %v4487_v57 }
 0x473   : > { %v4437_v23 = vpop.f32.mrb[126].mxu0  ;;  %13058 = vmatprep.mubr.msk.bf16.mxu1 %vm14616_vm2, %v14614_v1 }
 0x474   : > { %v4438_v41 = vadd.f32 %v15936_v48, %v4437_v23  ;;  %v13017_v25 = vpop.f32.mrb[127].mxu0  ;;  %v4475_v50 = vmax.f32 %v4435_v15, 0.0 }
 0x475   : > { %v3411_v44 = vpop.f32.mrb[16].mxu1 }
 0x476   : > { %v4476_v30 = vmax.f32 %v4438_v41, 0.0  ;;  %v16270_v53 = vadd.f32 %v3411_v44, %v16110_v22  ;;  %v12808_v14 = vpop.f32.mrb[17].mxu1  ;;  %13267 = vmatmul.mubr.msk.bf16.gmra.mrb[232].mxu0 %vm311_vm3, %v14434_v40  ;;  %v14435_v22 = vld [vmem:[%s14682_s29 + $0x3d8] sm:$0xff]  }
 0x477   : > { %v3414_v38 = vpop.f32.mrb[18].mxu1  ;;  %13270 = vmatprep.mubr.msk.bf16.mxu0 %vm14616_vm2, %v14614_v1 }
 0x478   : > { %v4488_v35 = vpack.c.bf16 %v4476_v30, %v4475_v50  ;;  %v16276_v55 = vadd.f32 %v3414_v38, %v16116_v56  ;;  %v12809_v49 = vpop.f32.mrb[19].mxu1 }
 0x479   : > { %v4442_v21 = vpop.f32.mrb[128].mxu0 }
 0x47a   : > { %v4443_v9 = vadd.f32 %v15936_v48, %v4442_v21  ;;  %v13020_v39 = vpop.f32.mrb[129].mxu0  ;;  %13059 = vmatmul.mubr.msk.bf16.gmra.mrb[124].mxu1 %vm741_vm4, %v4488_v35 }
 0x47b   : > { %v4445_v46 = vpop.f32.mrb[130].mxu0  ;;  %13062 = vmatprep.mubr.msk.bf16.mxu1 %vm14616_vm2, %v14614_v1 }
 0x47c   : > { %v4446_v27 = vadd.f32 %v15936_v48, %v4445_v46  ;;  %v13021_v4 = vpop.f32.mrb[131].mxu0  ;;  %v4477_v16 = vmax.f32 %v4443_v9, 0.0 }
 0x47d   : > { %v3419_v52 = vpop.f32.mrb[20].mxu1 }
 0x47e   : > { %v4478_v56 = vmax.f32 %v4446_v27, 0.0  ;;  %v16285_v47 = vadd.f32 %v3419_v52, %v16125_v61  ;;  %v12812_v0 = vpop.f32.mrb[21].mxu1  ;;  %13271 = vmatmul.mubr.msk.bf16.gmra.mrb[236].mxu0 %vm311_vm3, %v14435_v22  ;;  %v14436_v61 = vld [vmem:[%s14682_s29 + $0x3e0] sm:$0xff]  }
 0x47f   : > { %v3422_v24 = vpop.f32.mrb[22].mxu1  ;;  %13274 = vmatprep.mubr.msk.bf16.mxu0 %vm14616_vm2, %v14614_v1 }
 0x480   : > { %v4489_v13 = vpack.c.bf16 %v4478_v56, %v4477_v16  ;;  %v16291_v42 = vadd.f32 %v3422_v24, %v16131_v18  ;;  %v12813_v17 = vpop.f32.mrb[23].mxu1 }
 0x481   : > { %v4450_v20 = vpop.f32.mrb[132].mxu0  ;;  %v14440_v17 = vld [vmem:[%s18521_s3 + $0x180] sm:$0xff]  }
 0x482   : > { %v4451_v33 = vadd.f32 %v15936_v48, %v4450_v20  ;;  %v13024_v26 = vpop.f32.mrb[133].mxu0  ;;  %13063 = vmatmul.mubr.msk.bf16.gmra.mrb[128].mxu1 %vm741_vm4, %v4489_v13 }
 0x483   : > { %v4453_v60 = vpop.f32.mrb[134].mxu0  ;;  %13066 = vmatprep.mubr.msk.bf16.mxu1 %vm14616_vm2, %v14614_v1 }
 0x484   : > { %v4454_v62 = vadd.f32 %v15936_v48, %v4453_v60  ;;  %v13025_v28 = vpop.f32.mrb[135].mxu0  ;;  %v4479_v19 = vmax.f32 %v4451_v33, 0.0 }
 0x485   : > { %v3427_v10 = vpop.f32.mrb[24].mxu1 }
 0x486   : > { %v4480_v18 = vmax.f32 %v4454_v62, 0.0  ;;  %v16300_v32 = vadd.f32 %v3427_v10, %v16140_v63  ;;  %v12816_v31 = vpop.f32.mrb[25].mxu1  ;;  %13275 = vmatmul.mubr.msk.bf16.gmra.mrb[240].mxu0 %vm311_vm3, %v14436_v61  ;;  %v14438_v63 = vld [vmem:[%s14682_s29 + $0x3e8] sm:$0xff]   ;;  %v14441_v62 = vld [vmem:[%s14682_s29 + $0x3f8] sm:$0xff]   ;;  %v16354_v10 = vld [vmem:[%s18520_s2] ss:$0 sm:$0xff] }
 0x487   : > { %v3430_v57 = vpop.f32.mrb[26].mxu1  ;;  %13278 = vmatprep.mubr.msk.bf16.mxu0 %vm14616_vm2, %v14614_v1 }
 0x488   : > { %v4490_v7 = vpack.c.bf16 %v4480_v18, %v4479_v19  ;;  %v16306_v51 = vadd.f32 %v3430_v57, %v16146_v5  ;;  %v12817_v15 = vpop.f32.mrb[27].mxu1 }
 0x489   : > { %v4458_v59 = vpop.f32.mrb[136].mxu0 }
 0x48a   : > { %v4459_v40 = vadd.f32 %v15936_v48, %v4458_v59  ;;  %v13028_v23 = vpop.f32.mrb[137].mxu0  ;;  %13067 = vmatmul.mubr.msk.bf16.gmra.mrb[132].mxu1 %vm741_vm4, %v4490_v7 }
 0x48b   : > { %v4461_v41 = vpop.f32.mrb[138].mxu0  ;;  %13070 = vmatprep.mubr.msk.bf16.mxu1 %vm14616_vm2, %v14614_v1 }
 0x48c   : > { %v4462_v25 = vadd.f32 %v15936_v48, %v4461_v41  ;;  %v13029_v44 = vpop.f32.mrb[139].mxu0  ;;  %v4481_v30 = vmax.f32 %v4459_v40, 0.0  ;;  %v14446_v40 = vld [vmem:[%s18521_s3 + $0x190] sm:$0xff]  }
 0x48d   : > { %v3435_v50 = vpop.f32.mrb[28].mxu1 }
 0x48e   : > { %v4482_v5 = vmax.f32 %v4462_v25, 0.0  ;;  %v16315_v14 = vadd.f32 %v3435_v50, %v16155_v36  ;;  %v12820_v38 = vpop.f32.mrb[29].mxu1  ;;  %13279 = vmatmul.mubr.msk.bf16.gmra.mrb[244].mxu0 %vm311_vm3, %v14438_v63  ;;  %v14439_v36 = vld [vmem:[%s14682_s29 + $0x3f0] sm:$0xff]   ;;  %v14442_v50 = vld [vmem:[%s14682_s29 + $0x400] sm:$0xff]  }
 0x48f   : > { %v3438_v35 = vpop.f32.mrb[30].mxu1  ;;  %13330 = vmatprep.mubr.msk.bf16.mxu0 %vm14616_vm2, %v14614_v1 }
 0x490   : > { %v4491_v49 = vpack.c.bf16 %v4482_v5, %v4481_v30  ;;  %v16321_v21 = vadd.f32 %v3438_v35, %v16161_v43  ;;  %v12821_v9 = vpop.f32.mrb[31].mxu1 }
 0x491   : > { %v4799_v39 = vpop.f32.mrb[140].mxu0 }
 0x492   : > { %v4800_v22 = vadd.f32 %v15936_v48, %v4799_v39  ;;  %13071 = vmatmul.mubr.msk.bf16.gmra.mrb[136].mxu1 %vm741_vm4, %v4491_v49  ;;  %v13080_v46 = vpop.f32.mrb[141].mxu0 }
 0x493   : > { %v4802_v27 = vpop.f32.mrb[142].mxu0  ;;  %13122 = vmatprep.mubr.msk.bf16.mxu1 %vm14616_vm2, %v14614_v1 }
 0x494   : > { %v4803_v4 = vadd.f32 %v15936_v48, %v4802_v27  ;;  %v13081_v52 = vpop.f32.mrb[143].mxu0  ;;  %v4870_v56 = vmax.f32 %v4800_v22, 0.0 }
 0x495   : > { %v3776_v16 = vpop.f32.mrb[32].mxu1 }
 0x496   : > { %v4871_v0 = vmax.f32 %v4803_v4, 0.0  ;;  %v16330_v43 = vadd.f32 %v3776_v16, %v16170_v3  ;;  %v12872_v24 = vpop.f32.mrb[33].mxu1  ;;  %13331 = vmatmul.mubr.msk.bf16.vlgmr.msra.gmra.mrb[248].mxu0 %vm311_vm3, %v14439_v36 }
 0x497   : > { %13411 = vmatpush3.bf16.msra.mxu0 %v16176_v8  ;;  %v3779_v13 = vpop.f32.mrb[34].mxu1  ;;  %13334 = vmatprep.mubr.msk.bf16.mxu0 %vm14616_vm2, %v14614_v1 }
 0x498   : > { %v4888_v20 = vpack.c.bf16 %v4871_v0, %v4870_v56  ;;  %v16340_v33 = vadd.f32 %v3779_v13, %v16185_v37  ;;  %v12873_v26 = vpop.f32.mrb[35].mxu1  ;;  %13412 = vmatprep.subr.bf16.mxu0 %v14614_v1  ;;  %v14443_v37 = vld [vmem:[%s18521_s3 + $0x188] sm:$0xff]  }
 0x499   : > { %v4807_v3 = vpop.f32.mrb[144].mxu0  ;;  %v14444_v56 = vld [vmem:[%s14682_s29 + $0x408] sm:$0xff]  }
 0x49a   : > { %v4808_v61 = vadd.f32 %v15936_v48, %v4807_v3  ;;  %v13084_v60 = vpop.f32.mrb[145].mxu0  ;;  %13123 = vmatmul.mubr.msk.bf16.vlgmr.msra.gmra.mrb[140].mxu1 %vm741_vm4, %v4888_v20 }
 0x49b   : > { %13199 = vmatpush3.bf16.msra.mxu1 %v14440_v17  ;;  %v4810_v28 = vpop.f32.mrb[146].mxu0  ;;  %13126 = vmatprep.mubr.msk.bf16.mxu1 %vm14616_vm2, %v14614_v1 }
 0x49c   : > { %v4811_v48 = vadd.f32 %v16354_v10, %v4810_v28  ;;  %v13085_v19 = vpop.f32.mrb[147].mxu0  ;;  %13200 = vmatprep.subr.bf16.mxu1 %v14614_v1  ;;  %13413 = vmatpush3.bf16.msra.mxu0 %v14671_v6  ;;  %v4872_v31 = vmax.f32 %v4808_v61, 0.0 }
 0x49d   : > { %v3784_v18 = vpop.f32.mrb[36].mxu1  ;;  %13494 = vmatprep.subr.bf16.mxu0 %v14614_v1 }
 0x49e   : > { %v4873_v57 = vmax.f32 %v4811_v48, 0.0  ;;  %v16361_v7 = vadd.f32 %v3784_v18, %v16201_v45  ;;  %v12876_v15 = vpop.f32.mrb[37].mxu1  ;;  %13335 = vmatmul.mubr.msk.bf16.gmra.mrb[252].mxu0 %vm311_vm3, %v14441_v62 }
 0x49f   : > { %v3787_v59 = vpop.f32.mrb[38].mxu1  ;;  %13338 = vmatprep.mubr.msk.bf16.mxu0 %vm14616_vm2, %v14614_v1  ;;  %13201 = vmatpush3.bf16.msra.mxu1 %v14443_v37 }
 0x4a0   : > { %v4889_v23 = vpack.c.bf16 %v4873_v57, %v4872_v31  ;;  %v16370_v63 = vadd.f32 %v3787_v59, %v16210_v54  ;;  %v12877_v41 = vpop.f32.mrb[39].mxu1  ;;  %13202 = vmatprep.subr.bf16.mxu1 %v14614_v1  ;;  %v14450_v54 = vld [vmem:[%s18521_s3 + $0x198] sm:$0xff]  }
 0x4a1   : > { %v4815_v45 = vpop.f32.mrb[148].mxu0 }
 0x4a2   : > { %v4816_v25 = vadd.f32 %v16354_v10, %v4815_v45  ;;  %v13088_v44 = vpop.f32.mrb[149].mxu0  ;;  %13127 = vmatmul.mubr.msk.bf16.gmra.mrb[144].mxu1 %vm741_vm4, %v4889_v23 }
 0x4a3   : > { %v4818_v30 = vpop.f32.mrb[150].mxu0  ;;  %13130 = vmatprep.mubr.msk.bf16.mxu1 %vm14616_vm2, %v14614_v1  ;;  %13203 = vmatpush3.bf16.msra.mxu1 %v14446_v40 }
 0x4a4   : > { %v4819_v5 = vadd.f32 %v16354_v10, %v4818_v30  ;;  %v13089_v38 = vpop.f32.mrb[151].mxu0  ;;  %13204 = vmatprep.subr.bf16.mxu1 %v14614_v1  ;;  %v4874_v49 = vmax.f32 %v4816_v25, 0.0 }
 0x4a5   : > { %v3792_v35 = vpop.f32.mrb[40].mxu1 }
 0x4a6   : > { %v4875_v9 = vmax.f32 %v4819_v5, 0.0  ;;  %v16384_v39 = vadd.f32 %v3792_v35, %v16224_v12  ;;  %v12880_v22 = vpop.f32.mrb[41].mxu1  ;;  %13339 = vmatmul.mubr.msk.bf16.gmra.mrb[0].mxu0 %vm311_vm3, %v14442_v50 }
 0x4a7   : > { %v3795_v46 = vpop.f32.mrb[42].mxu1  ;;  %13342 = vmatprep.mubr.msk.bf16.mxu0 %vm14616_vm2, %v14614_v1  ;;  %13205 = vmatpush3.bf16.msra.mxu1 %v14450_v54 }
 0x4a8   : > { %v4890_v36 = vpack.c.bf16 %v4875_v9, %v4874_v49  ;;  %v16390_v27 = vadd.f32 %v3795_v46, %v16230_v29  ;;  %v12881_v4 = vpop.f32.mrb[43].mxu1  ;;  %13282 = vmatprep.subr.bf16.mxu1 %v14614_v1 }
 0x4a9   : > { %v4823_v52 = vpop.f32.mrb[152].mxu0 }
 0x4aa   : > { %v4824_v16 = vadd.f32 %v16354_v10, %v4823_v52  ;;  %v13092_v12 = vpop.f32.mrb[153].mxu0  ;;  %13131 = vmatmul.mubr.msk.bf16.gmra.mrb[148].mxu1 %vm741_vm4, %v4890_v36 }
 0x4ab   : > { %v4826_v0 = vpop.f32.mrb[154].mxu0  ;;  %13134 = vmatprep.mubr.msk.bf16.mxu1 %vm14616_vm2, %v14614_v1 }
 0x4ac   : > { %v4827_v24 = vadd.f32 %v16354_v10, %v4826_v0  ;;  %v13093_v13 = vpop.f32.mrb[155].mxu0  ;;  %v4876_v17 = vmax.f32 %v4824_v16, 0.0 }
 0x4ad   : > { %v3800_v29 = vpop.f32.mrb[44].mxu1 }
 0x4ae   : > { %v4877_v20 = vmax.f32 %v4827_v24, 0.0  ;;  %v16400_v26 = vadd.f32 %v3800_v29, %v16240_v11  ;;  %v12884_v3 = vpop.f32.mrb[45].mxu1  ;;  %13343 = vmatmul.mubr.msk.bf16.gmra.mrb[4].mxu0 %vm311_vm3, %v14444_v56  ;;  %v14445_v11 = vld [vmem:[%s14682_s29 + $0x410] sm:$0xff]  }
 0x4af   : > { %v3803_v61 = vpop.f32.mrb[46].mxu1  ;;  %13346 = vmatprep.mubr.msk.bf16.mxu0 %vm14616_vm2, %v14614_v1 }
 0x4b0   : > { %v4891_v60 = vpack.c.bf16 %v4877_v20, %v4876_v17  ;;  %v16406_v62 = vadd.f32 %v3803_v61, %v16246_v58  ;;  %v12885_v28 = vpop.f32.mrb[47].mxu1 }
 0x4b1   : > { %v4831_v37 = vpop.f32.mrb[156].mxu0 }
 0x4b2   : > { %v4832_v48 = vadd.f32 %v16354_v10, %v4831_v37  ;;  %v13096_v19 = vpop.f32.mrb[157].mxu0  ;;  %13135 = vmatmul.mubr.msk.bf16.gmra.mrb[152].mxu1 %vm741_vm4, %v4891_v60 }
 0x4b3   : > { %v4834_v18 = vpop.f32.mrb[158].mxu0  ;;  %13138 = vmatprep.mubr.msk.bf16.mxu1 %vm14616_vm2, %v14614_v1 }
 0x4b4   : > { %v4835_v31 = vadd.f32 %v16354_v10, %v4834_v18  ;;  %v13097_v57 = vpop.f32.mrb[159].mxu0  ;;  %v4878_v59 = vmax.f32 %v4832_v48, 0.0 }
 0x4b5   : > { %v3808_v15 = vpop.f32.mrb[48].mxu1 }
 0x4b6   : > { %v4879_v58 = vmax.f32 %v4835_v31, 0.0  ;;  %v16415_v40 = vadd.f32 %v3808_v15, %v16255_v34  ;;  %v12888_v23 = vpop.f32.mrb[49].mxu1  ;;  %13347 = vmatmul.mubr.msk.bf16.gmra.mrb[8].mxu0 %vm311_vm3, %v14445_v11  ;;  %v14447_v34 = vld [vmem:[%s14682_s29 + $0x418] sm:$0xff]  }
 0x4b7   : > { %v3811_v41 = vpop.f32.mrb[50].mxu1  ;;  %13350 = vmatprep.mubr.msk.bf16.mxu0 %vm14616_vm2, %v14614_v1 }
 0x4b8   : > { %v4892_v45 = vpack.c.bf16 %v4879_v58, %v4878_v59  ;;  %v16421_v25 = vadd.f32 %v3811_v41, %v16261_v2  ;;  %v12889_v44 = vpop.f32.mrb[51].mxu1 }
 0x4b9   : > { %v4839_v50 = vpop.f32.mrb[160].mxu0 }
 0x4ba   : > { %v4840_v30 = vadd.f32 %v16354_v10, %v4839_v50  ;;  %v13100_v54 = vpop.f32.mrb[161].mxu0  ;;  %13139 = vmatmul.mubr.msk.bf16.gmra.mrb[156].mxu1 %vm741_vm4, %v4892_v45 }
 0x4bb   : > { %v4842_v5 = vpop.f32.mrb[162].mxu0  ;;  %13142 = vmatprep.mubr.msk.bf16.mxu1 %vm14616_vm2, %v14614_v1 }
 0x4bc   : > { %v4843_v38 = vadd.f32 %v16354_v10, %v4842_v5  ;;  %v13101_v35 = vpop.f32.mrb[163].mxu0  ;;  %v4880_v9 = vmax.f32 %v4840_v30, 0.0 }
 0x4bd   : > { %v3816_v49 = vpop.f32.mrb[52].mxu1 }
 0x4be   : > { %v4881_v2 = vmax.f32 %v4843_v38, 0.0  ;;  %v16430_v22 = vadd.f32 %v3816_v49, %v16270_v53  ;;  %v12892_v46 = vpop.f32.mrb[53].mxu1  ;;  %13351 = vmatmul.mubr.msk.bf16.gmra.mrb[12].mxu0 %vm311_vm3, %v14447_v34  ;;  %v14448_v53 = vld [vmem:[%s14682_s29 + $0x420] sm:$0xff]  }
 0x4bf   : > { %v3819_v36 = vpop.f32.mrb[54].mxu1  ;;  %13354 = vmatprep.mubr.msk.bf16.mxu0 %vm14616_vm2, %v14614_v1 }
 0x4c0   : > { %v4893_v4 = vpack.c.bf16 %v4881_v2, %v4880_v9  ;;  %v16436_v52 = vadd.f32 %v3819_v36, %v16276_v55  ;;  %v12893_v16 = vpop.f32.mrb[55].mxu1 }
 0x4c1   : > { %v4847_v12 = vpop.f32.mrb[164].mxu0 }
 0x4c2   : > { %v4848_v56 = vadd.f32 %v16354_v10, %v4847_v12  ;;  %v13104_v0 = vpop.f32.mrb[165].mxu0  ;;  %13143 = vmatmul.mubr.msk.bf16.gmra.mrb[160].mxu1 %vm741_vm4, %v4893_v4 }
 0x4c3   : > { %v4850_v24 = vpop.f32.mrb[166].mxu0  ;;  %13146 = vmatprep.mubr.msk.bf16.mxu1 %vm14616_vm2, %v14614_v1 }
 0x4c4   : > { %v4851_v13 = vadd.f32 %v16354_v10, %v4850_v24  ;;  %v13105_v29 = vpop.f32.mrb[167].mxu0  ;;  %v4882_v20 = vmax.f32 %v4848_v56, 0.0 }
 0x4c5   : > { %v3824_v17 = vpop.f32.mrb[56].mxu1 }
 0x4c6   : > { %v4883_v55 = vmax.f32 %v4851_v13, 0.0  ;;  %v16445_v3 = vadd.f32 %v3824_v17, %v16285_v47  ;;  %v12896_v61 = vpop.f32.mrb[57].mxu1  ;;  %13355 = vmatmul.mubr.msk.bf16.gmra.mrb[16].mxu0 %vm311_vm3, %v14448_v53  ;;  %v14449_v47 = vld [vmem:[%s14682_s29 + $0x428] sm:$0xff]  }
 0x4c7   : > { %v3827_v60 = vpop.f32.mrb[58].mxu1  ;;  %13358 = vmatprep.mubr.msk.bf16.mxu0 %vm14616_vm2, %v14614_v1 }
 0x4c8   : > { %v4894_v28 = vpack.c.bf16 %v4883_v55, %v4882_v20  ;;  %v16451_v37 = vadd.f32 %v3827_v60, %v16291_v42  ;;  %v12897_v48 = vpop.f32.mrb[59].mxu1 }
 0x4c9   : > { %v4855_v19 = vpop.f32.mrb[168].mxu0  ;;  %v14453_v48 = vld [vmem:[%s18521_s3 + $0x1a0] sm:$0xff]  }
 0x4ca   : > { %v4856_v11 = vadd.f32 %v16354_v10, %v4855_v19  ;;  %v13108_v18 = vpop.f32.mrb[169].mxu0  ;;  %13147 = vmatmul.mubr.msk.bf16.gmra.mrb[164].mxu1 %vm741_vm4, %v4894_v28 }
 0x4cb   : > { %v4858_v31 = vpop.f32.mrb[170].mxu0  ;;  %13150 = vmatprep.mubr.msk.bf16.mxu1 %vm14616_vm2, %v14614_v1 }
 0x4cc   : > { %v4859_v57 = vadd.f32 %v16354_v10, %v4858_v31  ;;  %v13109_v15 = vpop.f32.mrb[171].mxu0  ;;  %v4884_v58 = vmax.f32 %v4856_v11, 0.0 }
 0x4cd   : > { %v3832_v59 = vpop.f32.mrb[60].mxu1 }
 0x4ce   : > { %v4885_v42 = vmax.f32 %v4859_v57, 0.0  ;;  %v16460_v23 = vadd.f32 %v3832_v59, %v16300_v32  ;;  %v12900_v41 = vpop.f32.mrb[61].mxu1  ;;  %13359 = vmatmul.mubr.msk.bf16.gmra.mrb[20].mxu0 %vm311_vm3, %v14449_v47  ;;  %v14451_v32 = vld [vmem:[%s14682_s29 + $0x430] sm:$0xff]  }
 0x4cf   : > { %v3835_v45 = vpop.f32.mrb[62].mxu1  ;;  %13362 = vmatprep.mubr.msk.bf16.mxu0 %vm14616_vm2, %v14614_v1 }
 0x4d0   : > { %v4895_v44 = vpack.c.bf16 %v4885_v42, %v4884_v58  ;;  %v16466_v50 = vadd.f32 %v3835_v45, %v16306_v51  ;;  %v12901_v30 = vpop.f32.mrb[63].mxu1 }
 0x4d1   : > { %v4863_v54 = vpop.f32.mrb[172].mxu0 }
 0x4d2   : > { %v4864_v34 = vadd.f32 %v16354_v10, %v4863_v54  ;;  %v13112_v5 = vpop.f32.mrb[173].mxu0  ;;  %13151 = vmatmul.mubr.msk.bf16.gmra.mrb[168].mxu1 %vm741_vm4, %v4895_v44  ;;  %v14459_v54 = vld [vmem:[%s18521_s3 + $0x1b0] sm:$0xff]  }
 0x4d3   : > { %v4866_v38 = vpop.f32.mrb[174].mxu0  ;;  %13154 = vmatprep.mubr.msk.bf16.mxu1 %vm14616_vm2, %v14614_v1 }
 0x4d4   : > { %v4867_v35 = vadd.f32 %v16354_v10, %v4866_v38  ;;  %v13113_v49 = vpop.f32.mrb[175].mxu0  ;;  %v4886_v2 = vmax.f32 %v4864_v34, 0.0 }
 0x4d5   : > { %v3840_v9 = vpop.f32.mrb[64].mxu1  ;;  %v14455_v49 = vld [vmem:[%s14682_s29 + $0x448] sm:$0xff]  }
 0x4d6   : > { %v4887_v51 = vmax.f32 %v4867_v35, 0.0  ;;  %v16475_v46 = vadd.f32 %v3840_v9, %v16315_v14  ;;  %v12904_v36 = vpop.f32.mrb[65].mxu1  ;;  %13363 = vmatmul.mubr.msk.bf16.gmra.mrb[24].mxu0 %vm311_vm3, %v14451_v32  ;;  %v14452_v14 = vld [vmem:[%s14682_s29 + $0x438] sm:$0xff]  }
 0x4d7   : > { %v3843_v4 = vpop.f32.mrb[66].mxu1  ;;  %13414 = vmatprep.mubr.msk.bf16.mxu0 %vm14616_vm2, %v14614_v1 }
 0x4d8   : > { %v4896_v16 = vpack.c.bf16 %v4887_v51, %v4886_v2  ;;  %v16481_v12 = vadd.f32 %v3843_v4, %v16321_v21  ;;  %v12905_v56 = vpop.f32.mrb[67].mxu1 }
 0x4d9   : > { %v5204_v0 = vpop.f32.mrb[176].mxu0 }
 0x4da   : > { %v5205_v53 = vadd.f32 %v16354_v10, %v5204_v0  ;;  %13155 = vmatmul.mubr.msk.bf16.gmra.mrb[172].mxu1 %vm741_vm4, %v4896_v16  ;;  %v13164_v24 = vpop.f32.mrb[177].mxu0 }
 0x4db   : > { %v5207_v13 = vpop.f32.mrb[178].mxu0  ;;  %13206 = vmatprep.mubr.msk.bf16.mxu1 %vm14616_vm2, %v14614_v1 }
 0x4dc   : > { %v5208_v29 = vadd.f32 %v16354_v10, %v5207_v13  ;;  %v13165_v17 = vpop.f32.mrb[179].mxu0  ;;  %v5275_v55 = vmax.f32 %v5205_v53, 0.0 }
 0x4dd   : > { %v4181_v20 = vpop.f32.mrb[68].mxu1 }
 0x4de   : > { %v5276_v61 = vmax.f32 %v5208_v29, 0.0  ;;  %v16490_v21 = vadd.f32 %v4181_v20, %v16330_v43  ;;  %v12956_v60 = vpop.f32.mrb[69].mxu1  ;;  %13415 = vmatmul.mubr.msk.bf16.vlgmr.msra.gmra.mrb[28].mxu0 %vm311_vm3, %v14452_v14  ;;  %v14457_v20 = vld [vmem:[%s14682_s29 + $0x450] sm:$0xff]  }
 0x4df   : > { %13495 = vmatpush3.bf16.msra.mxu0 %v16176_v8  ;;  %v4184_v28 = vpop.f32.mrb[70].mxu1  ;;  %13418 = vmatprep.mubr.msk.bf16.mxu0 %vm14616_vm2, %v14614_v1  ;;  %v14454_v8 = vld [vmem:[%s14682_s29 + $0x440] sm:$0xff]  }
 0x4e0   : > { %v5293_v19 = vpack.c.bf16 %v5276_v61, %v5275_v55  ;;  %v16500_v11 = vadd.f32 %v4184_v28, %v16340_v33  ;;  %v12957_v18 = vpop.f32.mrb[71].mxu1  ;;  %13496 = vmatprep.subr.bf16.mxu0 %v14614_v1  ;;  %v14456_v33 = vld [vmem:[%s18521_s3 + $0x1a8] sm:$0xff]  }
 0x4e1   : > { %v5212_v43 = vpop.f32.mrb[180].mxu0 }
 0x4e2   : > { %v5213_v47 = vadd.f32 %v16354_v10, %v5212_v43  ;;  %v13168_v31 = vpop.f32.mrb[181].mxu0  ;;  %13207 = vmatmul.mubr.msk.bf16.vlgmr.msra.gmra.mrb[176].mxu1 %vm741_vm4, %v5293_v19 }
 0x4e3   : > { %13283 = vmatpush3.bf16.msra.mxu1 %v14453_v48  ;;  %v5215_v57 = vpop.f32.mrb[182].mxu0  ;;  %13210 = vmatprep.mubr.msk.bf16.mxu1 %vm14616_vm2, %v14614_v1 }
 0x4e4   : > { %v5216_v15 = vadd.f32 %v16354_v10, %v5215_v57  ;;  %v13169_v59 = vpop.f32.mrb[183].mxu0  ;;  %13284 = vmatprep.subr.bf16.mxu1 %v14614_v1  ;;  %13497 = vmatpush3.bf16.msra.mxu0 %v14671_v6  ;;  %v5277_v42 = vmax.f32 %v5213_v47, 0.0 }
 0x4e5   : > { %v4189_v58 = vpop.f32.mrb[72].mxu1  ;;  %13578 = vmatprep.subr.bf16.mxu0 %v14614_v1 }
 0x4e6   : > { %v5278_v41 = vmax.f32 %v5216_v15, 0.0  ;;  %v16516_v45 = vadd.f32 %v4189_v58, %v16361_v7  ;;  %v12960_v44 = vpop.f32.mrb[73].mxu1  ;;  %13419 = vmatmul.mubr.msk.bf16.gmra.mrb[32].mxu0 %vm311_vm3, %v14454_v8 }
 0x4e7   : > { %v4192_v30 = vpop.f32.mrb[74].mxu1  ;;  %13422 = vmatprep.mubr.msk.bf16.mxu0 %vm14616_vm2, %v14614_v1  ;;  %13285 = vmatpush3.bf16.msra.mxu1 %v14456_v33 }
 0x4e8   : > { %v5294_v34 = vpack.c.bf16 %v5278_v41, %v5277_v42  ;;  %v16525_v5 = vadd.f32 %v4192_v30, %v16370_v63  ;;  %v12961_v32 = vpop.f32.mrb[75].mxu1  ;;  %13286 = vmatprep.subr.bf16.mxu1 %v14614_v1  ;;  %v14463_v63 = vld [vmem:[%s18521_s3 + $0x1b8] sm:$0xff]  }
 0x4e9   : > { %v5220_v7 = vpop.f32.mrb[184].mxu0 }
 0x4ea   : > { %v5221_v38 = vadd.f32 %v16354_v10, %v5220_v7  ;;  %v13172_v35 = vpop.f32.mrb[185].mxu0  ;;  %13211 = vmatmul.mubr.msk.bf16.gmra.mrb[180].mxu1 %vm741_vm4, %v5294_v34 }
 0x4eb   : > { %v5223_v9 = vpop.f32.mrb[186].mxu0  ;;  %13214 = vmatprep.mubr.msk.bf16.mxu1 %vm14616_vm2, %v14614_v1  ;;  %13287 = vmatpush3.bf16.msra.mxu1 %v14459_v54 }
 0x4ec   : > { %v5224_v2 = vadd.f32 %v16354_v10, %v5223_v9  ;;  %v13173_v51 = vpop.f32.mrb[187].mxu0  ;;  %13288 = vmatprep.subr.bf16.mxu1 %v14614_v1  ;;  %v5279_v4 = vmax.f32 %v5221_v38, 0.0 }
 0x4ed   : > { %v4197_v36 = vpop.f32.mrb[76].mxu1 }
 0x4ee   : > { %v5280_v16 = vmax.f32 %v5224_v2, 0.0  ;;  %v16539_v56 = vadd.f32 %v4197_v36, %v16384_v39  ;;  %v12964_v0 = vpop.f32.mrb[77].mxu1  ;;  %13423 = vmatmul.mubr.msk.bf16.gmra.mrb[36].mxu0 %vm311_vm3, %v14455_v49 }
 0x4ef   : > { %v4200_v53 = vpop.f32.mrb[78].mxu1  ;;  %13426 = vmatprep.mubr.msk.bf16.mxu0 %vm14616_vm2, %v14614_v1  ;;  %13289 = vmatpush3.bf16.msra.mxu1 %v14463_v63 }
 0x4f0   : > { %v5295_v24 = vpack.c.bf16 %v5280_v16, %v5279_v4  ;;  %v16545_v14 = vadd.f32 %v4200_v53, %v16390_v27  ;;  %v12965_v13 = vpop.f32.mrb[79].mxu1  ;;  %13366 = vmatprep.subr.bf16.mxu1 %v14614_v1 }
 0x4f1   : > { %v5228_v29 = vpop.f32.mrb[188].mxu0 }
 0x4f2   : > { %v5229_v17 = vadd.f32 %v16354_v10, %v5228_v29  ;;  %v13176_v39 = vpop.f32.mrb[189].mxu0  ;;  %13215 = vmatmul.mubr.msk.bf16.gmra.mrb[184].mxu1 %vm741_vm4, %v5295_v24 }
 0x4f3   : > { %v5231_v55 = vpop.f32.mrb[190].mxu0  ;;  %13218 = vmatprep.mubr.msk.bf16.mxu1 %vm14616_vm2, %v14614_v1 }
 0x4f4   : > { %v5232_v61 = vadd.f32 %v16354_v10, %v5231_v55  ;;  %v13177_v60 = vpop.f32.mrb[191].mxu0  ;;  %v5281_v28 = vmax.f32 %v5229_v17, 0.0 }
 0x4f5   : > { %v4205_v27 = vpop.f32.mrb[80].mxu1 }
 0x4f6   : > { %v5282_v48 = vmax.f32 %v5232_v61, 0.0  ;;  %v16555_v19 = vadd.f32 %v4205_v27, %v16400_v26  ;;  %v12968_v18 = vpop.f32.mrb[81].mxu1  ;;  %13427 = vmatmul.mubr.msk.bf16.gmra.mrb[40].mxu0 %vm311_vm3, %v14457_v20  ;;  %v14458_v26 = vld [vmem:[%s14682_s29 + $0x458] sm:$0xff]  }
 0x4f7   : > { %v4208_v43 = vpop.f32.mrb[82].mxu1  ;;  %13430 = vmatprep.mubr.msk.bf16.mxu0 %vm14616_vm2, %v14614_v1 }
 0x4f8   : > { %v5296_v47 = vpack.c.bf16 %v5282_v48, %v5281_v28  ;;  %v16561_v31 = vadd.f32 %v4208_v43, %v16406_v62  ;;  %v12969_v8 = vpop.f32.mrb[83].mxu1 }
 0x4f9   : > { %v5236_v57 = vpop.f32.mrb[192].mxu0 }
 0x4fa   : > { %v5237_v33 = vadd.f32 %v16354_v10, %v5236_v57  ;;  %v13180_v15 = vpop.f32.mrb[193].mxu0  ;;  %13219 = vmatmul.mubr.msk.bf16.gmra.mrb[188].mxu1 %vm741_vm4, %v5296_v47 }
 0x4fb   : > { %v5239_v59 = vpop.f32.mrb[194].mxu0  ;;  %13222 = vmatprep.mubr.msk.bf16.mxu1 %vm14616_vm2, %v14614_v1 }
 0x4fc   : > { %v5240_v58 = vadd.f32 %v16354_v10, %v5239_v59  ;;  %v13181_v42 = vpop.f32.mrb[195].mxu0  ;;  %v5283_v44 = vmax.f32 %v5237_v33, 0.0 }
 0x4fd   : > { %v4213_v41 = vpop.f32.mrb[84].mxu1 }
 0x4fe   : > { %v5284_v62 = vmax.f32 %v5240_v58, 0.0  ;;  %v16570_v30 = vadd.f32 %v4213_v41, %v16415_v40  ;;  %v12972_v54 = vpop.f32.mrb[85].mxu1  ;;  %13431 = vmatmul.mubr.msk.bf16.gmra.mrb[44].mxu0 %vm311_vm3, %v14458_v26  ;;  %v14460_v40 = vld [vmem:[%s14682_s29 + $0x460] sm:$0xff]  }
 0x4ff   : > { %v4216_v34 = vpop.f32.mrb[86].mxu1  ;;  %13434 = vmatprep.mubr.msk.bf16.mxu0 %vm14616_vm2, %v14614_v1 }
 0x500   : > { %v5297_v32 = vpack.c.bf16 %v5284_v62, %v5283_v44  ;;  %v16576_v7 = vadd.f32 %v4216_v34, %v16421_v25  ;;  %v12973_v38 = vpop.f32.mrb[87].mxu1 }
 0x501   : > { %v5244_v35 = vpop.f32.mrb[196].mxu0 }
 0x502   : > { %v5245_v49 = vadd.f32 %v16354_v10, %v5244_v35  ;;  %v13184_v9 = vpop.f32.mrb[197].mxu0  ;;  %13223 = vmatmul.mubr.msk.bf16.gmra.mrb[192].mxu1 %vm741_vm4, %v5297_v32 }
 0x503   : > { %v5247_v63 = vpop.f32.mrb[198].mxu0  ;;  %13226 = vmatprep.mubr.msk.bf16.mxu1 %vm14616_vm2, %v14614_v1 }
 0x504   : > { %v5248_v2 = vadd.f32 %v16354_v10, %v5247_v63  ;;  %v13185_v51 = vpop.f32.mrb[199].mxu0  ;;  %v5285_v4 = vmax.f32 %v5245_v49, 0.0 }
 0x505   : > { %v4221_v36 = vpop.f32.mrb[88].mxu1 }
 0x506   : > { %v5286_v25 = vmax.f32 %v5248_v2, 0.0  ;;  %v16585_v16 = vadd.f32 %v4221_v36, %v16430_v22  ;;  %v12976_v0 = vpop.f32.mrb[89].mxu1  ;;  %13435 = vmatmul.mubr.msk.bf16.gmra.mrb[48].mxu0 %vm311_vm3, %v14460_v40  ;;  %v14461_v22 = vld [vmem:[%s14682_s29 + $0x468] sm:$0xff]  }
 0x507   : > { %v4224_v53 = vpop.f32.mrb[90].mxu1  ;;  %13438 = vmatprep.mubr.msk.bf16.mxu0 %vm14616_vm2, %v14614_v1 }
 0x508   : > { %v5298_v24 = vpack.c.bf16 %v5286_v25, %v5285_v4  ;;  %v16591_v13 = vadd.f32 %v4224_v53, %v16436_v52  ;;  %v12977_v29 = vpop.f32.mrb[91].mxu1 }
 0x509   : > { %v5252_v17 = vpop.f32.mrb[200].mxu0 }
 0x50a   : > { %v5253_v39 = vadd.f32 %v16354_v10, %v5252_v17  ;;  %v13188_v20 = vpop.f32.mrb[201].mxu0  ;;  %13227 = vmatmul.mubr.msk.bf16.gmra.mrb[196].mxu1 %vm741_vm4, %v5298_v24 }
 0x50b   : > { %v5255_v55 = vpop.f32.mrb[202].mxu0  ;;  %13230 = vmatprep.mubr.msk.bf16.mxu1 %vm14616_vm2, %v14614_v1 }
 0x50c   : > { %v5256_v61 = vadd.f32 %v16354_v10, %v5255_v55  ;;  %v13189_v60 = vpop.f32.mrb[203].mxu0  ;;  %v5287_v28 = vmax.f32 %v5253_v39, 0.0 }
 0x50d   : > { %v4229_v27 = vpop.f32.mrb[92].mxu1 }
 0x50e   : > { %v5288_v52 = vmax.f32 %v5256_v61, 0.0  ;;  %v16600_v48 = vadd.f32 %v4229_v27, %v16445_v3  ;;  %v12980_v18 = vpop.f32.mrb[93].mxu1  ;;  %13439 = vmatmul.mubr.msk.bf16.gmra.mrb[52].mxu0 %vm311_vm3, %v14461_v22  ;;  %v14462_v3 = vld [vmem:[%s14682_s29 + $0x470] sm:$0xff]  }
 0x50f   : > { %v4232_v43 = vpop.f32.mrb[94].mxu1  ;;  %13442 = vmatprep.mubr.msk.bf16.mxu0 %vm14616_vm2, %v14614_v1 }
 0x510   : > { %v5299_v47 = vpack.c.bf16 %v5288_v52, %v5287_v28  ;;  %v16606_v8 = vadd.f32 %v4232_v43, %v16451_v37  ;;  %v12981_v57 = vpop.f32.mrb[95].mxu1  ;;  %v16651_v43 = vld [vmem:[%s18519_s1] sm:$0xff]  }
 0x511   : > { %v5260_v33 = vpop.f32.mrb[204].mxu0  ;;  %v14466_v57 = vld [vmem:[%s18521_s3 + $0x1c0] sm:$0xff]  }
 0x512   : > { %v5261_v15 = vadd.f32 %v16354_v10, %v5260_v33  ;;  %v13192_v26 = vpop.f32.mrb[205].mxu0  ;;  %13231 = vmatmul.mubr.msk.bf16.gmra.mrb[200].mxu1 %vm741_vm4, %v5299_v47 }
 0x513   : > { %v5263_v59 = vpop.f32.mrb[206].mxu0  ;;  %13234 = vmatprep.mubr.msk.bf16.mxu1 %vm14616_vm2, %v14614_v1 }
 0x514   : > { %v5264_v58 = vadd.f32 %v16354_v10, %v5263_v59  ;;  %v13193_v42 = vpop.f32.mrb[207].mxu0  ;;  %v5289_v44 = vmax.f32 %v5261_v15, 0.0 }
 0x515   : > { %v4237_v41 = vpop.f32.mrb[96].mxu1 }
 0x516   : > { %v5290_v37 = vmax.f32 %v5264_v58, 0.0  ;;  %v16615_v62 = vadd.f32 %v4237_v41, %v16460_v23  ;;  %v12984_v54 = vpop.f32.mrb[97].mxu1  ;;  %13443 = vmatmul.mubr.msk.bf16.gmra.mrb[56].mxu0 %vm311_vm3, %v14462_v3  ;;  %v14464_v23 = vld [vmem:[%s14682_s29 + $0x478] sm:$0xff]   ;;  %v14467_v58 = vld [vmem:[%s14682_s29 + $0x488] sm:$0xff]  }
 0x517   : > { %v4240_v34 = vpop.f32.mrb[98].mxu1  ;;  %13446 = vmatprep.mubr.msk.bf16.mxu0 %vm14616_vm2, %v14614_v1 }
 0x518   : > { %v5300_v32 = vpack.c.bf16 %v5290_v37, %v5289_v44  ;;  %v16621_v38 = vadd.f32 %v4240_v34, %v16466_v50  ;;  %v12985_v35 = vpop.f32.mrb[99].mxu1 }
 0x519   : > { %v5268_v49 = vpop.f32.mrb[208].mxu0 }
 0x51a   : > { %v5269_v9 = vadd.f32 %v16354_v10, %v5268_v49  ;;  %v13196_v40 = vpop.f32.mrb[209].mxu0  ;;  %13235 = vmatmul.mubr.msk.bf16.gmra.mrb[204].mxu1 %vm741_vm4, %v5300_v32 }
 0x51b   : > { %v5271_v63 = vpop.f32.mrb[210].mxu0  ;;  %13238 = vmatprep.mubr.msk.bf16.mxu1 %vm14616_vm2, %v14614_v1 }
 0x51c   : > { %v5272_v2 = vadd.f32 %v16354_v10, %v5271_v63  ;;  %v13197_v51 = vpop.f32.mrb[211].mxu0  ;;  %v5291_v4 = vmax.f32 %v5269_v9, 0.0  ;;  %v14472_v9 = vld [vmem:[%s18521_s3 + $0x1d0] sm:$0xff]  }
 0x51d   : > { %v4245_v36 = vpop.f32.mrb[100].mxu1 }
 0x51e   : > { %v5292_v50 = vmax.f32 %v5272_v2, 0.0  ;;  %v16630_v25 = vadd.f32 %v4245_v36, %v16475_v46  ;;  %v12988_v0 = vpop.f32.mrb[101].mxu1  ;;  %13447 = vmatmul.mubr.msk.bf16.gmra.mrb[60].mxu0 %vm311_vm3, %v14464_v23  ;;  %v14465_v46 = vld [vmem:[%s14682_s29 + $0x480] sm:$0xff]   ;;  %v14468_v36 = vld [vmem:[%s14682_s29 + $0x490] sm:$0xff]  }
 0x51f   : > { %v4248_v53 = vpop.f32.mrb[102].mxu1  ;;  %13498 = vmatprep.mubr.msk.bf16.mxu0 %vm14616_vm2, %v14614_v1 }
 0x520   : > { %v5301_v24 = vpack.c.bf16 %v5292_v50, %v5291_v4  ;;  %v16636_v29 = vadd.f32 %v4248_v53, %v16481_v12  ;;  %v12989_v17 = vpop.f32.mrb[103].mxu1 }
 0x521   : > { %v5609_v39 = vpop.f32.mrb[212].mxu0 }
 0x522   : > { %v5610_v20 = vadd.f32 %v16354_v10, %v5609_v39  ;;  %13239 = vmatmul.mubr.msk.bf16.gmra.mrb[208].mxu1 %vm741_vm4, %v5301_v24  ;;  %v13248_v22 = vpop.f32.mrb[213].mxu0 }
 0x523   : > { %v5612_v55 = vpop.f32.mrb[214].mxu0  ;;  %13290 = vmatprep.mubr.msk.bf16.mxu1 %vm14616_vm2, %v14614_v1 }
 0x524   : > { %v5613_v61 = vadd.f32 %v16354_v10, %v5612_v55  ;;  %v13249_v60 = vpop.f32.mrb[215].mxu0  ;;  %v5680_v28 = vmax.f32 %v5610_v20, 0.0 }
 0x525   : > { %v4586_v27 = vpop.f32.mrb[104].mxu1 }
 0x526   : > { %v5681_v52 = vmax.f32 %v5613_v61, 0.0  ;;  %v16645_v12 = vadd.f32 %v4586_v27, %v16490_v21  ;;  %v13040_v18 = vpop.f32.mrb[105].mxu1  ;;  %13499 = vmatmul.mubr.msk.bf16.vlgmr.msra.gmra.mrb[64].mxu0 %vm311_vm3, %v14465_v46 }
 0x527   : > { %13579 = vmatpush3.bf16.msra.mxu0 %v16651_v43  ;;  %v4589_v47 = vpop.f32.mrb[106].mxu1  ;;  %13502 = vmatprep.mubr.msk.bf16.mxu0 %vm14616_vm2, %v14614_v1 }
 0x528   : > { %v5698_v21 = vpack.c.bf16 %v5681_v52, %v5680_v28  ;;  %v16660_v33 = vadd.f32 %v4589_v47, %v16500_v11  ;;  %v13041_v15 = vpop.f32.mrb[107].mxu1  ;;  %13580 = vmatprep.subr.bf16.mxu0 %v14614_v1  ;;  %v14469_v11 = vld [vmem:[%s18521_s3 + $0x1c8] sm:$0xff]   ;;  %v14470_v28 = vld [vmem:[%s14682_s29 + $0x498] sm:$0xff]  }
 0x529   : > { %v5617_v26 = vpop.f32.mrb[216].mxu0 }
 0x52a   : > { %v5618_v3 = vadd.f32 %v16354_v10, %v5617_v26  ;;  %v13252_v59 = vpop.f32.mrb[217].mxu0  ;;  %13291 = vmatmul.mubr.msk.bf16.vlgmr.msra.gmra.mrb[212].mxu1 %vm741_vm4, %v5698_v21 }
 0x52b   : > { %13367 = vmatpush3.bf16.msra.mxu1 %v14466_v57  ;;  %v5620_v42 = vpop.f32.mrb[218].mxu0  ;;  %13294 = vmatprep.mubr.msk.bf16.mxu1 %vm14616_vm2, %v14614_v1 }
 0x52c   : > { %v5621_v41 = vadd.f32 %v16354_v10, %v5620_v42  ;;  %v13253_v44 = vpop.f32.mrb[219].mxu0  ;;  %13368 = vmatprep.subr.bf16.mxu1 %v14614_v1  ;;  %13581 = vmatpush3.bf16.msra.mxu0 %v14671_v6  ;;  %v5682_v54 = vmax.f32 %v5618_v3, 0.0 }
 0x52d   : > { %v4594_v37 = vpop.f32.mrb[108].mxu1  ;;  %13662 = vmatprep.subr.bf16.mxu0 %v14614_v1 }
 0x52e   : > { %v5683_v34 = vmax.f32 %v5621_v41, 0.0  ;;  %v16676_v32 = vadd.f32 %v4594_v37, %v16516_v45  ;;  %v13044_v35 = vpop.f32.mrb[109].mxu1  ;;  %13503 = vmatmul.mubr.msk.bf16.gmra.mrb[68].mxu0 %vm311_vm3, %v14467_v58 }
 0x52f   : > { %v4597_v49 = vpop.f32.mrb[110].mxu1  ;;  %13506 = vmatprep.mubr.msk.bf16.mxu0 %vm14616_vm2, %v14614_v1  ;;  %13369 = vmatpush3.bf16.msra.mxu1 %v14469_v11 }
 0x530   : > { %v5699_v40 = vpack.c.bf16 %v5683_v34, %v5682_v54  ;;  %v16685_v23 = vadd.f32 %v4597_v49, %v16525_v5  ;;  %v13045_v63 = vpop.f32.mrb[111].mxu1  ;;  %13370 = vmatprep.subr.bf16.mxu1 %v14614_v1  ;;  %v14476_v5 = vld [vmem:[%s18521_s3 + $0x1d8] sm:$0xff]  }
 0x531   : > { %v5625_v45 = vpop.f32.mrb[220].mxu0 }
 0x532   : > { %v5626_v2 = vadd.f32 %v16354_v10, %v5625_v45  ;;  %v13256_v51 = vpop.f32.mrb[221].mxu0  ;;  %13295 = vmatmul.mubr.msk.bf16.gmra.mrb[216].mxu1 %vm741_vm4, %v5699_v40 }
 0x533   : > { %v5628_v4 = vpop.f32.mrb[222].mxu0  ;;  %13298 = vmatprep.mubr.msk.bf16.mxu1 %vm14616_vm2, %v14614_v1  ;;  %13371 = vmatpush3.bf16.msra.mxu1 %v14472_v9 }
 0x534   : > { %v5629_v50 = vadd.f32 %v16354_v10, %v5628_v4  ;;  %v13257_v0 = vpop.f32.mrb[223].mxu0  ;;  %13372 = vmatprep.subr.bf16.mxu1 %v14614_v1  ;;  %v5684_v24 = vmax.f32 %v5626_v2, 0.0 }
 0x535   : > { %v4602_v53 = vpop.f32.mrb[112].mxu1 }
 0x536   : > { %v5685_v17 = vmax.f32 %v5629_v50, 0.0  ;;  %v16699_v39 = vadd.f32 %v4602_v53, %v16539_v56  ;;  %v13048_v20 = vpop.f32.mrb[113].mxu1  ;;  %13507 = vmatmul.mubr.msk.bf16.gmra.mrb[72].mxu0 %vm311_vm3, %v14468_v36 }
 0x537   : > { %v4605_v22 = vpop.f32.mrb[114].mxu1  ;;  %13510 = vmatprep.mubr.msk.bf16.mxu0 %vm14616_vm2, %v14614_v1  ;;  %13373 = vmatpush3.bf16.msra.mxu1 %v14476_v5 }
 0x538   : > { %v5700_v46 = vpack.c.bf16 %v5685_v17, %v5684_v24  ;;  %v16705_v55 = vadd.f32 %v4605_v22, %v16545_v14  ;;  %v13049_v61 = vpop.f32.mrb[115].mxu1  ;;  %13450 = vmatprep.subr.bf16.mxu1 %v14614_v1 }
 0x539   : > { %v5633_v60 = vpop.f32.mrb[224].mxu0 }
 0x53a   : > { %v5634_v27 = vadd.f32 %v16354_v10, %v5633_v60  ;;  %v13260_v56 = vpop.f32.mrb[225].mxu0  ;;  %13299 = vmatmul.mubr.msk.bf16.gmra.mrb[220].mxu1 %vm741_vm4, %v5700_v46 }
 0x53b   : > { %v5636_v52 = vpop.f32.mrb[226].mxu0  ;;  %13302 = vmatprep.mubr.msk.bf16.mxu1 %vm14616_vm2, %v14614_v1 }
 0x53c   : > { %v5637_v18 = vadd.f32 %v16354_v10, %v5636_v52  ;;  %v13261_v47 = vpop.f32.mrb[227].mxu0  ;;  %v5686_v57 = vmax.f32 %v5634_v27, 0.0 }
 0x53d   : > { %v4610_v14 = vpop.f32.mrb[116].mxu1 }
 0x53e   : > { %v5687_v21 = vmax.f32 %v5637_v18, 0.0  ;;  %v16715_v15 = vadd.f32 %v4610_v14, %v16555_v19  ;;  %v13052_v26 = vpop.f32.mrb[117].mxu1  ;;  %13511 = vmatmul.mubr.msk.bf16.gmra.mrb[76].mxu0 %vm311_vm3, %v14470_v28  ;;  %v14471_v19 = vld [vmem:[%s14682_s29 + $0x4a0] sm:$0xff]  }
 0x53f   : > { %v4613_v3 = vpop.f32.mrb[118].mxu1  ;;  %13514 = vmatprep.mubr.msk.bf16.mxu0 %vm14616_vm2, %v14614_v1 }
 0x540   : > { %v5701_v59 = vpack.c.bf16 %v5687_v21, %v5686_v57  ;;  %v16721_v58 = vadd.f32 %v4613_v3, %v16561_v31  ;;  %v13053_v42 = vpop.f32.mrb[119].mxu1 }
 0x541   : > { %v5641_v11 = vpop.f32.mrb[228].mxu0 }
 0x542   : > { %v5642_v41 = vadd.f32 %v16354_v10, %v5641_v11  ;;  %v13264_v44 = vpop.f32.mrb[229].mxu0  ;;  %13303 = vmatmul.mubr.msk.bf16.gmra.mrb[224].mxu1 %vm741_vm4, %v5701_v59 }
 0x543   : > { %v5644_v37 = vpop.f32.mrb[230].mxu0  ;;  %13306 = vmatprep.mubr.msk.bf16.mxu1 %vm14616_vm2, %v14614_v1  ;;  %v16771_v44 = vld [vmem:[%s18520_s2] ss:$0 sm:$0xff] }
 0x544   : > { %v5645_v54 = vadd.f32 %v16354_v10, %v5644_v37  ;;  %v13265_v34 = vpop.f32.mrb[231].mxu0  ;;  %v5688_v49 = vmax.f32 %v5642_v41, 0.0  ;;  %v14475_v37 = vld [vmem:[%s14682_s29 + $0x4b8] sm:$0xff]  }
 0x545   : > { %v4618_v35 = vpop.f32.mrb[120].mxu1 }
 0x546   : > { %v5689_v31 = vmax.f32 %v5645_v54, 0.0  ;;  %v16730_v9 = vadd.f32 %v4618_v35, %v16570_v30  ;;  %v13056_v40 = vpop.f32.mrb[121].mxu1  ;;  %13515 = vmatmul.mubr.msk.bf16.gmra.mrb[80].mxu0 %vm311_vm3, %v14471_v19  ;;  %v14473_v30 = vld [vmem:[%s14682_s29 + $0x4a8] sm:$0xff]  }
 0x547   : > { %v4621_v63 = vpop.f32.mrb[122].mxu1  ;;  %13518 = vmatprep.mubr.msk.bf16.mxu0 %vm14616_vm2, %v14614_v1 }
 0x548   : > { %v5702_v45 = vpack.c.bf16 %v5689_v31, %v5688_v49  ;;  %v16736_v2 = vadd.f32 %v4621_v63, %v16576_v7  ;;  %v13057_v51 = vpop.f32.mrb[123].mxu1 }
 0x549   : > { %v5649_v36 = vpop.f32.mrb[232].mxu0 }
 0x54a   : > { %v5650_v4 = vadd.f32 %v16354_v10, %v5649_v36  ;;  %v13268_v5 = vpop.f32.mrb[233].mxu0  ;;  %13307 = vmatmul.mubr.msk.bf16.gmra.mrb[228].mxu1 %vm741_vm4, %v5702_v45 }
 0x54b   : > { %v5652_v50 = vpop.f32.mrb[234].mxu0  ;;  %13310 = vmatprep.mubr.msk.bf16.mxu1 %vm14616_vm2, %v14614_v1 }
 0x54c   : > { %v5653_v0 = vadd.f32 %v16354_v10, %v5652_v50  ;;  %v13269_v53 = vpop.f32.mrb[235].mxu0  ;;  %v5690_v17 = vmax.f32 %v5650_v4, 0.0 }
 0x54d   : > { %v4626_v24 = vpop.f32.mrb[124].mxu1 }
 0x54e   : > { %v5691_v7 = vmax.f32 %v5653_v0, 0.0  ;;  %v16745_v20 = vadd.f32 %v4626_v24, %v16585_v16  ;;  %v13060_v22 = vpop.f32.mrb[125].mxu1  ;;  %13519 = vmatmul.mubr.msk.bf16.gmra.mrb[84].mxu0 %vm311_vm3, %v14473_v30  ;;  %v14474_v16 = vld [vmem:[%s14682_s29 + $0x4b0] sm:$0xff]  }
 0x54f   : > { %v4629_v46 = vpop.f32.mrb[126].mxu1  ;;  %13522 = vmatprep.mubr.msk.bf16.mxu0 %vm14616_vm2, %v14614_v1 }
 0x550   : > { %v5703_v61 = vpack.c.bf16 %v5691_v7, %v5690_v17  ;;  %v16751_v60 = vadd.f32 %v4629_v46, %v16591_v13  ;;  %v13061_v27 = vpop.f32.mrb[127].mxu1 }
 0x551   : > { %v5657_v56 = vpop.f32.mrb[236].mxu0 }
 0x552   : > { %v5658_v28 = vadd.f32 %v16354_v10, %v5657_v56  ;;  %v13272_v52 = vpop.f32.mrb[237].mxu0  ;;  %13311 = vmatmul.mubr.msk.bf16.gmra.mrb[232].mxu1 %vm741_vm4, %v5703_v61 }
 0x553   : > { %v5660_v18 = vpop.f32.mrb[238].mxu0  ;;  %13314 = vmatprep.mubr.msk.bf16.mxu1 %vm14616_vm2, %v14614_v1 }
 0x554   : > { %v5661_v47 = vadd.f32 %v16354_v10, %v5660_v18  ;;  %v13273_v14 = vpop.f32.mrb[239].mxu0  ;;  %v5692_v21 = vmax.f32 %v5658_v28, 0.0 }
 0x555   : > { %v4634_v57 = vpop.f32.mrb[128].mxu1 }
 0x556   : > { %v5693_v13 = vmax.f32 %v5661_v47, 0.0  ;;  %v16760_v26 = vadd.f32 %v4634_v57, %v16600_v48  ;;  %v13064_v3 = vpop.f32.mrb[129].mxu1  ;;  %13523 = vmatmul.mubr.msk.bf16.gmra.mrb[88].mxu0 %vm311_vm3, %v14474_v16 }
 0x557   : > { %v4637_v59 = vpop.f32.mrb[130].mxu1  ;;  %13526 = vmatprep.mubr.msk.bf16.mxu0 %vm14616_vm2, %v14614_v1 }
 0x558   : > { %v5704_v42 = vpack.c.bf16 %v5693_v13, %v5692_v21  ;;  %v16766_v11 = vadd.f32 %v4637_v59, %v16606_v8  ;;  %v13065_v10 = vpop.f32.mrb[131].mxu1 }
 0x559   : > { %v5665_v41 = vpop.f32.mrb[240].mxu0  ;;  %v14479_v10 = vld [vmem:[%s18521_s3 + $0x1e0] sm:$0xff]  }
 0x55a   : > { %v5666_v48 = vadd.f32 %v16771_v44, %v5665_v41  ;;  %v13276_v19 = vpop.f32.mrb[241].mxu0  ;;  %13315 = vmatmul.mubr.msk.bf16.gmra.mrb[236].mxu1 %vm741_vm4, %v5704_v42 }
 0x55b   : > { %v5668_v54 = vpop.f32.mrb[242].mxu0  ;;  %13318 = vmatprep.mubr.msk.bf16.mxu1 %vm14616_vm2, %v14614_v1 }
 0x55c   : > { %v5669_v8 = vadd.f32 %v16771_v44, %v5668_v54  ;;  %v13277_v34 = vpop.f32.mrb[243].mxu0  ;;  %v5694_v49 = vmax.f32 %v5666_v48, 0.0 }
 0x55d   : > { %v4642_v35 = vpop.f32.mrb[132].mxu1 }
 0x55e   : > { %v5695_v31 = vmax.f32 %v5669_v8, 0.0  ;;  %v16780_v40 = vadd.f32 %v4642_v35, %v16615_v62  ;;  %v13068_v63 = vpop.f32.mrb[133].mxu1  ;;  %13527 = vmatmul.mubr.msk.bf16.gmra.mrb[92].mxu0 %vm311_vm3, %v14475_v37  ;;  %v14477_v62 = vld [vmem:[%s14682_s29 + $0x4c0] sm:$0xff]   ;;  %v14480_v8 = vld [vmem:[%s14682_s29 + $0x4d0] sm:$0xff]  }
 0x55f   : > { %v4645_v45 = vpop.f32.mrb[134].mxu1  ;;  %13530 = vmatprep.mubr.msk.bf16.mxu0 %vm14616_vm2, %v14614_v1 }
 0x560   : > { %v5705_v51 = vpack.c.bf16 %v5695_v31, %v5694_v49  ;;  %v16786_v36 = vadd.f32 %v4645_v45, %v16621_v38  ;;  %v13069_v4 = vpop.f32.mrb[135].mxu1 }
 0x561   : > { %v5673_v5 = vpop.f32.mrb[244].mxu0 }
 0x562   : > { %v5674_v30 = vadd.f32 %v16771_v44, %v5673_v5  ;;  %v13280_v50 = vpop.f32.mrb[245].mxu0  ;;  %13319 = vmatmul.mubr.msk.bf16.gmra.mrb[240].mxu1 %vm741_vm4, %v5705_v51 }
 0x563   : > { %v5676_v0 = vpop.f32.mrb[246].mxu0  ;;  %13322 = vmatprep.mubr.msk.bf16.mxu1 %vm14616_vm2, %v14614_v1 }
 0x564   : > { %v5677_v53 = vadd.f32 %v16771_v44, %v5676_v0  ;;  %v13281_v24 = vpop.f32.mrb[247].mxu0  ;;  %v5696_v7 = vmax.f32 %v5674_v30, 0.0  ;;  %v14485_v30 = vld [vmem:[%s18521_s3 + $0x1f0] sm:$0xff]  }
 0x565   : > { %v4650_v17 = vpop.f32.mrb[136].mxu1 }
 0x566   : > { %v5697_v38 = vmax.f32 %v5677_v53, 0.0  ;;  %v16795_v22 = vadd.f32 %v4650_v17, %v16630_v25  ;;  %v13072_v46 = vpop.f32.mrb[137].mxu1  ;;  %13531 = vmatmul.mubr.msk.bf16.gmra.mrb[96].mxu0 %vm311_vm3, %v14477_v62  ;;  %v14478_v25 = vld [vmem:[%s14682_s29 + $0x4c8] sm:$0xff]   ;;  %v14481_v17 = vld [vmem:[%s14682_s29 + $0x4d8] sm:$0xff]  }
 0x567   : > { %v4653_v61 = vpop.f32.mrb[138].mxu1  ;;  %13582 = vmatprep.mubr.msk.bf16.mxu0 %vm14616_vm2, %v14614_v1 }
 0x568   : > { %v5706_v27 = vpack.c.bf16 %v5697_v38, %v5696_v7  ;;  %v16801_v56 = vadd.f32 %v4653_v61, %v16636_v29  ;;  %v13073_v28 = vpop.f32.mrb[139].mxu1 }
 0x569   : > { %v6014_v52 = vpop.f32.mrb[248].mxu0 }
 0x56a   : > { %v6015_v16 = vadd.f32 %v16771_v44, %v6014_v52  ;;  %13323 = vmatmul.mubr.msk.bf16.gmra.mrb[244].mxu1 %vm741_vm4, %v5706_v27  ;;  %v13332_v18 = vpop.f32.mrb[249].mxu0 }
 0x56b   : > { %v6017_v47 = vpop.f32.mrb[250].mxu0  ;;  %13374 = vmatprep.mubr.msk.bf16.mxu1 %vm14616_vm2, %v14614_v1 }
 0x56c   : > { %v6018_v14 = vadd.f32 %v16771_v44, %v6017_v47  ;;  %v13333_v57 = vpop.f32.mrb[251].mxu0  ;;  %v6085_v13 = vmax.f32 %v6015_v16, 0.0 }
 0x56d   : > { %v4991_v21 = vpop.f32.mrb[140].mxu1 }
 0x56e   : > { %v6086_v3 = vmax.f32 %v6018_v14, 0.0  ;;  %v16810_v29 = vadd.f32 %v4991_v21, %v16645_v12  ;;  %v13124_v59 = vpop.f32.mrb[141].mxu1  ;;  %13583 = vmatmul.mubr.msk.bf16.vlgmr.msra.gmra.mrb[100].mxu0 %vm311_vm3, %v14478_v25 }
 0x56f   : > { %13663 = vmatpush3.bf16.msra.mxu0 %v16651_v43  ;;  %v4994_v42 = vpop.f32.mrb[142].mxu1  ;;  %13586 = vmatprep.mubr.msk.bf16.mxu0 %vm14616_vm2, %v14614_v1 }
 0x570   : > { %v6103_v41 = vpack.c.bf16 %v6086_v3, %v6085_v13  ;;  %v16820_v48 = vadd.f32 %v4994_v42, %v16660_v33  ;;  %v13125_v19 = vpop.f32.mrb[143].mxu1  ;;  %13664 = vmatprep.subr.bf16.mxu0 %v14614_v1  ;;  %v14482_v33 = vld [vmem:[%s18521_s3 + $0x1e8] sm:$0xff]   ;;  %v14483_v13 = vld [vmem:[%s14682_s29 + $0x4e0] sm:$0xff]  }
 0x571   : > { %v6022_v12 = vpop.f32.mrb[252].mxu0 }
 0x572   : > { %v6023_v37 = vadd.f32 %v16771_v44, %v6022_v12  ;;  %v13336_v54 = vpop.f32.mrb[253].mxu0  ;;  %13375 = vmatmul.mubr.msk.bf16.vlgmr.msra.gmra.mrb[248].mxu1 %vm741_vm4, %v6103_v41 }
 0x573   : > { %13451 = vmatpush3.bf16.msra.mxu1 %v14479_v10  ;;  %v6025_v34 = vpop.f32.mrb[254].mxu0  ;;  %13378 = vmatprep.mubr.msk.bf16.mxu1 %vm14616_vm2, %v14614_v1 }
 0x574   : > { %v6026_v35 = vadd.f32 %v16771_v44, %v6025_v34  ;;  %v13337_v49 = vpop.f32.mrb[255].mxu0  ;;  %13452 = vmatprep.subr.bf16.mxu1 %v14614_v1  ;;  %13665 = vmatpush3.bf16.msra.mxu0 %v14671_v6  ;;  %v6087_v63 = vmax.f32 %v6023_v37, 0.0 }
 0x575   : > { %v4999_v31 = vpop.f32.mrb[144].mxu1  ;;  %13746 = vmatprep.subr.bf16.mxu0 %v14614_v1 }
 0x576   : > { %v6088_v45 = vmax.f32 %v6026_v35, 0.0  ;;  %v16836_v51 = vadd.f32 %v4999_v31, %v16676_v32  ;;  %v13128_v4 = vpop.f32.mrb[145].mxu1  ;;  %13587 = vmatmul.mubr.msk.bf16.gmra.mrb[104].mxu0 %vm311_vm3, %v14480_v8 }
 0x577   : > { %v5002_v5 = vpop.f32.mrb[146].mxu1  ;;  %13590 = vmatprep.mubr.msk.bf16.mxu0 %vm14616_vm2, %v14614_v1  ;;  %13453 = vmatpush3.bf16.msra.mxu1 %v14482_v33 }
 0x578   : > { %v6104_v50 = vpack.c.bf16 %v6088_v45, %v6087_v63  ;;  %v16845_v62 = vadd.f32 %v5002_v5, %v16685_v23  ;;  %v13129_v0 = vpop.f32.mrb[147].mxu1  ;;  %13454 = vmatprep.subr.bf16.mxu1 %v14614_v1  ;;  %v14489_v23 = vld [vmem:[%s18521_s3 + $0x1f8] sm:$0xff]  }
 0x579   : > { %v6030_v32 = vpop.f32.mrb[0].mxu0 }
 0x57a   : > { %v6031_v53 = vadd.f32 %v16771_v44, %v6030_v32  ;;  %v13340_v24 = vpop.f32.mrb[1].mxu0  ;;  %13379 = vmatmul.mubr.msk.bf16.gmra.mrb[252].mxu1 %vm741_vm4, %v6104_v50 }
 0x57b   : > { %v6033_v7 = vpop.f32.mrb[2].mxu0  ;;  %13382 = vmatprep.mubr.msk.bf16.mxu1 %vm14616_vm2, %v14614_v1  ;;  %13455 = vmatpush3.bf16.msra.mxu1 %v14485_v30 }
 0x57c   : > { %v6034_v38 = vadd.f32 %v16771_v44, %v6033_v7  ;;  %v13341_v46 = vpop.f32.mrb[3].mxu0  ;;  %13456 = vmatprep.subr.bf16.mxu1 %v14614_v1  ;;  %v6089_v27 = vmax.f32 %v6031_v53, 0.0 }
 0x57d   : > { %v5007_v61 = vpop.f32.mrb[148].mxu1 }
 0x57e   : > { %v6090_v28 = vmax.f32 %v6034_v38, 0.0  ;;  %v16859_v52 = vadd.f32 %v5007_v61, %v16699_v39  ;;  %v13132_v16 = vpop.f32.mrb[149].mxu1  ;;  %13591 = vmatmul.mubr.msk.bf16.gmra.mrb[108].mxu0 %vm311_vm3, %v14481_v17 }
 0x57f   : > { %v5010_v18 = vpop.f32.mrb[150].mxu1  ;;  %13594 = vmatprep.mubr.msk.bf16.mxu0 %vm14616_vm2, %v14614_v1  ;;  %13457 = vmatpush3.bf16.msra.mxu1 %v14489_v23 }
 0x580   : > { %v6105_v25 = vpack.c.bf16 %v6090_v28, %v6089_v27  ;;  %v16865_v47 = vadd.f32 %v5010_v18, %v16705_v55  ;;  %v13133_v14 = vpop.f32.mrb[151].mxu1  ;;  %13534 = vmatprep.subr.bf16.mxu1 %v14614_v1 }
 0x581   : > { %v6038_v57 = vpop.f32.mrb[4].mxu0 }
 0x582   : > { %v6039_v21 = vadd.f32 %v16771_v44, %v6038_v57  ;;  %v13344_v39 = vpop.f32.mrb[5].mxu0  ;;  %13383 = vmatmul.mubr.msk.bf16.gmra.mrb[0].mxu1 %vm741_vm4, %v6105_v25 }
 0x583   : > { %v6041_v3 = vpop.f32.mrb[6].mxu0  ;;  %13386 = vmatprep.mubr.msk.bf16.mxu1 %vm14616_vm2, %v14614_v1 }
 0x584   : > { %v6042_v59 = vadd.f32 %v16771_v44, %v6041_v3  ;;  %v13345_v42 = vpop.f32.mrb[7].mxu0  ;;  %v6091_v10 = vmax.f32 %v6039_v21, 0.0 }
 0x585   : > { %v5015_v55 = vpop.f32.mrb[152].mxu1 }
 0x586   : > { %v6092_v41 = vmax.f32 %v6042_v59, 0.0  ;;  %v16875_v19 = vadd.f32 %v5015_v55, %v16715_v15  ;;  %v13136_v12 = vpop.f32.mrb[153].mxu1  ;;  %13595 = vmatmul.mubr.msk.bf16.gmra.mrb[112].mxu0 %vm311_vm3, %v14483_v13  ;;  %v14484_v15 = vld [vmem:[%s14682_s29 + $0x4e8] sm:$0xff]  }
 0x587   : > { %v5018_v37 = vpop.f32.mrb[154].mxu1  ;;  %13598 = vmatprep.mubr.msk.bf16.mxu0 %vm14616_vm2, %v14614_v1 }
 0x588   : > { %v6106_v54 = vpack.c.bf16 %v6092_v41, %v6091_v10  ;;  %v16881_v8 = vadd.f32 %v5018_v37, %v16721_v58  ;;  %v13137_v34 = vpop.f32.mrb[155].mxu1 }
 0x589   : > { %v6046_v33 = vpop.f32.mrb[8].mxu0 }
 0x58a   : > { %v6047_v35 = vadd.f32 %v16771_v44, %v6046_v33  ;;  %v13348_v49 = vpop.f32.mrb[9].mxu0  ;;  %13387 = vmatmul.mubr.msk.bf16.gmra.mrb[4].mxu1 %vm741_vm4, %v6106_v54 }
 0x58b   : > { %v6049_v31 = vpop.f32.mrb[10].mxu0  ;;  %13390 = vmatprep.mubr.msk.bf16.mxu1 %vm14616_vm2, %v14614_v1 }
 0x58c   : > { %v6050_v63 = vadd.f32 %v16771_v44, %v6049_v31  ;;  %v13349_v45 = vpop.f32.mrb[11].mxu0  ;;  %v6093_v5 = vmax.f32 %v6047_v35, 0.0 }
 0x58d   : > { %v5023_v4 = vpop.f32.mrb[156].mxu1 }
 0x58e   : > { %v6094_v58 = vmax.f32 %v6050_v63, 0.0  ;;  %v16890_v30 = vadd.f32 %v5023_v4, %v16730_v9  ;;  %v13140_v50 = vpop.f32.mrb[157].mxu1  ;;  %13599 = vmatmul.mubr.msk.bf16.gmra.mrb[116].mxu0 %vm311_vm3, %v14484_v15  ;;  %v14486_v9 = vld [vmem:[%s14682_s29 + $0x4f0] sm:$0xff]  }
 0x58f   : > { %v5026_v0 = vpop.f32.mrb[158].mxu1  ;;  %13602 = vmatprep.mubr.msk.bf16.mxu0 %vm14616_vm2, %v14614_v1 }
 0x590   : > { %v6107_v32 = vpack.c.bf16 %v6094_v58, %v6093_v5  ;;  %v16896_v53 = vadd.f32 %v5026_v0, %v16736_v2  ;;  %v13141_v24 = vpop.f32.mrb[159].mxu1 }
 0x591   : > { %v6054_v17 = vpop.f32.mrb[12].mxu0 }
 0x592   : > { %v6055_v7 = vadd.f32 %v16771_v44, %v6054_v17  ;;  %v13352_v23 = vpop.f32.mrb[13].mxu0  ;;  %13391 = vmatmul.mubr.msk.bf16.gmra.mrb[8].mxu1 %vm741_vm4, %v6107_v32 }
 0x593   : > { %v6057_v38 = vpop.f32.mrb[14].mxu0  ;;  %13394 = vmatprep.mubr.msk.bf16.mxu1 %vm14616_vm2, %v14614_v1 }
 0x594   : > { %v6058_v46 = vadd.f32 %v16771_v44, %v6057_v38  ;;  %v13353_v61 = vpop.f32.mrb[15].mxu0  ;;  %v6095_v28 = vmax.f32 %v6055_v7, 0.0 }
 0x595   : > { %v5031_v27 = vpop.f32.mrb[160].mxu1 }
 0x596   : > { %v6096_v2 = vmax.f32 %v6058_v46, 0.0  ;;  %v16905_v16 = vadd.f32 %v5031_v27, %v16745_v20  ;;  %v13144_v18 = vpop.f32.mrb[161].mxu1  ;;  %13603 = vmatmul.mubr.msk.bf16.gmra.mrb[120].mxu0 %vm311_vm3, %v14486_v9  ;;  %v14487_v20 = vld [vmem:[%s14682_s29 + $0x4f8] sm:$0xff]  }
 0x597   : > { %v5034_v25 = vpop.f32.mrb[162].mxu1  ;;  %13606 = vmatprep.mubr.msk.bf16.mxu0 %vm14616_vm2, %v14614_v1 }
 0x598   : > { %v6108_v14 = vpack.c.bf16 %v6096_v2, %v6095_v28  ;;  %v16911_v57 = vadd.f32 %v5034_v25, %v16751_v60  ;;  %v13145_v21 = vpop.f32.mrb[163].mxu1 }
 0x599   : > { %v6062_v39 = vpop.f32.mrb[16].mxu0 }
 0x59a   : > { %v6063_v13 = vadd.f32 %v16771_v44, %v6062_v39  ;;  %v13356_v3 = vpop.f32.mrb[17].mxu0  ;;  %13395 = vmatmul.mubr.msk.bf16.gmra.mrb[12].mxu1 %vm741_vm4, %v6108_v14 }
 0x59b   : > { %v6065_v59 = vpop.f32.mrb[18].mxu0  ;;  %13398 = vmatprep.mubr.msk.bf16.mxu1 %vm14616_vm2, %v14614_v1 }
 0x59c   : > { %v6066_v42 = vadd.f32 %v16771_v44, %v6065_v59  ;;  %v13357_v55 = vpop.f32.mrb[19].mxu0  ;;  %v6097_v41 = vmax.f32 %v6063_v13, 0.0 }
 0x59d   : > { %v5039_v10 = vpop.f32.mrb[164].mxu1 }
 0x59e   : > { %v6098_v60 = vmax.f32 %v6066_v42, 0.0  ;;  %v16920_v12 = vadd.f32 %v5039_v10, %v16760_v26  ;;  %v13148_v37 = vpop.f32.mrb[165].mxu1  ;;  %13607 = vmatmul.mubr.msk.bf16.gmra.mrb[124].mxu0 %vm311_vm3, %v14487_v20  ;;  %v14488_v26 = vld [vmem:[%s14682_s29 + $0x500] sm:$0xff]  }
 0x59f   : > { %v5042_v54 = vpop.f32.mrb[166].mxu1  ;;  %13610 = vmatprep.mubr.msk.bf16.mxu0 %vm14616_vm2, %v14614_v1 }
 0x5a0   : > { %v6109_v34 = vpack.c.bf16 %v6098_v60, %v6097_v41  ;;  %v16926_v33 = vadd.f32 %v5042_v54, %v16766_v11  ;;  %v13149_v35 = vpop.f32.mrb[167].mxu1 }
 0x5a1   : > { %v6070_v49 = vpop.f32.mrb[20].mxu0  ;;  %v14492_v35 = vld [vmem:[%s18521_s3 + $0x200] sm:$0xff]  }
 0x5a2   : > { %v6071_v15 = vadd.f32 %v16771_v44, %v6070_v49  ;;  %v13360_v31 = vpop.f32.mrb[21].mxu0  ;;  %13399 = vmatmul.mubr.msk.bf16.gmra.mrb[16].mxu1 %vm741_vm4, %v6109_v34 }
 0x5a3   : > { %v6073_v63 = vpop.f32.mrb[22].mxu0  ;;  %13402 = vmatprep.mubr.msk.bf16.mxu1 %vm14616_vm2, %v14614_v1 }
 0x5a4   : > { %v6074_v45 = vadd.f32 %v16771_v44, %v6073_v63  ;;  %v13361_v4 = vpop.f32.mrb[23].mxu0  ;;  %v6099_v58 = vmax.f32 %v6071_v15, 0.0 }
 0x5a5   : > { %v5047_v5 = vpop.f32.mrb[168].mxu1 }
 0x5a6   : > { %v6100_v11 = vmax.f32 %v6074_v45, 0.0  ;;  %v16935_v50 = vadd.f32 %v5047_v5, %v16780_v40  ;;  %v13152_v0 = vpop.f32.mrb[169].mxu1  ;;  %13611 = vmatmul.mubr.msk.bf16.gmra.mrb[128].mxu0 %vm311_vm3, %v14488_v26  ;;  %v14490_v40 = vld [vmem:[%s14682_s29 + $0x508] sm:$0xff]  }
 0x5a7   : > { %v5050_v32 = vpop.f32.mrb[170].mxu1  ;;  %13614 = vmatprep.mubr.msk.bf16.mxu0 %vm14616_vm2, %v14614_v1 }
 0x5a8   : > { %v6110_v24 = vpack.c.bf16 %v6100_v11, %v6099_v58  ;;  %v16941_v17 = vadd.f32 %v5050_v32, %v16786_v36  ;;  %v13153_v7 = vpop.f32.mrb[171].mxu1 }
 0x5a9   : > { %v6078_v23 = vpop.f32.mrb[24].mxu0 }
 0x5aa   : > { %v6079_v9 = vadd.f32 %v16771_v44, %v6078_v23  ;;  %v13364_v38 = vpop.f32.mrb[25].mxu0  ;;  %13403 = vmatmul.mubr.msk.bf16.gmra.mrb[20].mxu1 %vm741_vm4, %v6110_v24  ;;  %v14498_v23 = vld [vmem:[%s18521_s3 + $0x210] sm:$0xff]  }
 0x5ab   : > { %v6081_v46 = vpop.f32.mrb[26].mxu0  ;;  %13406 = vmatprep.mubr.msk.bf16.mxu1 %vm14616_vm2, %v14614_v1 }
 0x5ac   : > { %v6082_v61 = vadd.f32 %v16771_v44, %v6081_v46  ;;  %v13365_v27 = vpop.f32.mrb[27].mxu0  ;;  %v6101_v2 = vmax.f32 %v6079_v9, 0.0 }
 0x5ad   : > { %v5055_v28 = vpop.f32.mrb[172].mxu1  ;;  %v14494_v27 = vld [vmem:[%s14682_s29 + $0x520] sm:$0xff]  }
 0x5ae   : > { %v6102_v36 = vmax.f32 %v6082_v61, 0.0  ;;  %v16950_v18 = vadd.f32 %v5055_v28, %v16795_v22  ;;  %v13156_v25 = vpop.f32.mrb[173].mxu1  ;;  %13615 = vmatmul.mubr.msk.bf16.gmra.mrb[132].mxu0 %vm311_vm3, %v14490_v40  ;;  %v14491_v22 = vld [vmem:[%s14682_s29 + $0x510] sm:$0xff]  }
 0x5af   : > { %v5058_v14 = vpop.f32.mrb[174].mxu1  ;;  %13666 = vmatprep.mubr.msk.bf16.mxu0 %vm14616_vm2, %v14614_v1 }
 0x5b0   : > { %v6111_v21 = vpack.c.bf16 %v6102_v36, %v6101_v2  ;;  %v16956_v39 = vadd.f32 %v5058_v14, %v16801_v56  ;;  %v13157_v13 = vpop.f32.mrb[175].mxu1 }
 0x5b1   : > { %v6419_v3 = vpop.f32.mrb[28].mxu0 }
 0x5b2   : > { %v6420_v20 = vadd.f32 %v16771_v44, %v6419_v3  ;;  %13407 = vmatmul.mubr.msk.bf16.gmra.mrb[24].mxu1 %vm741_vm4, %v6111_v21  ;;  %v13416_v59 = vpop.f32.mrb[29].mxu0 }
 0x5b3   : > { %v6422_v42 = vpop.f32.mrb[30].mxu0  ;;  %13458 = vmatprep.mubr.msk.bf16.mxu1 %vm14616_vm2, %v14614_v1 }
 0x5b4   : > { %v6423_v55 = vadd.f32 %v16771_v44, %v6422_v42  ;;  %v13417_v10 = vpop.f32.mrb[31].mxu0  ;;  %v6490_v60 = vmax.f32 %v6420_v20, 0.0 }
 0x5b5   : > { %v5396_v41 = vpop.f32.mrb[176].mxu1 }
 0x5b6   : > { %v6491_v37 = vmax.f32 %v6423_v55, 0.0  ;;  %v16965_v56 = vadd.f32 %v5396_v41, %v16810_v29  ;;  %v13208_v54 = vpop.f32.mrb[177].mxu1  ;;  %13667 = vmatmul.mubr.msk.bf16.vlgmr.msra.gmra.mrb[136].mxu0 %vm311_vm3, %v14491_v22  ;;  %v14496_v41 = vld [vmem:[%s14682_s29 + $0x528] sm:$0xff]  }
 0x5b7   : > { %13747 = vmatpush3.bf16.msra.mxu0 %v16651_v43  ;;  %v5399_v34 = vpop.f32.mrb[178].mxu1  ;;  %13670 = vmatprep.mubr.msk.bf16.mxu0 %vm14616_vm2, %v14614_v1  ;;  %v14493_v43 = vld [vmem:[%s14682_s29 + $0x518] sm:$0xff]  }
 0x5b8   : > { %v6508_v49 = vpack.c.bf16 %v6491_v37, %v6490_v60  ;;  %v16975_v15 = vadd.f32 %v5399_v34, %v16820_v48  ;;  %v13209_v31 = vpop.f32.mrb[179].mxu1  ;;  %13748 = vmatprep.subr.bf16.mxu0 %v14614_v1  ;;  %v14495_v48 = vld [vmem:[%s18521_s3 + $0x208] sm:$0xff]  }
 0x5b9   : > { %v6427_v29 = vpop.f32.mrb[32].mxu0 }
 0x5ba   : > { %v6428_v26 = vadd.f32 %v16771_v44, %v6427_v29  ;;  %v13420_v63 = vpop.f32.mrb[33].mxu0  ;;  %13459 = vmatmul.mubr.msk.bf16.vlgmr.msra.gmra.mrb[28].mxu1 %vm741_vm4, %v6508_v49 }
 0x5bb   : > { %13535 = vmatpush3.bf16.msra.mxu1 %v14492_v35  ;;  %v6430_v45 = vpop.f32.mrb[34].mxu0  ;;  %13462 = vmatprep.mubr.msk.bf16.mxu1 %vm14616_vm2, %v14614_v1 }
 0x5bc   : > { %v6431_v4 = vadd.f32 %v16771_v44, %v6430_v45  ;;  %v13421_v5 = vpop.f32.mrb[35].mxu0  ;;  %13536 = vmatprep.subr.bf16.mxu1 %v14614_v1  ;;  %13749 = vmatpush3.bf16.msra.mxu0 %v14671_v6  ;;  %v6492_v11 = vmax.f32 %v6428_v26, 0.0 }
 0x5bd   : > { %v5404_v58 = vpop.f32.mrb[180].mxu1  ;;  %13830 = vmatprep.subr.bf16.mxu0 %v14614_v1 }
 0x5be   : > { %v6493_v0 = vmax.f32 %v6431_v4, 0.0  ;;  %v16991_v32 = vadd.f32 %v5404_v58, %v16836_v51  ;;  %v13212_v24 = vpop.f32.mrb[181].mxu1  ;;  %13671 = vmatmul.mubr.msk.bf16.gmra.mrb[140].mxu0 %vm311_vm3, %v14493_v43 }
 0x5bf   : > { %v5407_v7 = vpop.f32.mrb[182].mxu1  ;;  %13674 = vmatprep.mubr.msk.bf16.mxu0 %vm14616_vm2, %v14614_v1  ;;  %13537 = vmatpush3.bf16.msra.mxu1 %v14495_v48 }
 0x5c0   : > { %v6509_v9 = vpack.c.bf16 %v6493_v0, %v6492_v11  ;;  %v17000_v38 = vadd.f32 %v5407_v7, %v16845_v62  ;;  %v13213_v40 = vpop.f32.mrb[183].mxu1  ;;  %13538 = vmatprep.subr.bf16.mxu1 %v14614_v1  ;;  %v14502_v62 = vld [vmem:[%s18521_s3 + $0x218] sm:$0xff]  }
 0x5c1   : > { %v6435_v51 = vpop.f32.mrb[36].mxu0 }
 0x5c2   : > { %v6436_v46 = vadd.f32 %v16771_v44, %v6435_v51  ;;  %v13424_v61 = vpop.f32.mrb[37].mxu0  ;;  %13463 = vmatmul.mubr.msk.bf16.gmra.mrb[32].mxu1 %vm741_vm4, %v6509_v9 }
 0x5c3   : > { %v6438_v28 = vpop.f32.mrb[38].mxu0  ;;  %13466 = vmatprep.mubr.msk.bf16.mxu1 %vm14616_vm2, %v14614_v1  ;;  %13539 = vmatpush3.bf16.msra.mxu1 %v14498_v23 }
 0x5c4   : > { %v6439_v2 = vadd.f32 %v16771_v44, %v6438_v28  ;;  %v13425_v36 = vpop.f32.mrb[39].mxu0  ;;  %13540 = vmatprep.subr.bf16.mxu1 %v14614_v1  ;;  %v6494_v14 = vmax.f32 %v6436_v46, 0.0 }
 0x5c5   : > { %v5412_v25 = vpop.f32.mrb[184].mxu1 }
 0x5c6   : > { %v6495_v21 = vmax.f32 %v6439_v2, 0.0  ;;  %v17014_v13 = vadd.f32 %v5412_v25, %v16859_v52  ;;  %v13216_v3 = vpop.f32.mrb[185].mxu1  ;;  %13675 = vmatmul.mubr.msk.bf16.gmra.mrb[144].mxu0 %vm311_vm3, %v14494_v27 }
 0x5c7   : > { %v5415_v20 = vpop.f32.mrb[186].mxu1  ;;  %13678 = vmatprep.mubr.msk.bf16.mxu0 %vm14616_vm2, %v14614_v1  ;;  %13541 = vmatpush3.bf16.msra.mxu1 %v14502_v62 }
 0x5c8   : > { %v6510_v59 = vpack.c.bf16 %v6495_v21, %v6494_v14  ;;  %v17020_v22 = vadd.f32 %v5415_v20, %v16865_v47  ;;  %v13217_v42 = vpop.f32.mrb[187].mxu1  ;;  %13618 = vmatprep.subr.bf16.mxu1 %v14614_v1 }
 0x5c9   : > { %v6443_v55 = vpop.f32.mrb[40].mxu0 }
 0x5ca   : > { %v6444_v10 = vadd.f32 %v16771_v44, %v6443_v55  ;;  %v13428_v52 = vpop.f32.mrb[41].mxu0  ;;  %13467 = vmatmul.mubr.msk.bf16.gmra.mrb[36].mxu1 %vm741_vm4, %v6510_v59 }
 0x5cb   : > { %v6446_v60 = vpop.f32.mrb[42].mxu0  ;;  %13470 = vmatprep.mubr.msk.bf16.mxu1 %vm14616_vm2, %v14614_v1 }
 0x5cc   : > { %v6447_v37 = vadd.f32 %v16771_v44, %v6446_v60  ;;  %v13429_v54 = vpop.f32.mrb[43].mxu0  ;;  %v6496_v34 = vmax.f32 %v6444_v10, 0.0 }
 0x5cd   : > { %v5420_v47 = vpop.f32.mrb[188].mxu1 }
 0x5ce   : > { %v6497_v35 = vmax.f32 %v6447_v37, 0.0  ;;  %v17030_v49 = vadd.f32 %v5420_v47, %v16875_v19  ;;  %v13220_v31 = vpop.f32.mrb[189].mxu1  ;;  %13679 = vmatmul.mubr.msk.bf16.gmra.mrb[148].mxu0 %vm311_vm3, %v14496_v41  ;;  %v14497_v19 = vld [vmem:[%s14682_s29 + $0x530] sm:$0xff]  }
 0x5cf   : > { %v5423_v29 = vpop.f32.mrb[190].mxu1  ;;  %13682 = vmatprep.mubr.msk.bf16.mxu0 %vm14616_vm2, %v14614_v1 }
 0x5d0   : > { %v6511_v26 = vpack.c.bf16 %v6497_v35, %v6496_v34  ;;  %v17036_v63 = vadd.f32 %v5423_v29, %v16881_v8  ;;  %v13221_v43 = vpop.f32.mrb[191].mxu1 }
 0x5d1   : > { %v6451_v45 = vpop.f32.mrb[44].mxu0 }
 0x5d2   : > { %v6452_v48 = vadd.f32 %v16771_v44, %v6451_v45  ;;  %v13432_v4 = vpop.f32.mrb[45].mxu0  ;;  %13471 = vmatmul.mubr.msk.bf16.gmra.mrb[40].mxu1 %vm741_vm4, %v6511_v26 }
 0x5d3   : > { %v6454_v5 = vpop.f32.mrb[46].mxu0  ;;  %13474 = vmatprep.mubr.msk.bf16.mxu1 %vm14616_vm2, %v14614_v1 }
 0x5d4   : > { %v6455_v58 = vadd.f32 %v16771_v44, %v6454_v5  ;;  %v13433_v11 = vpop.f32.mrb[47].mxu0  ;;  %v6498_v24 = vmax.f32 %v6452_v48, 0.0 }
 0x5d5   : > { %v5428_v0 = vpop.f32.mrb[192].mxu1 }
 0x5d6   : > { %v6499_v8 = vmax.f32 %v6455_v58, 0.0  ;;  %v17045_v7 = vadd.f32 %v5428_v0, %v16890_v30  ;;  %v13224_v23 = vpop.f32.mrb[193].mxu1  ;;  %13683 = vmatmul.mubr.msk.bf16.gmra.mrb[152].mxu0 %vm311_vm3, %v14497_v19  ;;  %v14499_v30 = vld [vmem:[%s14682_s29 + $0x538] sm:$0xff]  }
 0x5d7   : > { %v5431_v9 = vpop.f32.mrb[194].mxu1  ;;  %13686 = vmatprep.mubr.msk.bf16.mxu0 %vm14616_vm2, %v14614_v1 }
 0x5d8   : > { %v6512_v40 = vpack.c.bf16 %v6499_v8, %v6498_v24  ;;  %v17051_v51 = vadd.f32 %v5431_v9, %v16896_v53  ;;  %v13225_v46 = vpop.f32.mrb[195].mxu1 }
 0x5d9   : > { %v6459_v61 = vpop.f32.mrb[48].mxu0 }
 0x5da   : > { %v6460_v27 = vadd.f32 %v16771_v44, %v6459_v61  ;;  %v13436_v28 = vpop.f32.mrb[49].mxu0  ;;  %13475 = vmatmul.mubr.msk.bf16.gmra.mrb[44].mxu1 %vm741_vm4, %v6512_v40 }
 0x5db   : > { %v6462_v62 = vpop.f32.mrb[50].mxu0  ;;  %13478 = vmatprep.mubr.msk.bf16.mxu1 %vm14616_vm2, %v14614_v1 }
 0x5dc   : > { %v6463_v2 = vadd.f32 %v16771_v44, %v6462_v62  ;;  %v13437_v36 = vpop.f32.mrb[51].mxu0  ;;  %v6500_v14 = vmax.f32 %v6460_v27, 0.0 }
 0x5dd   : > { %v5436_v25 = vpop.f32.mrb[196].mxu1 }
 0x5de   : > { %v6501_v53 = vmax.f32 %v6463_v2, 0.0  ;;  %v17060_v21 = vadd.f32 %v5436_v25, %v16905_v16  ;;  %v13228_v3 = vpop.f32.mrb[197].mxu1  ;;  %13687 = vmatmul.mubr.msk.bf16.gmra.mrb[156].mxu0 %vm311_vm3, %v14499_v30  ;;  %v14500_v16 = vld [vmem:[%s14682_s29 + $0x540] sm:$0xff]  }
 0x5df   : > { %v5439_v20 = vpop.f32.mrb[198].mxu1  ;;  %13690 = vmatprep.mubr.msk.bf16.mxu0 %vm14616_vm2, %v14614_v1 }
 0x5e0   : > { %v6513_v59 = vpack.c.bf16 %v6501_v53, %v6500_v14  ;;  %v17066_v42 = vadd.f32 %v5439_v20, %v16911_v57  ;;  %v13229_v55 = vpop.f32.mrb[199].mxu1 }
 0x5e1   : > { %v6467_v10 = vpop.f32.mrb[52].mxu0 }
 0x5e2   : > { %v6468_v52 = vadd.f32 %v16771_v44, %v6467_v10  ;;  %v13440_v41 = vpop.f32.mrb[53].mxu0  ;;  %13479 = vmatmul.mubr.msk.bf16.gmra.mrb[48].mxu1 %vm741_vm4, %v6513_v59 }
 0x5e3   : > { %v6470_v60 = vpop.f32.mrb[54].mxu0  ;;  %13482 = vmatprep.mubr.msk.bf16.mxu1 %vm14616_vm2, %v14614_v1 }
 0x5e4   : > { %v6471_v37 = vadd.f32 %v16771_v44, %v6470_v60  ;;  %v13441_v54 = vpop.f32.mrb[55].mxu0  ;;  %v6502_v34 = vmax.f32 %v6468_v52, 0.0 }
 0x5e5   : > { %v5444_v47 = vpop.f32.mrb[200].mxu1 }
 0x5e6   : > { %v6503_v57 = vmax.f32 %v6471_v37, 0.0  ;;  %v17075_v35 = vadd.f32 %v5444_v47, %v16920_v12  ;;  %v13232_v31 = vpop.f32.mrb[201].mxu1  ;;  %13691 = vmatmul.mubr.msk.bf16.gmra.mrb[160].mxu0 %vm311_vm3, %v14500_v16  ;;  %v14501_v12 = vld [vmem:[%s14682_s29 + $0x548] sm:$0xff]  }
 0x5e7   : > { %v5447_v29 = vpop.f32.mrb[202].mxu1  ;;  %13694 = vmatprep.mubr.msk.bf16.mxu0 %vm14616_vm2, %v14614_v1 }
 0x5e8   : > { %v6514_v26 = vpack.c.bf16 %v6503_v57, %v6502_v34  ;;  %v17081_v43 = vadd.f32 %v5447_v29, %v16926_v33  ;;  %v13233_v45 = vpop.f32.mrb[203].mxu1  ;;  %v17126_v29 = vld [vmem:[%s18519_s1] sm:$0xff]  }
 0x5e9   : > { %v6475_v48 = vpop.f32.mrb[56].mxu0  ;;  %v14505_v45 = vld [vmem:[%s18521_s3 + $0x220] sm:$0xff]  }
 0x5ea   : > { %v6476_v4 = vadd.f32 %v16771_v44, %v6475_v48  ;;  %v13444_v19 = vpop.f32.mrb[57].mxu0  ;;  %13483 = vmatmul.mubr.msk.bf16.gmra.mrb[52].mxu1 %vm741_vm4, %v6514_v26 }
 0x5eb   : > { %v6478_v5 = vpop.f32.mrb[58].mxu0  ;;  %13486 = vmatprep.mubr.msk.bf16.mxu1 %vm14616_vm2, %v14614_v1 }
 0x5ec   : > { %v6479_v58 = vadd.f32 %v16771_v44, %v6478_v5  ;;  %v13445_v11 = vpop.f32.mrb[59].mxu0  ;;  %v6504_v24 = vmax.f32 %v6476_v4, 0.0 }
 0x5ed   : > { %v5452_v0 = vpop.f32.mrb[204].mxu1 }
 0x5ee   : > { %v6505_v33 = vmax.f32 %v6479_v58, 0.0  ;;  %v17090_v8 = vadd.f32 %v5452_v0, %v16935_v50  ;;  %v13236_v23 = vpop.f32.mrb[205].mxu1  ;;  %13695 = vmatmul.mubr.msk.bf16.gmra.mrb[164].mxu0 %vm311_vm3, %v14501_v12  ;;  %v14503_v50 = vld [vmem:[%s14682_s29 + $0x550] sm:$0xff]   ;;  %v14506_v58 = vld [vmem:[%s14682_s29 + $0x560] sm:$0xff]  }
 0x5ef   : > { %v5455_v9 = vpop.f32.mrb[206].mxu1  ;;  %13698 = vmatprep.mubr.msk.bf16.mxu0 %vm14616_vm2, %v14614_v1 }
 0x5f0   : > { %v6515_v40 = vpack.c.bf16 %v6505_v33, %v6504_v24  ;;  %v17096_v46 = vadd.f32 %v5455_v9, %v16941_v17  ;;  %v13237_v61 = vpop.f32.mrb[207].mxu1 }
 0x5f1   : > { %v6483_v27 = vpop.f32.mrb[60].mxu0 }
 0x5f2   : > { %v6484_v28 = vadd.f32 %v16771_v44, %v6483_v27  ;;  %v13448_v30 = vpop.f32.mrb[61].mxu0  ;;  %13487 = vmatmul.mubr.msk.bf16.gmra.mrb[56].mxu1 %vm741_vm4, %v6515_v40 }
 0x5f3   : > { %v6486_v62 = vpop.f32.mrb[62].mxu0  ;;  %13490 = vmatprep.mubr.msk.bf16.mxu1 %vm14616_vm2, %v14614_v1 }
 0x5f4   : > { %v6487_v2 = vadd.f32 %v16771_v44, %v6486_v62  ;;  %v13449_v36 = vpop.f32.mrb[63].mxu0  ;;  %v6506_v14 = vmax.f32 %v6484_v28, 0.0  ;;  %v14511_v28 = vld [vmem:[%s18521_s3 + $0x230] sm:$0xff]  }
 0x5f5   : > { %v5460_v25 = vpop.f32.mrb[208].mxu1 }
 0x5f6   : > { %v6507_v17 = vmax.f32 %v6487_v2, 0.0  ;;  %v17105_v53 = vadd.f32 %v5460_v25, %v16950_v18  ;;  %v13240_v3 = vpop.f32.mrb[209].mxu1  ;;  %13699 = vmatmul.mubr.msk.bf16.gmra.mrb[168].mxu0 %vm311_vm3, %v14503_v50  ;;  %v14504_v18 = vld [vmem:[%s14682_s29 + $0x558] sm:$0xff]   ;;  %v14507_v25 = vld [vmem:[%s14682_s29 + $0x568] sm:$0xff]  }
 0x5f7   : > { %v5463_v20 = vpop.f32.mrb[210].mxu1  ;;  %13750 = vmatprep.mubr.msk.bf16.mxu0 %vm14616_vm2, %v14614_v1 }
 0x5f8   : > { %v6516_v59 = vpack.c.bf16 %v6507_v17, %v6506_v14  ;;  %v17111_v55 = vadd.f32 %v5463_v20, %v16956_v39  ;;  %v13241_v10 = vpop.f32.mrb[211].mxu1 }
 0x5f9   : > { %v6824_v52 = vpop.f32.mrb[64].mxu0 }
 0x5fa   : > { %v6825_v41 = vadd.f32 %v16771_v44, %v6824_v52  ;;  %13491 = vmatmul.mubr.msk.bf16.gmra.mrb[60].mxu1 %vm741_vm4, %v6516_v59  ;;  %v13500_v16 = vpop.f32.mrb[65].mxu0 }
 0x5fb   : > { %v6827_v60 = vpop.f32.mrb[66].mxu0  ;;  %13542 = vmatprep.mubr.msk.bf16.mxu1 %vm14616_vm2, %v14614_v1 }
 0x5fc   : > { %v6828_v37 = vadd.f32 %v16771_v44, %v6827_v60  ;;  %v13501_v54 = vpop.f32.mrb[67].mxu0  ;;  %v6895_v34 = vmax.f32 %v6825_v41, 0.0 }
 0x5fd   : > { %v5801_v47 = vpop.f32.mrb[212].mxu1 }
 0x5fe   : > { %v6896_v57 = vmax.f32 %v6828_v37, 0.0  ;;  %v17120_v39 = vadd.f32 %v5801_v47, %v16965_v56  ;;  %v13292_v31 = vpop.f32.mrb[213].mxu1  ;;  %13751 = vmatmul.mubr.msk.bf16.vlgmr.msra.gmra.mrb[172].mxu0 %vm311_vm3, %v14504_v18 }
 0x5ff   : > { %13831 = vmatpush3.bf16.msra.mxu0 %v17126_v29  ;;  %v5804_v26 = vpop.f32.mrb[214].mxu1  ;;  %13754 = vmatprep.mubr.msk.bf16.mxu0 %vm14616_vm2, %v14614_v1  ;;  %v17191_v31 = vld [vmem:[%s18520_s2] ss:$0 sm:$0xff] }
 0x600   : > { %v6913_v56 = vpack.c.bf16 %v6896_v57, %v6895_v34  ;;  %v17135_v48 = vadd.f32 %v5804_v26, %v16975_v15  ;;  %v13293_v4 = vpop.f32.mrb[215].mxu1  ;;  %13832 = vmatprep.subr.bf16.mxu0 %v14614_v1  ;;  %v14508_v15 = vld [vmem:[%s18521_s3 + $0x228] sm:$0xff]   ;;  %v14509_v34 = vld [vmem:[%s14682_s29 + $0x570] sm:$0xff]  }
 0x601   : > { %v6832_v19 = vpop.f32.mrb[68].mxu0 }
 0x602   : > { %v6833_v12 = vadd.f32 %v16771_v44, %v6832_v19  ;;  %v13504_v5 = vpop.f32.mrb[69].mxu0  ;;  %13543 = vmatmul.mubr.msk.bf16.vlgmr.msra.gmra.mrb[64].mxu1 %vm741_vm4, %v6913_v56 }
 0x603   : > { %13619 = vmatpush3.bf16.msra.mxu1 %v14505_v45  ;;  %v6835_v11 = vpop.f32.mrb[70].mxu0  ;;  %13546 = vmatprep.mubr.msk.bf16.mxu1 %vm14616_vm2, %v14614_v1 }
 0x604   : > { %v6836_v0 = vadd.f32 %v16771_v44, %v6835_v11  ;;  %v13505_v24 = vpop.f32.mrb[71].mxu0  ;;  %13620 = vmatprep.subr.bf16.mxu1 %v14614_v1  ;;  %13833 = vmatpush3.bf16.msra.mxu0 %v14671_v6  ;;  %v6897_v23 = vmax.f32 %v6833_v12, 0.0 }
 0x605   : > { %v5809_v33 = vpop.f32.mrb[216].mxu1  ;;  %13914 = vmatprep.subr.bf16.mxu0 %v14614_v1 }
 0x606   : > { %v6898_v9 = vmax.f32 %v6836_v0, 0.0  ;;  %v17151_v40 = vadd.f32 %v5809_v33, %v16991_v32  ;;  %v13296_v61 = vpop.f32.mrb[217].mxu1  ;;  %13755 = vmatmul.mubr.msk.bf16.gmra.mrb[176].mxu0 %vm311_vm3, %v14506_v58 }
 0x607   : > { %v5812_v27 = vpop.f32.mrb[218].mxu1  ;;  %13758 = vmatprep.mubr.msk.bf16.mxu0 %vm14616_vm2, %v14614_v1  ;;  %13621 = vmatpush3.bf16.msra.mxu1 %v14508_v15 }
 0x608   : > { %v6914_v30 = vpack.c.bf16 %v6898_v9, %v6897_v23  ;;  %v17160_v50 = vadd.f32 %v5812_v27, %v17000_v38  ;;  %v13297_v62 = vpop.f32.mrb[219].mxu1  ;;  %13622 = vmatprep.subr.bf16.mxu1 %v14614_v1  ;;  %v14515_v38 = vld [vmem:[%s18521_s3 + $0x238] sm:$0xff]  }
 0x609   : > { %v6840_v32 = vpop.f32.mrb[72].mxu0 }
 0x60a   : > { %v6841_v2 = vadd.f32 %v16771_v44, %v6840_v32  ;;  %v13508_v36 = vpop.f32.mrb[73].mxu0  ;;  %13547 = vmatmul.mubr.msk.bf16.gmra.mrb[68].mxu1 %vm741_vm4, %v6914_v30 }
 0x60b   : > { %v6843_v14 = vpop.f32.mrb[74].mxu0  ;;  %13550 = vmatprep.mubr.msk.bf16.mxu1 %vm14616_vm2, %v14614_v1  ;;  %13623 = vmatpush3.bf16.msra.mxu1 %v14511_v28 }
 0x60c   : > { %v6844_v17 = vadd.f32 %v16771_v44, %v6843_v14  ;;  %v13509_v3 = vpop.f32.mrb[75].mxu0  ;;  %13624 = vmatprep.subr.bf16.mxu1 %v14614_v1  ;;  %v6899_v59 = vmax.f32 %v6841_v2, 0.0 }
 0x60d   : > { %v5817_v20 = vpop.f32.mrb[220].mxu1 }
 0x60e   : > { %v6900_v10 = vmax.f32 %v6844_v17, 0.0  ;;  %v17174_v52 = vadd.f32 %v5817_v20, %v17014_v13  ;;  %v13300_v41 = vpop.f32.mrb[221].mxu1  ;;  %13759 = vmatmul.mubr.msk.bf16.gmra.mrb[180].mxu0 %vm311_vm3, %v14507_v25 }
 0x60f   : > { %v5820_v16 = vpop.f32.mrb[222].mxu1  ;;  %13762 = vmatprep.mubr.msk.bf16.mxu0 %vm14616_vm2, %v14614_v1  ;;  %13625 = vmatpush3.bf16.msra.mxu1 %v14515_v38 }
 0x610   : > { %v6915_v18 = vpack.c.bf16 %v6900_v10, %v6899_v59  ;;  %v17180_v60 = vadd.f32 %v5820_v16, %v17020_v22  ;;  %v13301_v37 = vpop.f32.mrb[223].mxu1  ;;  %13702 = vmatprep.subr.bf16.mxu1 %v14614_v1 }
 0x611   : > { %v6848_v54 = vpop.f32.mrb[76].mxu0 }
 0x612   : > { %v6849_v47 = vadd.f32 %v16771_v44, %v6848_v54  ;;  %v13512_v13 = vpop.f32.mrb[77].mxu0  ;;  %13551 = vmatmul.mubr.msk.bf16.gmra.mrb[72].mxu1 %vm741_vm4, %v6915_v18 }
 0x613   : > { %v6851_v57 = vpop.f32.mrb[78].mxu0  ;;  %13554 = vmatprep.mubr.msk.bf16.mxu1 %vm14616_vm2, %v14614_v1 }
 0x614   : > { %v6852_v22 = vadd.f32 %v17191_v31, %v6851_v57  ;;  %v13513_v26 = vpop.f32.mrb[79].mxu0  ;;  %v6901_v56 = vmax.f32 %v6849_v47, 0.0 }
 0x615   : > { %v5825_v45 = vpop.f32.mrb[224].mxu1 }
 0x616   : > { %v6902_v44 = vmax.f32 %v6852_v22, 0.0  ;;  %v17195_v4 = vadd.f32 %v5825_v45, %v17030_v49  ;;  %v13304_v19 = vpop.f32.mrb[225].mxu1  ;;  %13763 = vmatmul.mubr.msk.bf16.gmra.mrb[184].mxu0 %vm311_vm3, %v14509_v34  ;;  %v14510_v49 = vld [vmem:[%s14682_s29 + $0x578] sm:$0xff]  }
 0x617   : > { %v5828_v12 = vpop.f32.mrb[226].mxu1  ;;  %13766 = vmatprep.mubr.msk.bf16.mxu0 %vm14616_vm2, %v14614_v1 }
 0x618   : > { %v6916_v5 = vpack.c.bf16 %v6902_v44, %v6901_v56  ;;  %v17201_v58 = vadd.f32 %v5828_v12, %v17036_v63  ;;  %v13305_v11 = vpop.f32.mrb[227].mxu1 }
 0x619   : > { %v6856_v15 = vpop.f32.mrb[80].mxu0 }
 0x61a   : > { %v6857_v0 = vadd.f32 %v17191_v31, %v6856_v15  ;;  %v13516_v24 = vpop.f32.mrb[81].mxu0  ;;  %13555 = vmatmul.mubr.msk.bf16.gmra.mrb[76].mxu1 %vm741_vm4, %v6916_v5 }
 0x61b   : > { %v6859_v33 = vpop.f32.mrb[82].mxu0  ;;  %13558 = vmatprep.mubr.msk.bf16.mxu1 %vm14616_vm2, %v14614_v1 }
 0x61c   : > { %v6860_v23 = vadd.f32 %v17191_v31, %v6859_v33  ;;  %v13517_v9 = vpop.f32.mrb[83].mxu0  ;;  %v6903_v27 = vmax.f32 %v6857_v0, 0.0 }
 0x61d   : > { %v5833_v61 = vpop.f32.mrb[228].mxu1 }
 0x61e   : > { %v6904_v63 = vmax.f32 %v6860_v23, 0.0  ;;  %v17210_v28 = vadd.f32 %v5833_v61, %v17045_v7  ;;  %v13308_v30 = vpop.f32.mrb[229].mxu1  ;;  %13767 = vmatmul.mubr.msk.bf16.gmra.mrb[188].mxu0 %vm311_vm3, %v14510_v49  ;;  %v14512_v7 = vld [vmem:[%s14682_s29 + $0x580] sm:$0xff]  }
 0x61f   : > { %v5836_v62 = vpop.f32.mrb[230].mxu1  ;;  %13770 = vmatprep.mubr.msk.bf16.mxu0 %vm14616_vm2, %v14614_v1 }
 0x620   : > { %v6917_v32 = vpack.c.bf16 %v6904_v63, %v6903_v27  ;;  %v17216_v2 = vadd.f32 %v5836_v62, %v17051_v51  ;;  %v13309_v36 = vpop.f32.mrb[231].mxu1 }
 0x621   : > { %v6864_v25 = vpop.f32.mrb[84].mxu0 }
 0x622   : > { %v6865_v14 = vadd.f32 %v17191_v31, %v6864_v25  ;;  %v13520_v38 = vpop.f32.mrb[85].mxu0  ;;  %13559 = vmatmul.mubr.msk.bf16.gmra.mrb[80].mxu1 %vm741_vm4, %v6917_v32 }
 0x623   : > { %v6867_v17 = vpop.f32.mrb[86].mxu0  ;;  %13562 = vmatprep.mubr.msk.bf16.mxu1 %vm14616_vm2, %v14614_v1 }
 0x624   : > { %v6868_v3 = vadd.f32 %v17191_v31, %v6867_v17  ;;  %v13521_v20 = vpop.f32.mrb[87].mxu0  ;;  %v6905_v10 = vmax.f32 %v6865_v14, 0.0 }
 0x625   : > { %v5841_v59 = vpop.f32.mrb[232].mxu1 }
 0x626   : > { %v6906_v51 = vmax.f32 %v6868_v3, 0.0  ;;  %v17225_v41 = vadd.f32 %v5841_v59, %v17060_v21  ;;  %v13312_v16 = vpop.f32.mrb[233].mxu1  ;;  %13771 = vmatmul.mubr.msk.bf16.gmra.mrb[192].mxu0 %vm311_vm3, %v14512_v7  ;;  %v14513_v21 = vld [vmem:[%s14682_s29 + $0x588] sm:$0xff]  }
 0x627   : > { %v5844_v18 = vpop.f32.mrb[234].mxu1  ;;  %13774 = vmatprep.mubr.msk.bf16.mxu0 %vm14616_vm2, %v14614_v1 }
 0x628   : > { %v6918_v37 = vpack.c.bf16 %v6906_v51, %v6905_v10  ;;  %v17231_v54 = vadd.f32 %v5844_v18, %v17066_v42  ;;  %v13313_v47 = vpop.f32.mrb[235].mxu1 }
 0x629   : > { %v6872_v13 = vpop.f32.mrb[88].mxu0 }
 0x62a   : > { %v6873_v34 = vadd.f32 %v17191_v31, %v6872_v13  ;;  %v13524_v57 = vpop.f32.mrb[89].mxu0  ;;  %13563 = vmatmul.mubr.msk.bf16.gmra.mrb[84].mxu1 %vm741_vm4, %v6918_v37 }
 0x62b   : > { %v6875_v22 = vpop.f32.mrb[90].mxu0  ;;  %13566 = vmatprep.mubr.msk.bf16.mxu1 %vm14616_vm2, %v14614_v1 }
 0x62c   : > { %v6876_v26 = vadd.f32 %v17191_v31, %v6875_v22  ;;  %v13525_v45 = vpop.f32.mrb[91].mxu0  ;;  %v6907_v44 = vmax.f32 %v6873_v34, 0.0 }
 0x62d   : > { %v5849_v56 = vpop.f32.mrb[236].mxu1 }
 0x62e   : > { %v6908_v42 = vmax.f32 %v6876_v26, 0.0  ;;  %v17240_v19 = vadd.f32 %v5849_v56, %v17075_v35  ;;  %v13316_v12 = vpop.f32.mrb[237].mxu1  ;;  %13775 = vmatmul.mubr.msk.bf16.gmra.mrb[196].mxu0 %vm311_vm3, %v14513_v21  ;;  %v14514_v35 = vld [vmem:[%s14682_s29 + $0x590] sm:$0xff]  }
 0x62f   : > { %v5852_v5 = vpop.f32.mrb[238].mxu1  ;;  %13778 = vmatprep.mubr.msk.bf16.mxu0 %vm14616_vm2, %v14614_v1 }
 0x630   : > { %v6919_v11 = vpack.c.bf16 %v6908_v42, %v6907_v44  ;;  %v17246_v15 = vadd.f32 %v5852_v5, %v17081_v43  ;;  %v13317_v0 = vpop.f32.mrb[239].mxu1 }
 0x631   : > { %v6880_v24 = vpop.f32.mrb[92].mxu0  ;;  %v14518_v0 = vld [vmem:[%s18521_s3 + $0x240] sm:$0xff]  }
 0x632   : > { %v6881_v49 = vadd.f32 %v17191_v31, %v6880_v24  ;;  %v13528_v33 = vpop.f32.mrb[93].mxu0  ;;  %13567 = vmatmul.mubr.msk.bf16.gmra.mrb[88].mxu1 %vm741_vm4, %v6919_v11 }
 0x633   : > { %v6883_v23 = vpop.f32.mrb[94].mxu0  ;;  %13570 = vmatprep.mubr.msk.bf16.mxu1 %vm14616_vm2, %v14614_v1 }
 0x634   : > { %v6884_v9 = vadd.f32 %v17191_v31, %v6883_v23  ;;  %v13529_v61 = vpop.f32.mrb[95].mxu0  ;;  %v6909_v63 = vmax.f32 %v6881_v49, 0.0 }
 0x635   : > { %v5857_v27 = vpop.f32.mrb[240].mxu1 }
 0x636   : > { %v6910_v43 = vmax.f32 %v6884_v9, 0.0  ;;  %v17255_v30 = vadd.f32 %v5857_v27, %v17090_v8  ;;  %v13320_v62 = vpop.f32.mrb[241].mxu1  ;;  %13779 = vmatmul.mubr.msk.bf16.gmra.mrb[200].mxu0 %vm311_vm3, %v14514_v35  ;;  %v14516_v8 = vld [vmem:[%s14682_s29 + $0x598] sm:$0xff]   ;;  %v14519_v9 = vld [vmem:[%s14682_s29 + $0x5a8] sm:$0xff]  }
 0x637   : > { %v5860_v32 = vpop.f32.mrb[242].mxu1  ;;  %13782 = vmatprep.mubr.msk.bf16.mxu0 %vm14616_vm2, %v14614_v1 }
 0x638   : > { %v6920_v36 = vpack.c.bf16 %v6910_v43, %v6909_v63  ;;  %v17261_v25 = vadd.f32 %v5860_v32, %v17096_v46  ;;  %v13321_v14 = vpop.f32.mrb[243].mxu1 }
 0x639   : > { %v6888_v38 = vpop.f32.mrb[96].mxu0 }
 0x63a   : > { %v6889_v7 = vadd.f32 %v17191_v31, %v6888_v38  ;;  %v13532_v17 = vpop.f32.mrb[97].mxu0  ;;  %13571 = vmatmul.mubr.msk.bf16.gmra.mrb[92].mxu1 %vm741_vm4, %v6920_v36 }
 0x63b   : > { %v6891_v3 = vpop.f32.mrb[98].mxu0  ;;  %13574 = vmatprep.mubr.msk.bf16.mxu1 %vm14616_vm2, %v14614_v1 }
 0x63c   : > { %v6892_v20 = vadd.f32 %v17191_v31, %v6891_v3  ;;  %v13533_v59 = vpop.f32.mrb[99].mxu0  ;;  %v6911_v51 = vmax.f32 %v6889_v7, 0.0  ;;  %v14524_v7 = vld [vmem:[%s18521_s3 + $0x250] sm:$0xff]  }
 0x63d   : > { %v5865_v10 = vpop.f32.mrb[244].mxu1 }
 0x63e   : > { %v6912_v46 = vmax.f32 %v6892_v20, 0.0  ;;  %v17270_v16 = vadd.f32 %v5865_v10, %v17105_v53  ;;  %v13324_v18 = vpop.f32.mrb[245].mxu1  ;;  %13783 = vmatmul.mubr.msk.bf16.gmra.mrb[204].mxu0 %vm311_vm3, %v14516_v8  ;;  %v14517_v53 = vld [vmem:[%s14682_s29 + $0x5a0] sm:$0xff]   ;;  %v14520_v10 = vld [vmem:[%s14682_s29 + $0x5b0] sm:$0xff]  }
 0x63f   : > { %v5868_v37 = vpop.f32.mrb[246].mxu1  ;;  %13834 = vmatprep.mubr.msk.bf16.mxu0 %vm14616_vm2, %v14614_v1 }
 0x640   : > { %v6921_v47 = vpack.c.bf16 %v6912_v46, %v6911_v51  ;;  %v17276_v13 = vadd.f32 %v5868_v37, %v17111_v55  ;;  %v13325_v34 = vpop.f32.mrb[247].mxu1 }
 0x641   : > { %v7229_v57 = vpop.f32.mrb[100].mxu0 }
 0x642   : > { %v7230_v21 = vadd.f32 %v17191_v31, %v7229_v57  ;;  %13575 = vmatmul.mubr.msk.bf16.gmra.mrb[96].mxu1 %vm741_vm4, %v6921_v47  ;;  %v13584_v22 = vpop.f32.mrb[101].mxu0 }
 0x643   : > { %v7232_v26 = vpop.f32.mrb[102].mxu0  ;;  %13626 = vmatprep.mubr.msk.bf16.mxu1 %vm14616_vm2, %v14614_v1 }
 0x644   : > { %v7233_v45 = vadd.f32 %v17191_v31, %v7232_v26  ;;  %v13585_v56 = vpop.f32.mrb[103].mxu0  ;;  %v7300_v42 = vmax.f32 %v7230_v21, 0.0 }
 0x645   : > { %v6206_v44 = vpop.f32.mrb[248].mxu1 }
 0x646   : > { %v7301_v12 = vmax.f32 %v7233_v45, 0.0  ;;  %v17285_v55 = vadd.f32 %v6206_v44, %v17120_v39  ;;  %v13376_v5 = vpop.f32.mrb[249].mxu1  ;;  %13835 = vmatmul.mubr.msk.bf16.vlgmr.msra.gmra.mrb[208].mxu0 %vm311_vm3, %v14517_v53 }
 0x647   : > { %13915 = vmatpush3.bf16.msra.mxu0 %v17126_v29  ;;  %v6209_v11 = vpop.f32.mrb[250].mxu1  ;;  %13838 = vmatprep.mubr.msk.bf16.mxu0 %vm14616_vm2, %v14614_v1 }
 0x648   : > { %v7318_v24 = vpack.c.bf16 %v7301_v12, %v7300_v42  ;;  %v17295_v49 = vadd.f32 %v6209_v11, %v17135_v48  ;;  %v13377_v33 = vpop.f32.mrb[251].mxu1  ;;  %13916 = vmatprep.subr.bf16.mxu0 %v14614_v1  ;;  %v14521_v48 = vld [vmem:[%s18521_s3 + $0x248] sm:$0xff]   ;;  %v14522_v42 = vld [vmem:[%s14682_s29 + $0x5b8] sm:$0xff]  }
 0x649   : > { %v7237_v39 = vpop.f32.mrb[104].mxu0 }
 0x64a   : > { %v7238_v35 = vadd.f32 %v17191_v31, %v7237_v39  ;;  %v13588_v23 = vpop.f32.mrb[105].mxu0  ;;  %13627 = vmatmul.mubr.msk.bf16.vlgmr.msra.gmra.mrb[100].mxu1 %vm741_vm4, %v7318_v24 }
 0x64b   : > { %13703 = vmatpush3.bf16.msra.mxu1 %v14518_v0  ;;  %v7240_v61 = vpop.f32.mrb[106].mxu0  ;;  %13630 = vmatprep.mubr.msk.bf16.mxu1 %vm14616_vm2, %v14614_v1 }
 0x64c   : > { %v7241_v27 = vadd.f32 %v17191_v31, %v7240_v61  ;;  %v13589_v63 = vpop.f32.mrb[107].mxu0  ;;  %13704 = vmatprep.subr.bf16.mxu1 %v14614_v1  ;;  %13917 = vmatpush3.bf16.msra.mxu0 %v14671_v6  ;;  %v7302_v62 = vmax.f32 %v7238_v35, 0.0 }
 0x64d   : > { %v6214_v43 = vpop.f32.mrb[252].mxu1  ;;  %13998 = vmatprep.subr.bf16.mxu0 %v14614_v1 }
 0x64e   : > { %v7303_v32 = vmax.f32 %v7241_v27, 0.0  ;;  %v17311_v36 = vadd.f32 %v6214_v43, %v17151_v40  ;;  %v13380_v14 = vpop.f32.mrb[253].mxu1  ;;  %13839 = vmatmul.mubr.msk.bf16.gmra.mrb[212].mxu0 %vm311_vm3, %v14519_v9 }
 0x64f   : > { %v6217_v38 = vpop.f32.mrb[254].mxu1  ;;  %13842 = vmatprep.mubr.msk.bf16.mxu0 %vm14616_vm2, %v14614_v1  ;;  %13705 = vmatpush3.bf16.msra.mxu1 %v14521_v48 }
 0x650   : > { %v7319_v17 = vpack.c.bf16 %v7303_v32, %v7302_v62  ;;  %v17320_v8 = vadd.f32 %v6217_v38, %v17160_v50  ;;  %v13381_v3 = vpop.f32.mrb[255].mxu1  ;;  %13706 = vmatprep.subr.bf16.mxu1 %v14614_v1  ;;  %v14528_v50 = vld [vmem:[%s18521_s3 + $0x258] sm:$0xff]  }
 0x651   : > { %v7245_v40 = vpop.f32.mrb[108].mxu0 }
 0x652   : > { %v7246_v20 = vadd.f32 %v17191_v31, %v7245_v40  ;;  %v13592_v59 = vpop.f32.mrb[109].mxu0  ;;  %13631 = vmatmul.mubr.msk.bf16.gmra.mrb[104].mxu1 %vm741_vm4, %v7319_v17 }
 0x653   : > { %v7248_v51 = vpop.f32.mrb[110].mxu0  ;;  %13634 = vmatprep.mubr.msk.bf16.mxu1 %vm14616_vm2, %v14614_v1  ;;  %13707 = vmatpush3.bf16.msra.mxu1 %v14524_v7 }
 0x654   : > { %v7249_v46 = vadd.f32 %v17191_v31, %v7248_v51  ;;  %v13593_v18 = vpop.f32.mrb[111].mxu0  ;;  %13708 = vmatprep.subr.bf16.mxu1 %v14614_v1  ;;  %v7304_v47 = vmax.f32 %v7246_v20, 0.0 }
 0x655   : > { %v6222_v37 = vpop.f32.mrb[0].mxu1 }
 0x656   : > { %v7305_v34 = vmax.f32 %v7249_v46, 0.0  ;;  %v17334_v57 = vadd.f32 %v6222_v37, %v17174_v52  ;;  %v13384_v21 = vpop.f32.mrb[1].mxu1  ;;  %13843 = vmatmul.mubr.msk.bf16.gmra.mrb[216].mxu0 %vm311_vm3, %v14520_v10 }
 0x657   : > { %v6225_v22 = vpop.f32.mrb[2].mxu1  ;;  %13846 = vmatprep.mubr.msk.bf16.mxu0 %vm14616_vm2, %v14614_v1  ;;  %13709 = vmatpush3.bf16.msra.mxu1 %v14528_v50 }
 0x658   : > { %v7320_v53 = vpack.c.bf16 %v7305_v34, %v7304_v47  ;;  %v17340_v26 = vadd.f32 %v6225_v22, %v17180_v60  ;;  %v13385_v45 = vpop.f32.mrb[3].mxu1  ;;  %13786 = vmatprep.subr.bf16.mxu1 %v14614_v1 }
 0x659   : > { %v7253_v56 = vpop.f32.mrb[112].mxu0 }
 0x65a   : > { %v7254_v44 = vadd.f32 %v17191_v31, %v7253_v56  ;;  %v13596_v52 = vpop.f32.mrb[113].mxu0  ;;  %13635 = vmatmul.mubr.msk.bf16.gmra.mrb[108].mxu1 %vm741_vm4, %v7320_v53 }
 0x65b   : > { %v7256_v12 = vpop.f32.mrb[114].mxu0  ;;  %13638 = vmatprep.mubr.msk.bf16.mxu1 %vm14616_vm2, %v14614_v1 }
 0x65c   : > { %v7257_v5 = vadd.f32 %v17191_v31, %v7256_v12  ;;  %v13597_v11 = vpop.f32.mrb[115].mxu0  ;;  %v7306_v0 = vmax.f32 %v7254_v44, 0.0 }
 0x65d   : > { %v6230_v60 = vpop.f32.mrb[4].mxu1 }
 0x65e   : > { %v7307_v24 = vmax.f32 %v7257_v5, 0.0  ;;  %v17350_v33 = vadd.f32 %v6230_v60, %v17195_v4  ;;  %v13388_v39 = vpop.f32.mrb[5].mxu1  ;;  %13847 = vmatmul.mubr.msk.bf16.gmra.mrb[220].mxu0 %vm311_vm3, %v14522_v42  ;;  %v14523_v4 = vld [vmem:[%s14682_s29 + $0x5c0] sm:$0xff]  }
 0x65f   : > { %v6233_v35 = vpop.f32.mrb[6].mxu1  ;;  %13850 = vmatprep.mubr.msk.bf16.mxu0 %vm14616_vm2, %v14614_v1 }
 0x660   : > { %v7321_v23 = vpack.c.bf16 %v7307_v24, %v7306_v0  ;;  %v17356_v9 = vadd.f32 %v6233_v35, %v17201_v58  ;;  %v13389_v61 = vpop.f32.mrb[7].mxu1 }
 0x661   : > { %v7261_v48 = vpop.f32.mrb[116].mxu0 }
 0x662   : > { %v7262_v27 = vadd.f32 %v17191_v31, %v7261_v48  ;;  %v13600_v63 = vpop.f32.mrb[117].mxu0  ;;  %13639 = vmatmul.mubr.msk.bf16.gmra.mrb[112].mxu1 %vm741_vm4, %v7321_v23 }
 0x663   : > { %v7264_v43 = vpop.f32.mrb[118].mxu0  ;;  %13642 = vmatprep.mubr.msk.bf16.mxu1 %vm14616_vm2, %v14614_v1 }
 0x664   : > { %v7265_v62 = vadd.f32 %v17191_v31, %v7264_v43  ;;  %v13601_v32 = vpop.f32.mrb[119].mxu0  ;;  %v7308_v38 = vmax.f32 %v7262_v27, 0.0 }
 0x665   : > { %v6238_v14 = vpop.f32.mrb[8].mxu1 }
 0x666   : > { %v7309_v58 = vmax.f32 %v7265_v62, 0.0  ;;  %v17365_v7 = vadd.f32 %v6238_v14, %v17210_v28  ;;  %v13392_v17 = vpop.f32.mrb[9].mxu1  ;;  %13851 = vmatmul.mubr.msk.bf16.gmra.mrb[224].mxu0 %vm311_vm3, %v14523_v4  ;;  %v14525_v28 = vld [vmem:[%s14682_s29 + $0x5c8] sm:$0xff]  }
 0x667   : > { %v6241_v3 = vpop.f32.mrb[10].mxu1  ;;  %13854 = vmatprep.mubr.msk.bf16.mxu0 %vm14616_vm2, %v14614_v1 }
 0x668   : > { %v7322_v40 = vpack.c.bf16 %v7309_v58, %v7308_v38  ;;  %v17371_v20 = vadd.f32 %v6241_v3, %v17216_v2  ;;  %v13393_v59 = vpop.f32.mrb[11].mxu1 }
 0x669   : > { %v7269_v10 = vpop.f32.mrb[120].mxu0 }
 0x66a   : > { %v7270_v51 = vadd.f32 %v17191_v31, %v7269_v10  ;;  %v13604_v50 = vpop.f32.mrb[121].mxu0  ;;  %13643 = vmatmul.mubr.msk.bf16.gmra.mrb[116].mxu1 %vm741_vm4, %v7322_v40 }
 0x66b   : > { %v7272_v46 = vpop.f32.mrb[122].mxu0  ;;  %13646 = vmatprep.mubr.msk.bf16.mxu1 %vm14616_vm2, %v14614_v1 }
 0x66c   : > { %v7273_v18 = vadd.f32 %v17191_v31, %v7272_v46  ;;  %v13605_v37 = vpop.f32.mrb[123].mxu0  ;;  %v7310_v34 = vmax.f32 %v7270_v51, 0.0 }
 0x66d   : > { %v6246_v47 = vpop.f32.mrb[12].mxu1 }
 0x66e   : > { %v7311_v2 = vmax.f32 %v7273_v18, 0.0  ;;  %v17380_v21 = vadd.f32 %v6246_v47, %v17225_v41  ;;  %v13396_v22 = vpop.f32.mrb[13].mxu1  ;;  %13855 = vmatmul.mubr.msk.bf16.gmra.mrb[228].mxu0 %vm311_vm3, %v14525_v28  ;;  %v14526_v41 = vld [vmem:[%s14682_s29 + $0x5d0] sm:$0xff]  }
 0x66f   : > { %v6249_v53 = vpop.f32.mrb[14].mxu1  ;;  %13858 = vmatprep.mubr.msk.bf16.mxu0 %vm14616_vm2, %v14614_v1 }
 0x670   : > { %v7323_v45 = vpack.c.bf16 %v7311_v2, %v7310_v34  ;;  %v17386_v56 = vadd.f32 %v6249_v53, %v17231_v54  ;;  %v13397_v44 = vpop.f32.mrb[15].mxu1 }
 0x671   : > { %v7277_v52 = vpop.f32.mrb[124].mxu0 }
 0x672   : > { %v7278_v42 = vadd.f32 %v17191_v31, %v7277_v52  ;;  %v13608_v12 = vpop.f32.mrb[125].mxu0  ;;  %13647 = vmatmul.mubr.msk.bf16.gmra.mrb[120].mxu1 %vm741_vm4, %v7323_v45 }
 0x673   : > { %v7280_v5 = vpop.f32.mrb[126].mxu0  ;;  %13650 = vmatprep.mubr.msk.bf16.mxu1 %vm14616_vm2, %v14614_v1 }
 0x674   : > { %v7281_v11 = vadd.f32 %v17191_v31, %v7280_v5  ;;  %v13609_v60 = vpop.f32.mrb[127].mxu0  ;;  %v7312_v24 = vmax.f32 %v7278_v42, 0.0 }
 0x675   : > { %v6254_v0 = vpop.f32.mrb[16].mxu1 }
 0x676   : > { %v7313_v54 = vmax.f32 %v7281_v11, 0.0  ;;  %v17395_v39 = vadd.f32 %v6254_v0, %v17240_v19  ;;  %v13400_v35 = vpop.f32.mrb[17].mxu1  ;;  %13859 = vmatmul.mubr.msk.bf16.gmra.mrb[232].mxu0 %vm311_vm3, %v14526_v41  ;;  %v14527_v19 = vld [vmem:[%s14682_s29 + $0x5d8] sm:$0xff]  }
 0x677   : > { %v6257_v23 = vpop.f32.mrb[18].mxu1  ;;  %13862 = vmatprep.mubr.msk.bf16.mxu0 %vm14616_vm2, %v14614_v1 }
 0x678   : > { %v7324_v61 = vpack.c.bf16 %v7313_v54, %v7312_v24  ;;  %v17401_v48 = vadd.f32 %v6257_v23, %v17246_v15  ;;  %v13401_v27 = vpop.f32.mrb[19].mxu1 }
 0x679   : > { %v7285_v63 = vpop.f32.mrb[128].mxu0  ;;  %v14531_v27 = vld [vmem:[%s18521_s3 + $0x260] sm:$0xff]  }
 0x67a   : > { %v7286_v4 = vadd.f32 %v17191_v31, %v7285_v63  ;;  %v13612_v43 = vpop.f32.mrb[129].mxu0  ;;  %13651 = vmatmul.mubr.msk.bf16.gmra.mrb[124].mxu1 %vm741_vm4, %v7324_v61 }
 0x67b   : > { %v7288_v62 = vpop.f32.mrb[130].mxu0  ;;  %13654 = vmatprep.mubr.msk.bf16.mxu1 %vm14616_vm2, %v14614_v1 }
 0x67c   : > { %v7289_v32 = vadd.f32 %v17191_v31, %v7288_v62  ;;  %v13613_v14 = vpop.f32.mrb[131].mxu0  ;;  %v7314_v58 = vmax.f32 %v7286_v4, 0.0 }
 0x67d   : > { %v6262_v38 = vpop.f32.mrb[20].mxu1 }
 0x67e   : > { %v7315_v15 = vmax.f32 %v7289_v32, 0.0  ;;  %v17410_v17 = vadd.f32 %v6262_v38, %v17255_v30  ;;  %v13404_v3 = vpop.f32.mrb[21].mxu1  ;;  %13863 = vmatmul.mubr.msk.bf16.gmra.mrb[236].mxu0 %vm311_vm3, %v14527_v19  ;;  %v14529_v30 = vld [vmem:[%s14682_s29 + $0x5e0] sm:$0xff]  }
 0x67f   : > { %v6265_v40 = vpop.f32.mrb[22].mxu1  ;;  %13866 = vmatprep.mubr.msk.bf16.mxu0 %vm14616_vm2, %v14614_v1 }
 0x680   : > { %v7325_v59 = vpack.c.bf16 %v7315_v15, %v7314_v58  ;;  %v17416_v10 = vadd.f32 %v6265_v40, %v17261_v25  ;;  %v13405_v51 = vpop.f32.mrb[23].mxu1 }
 0x681   : > { %v7293_v50 = vpop.f32.mrb[132].mxu0 }
 0x682   : > { %v7294_v28 = vadd.f32 %v17191_v31, %v7293_v50  ;;  %v13616_v46 = vpop.f32.mrb[133].mxu0  ;;  %13655 = vmatmul.mubr.msk.bf16.gmra.mrb[128].mxu1 %vm741_vm4, %v7325_v59  ;;  %v14537_v50 = vld [vmem:[%s18521_s3 + $0x270] sm:$0xff]  }
 0x683   : > { %v7296_v18 = vpop.f32.mrb[134].mxu0  ;;  %13658 = vmatprep.mubr.msk.bf16.mxu1 %vm14616_vm2, %v14614_v1 }
 0x684   : > { %v7297_v37 = vadd.f32 %v17191_v31, %v7296_v18  ;;  %v13617_v47 = vpop.f32.mrb[135].mxu0  ;;  %v7316_v2 = vmax.f32 %v7294_v28, 0.0 }
 0x685   : > { %v6270_v34 = vpop.f32.mrb[24].mxu1  ;;  %v14533_v47 = vld [vmem:[%s14682_s29 + $0x5f8] sm:$0xff]  }
 0x686   : > { %v7317_v25 = vmax.f32 %v7297_v37, 0.0  ;;  %v17425_v22 = vadd.f32 %v6270_v34, %v17270_v16  ;;  %v13408_v53 = vpop.f32.mrb[25].mxu1  ;;  %13867 = vmatmul.mubr.msk.bf16.gmra.mrb[240].mxu0 %vm311_vm3, %v14529_v30  ;;  %v14530_v16 = vld [vmem:[%s14682_s29 + $0x5e8] sm:$0xff]  }
 0x687   : > { %v6273_v45 = vpop.f32.mrb[26].mxu1  ;;  %13918 = vmatprep.mubr.msk.bf16.mxu0 %vm14616_vm2, %v14614_v1 }
 0x688   : > { %v7326_v44 = vpack.c.bf16 %v7317_v25, %v7316_v2  ;;  %v17431_v52 = vadd.f32 %v6273_v45, %v17276_v13  ;;  %v13409_v42 = vpop.f32.mrb[27].mxu1 }
 0x689   : > { %v7634_v12 = vpop.f32.mrb[136].mxu0 }
 0x68a   : > { %v7635_v41 = vadd.f32 %v17191_v31, %v7634_v12  ;;  %13659 = vmatmul.mubr.msk.bf16.gmra.mrb[132].mxu1 %vm741_vm4, %v7326_v44  ;;  %v13668_v5 = vpop.f32.mrb[137].mxu0 }
 0x68b   : > { %v7637_v11 = vpop.f32.mrb[138].mxu0  ;;  %13710 = vmatprep.mubr.msk.bf16.mxu1 %vm14616_vm2, %v14614_v1 }
 0x68c   : > { %v7638_v60 = vadd.f32 %v17191_v31, %v7637_v11  ;;  %v13669_v0 = vpop.f32.mrb[139].mxu0  ;;  %v7705_v54 = vmax.f32 %v7635_v41, 0.0 }
 0x68d   : > { %v6611_v24 = vpop.f32.mrb[28].mxu1 }
 0x68e   : > { %v7706_v35 = vmax.f32 %v7638_v60, 0.0  ;;  %v17440_v13 = vadd.f32 %v6611_v24, %v17285_v55  ;;  %v13460_v23 = vpop.f32.mrb[29].mxu1  ;;  %13919 = vmatmul.mubr.msk.bf16.vlgmr.msra.gmra.mrb[244].mxu0 %vm311_vm3, %v14530_v16  ;;  %v14535_v24 = vld [vmem:[%s14682_s29 + $0x600] sm:$0xff]  }
 0x68f   : > { %13999 = vmatpush3.bf16.msra.mxu0 %v17126_v29  ;;  %v6614_v61 = vpop.f32.mrb[30].mxu1  ;;  %13922 = vmatprep.mubr.msk.bf16.mxu0 %vm14616_vm2, %v14614_v1  ;;  %v14532_v29 = vld [vmem:[%s14682_s29 + $0x5f0] sm:$0xff]  }
 0x690   : > { %v7723_v63 = vpack.c.bf16 %v7706_v35, %v7705_v54  ;;  %v17450_v4 = vadd.f32 %v6614_v61, %v17295_v49  ;;  %v13461_v43 = vpop.f32.mrb[31].mxu1  ;;  %14000 = vmatprep.subr.bf16.mxu0 %v14614_v1  ;;  %v14534_v49 = vld [vmem:[%s18521_s3 + $0x268] sm:$0xff]  }
 0x691   : > { %v7642_v55 = vpop.f32.mrb[140].mxu0 }
 0x692   : > { %v7643_v19 = vadd.f32 %v17191_v31, %v7642_v55  ;;  %v13672_v62 = vpop.f32.mrb[141].mxu0  ;;  %13711 = vmatmul.mubr.msk.bf16.vlgmr.msra.gmra.mrb[136].mxu1 %vm741_vm4, %v7723_v63 }
 0x693   : > { %13787 = vmatpush3.bf16.msra.mxu1 %v14531_v27  ;;  %v7645_v32 = vpop.f32.mrb[142].mxu0  ;;  %13714 = vmatprep.mubr.msk.bf16.mxu1 %vm14616_vm2, %v14614_v1 }
 0x694   : > { %v7646_v14 = vadd.f32 %v17191_v31, %v7645_v32  ;;  %v13673_v38 = vpop.f32.mrb[143].mxu0  ;;  %13788 = vmatprep.subr.bf16.mxu1 %v14614_v1  ;;  %14001 = vmatpush3.bf16.msra.mxu0 %v14671_v6  ;;  %v7707_v15 = vmax.f32 %v7643_v19, 0.0 }
 0x695   : > { %v6619_v58 = vpop.f32.mrb[32].mxu1  ;;  %14082 = vmatprep.subr.bf16.mxu0 %v14614_v1 }
 0x696   : > { %v7708_v3 = vmax.f32 %v7646_v14, 0.0  ;;  %v17466_v40 = vadd.f32 %v6619_v58, %v17311_v36  ;;  %v13464_v59 = vpop.f32.mrb[33].mxu1  ;;  %13923 = vmatmul.mubr.msk.bf16.gmra.mrb[248].mxu0 %vm311_vm3, %v14532_v29 }
 0x697   : > { %v6622_v51 = vpop.f32.mrb[34].mxu1  ;;  %13926 = vmatprep.mubr.msk.bf16.mxu0 %vm14616_vm2, %v14614_v1  ;;  %13789 = vmatpush3.bf16.msra.mxu1 %v14534_v49 }
 0x698   : > { %v7724_v28 = vpack.c.bf16 %v7708_v3, %v7707_v15  ;;  %v17475_v46 = vadd.f32 %v6622_v51, %v17320_v8  ;;  %v13465_v30 = vpop.f32.mrb[35].mxu1  ;;  %13790 = vmatprep.subr.bf16.mxu1 %v14614_v1  ;;  %v14541_v8 = vld [vmem:[%s18521_s3 + $0x278] sm:$0xff]  }
 0x699   : > { %v7650_v36 = vpop.f32.mrb[144].mxu0 }
 0x69a   : > { %v7651_v18 = vadd.f32 %v17191_v31, %v7650_v36  ;;  %v13676_v37 = vpop.f32.mrb[145].mxu0  ;;  %13715 = vmatmul.mubr.msk.bf16.gmra.mrb[140].mxu1 %vm741_vm4, %v7724_v28 }
 0x69b   : > { %v7653_v34 = vpop.f32.mrb[146].mxu0  ;;  %13718 = vmatprep.mubr.msk.bf16.mxu1 %vm14616_vm2, %v14614_v1  ;;  %13791 = vmatpush3.bf16.msra.mxu1 %v14537_v50 }
 0x69c   : > { %v7654_v2 = vadd.f32 %v17191_v31, %v7653_v34  ;;  %v13677_v25 = vpop.f32.mrb[147].mxu0  ;;  %13792 = vmatprep.subr.bf16.mxu1 %v14614_v1  ;;  %v7709_v45 = vmax.f32 %v7651_v18, 0.0 }
 0x69d   : > { %v6627_v53 = vpop.f32.mrb[36].mxu1 }
 0x69e   : > { %v7710_v44 = vmax.f32 %v7654_v2, 0.0  ;;  %v17489_v42 = vadd.f32 %v6627_v53, %v17334_v57  ;;  %v13468_v12 = vpop.f32.mrb[37].mxu1  ;;  %13927 = vmatmul.mubr.msk.bf16.gmra.mrb[252].mxu0 %vm311_vm3, %v14533_v47 }
 0x69f   : > { %v6630_v41 = vpop.f32.mrb[38].mxu1  ;;  %13930 = vmatprep.mubr.msk.bf16.mxu0 %vm14616_vm2, %v14614_v1  ;;  %13793 = vmatpush3.bf16.msra.mxu1 %v14541_v8 }
 0x6a0   : > { %v7725_v5 = vpack.c.bf16 %v7710_v44, %v7709_v45  ;;  %v17495_v16 = vadd.f32 %v6630_v41, %v17340_v26  ;;  %v13469_v11 = vpop.f32.mrb[39].mxu1  ;;  %13870 = vmatprep.subr.bf16.mxu1 %v14614_v1 }
 0x6a1   : > { %v7658_v60 = vpop.f32.mrb[148].mxu0 }
 0x6a2   : > { %v7659_v0 = vadd.f32 %v17191_v31, %v7658_v60  ;;  %v13680_v57 = vpop.f32.mrb[149].mxu0  ;;  %13719 = vmatmul.mubr.msk.bf16.gmra.mrb[144].mxu1 %vm741_vm4, %v7725_v5 }
 0x6a3   : > { %v7661_v54 = vpop.f32.mrb[150].mxu0  ;;  %13722 = vmatprep.mubr.msk.bf16.mxu1 %vm14616_vm2, %v14614_v1 }
 0x6a4   : > { %v7662_v35 = vadd.f32 %v17191_v31, %v7661_v54  ;;  %v13681_v23 = vpop.f32.mrb[151].mxu0  ;;  %v7711_v61 = vmax.f32 %v7659_v0, 0.0 }
 0x6a5   : > { %v6635_v26 = vpop.f32.mrb[40].mxu1 }
 0x6a6   : > { %v7712_v27 = vmax.f32 %v7662_v35, 0.0  ;;  %v17505_v63 = vadd.f32 %v6635_v26, %v17350_v33  ;;  %v13472_v43 = vpop.f32.mrb[41].mxu1  ;;  %13931 = vmatmul.mubr.msk.bf16.gmra.mrb[0].mxu0 %vm311_vm3, %v14535_v24  ;;  %v14536_v33 = vld [vmem:[%s14682_s29 + $0x608] sm:$0xff]  }
 0x6a7   : > { %v6638_v55 = vpop.f32.mrb[42].mxu1  ;;  %13934 = vmatprep.mubr.msk.bf16.mxu0 %vm14616_vm2, %v14614_v1 }
 0x6a8   : > { %v7726_v19 = vpack.c.bf16 %v7712_v27, %v7711_v61  ;;  %v17511_v62 = vadd.f32 %v6638_v55, %v17356_v9  ;;  %v13473_v29 = vpop.f32.mrb[43].mxu1 }
 0x6a9   : > { %v7666_v32 = vpop.f32.mrb[152].mxu0 }
 0x6aa   : > { %v7667_v49 = vadd.f32 %v17191_v31, %v7666_v32  ;;  %v13684_v14 = vpop.f32.mrb[153].mxu0  ;;  %13723 = vmatmul.mubr.msk.bf16.gmra.mrb[148].mxu1 %vm741_vm4, %v7726_v19 }
 0x6ab   : > { %v7669_v38 = vpop.f32.mrb[154].mxu0  ;;  %13726 = vmatprep.mubr.msk.bf16.mxu1 %vm14616_vm2, %v14614_v1 }
 0x6ac   : > { %v7670_v58 = vadd.f32 %v17191_v31, %v7669_v38  ;;  %v13685_v15 = vpop.f32.mrb[155].mxu0  ;;  %v7713_v59 = vmax.f32 %v7667_v49, 0.0 }
 0x6ad   : > { %v6643_v3 = vpop.f32.mrb[44].mxu1 }
 0x6ae   : > { %v7714_v9 = vmax.f32 %v7670_v58, 0.0  ;;  %v17520_v51 = vadd.f32 %v6643_v3, %v17365_v7  ;;  %v13476_v50 = vpop.f32.mrb[45].mxu1  ;;  %13935 = vmatmul.mubr.msk.bf16.gmra.mrb[4].mxu0 %vm311_vm3, %v14536_v33  ;;  %v14538_v7 = vld [vmem:[%s14682_s29 + $0x610] sm:$0xff]  }
 0x6af   : > { %v6646_v28 = vpop.f32.mrb[46].mxu1  ;;  %13938 = vmatprep.mubr.msk.bf16.mxu0 %vm14616_vm2, %v14614_v1 }
 0x6b0   : > { %v7727_v30 = vpack.c.bf16 %v7714_v9, %v7713_v59  ;;  %v17526_v36 = vadd.f32 %v6646_v28, %v17371_v20  ;;  %v13477_v18 = vpop.f32.mrb[47].mxu1 }
 0x6b1   : > { %v7674_v37 = vpop.f32.mrb[156].mxu0 }
 0x6b2   : > { %v7675_v47 = vadd.f32 %v17191_v31, %v7674_v37  ;;  %v13688_v34 = vpop.f32.mrb[157].mxu0  ;;  %13727 = vmatmul.mubr.msk.bf16.gmra.mrb[152].mxu1 %vm741_vm4, %v7727_v30 }
 0x6b3   : > { %v7677_v8 = vpop.f32.mrb[158].mxu0  ;;  %13730 = vmatprep.mubr.msk.bf16.mxu1 %vm14616_vm2, %v14614_v1 }
 0x6b4   : > { %v7678_v2 = vadd.f32 %v17191_v31, %v7677_v8  ;;  %v13689_v25 = vpop.f32.mrb[159].mxu0  ;;  %v7715_v45 = vmax.f32 %v7675_v47, 0.0 }
 0x6b5   : > { %v6651_v53 = vpop.f32.mrb[48].mxu1 }
 0x6b6   : > { %v7716_v20 = vmax.f32 %v7678_v2, 0.0  ;;  %v17535_v44 = vadd.f32 %v6651_v53, %v17380_v21  ;;  %v13480_v12 = vpop.f32.mrb[49].mxu1  ;;  %13939 = vmatmul.mubr.msk.bf16.gmra.mrb[8].mxu0 %vm311_vm3, %v14538_v7  ;;  %v14539_v21 = vld [vmem:[%s14682_s29 + $0x618] sm:$0xff]  }
 0x6b7   : > { %v6654_v41 = vpop.f32.mrb[50].mxu1  ;;  %13942 = vmatprep.mubr.msk.bf16.mxu0 %vm14616_vm2, %v14614_v1 }
 0x6b8   : > { %v7728_v5 = vpack.c.bf16 %v7716_v20, %v7715_v45  ;;  %v17541_v11 = vadd.f32 %v6654_v41, %v17386_v56  ;;  %v13481_v60 = vpop.f32.mrb[51].mxu1 }
 0x6b9   : > { %v7682_v0 = vpop.f32.mrb[160].mxu0 }
 0x6ba   : > { %v7683_v57 = vadd.f32 %v17191_v31, %v7682_v0  ;;  %v13692_v24 = vpop.f32.mrb[161].mxu0  ;;  %13731 = vmatmul.mubr.msk.bf16.gmra.mrb[156].mxu1 %vm741_vm4, %v7728_v5 }
 0x6bb   : > { %v7685_v54 = vpop.f32.mrb[162].mxu0  ;;  %13734 = vmatprep.mubr.msk.bf16.mxu1 %vm14616_vm2, %v14614_v1 }
 0x6bc   : > { %v7686_v35 = vadd.f32 %v17191_v31, %v7685_v54  ;;  %v13693_v23 = vpop.f32.mrb[163].mxu0  ;;  %v7717_v61 = vmax.f32 %v7683_v57, 0.0 }
 0x6bd   : > { %v6659_v26 = vpop.f32.mrb[52].mxu1 }
 0x6be   : > { %v7718_v56 = vmax.f32 %v7686_v35, 0.0  ;;  %v17550_v27 = vadd.f32 %v6659_v26, %v17395_v39  ;;  %v13484_v43 = vpop.f32.mrb[53].mxu1  ;;  %13943 = vmatmul.mubr.msk.bf16.gmra.mrb[12].mxu0 %vm311_vm3, %v14539_v21  ;;  %v14540_v39 = vld [vmem:[%s14682_s29 + $0x620] sm:$0xff]  }
 0x6bf   : > { %v6662_v55 = vpop.f32.mrb[54].mxu1  ;;  %13946 = vmatprep.mubr.msk.bf16.mxu0 %vm14616_vm2, %v14614_v1  ;;  %v17596_v35 = vld [vmem:[%s18520_s2] ss:$0 sm:$0xff] }
 0x6c0   : > { %v7729_v19 = vpack.c.bf16 %v7718_v56, %v7717_v61  ;;  %v17556_v29 = vadd.f32 %v6662_v55, %v17401_v48  ;;  %v13485_v32 = vpop.f32.mrb[55].mxu1  ;;  %v17606_v55 = vld [vmem:[%s18519_s1] sm:$0xff]  }
 0x6c1   : > { %v7690_v49 = vpop.f32.mrb[164].mxu0  ;;  %v14544_v32 = vld [vmem:[%s18521_s3 + $0x280] sm:$0xff]  }
 0x6c2   : > { %v7691_v14 = vadd.f32 %v17191_v31, %v7690_v49  ;;  %v13696_v33 = vpop.f32.mrb[165].mxu0  ;;  %13735 = vmatmul.mubr.msk.bf16.gmra.mrb[160].mxu1 %vm741_vm4, %v7729_v19 }
 0x6c3   : > { %v7693_v38 = vpop.f32.mrb[166].mxu0  ;;  %13738 = vmatprep.mubr.msk.bf16.mxu1 %vm14616_vm2, %v14614_v1 }
 0x6c4   : > { %v7694_v58 = vadd.f32 %v17191_v31, %v7693_v38  ;;  %v13697_v15 = vpop.f32.mrb[167].mxu0  ;;  %v7719_v59 = vmax.f32 %v7691_v14, 0.0 }
 0x6c5   : > { %v6667_v3 = vpop.f32.mrb[56].mxu1 }
 0x6c6   : > { %v7720_v48 = vmax.f32 %v7694_v58, 0.0  ;;  %v17565_v9 = vadd.f32 %v6667_v3, %v17410_v17  ;;  %v13488_v50 = vpop.f32.mrb[57].mxu1  ;;  %13947 = vmatmul.mubr.msk.bf16.gmra.mrb[16].mxu0 %vm311_vm3, %v14540_v39  ;;  %v14542_v17 = vld [vmem:[%s14682_s29 + $0x628] sm:$0xff]   ;;  %v14545_v58 = vld [vmem:[%s14682_s29 + $0x638] sm:$0xff]  }
 0x6c7   : > { %v6670_v28 = vpop.f32.mrb[58].mxu1  ;;  %13950 = vmatprep.mubr.msk.bf16.mxu0 %vm14616_vm2, %v14614_v1 }
 0x6c8   : > { %v7730_v30 = vpack.c.bf16 %v7720_v48, %v7719_v59  ;;  %v17571_v18 = vadd.f32 %v6670_v28, %v17416_v10  ;;  %v13489_v37 = vpop.f32.mrb[59].mxu1 }
 0x6c9   : > { %v7698_v47 = vpop.f32.mrb[168].mxu0 }
 0x6ca   : > { %v7699_v34 = vadd.f32 %v17191_v31, %v7698_v47  ;;  %v13700_v7 = vpop.f32.mrb[169].mxu0  ;;  %13739 = vmatmul.mubr.msk.bf16.gmra.mrb[164].mxu1 %vm741_vm4, %v7730_v30 }
 0x6cb   : > { %v7701_v8 = vpop.f32.mrb[170].mxu0  ;;  %13742 = vmatprep.mubr.msk.bf16.mxu1 %vm14616_vm2, %v14614_v1 }
 0x6cc   : > { %v7702_v2 = vadd.f32 %v17191_v31, %v7701_v8  ;;  %v13701_v25 = vpop.f32.mrb[171].mxu0  ;;  %v7721_v45 = vmax.f32 %v7699_v34, 0.0  ;;  %v14550_v34 = vld [vmem:[%s18521_s3 + $0x290] sm:$0xff]  }
 0x6cd   : > { %v6675_v53 = vpop.f32.mrb[60].mxu1 }
 0x6ce   : > { %v7722_v10 = vmax.f32 %v7702_v2, 0.0  ;;  %v17580_v20 = vadd.f32 %v6675_v53, %v17425_v22  ;;  %v13492_v12 = vpop.f32.mrb[61].mxu1  ;;  %13951 = vmatmul.mubr.msk.bf16.gmra.mrb[20].mxu0 %vm311_vm3, %v14542_v17  ;;  %v14543_v22 = vld [vmem:[%s14682_s29 + $0x630] sm:$0xff]   ;;  %v14546_v53 = vld [vmem:[%s14682_s29 + $0x640] sm:$0xff]  }
 0x6cf   : > { %v6678_v41 = vpop.f32.mrb[62].mxu1  ;;  %14002 = vmatprep.mubr.msk.bf16.mxu0 %vm14616_vm2, %v14614_v1 }
 0x6d0   : > { %v7731_v5 = vpack.c.bf16 %v7722_v10, %v7721_v45  ;;  %v17586_v60 = vadd.f32 %v6678_v41, %v17431_v52  ;;  %v13493_v0 = vpop.f32.mrb[63].mxu1 }
 0x6d1   : > { %v8039_v57 = vpop.f32.mrb[172].mxu0 }
 0x6d2   : > { %v8040_v24 = vadd.f32 %v17191_v31, %v8039_v57  ;;  %13743 = vmatmul.mubr.msk.bf16.gmra.mrb[168].mxu1 %vm741_vm4, %v7731_v5  ;;  %v13752_v21 = vpop.f32.mrb[173].mxu0 }
 0x6d3   : > { %v8042_v54 = vpop.f32.mrb[174].mxu0  ;;  %13794 = vmatprep.mubr.msk.bf16.mxu1 %vm14616_vm2, %v14614_v1 }
 0x6d4   : > { %v8043_v52 = vadd.f32 %v17596_v35, %v8042_v54  ;;  %v13753_v23 = vpop.f32.mrb[175].mxu0  ;;  %v8110_v61 = vmax.f32 %v8040_v24, 0.0 }
 0x6d5   : > { %v7016_v26 = vpop.f32.mrb[64].mxu1 }
 0x6d6   : > { %v8111_v56 = vmax.f32 %v8043_v52, 0.0  ;;  %v17600_v31 = vadd.f32 %v7016_v26, %v17440_v13  ;;  %v13544_v43 = vpop.f32.mrb[65].mxu1  ;;  %14003 = vmatmul.mubr.msk.bf16.vlgmr.msra.gmra.mrb[24].mxu0 %vm311_vm3, %v14543_v22 }
 0x6d7   : > { %14083 = vmatpush3.bf16.msra.mxu0 %v17606_v55  ;;  %v7019_v19 = vpop.f32.mrb[66].mxu1  ;;  %14006 = vmatprep.mubr.msk.bf16.mxu0 %vm14616_vm2, %v14614_v1 }
 0x6d8   : > { %v8128_v13 = vpack.c.bf16 %v8111_v56, %v8110_v61  ;;  %v17615_v49 = vadd.f32 %v7019_v19, %v17450_v4  ;;  %v13545_v14 = vpop.f32.mrb[67].mxu1  ;;  %14084 = vmatprep.subr.bf16.mxu0 %v14614_v1  ;;  %v14547_v4 = vld [vmem:[%s18521_s3 + $0x288] sm:$0xff]  }
 0x6d9   : > { %v8047_v33 = vpop.f32.mrb[176].mxu0  ;;  %v14548_v61 = vld [vmem:[%s14682_s29 + $0x648] sm:$0xff]  }
 0x6da   : > { %v8048_v39 = vadd.f32 %v17596_v35, %v8047_v33  ;;  %v13756_v38 = vpop.f32.mrb[177].mxu0  ;;  %13795 = vmatmul.mubr.msk.bf16.vlgmr.msra.gmra.mrb[172].mxu1 %vm741_vm4, %v8128_v13 }
 0x6db   : > { %13871 = vmatpush3.bf16.msra.mxu1 %v14544_v32  ;;  %v8050_v15 = vpop.f32.mrb[178].mxu0  ;;  %13798 = vmatprep.mubr.msk.bf16.mxu1 %vm14616_vm2, %v14614_v1 }
 0x6dc   : > { %v8051_v3 = vadd.f32 %v17596_v35, %v8050_v15  ;;  %v13757_v59 = vpop.f32.mrb[179].mxu0  ;;  %13872 = vmatprep.subr.bf16.mxu1 %v14614_v1  ;;  %14085 = vmatpush3.bf16.msra.mxu0 %v14671_v6  ;;  %v8112_v50 = vmax.f32 %v8048_v39, 0.0 }
 0x6dd   : > { %v7024_v48 = vpop.f32.mrb[68].mxu1  ;;  %14166 = vmatprep.subr.bf16.mxu0 %v14614_v1 }
 0x6de   : > { %v8113_v28 = vmax.f32 %v8051_v3, 0.0  ;;  %v17631_v30 = vadd.f32 %v7024_v48, %v17466_v40  ;;  %v13548_v37 = vpop.f32.mrb[69].mxu1  ;;  %14007 = vmatmul.mubr.msk.bf16.gmra.mrb[28].mxu0 %vm311_vm3, %v14545_v58 }
 0x6df   : > { %v7027_v47 = vpop.f32.mrb[70].mxu1  ;;  %14010 = vmatprep.mubr.msk.bf16.mxu0 %vm14616_vm2, %v14614_v1  ;;  %13873 = vmatpush3.bf16.msra.mxu1 %v14547_v4 }
 0x6e0   : > { %v8129_v7 = vpack.c.bf16 %v8113_v28, %v8112_v50  ;;  %v17640_v17 = vadd.f32 %v7027_v47, %v17475_v46  ;;  %v13549_v8 = vpop.f32.mrb[71].mxu1  ;;  %13874 = vmatprep.subr.bf16.mxu1 %v14614_v1  ;;  %v14554_v46 = vld [vmem:[%s18521_s3 + $0x298] sm:$0xff]  }
 0x6e1   : > { %v8055_v40 = vpop.f32.mrb[180].mxu0 }
 0x6e2   : > { %v8056_v2 = vadd.f32 %v17596_v35, %v8055_v40  ;;  %v13760_v25 = vpop.f32.mrb[181].mxu0  ;;  %13799 = vmatmul.mubr.msk.bf16.gmra.mrb[176].mxu1 %vm741_vm4, %v8129_v7 }
 0x6e3   : > { %v8058_v45 = vpop.f32.mrb[182].mxu0  ;;  %13802 = vmatprep.mubr.msk.bf16.mxu1 %vm14616_vm2, %v14614_v1  ;;  %13875 = vmatpush3.bf16.msra.mxu1 %v14550_v34 }
 0x6e4   : > { %v8059_v10 = vadd.f32 %v17596_v35, %v8058_v45  ;;  %v13761_v12 = vpop.f32.mrb[183].mxu0  ;;  %13876 = vmatprep.subr.bf16.mxu1 %v14614_v1  ;;  %v8114_v5 = vmax.f32 %v8056_v2, 0.0 }
 0x6e5   : > { %v7032_v41 = vpop.f32.mrb[72].mxu1 }
 0x6e6   : > { %v8115_v0 = vmax.f32 %v8059_v10, 0.0  ;;  %v17654_v57 = vadd.f32 %v7032_v41, %v17489_v42  ;;  %v13552_v24 = vpop.f32.mrb[73].mxu1  ;;  %14011 = vmatmul.mubr.msk.bf16.gmra.mrb[32].mxu0 %vm311_vm3, %v14546_v53 }
 0x6e7   : > { %v7035_v21 = vpop.f32.mrb[74].mxu1  ;;  %14014 = vmatprep.mubr.msk.bf16.mxu0 %vm14616_vm2, %v14614_v1  ;;  %13877 = vmatpush3.bf16.msra.mxu1 %v14554_v46 }
 0x6e8   : > { %v8130_v22 = vpack.c.bf16 %v8115_v0, %v8114_v5  ;;  %v17660_v54 = vadd.f32 %v7035_v21, %v17495_v16  ;;  %v13553_v52 = vpop.f32.mrb[75].mxu1  ;;  %13954 = vmatprep.subr.bf16.mxu1 %v14614_v1 }
 0x6e9   : > { %v8063_v23 = vpop.f32.mrb[184].mxu0 }
 0x6ea   : > { %v8064_v26 = vadd.f32 %v17596_v35, %v8063_v23  ;;  %v13764_v42 = vpop.f32.mrb[185].mxu0  ;;  %13803 = vmatmul.mubr.msk.bf16.gmra.mrb[180].mxu1 %vm741_vm4, %v8130_v22 }
 0x6eb   : > { %v8066_v56 = vpop.f32.mrb[186].mxu0  ;;  %13806 = vmatprep.mubr.msk.bf16.mxu1 %vm14616_vm2, %v14614_v1 }
 0x6ec   : > { %v8067_v43 = vadd.f32 %v17596_v35, %v8066_v56  ;;  %v13765_v19 = vpop.f32.mrb[187].mxu0  ;;  %v8116_v32 = vmax.f32 %v8064_v26, 0.0 }
 0x6ed   : > { %v7040_v16 = vpop.f32.mrb[76].mxu1 }
 0x6ee   : > { %v8117_v13 = vmax.f32 %v8067_v43, 0.0  ;;  %v17670_v14 = vadd.f32 %v7040_v16, %v17505_v63  ;;  %v13556_v33 = vpop.f32.mrb[77].mxu1  ;;  %14015 = vmatmul.mubr.msk.bf16.gmra.mrb[36].mxu0 %vm311_vm3, %v14548_v61  ;;  %v14549_v63 = vld [vmem:[%s14682_s29 + $0x650] sm:$0xff]  }
 0x6ef   : > { %v7043_v39 = vpop.f32.mrb[78].mxu1  ;;  %14018 = vmatprep.mubr.msk.bf16.mxu0 %vm14616_vm2, %v14614_v1 }
 0x6f0   : > { %v8131_v38 = vpack.c.bf16 %v8117_v13, %v8116_v32  ;;  %v17676_v58 = vadd.f32 %v7043_v39, %v17511_v62  ;;  %v13557_v15 = vpop.f32.mrb[79].mxu1 }
 0x6f1   : > { %v8071_v4 = vpop.f32.mrb[188].mxu0 }
 0x6f2   : > { %v8072_v3 = vadd.f32 %v17596_v35, %v8071_v4  ;;  %v13768_v59 = vpop.f32.mrb[189].mxu0  ;;  %13807 = vmatmul.mubr.msk.bf16.gmra.mrb[184].mxu1 %vm741_vm4, %v8131_v38 }
 0x6f3   : > { %v8074_v48 = vpop.f32.mrb[190].mxu0  ;;  %13810 = vmatprep.mubr.msk.bf16.mxu1 %vm14616_vm2, %v14614_v1 }
 0x6f4   : > { %v8075_v50 = vadd.f32 %v17596_v35, %v8074_v48  ;;  %v13769_v28 = vpop.f32.mrb[191].mxu0  ;;  %v8118_v47 = vmax.f32 %v8072_v3, 0.0 }
 0x6f5   : > { %v7048_v37 = vpop.f32.mrb[80].mxu1 }
 0x6f6   : > { %v8119_v62 = vmax.f32 %v8075_v50, 0.0  ;;  %v17685_v34 = vadd.f32 %v7048_v37, %v17520_v51  ;;  %v13560_v7 = vpop.f32.mrb[81].mxu1  ;;  %14019 = vmatmul.mubr.msk.bf16.gmra.mrb[40].mxu0 %vm311_vm3, %v14549_v63  ;;  %v14551_v51 = vld [vmem:[%s14682_s29 + $0x658] sm:$0xff]  }
 0x6f7   : > { %v7051_v8 = vpop.f32.mrb[82].mxu1  ;;  %14022 = vmatprep.mubr.msk.bf16.mxu0 %vm14616_vm2, %v14614_v1 }
 0x6f8   : > { %v8132_v40 = vpack.c.bf16 %v8119_v62, %v8118_v47  ;;  %v17691_v2 = vadd.f32 %v7051_v8, %v17526_v36  ;;  %v13561_v25 = vpop.f32.mrb[83].mxu1 }
 0x6f9   : > { %v8079_v53 = vpop.f32.mrb[192].mxu0 }
 0x6fa   : > { %v8080_v45 = vadd.f32 %v17596_v35, %v8079_v53  ;;  %v13772_v46 = vpop.f32.mrb[193].mxu0  ;;  %13811 = vmatmul.mubr.msk.bf16.gmra.mrb[188].mxu1 %vm741_vm4, %v8132_v40 }
 0x6fb   : > { %v8082_v10 = vpop.f32.mrb[194].mxu0  ;;  %13814 = vmatprep.mubr.msk.bf16.mxu1 %vm14616_vm2, %v14614_v1 }
 0x6fc   : > { %v8083_v12 = vadd.f32 %v17596_v35, %v8082_v10  ;;  %v13773_v41 = vpop.f32.mrb[195].mxu0  ;;  %v8120_v0 = vmax.f32 %v8080_v45, 0.0 }
 0x6fd   : > { %v7056_v5 = vpop.f32.mrb[84].mxu1 }
 0x6fe   : > { %v8121_v36 = vmax.f32 %v8083_v12, 0.0  ;;  %v17700_v24 = vadd.f32 %v7056_v5, %v17535_v44  ;;  %v13564_v21 = vpop.f32.mrb[85].mxu1  ;;  %14023 = vmatmul.mubr.msk.bf16.gmra.mrb[44].mxu0 %vm311_vm3, %v14551_v51  ;;  %v14552_v44 = vld [vmem:[%s14682_s29 + $0x660] sm:$0xff]  }
 0x6ff   : > { %v7059_v22 = vpop.f32.mrb[86].mxu1  ;;  %14026 = vmatprep.mubr.msk.bf16.mxu0 %vm14616_vm2, %v14614_v1 }
 0x700   : > { %v8133_v52 = vpack.c.bf16 %v8121_v36, %v8120_v0  ;;  %v17706_v23 = vadd.f32 %v7059_v22, %v17541_v11  ;;  %v13565_v26 = vpop.f32.mrb[87].mxu1 }
 0x701   : > { %v8087_v42 = vpop.f32.mrb[196].mxu0 }
 0x702   : > { %v8088_v61 = vadd.f32 %v17596_v35, %v8087_v42  ;;  %v13776_v56 = vpop.f32.mrb[197].mxu0  ;;  %13815 = vmatmul.mubr.msk.bf16.gmra.mrb[192].mxu1 %vm741_vm4, %v8133_v52 }
 0x703   : > { %v8090_v43 = vpop.f32.mrb[198].mxu0  ;;  %13818 = vmatprep.mubr.msk.bf16.mxu1 %vm14616_vm2, %v14614_v1 }
 0x704   : > { %v8091_v19 = vadd.f32 %v17596_v35, %v8090_v43  ;;  %v13777_v16 = vpop.f32.mrb[199].mxu0  ;;  %v8122_v13 = vmax.f32 %v8088_v61, 0.0 }
 0x705   : > { %v7064_v32 = vpop.f32.mrb[88].mxu1 }
 0x706   : > { %v8123_v11 = vmax.f32 %v8091_v19, 0.0  ;;  %v17715_v33 = vadd.f32 %v7064_v32, %v17550_v27  ;;  %v13568_v39 = vpop.f32.mrb[89].mxu1  ;;  %14027 = vmatmul.mubr.msk.bf16.gmra.mrb[48].mxu0 %vm311_vm3, %v14552_v44  ;;  %v14553_v27 = vld [vmem:[%s14682_s29 + $0x668] sm:$0xff]   ;;  %v14556_v19 = vld [vmem:[%s14682_s29 + $0x678] sm:$0xff]  }
 0x707   : > { %v7067_v38 = vpop.f32.mrb[90].mxu1  ;;  %14030 = vmatprep.mubr.msk.bf16.mxu0 %vm14616_vm2, %v14614_v1 }
 0x708   : > { %v8134_v15 = vpack.c.bf16 %v8123_v11, %v8122_v13  ;;  %v17721_v4 = vadd.f32 %v7067_v38, %v17556_v29  ;;  %v13569_v3 = vpop.f32.mrb[91].mxu1 }
 0x709   : > { %v8095_v59 = vpop.f32.mrb[200].mxu0  ;;  %v14557_v3 = vld [vmem:[%s18521_s3 + $0x2a0] sm:$0xff]  }
 0x70a   : > { %v8096_v63 = vadd.f32 %v17596_v35, %v8095_v59  ;;  %v13780_v48 = vpop.f32.mrb[201].mxu0  ;;  %13819 = vmatmul.mubr.msk.bf16.gmra.mrb[196].mxu1 %vm741_vm4, %v8134_v15 }
 0x70b   : > { %v8098_v50 = vpop.f32.mrb[202].mxu0  ;;  %13822 = vmatprep.mubr.msk.bf16.mxu1 %vm14616_vm2, %v14614_v1 }
 0x70c   : > { %v8099_v28 = vadd.f32 %v17596_v35, %v8098_v50  ;;  %v13781_v37 = vpop.f32.mrb[203].mxu0  ;;  %v8124_v62 = vmax.f32 %v8096_v63, 0.0 }
 0x70d   : > { %v7072_v47 = vpop.f32.mrb[92].mxu1  ;;  %v14560_v37 = vld [vmem:[%s18521_s3 + $0x2a8] sm:$0xff]  }
 0x70e   : > { %v8125_v29 = vmax.f32 %v8099_v28, 0.0  ;;  %v17730_v7 = vadd.f32 %v7072_v47, %v17565_v9  ;;  %v13572_v8 = vpop.f32.mrb[93].mxu1  ;;  %14031 = vmatmul.mubr.msk.bf16.gmra.mrb[52].mxu0 %vm311_vm3, %v14553_v27  ;;  %v14555_v9 = vld [vmem:[%s14682_s29 + $0x670] sm:$0xff]  }
 0x70f   : > { %v7075_v40 = vpop.f32.mrb[94].mxu1  ;;  %14034 = vmatprep.mubr.msk.bf16.mxu0 %vm14616_vm2, %v14614_v1 }
 0x710   : > { %v8135_v25 = vpack.c.bf16 %v8125_v29, %v8124_v62  ;;  %v17736_v53 = vadd.f32 %v7075_v40, %v17571_v18  ;;  %v13573_v45 = vpop.f32.mrb[95].mxu1 }
 0x711   : > { %v8103_v46 = vpop.f32.mrb[204].mxu0 }
 0x712   : > { %v8104_v51 = vadd.f32 %v17596_v35, %v8103_v46  ;;  %v13784_v10 = vpop.f32.mrb[205].mxu0  ;;  %13823 = vmatmul.mubr.msk.bf16.gmra.mrb[200].mxu1 %vm741_vm4, %v8135_v25  ;;  %v14563_v46 = vld [vmem:[%s18521_s3 + $0x2b0] sm:$0xff]  }
 0x713   : > { %v8106_v12 = vpop.f32.mrb[206].mxu0  ;;  %13826 = vmatprep.mubr.msk.bf16.mxu1 %vm14616_vm2, %v14614_v1 }
 0x714   : > { %v8107_v41 = vadd.f32 %v17596_v35, %v8106_v12  ;;  %v13785_v5 = vpop.f32.mrb[207].mxu0  ;;  %v8126_v36 = vmax.f32 %v8104_v51, 0.0 }
 0x715   : > { %v7080_v0 = vpop.f32.mrb[96].mxu1 }
 0x716   : > { %v8127_v18 = vmax.f32 %v8107_v41, 0.0  ;;  %v13576_v21 = vpop.f32.mrb[97].mxu1  ;;  %14035 = vmatmul.mubr.msk.bf16.gmra.mrb[56].mxu0 %vm311_vm3, %v14555_v9  ;;  %v17746_v22 = vadd.f32 %v7080_v0, %v17580_v20  ;;  %v14559_v41 = vld [vmem:[%s14682_s29 + $0x688] sm:$0xff]   ;;  %v14567_v0 = vld [vmem:[%s18521_s3 + $0x2b8] sm:$0xff]  }
 0x717   : > { %v7083_v52 = vpop.f32.mrb[98].mxu1  ;;  %14086 = vmatprep.mubr.msk.bf16.mxu0 %vm14616_vm2, %v14614_v1 }
 0x718   : > { %v8136_v26 = vpack.c.bf16 %v8127_v18, %v8126_v36  ;;  %v13577_v42 = vpop.f32.mrb[99].mxu1  ;;  %v17751_v61 = vadd.f32 %v7083_v52, %v17586_v60 }
 0x719   : > { %v8444_v56 = vpop.f32.mrb[208].mxu0 }
 0x71a   : > { %v8445_v44 = vadd.f32 %v17596_v35, %v8444_v56  ;;  %13827 = vmatmul.mubr.msk.bf16.gmra.mrb[204].mxu1 %vm741_vm4, %v8136_v26  ;;  %v13836_v43 = vpop.f32.mrb[209].mxu0 }
 0x71b   : > { %v8447_v16 = vpop.f32.mrb[210].mxu0  ;;  %13878 = vmatprep.mubr.msk.bf16.mxu1 %vm14616_vm2, %v14614_v1 }
 0x71c   : > { %v8448_v20 = vadd.f32 %v17596_v35, %v8447_v16  ;;  %v13837_v32 = vpop.f32.mrb[211].mxu0  ;;  %v8515_v11 = vmax.f32 %v8445_v44, 0.0 }
 0x71d   : > { %v7421_v13 = vpop.f32.mrb[100].mxu1 }
 0x71e   : > { %v8516_v39 = vmax.f32 %v8448_v20, 0.0  ;;  %v13628_v60 = vpop.f32.mrb[101].mxu1  ;;  %14087 = vmatmul.mubr.msk.bf16.vlgmr.msra.gmra.mrb[60].mxu0 %vm311_vm3, %v14556_v19  ;;  %v17761_v38 = vadd.f32 %v7421_v13, %v17600_v31 }
 0x71f   : > { %14167 = vmatpush3.bf16.msra.mxu0 %v17606_v55  ;;  %v7424_v15 = vpop.f32.mrb[102].mxu1  ;;  %14090 = vmatprep.mubr.msk.bf16.mxu0 %vm14616_vm2, %v14614_v1  ;;  %v14558_v55 = vld [vmem:[%s14682_s29 + $0x680] sm:$0xff]  }
 0x720   : > { %v8533_v59 = vpack.c.bf16 %v8516_v39, %v8515_v11  ;;  %v13629_v63 = vpop.f32.mrb[103].mxu1  ;;  %14168 = vmatprep.subr.bf16.mxu0 %v14614_v1  ;;  %v17771_v48 = vadd.f32 %v7424_v15, %v17615_v49 }
 0x721   : > { %v8452_v27 = vpop.f32.mrb[212].mxu0 }
 0x722   : > { %v8453_v31 = vadd.f32 %v17596_v35, %v8452_v27  ;;  %v13840_v50 = vpop.f32.mrb[213].mxu0  ;;  %13879 = vmatmul.mubr.msk.bf16.vlgmr.msra.gmra.mrb[208].mxu1 %vm741_vm4, %v8533_v59 }
 0x723   : > { %13955 = vmatpush3.bf16.msra.mxu1 %v14557_v3  ;;  %v8455_v28 = vpop.f32.mrb[214].mxu0  ;;  %13882 = vmatprep.mubr.msk.bf16.mxu1 %vm14616_vm2, %v14614_v1 }
 0x724   : > { %v8456_v47 = vadd.f32 %v17596_v35, %v8455_v28  ;;  %v13841_v49 = vpop.f32.mrb[215].mxu0  ;;  %13956 = vmatprep.subr.bf16.mxu1 %v14614_v1  ;;  %14169 = vmatpush3.bf16.msra.mxu0 %v14671_v6  ;;  %v8517_v29 = vmax.f32 %v8453_v31, 0.0 }
 0x725   : > { %v7429_v62 = vpop.f32.mrb[104].mxu1 }
 0x726   : > { %v8518_v8 = vmax.f32 %v8456_v47, 0.0  ;;  %v13632_v40 = vpop.f32.mrb[105].mxu1  ;;  %14091 = vmatmul.mubr.msk.bf16.gmra.mrb[64].mxu0 %vm311_vm3, %v14558_v55  ;;  %v17786_v25 = vadd.f32 %v7429_v62, %v17631_v30  ;;  %v14562_v47 = vld [vmem:[%s14682_s29 + $0x698] sm:$0xff]  }
 0x727   : > { %v7432_v45 = vpop.f32.mrb[106].mxu1  ;;  %14094 = vmatprep.mubr.msk.bf16.mxu0 %vm14616_vm2, %v14614_v1  ;;  %13957 = vmatpush3.bf16.msra.mxu1 %v14560_v37 }
 0x728   : > { %v8534_v6 = vpack.c.bf16 %v8518_v8, %v8517_v29  ;;  %v13633_v51 = vpop.f32.mrb[107].mxu1  ;;  %13958 = vmatprep.subr.bf16.mxu1 %v14614_v1  ;;  %v17795_v10 = vadd.f32 %v7432_v45, %v17640_v17 }
 0x729   : > { %v8460_v9 = vpop.f32.mrb[216].mxu0 }
 0x72a   : > { %v8461_v30 = vadd.f32 %v17596_v35, %v8460_v9  ;;  %v13844_v12 = vpop.f32.mrb[217].mxu0  ;;  %13883 = vmatmul.mubr.msk.bf16.gmra.mrb[212].mxu1 %vm741_vm4, %v8534_v6 }
 0x72b   : > { %v8463_v5 = vpop.f32.mrb[218].mxu0  ;;  %13886 = vmatprep.mubr.msk.bf16.mxu1 %vm14616_vm2, %v14614_v1  ;;  %13959 = vmatpush3.bf16.msra.mxu1 %v14563_v46 }
 0x72c   : > { %v8464_v36 = vadd.f32 %v17596_v35, %v8463_v5  ;;  %v13845_v17 = vpop.f32.mrb[219].mxu0  ;;  %13960 = vmatprep.subr.bf16.mxu1 %v14614_v1  ;;  %v8519_v21 = vmax.f32 %v8461_v30, 0.0  ;;  %v14564_v5 = vld [vmem:[%s14682_s29 + $0x6a0] sm:$0xff]  }
 0x72d   : > { %v7437_v18 = vpop.f32.mrb[108].mxu1 }
 0x72e   : > { %v8520_v52 = vmax.f32 %v8464_v36, 0.0  ;;  %v13636_v26 = vpop.f32.mrb[109].mxu1  ;;  %14095 = vmatmul.mubr.msk.bf16.gmra.mrb[68].mxu0 %vm311_vm3, %v14559_v41  ;;  %v17809_v42 = vadd.f32 %v7437_v18, %v17654_v57  ;;  %v14561_v57 = vld [vmem:[%s14682_s29 + $0x690] sm:$0xff]  }
 0x72f   : > { %v7440_v56 = vpop.f32.mrb[110].mxu1  ;;  %14098 = vmatprep.mubr.msk.bf16.mxu0 %vm14616_vm2, %v14614_v1  ;;  %13961 = vmatpush3.bf16.msra.mxu1 %v14567_v0 }
 0x730   : > { %v8535_v44 = vpack.c.bf16 %v8520_v52, %v8519_v21  ;;  %v13637_v43 = vpop.f32.mrb[111].mxu1  ;;  %14038 = vmatprep.subr.bf16.mxu1 %v14614_v1  ;;  %v17815_v19 = vadd.f32 %v7440_v56, %v17660_v54 }
 0x731   : > { %v8468_v16 = vpop.f32.mrb[220].mxu0 }
 0x732   : > { %v8469_v20 = vadd.f32 %v17596_v35, %v8468_v16  ;;  %v13848_v32 = vpop.f32.mrb[221].mxu0  ;;  %13887 = vmatmul.mubr.msk.bf16.gmra.mrb[216].mxu1 %vm741_vm4, %v8535_v44 }
 0x733   : > { %v8471_v13 = vpop.f32.mrb[222].mxu0  ;;  %13890 = vmatprep.mubr.msk.bf16.mxu1 %vm14616_vm2, %v14614_v1 }
 0x734   : > { %v8472_v11 = vadd.f32 %v17596_v35, %v8471_v13  ;;  %v13849_v39 = vpop.f32.mrb[223].mxu0  ;;  %v8521_v15 = vmax.f32 %v8469_v20, 0.0 }
 0x735   : > { %v7445_v60 = vpop.f32.mrb[112].mxu1 }
 0x736   : > { %v8522_v3 = vmax.f32 %v8472_v11, 0.0  ;;  %v13640_v54 = vpop.f32.mrb[113].mxu1  ;;  %14099 = vmatmul.mubr.msk.bf16.gmra.mrb[72].mxu0 %vm311_vm3, %v14561_v57  ;;  %v17825_v59 = vadd.f32 %v7445_v60, %v17670_v14  ;;  %v14565_v57 = vld [vmem:[%s14682_s29 + $0x6a8] sm:$0xff]  }
 0x737   : > { %v7448_v63 = vpop.f32.mrb[114].mxu1  ;;  %14102 = vmatprep.mubr.msk.bf16.mxu0 %vm14616_vm2, %v14614_v1 }
 0x738   : > { %v8536_v27 = vpack.c.bf16 %v8522_v3, %v8521_v15  ;;  %v13641_v31 = vpop.f32.mrb[115].mxu1  ;;  %v17830_v50 = vadd.f32 %v7448_v63, %v17676_v58 }
 0x739   : > { %v8476_v55 = vpop.f32.mrb[224].mxu0 }
 0x73a   : > { %v8477_v28 = vadd.f32 %v17596_v35, %v8476_v55  ;;  %v13852_v37 = vpop.f32.mrb[225].mxu0  ;;  %13891 = vmatmul.mubr.msk.bf16.gmra.mrb[220].mxu1 %vm741_vm4, %v8536_v27 }
 0x73b   : > { %v8479_v49 = vpop.f32.mrb[226].mxu0  ;;  %13894 = vmatprep.mubr.msk.bf16.mxu1 %vm14616_vm2, %v14614_v1 }
 0x73c   : > { %v8480_v14 = vadd.f32 %v17596_v35, %v8479_v49  ;;  %v13853_v62 = vpop.f32.mrb[227].mxu0  ;;  %v8523_v8 = vmax.f32 %v8477_v28, 0.0 }
 0x73d   : > { %v7453_v29 = vpop.f32.mrb[116].mxu1 }
 0x73e   : > { %v8524_v40 = vmax.f32 %v8480_v14, 0.0  ;;  %v13644_v58 = vpop.f32.mrb[117].mxu1  ;;  %14103 = vmatmul.mubr.msk.bf16.gmra.mrb[76].mxu0 %vm311_vm3, %v14562_v47  ;;  %v17840_v45 = vadd.f32 %v7453_v29, %v17685_v34  ;;  %v14566_v47 = vld [vmem:[%s14682_s29 + $0x6b0] sm:$0xff]  }
 0x73f   : > { %v7456_v46 = vpop.f32.mrb[118].mxu1  ;;  %14106 = vmatprep.mubr.msk.bf16.mxu0 %vm14616_vm2, %v14614_v1 }
 0x740   : > { %v8537_v6 = vpack.c.bf16 %v8524_v40, %v8523_v8  ;;  %v13645_v51 = vpop.f32.mrb[119].mxu1  ;;  %v17845_v9 = vadd.f32 %v7456_v46, %v17691_v2 }
 0x741   : > { %v8484_v30 = vpop.f32.mrb[228].mxu0 }
 0x742   : > { %v8485_v12 = vadd.f32 %v17596_v35, %v8484_v30  ;;  %v13856_v41 = vpop.f32.mrb[229].mxu0  ;;  %13895 = vmatmul.mubr.msk.bf16.gmra.mrb[224].mxu1 %vm741_vm4, %v8537_v6 }
 0x743   : > { %v8487_v0 = vpop.f32.mrb[230].mxu0  ;;  %13898 = vmatprep.mubr.msk.bf16.mxu1 %vm14616_vm2, %v14614_v1 }
 0x744   : > { %v8488_v34 = vadd.f32 %v17596_v35, %v8487_v0  ;;  %v13857_v36 = vpop.f32.mrb[231].mxu0  ;;  %v8525_v18 = vmax.f32 %v8485_v12, 0.0 }
 0x745   : > { %v7461_v17 = vpop.f32.mrb[120].mxu1 }
 0x746   : > { %v8526_v21 = vmax.f32 %v8488_v34, 0.0  ;;  %v13648_v2 = vpop.f32.mrb[121].mxu1  ;;  %14107 = vmatmul.mubr.msk.bf16.gmra.mrb[80].mxu0 %vm311_vm3, %v14564_v5  ;;  %v17855_v52 = vadd.f32 %v7461_v17, %v17700_v24  ;;  %v14568_v5 = vld [vmem:[%s14682_s29 + $0x6b8] sm:$0xff]  }
 0x747   : > { %v7464_v26 = vpop.f32.mrb[122].mxu1  ;;  %14110 = vmatprep.mubr.msk.bf16.mxu0 %vm14616_vm2, %v14614_v1 }
 0x748   : > { %v8538_v56 = vpack.c.bf16 %v8526_v21, %v8525_v18  ;;  %v13649_v44 = vpop.f32.mrb[123].mxu1  ;;  %v17860_v43 = vadd.f32 %v7464_v26, %v17706_v23 }
 0x749   : > { %v8492_v16 = vpop.f32.mrb[232].mxu0 }
 0x74a   : > { %v8493_v20 = vadd.f32 %v17596_v35, %v8492_v16  ;;  %v13860_v32 = vpop.f32.mrb[233].mxu0  ;;  %13899 = vmatmul.mubr.msk.bf16.gmra.mrb[228].mxu1 %vm741_vm4, %v8538_v56 }
 0x74b   : > { %v8495_v13 = vpop.f32.mrb[234].mxu0  ;;  %13902 = vmatprep.mubr.msk.bf16.mxu1 %vm14616_vm2, %v14614_v1 }
 0x74c   : > { %v8496_v24 = vadd.f32 %v17596_v35, %v8495_v13  ;;  %v13861_v11 = vpop.f32.mrb[235].mxu0  ;;  %v8527_v60 = vmax.f32 %v8493_v20, 0.0 }
 0x74d   : > { %v7469_v39 = vpop.f32.mrb[124].mxu1 }
 0x74e   : > { %v8528_v15 = vmax.f32 %v8496_v24, 0.0  ;;  %v13652_v23 = vpop.f32.mrb[125].mxu1  ;;  %14111 = vmatmul.mubr.msk.bf16.gmra.mrb[84].mxu0 %vm311_vm3, %v14565_v57  ;;  %v17870_v3 = vadd.f32 %v7469_v39, %v17715_v33 }
 0x74f   : > { %v7472_v54 = vpop.f32.mrb[126].mxu1  ;;  %14114 = vmatprep.mubr.msk.bf16.mxu0 %vm14616_vm2, %v14614_v1 }
 0x750   : > { %v8539_v63 = vpack.c.bf16 %v8528_v15, %v8527_v60  ;;  %v13653_v27 = vpop.f32.mrb[127].mxu1  ;;  %v17875_v31 = vadd.f32 %v7472_v54, %v17721_v4  ;;  %v14570_v54 = vld [vmem:[%s18521_s3 + $0x2c0] sm:$0xff]  }
 0x751   : > { %v8500_v55 = vpop.f32.mrb[236].mxu0 }
 0x752   : > { %v8501_v28 = vadd.f32 %v17596_v35, %v8500_v55  ;;  %v13864_v37 = vpop.f32.mrb[237].mxu0  ;;  %13903 = vmatmul.mubr.msk.bf16.gmra.mrb[232].mxu1 %vm741_vm4, %v8539_v63 }
 0x753   : > { %v8503_v49 = vpop.f32.mrb[238].mxu0  ;;  %13906 = vmatprep.mubr.msk.bf16.mxu1 %vm14616_vm2, %v14614_v1 }
 0x754   : > { %v8504_v33 = vadd.f32 %v17596_v35, %v8503_v49  ;;  %v13865_v14 = vpop.f32.mrb[239].mxu0  ;;  %v8529_v29 = vmax.f32 %v8501_v28, 0.0 }
 0x755   : > { %v7477_v62 = vpop.f32.mrb[128].mxu1 }
 0x756   : > { %v8530_v8 = vmax.f32 %v8504_v33, 0.0  ;;  %v13656_v4 = vpop.f32.mrb[129].mxu1  ;;  %14115 = vmatmul.mubr.msk.bf16.gmra.mrb[88].mxu0 %vm311_vm3, %v14566_v47  ;;  %v17885_v40 = vadd.f32 %v7477_v62, %v17730_v7  ;;  %v14571_v47 = vld [vmem:[%s14682_s29 + $0x6c8] sm:$0xff]  }
 0x757   : > { %v7480_v58 = vpop.f32.mrb[130].mxu1  ;;  %14118 = vmatprep.mubr.msk.bf16.mxu0 %vm14616_vm2, %v14614_v1  ;;  %v14573_v33 = vld [vmem:[%s18521_s3 + $0x2c8] sm:$0xff]  }
 0x758   : > { %v8540_v46 = vpack.c.bf16 %v8530_v8, %v8529_v29  ;;  %v13657_v6 = vpop.f32.mrb[131].mxu1  ;;  %v17890_v51 = vadd.f32 %v7480_v58, %v17736_v53 }
 0x759   : > { %v8508_v30 = vpop.f32.mrb[240].mxu0  ;;  %v14576_v6 = vld [vmem:[%s18521_s3 + $0x2d0] sm:$0xff]  }
 0x75a   : > { %v8509_v12 = vadd.f32 %v17596_v35, %v8508_v30  ;;  %v13868_v41 = vpop.f32.mrb[241].mxu0  ;;  %13907 = vmatmul.mubr.msk.bf16.gmra.mrb[236].mxu1 %vm741_vm4, %v8540_v46 }
 0x75b   : > { %v8511_v0 = vpop.f32.mrb[242].mxu0  ;;  %13910 = vmatprep.mubr.msk.bf16.mxu1 %vm14616_vm2, %v14614_v1 }
 0x75c   : > { %v8512_v7 = vadd.f32 %v17596_v35, %v8511_v0  ;;  %v13869_v34 = vpop.f32.mrb[243].mxu0  ;;  %v8531_v17 = vmax.f32 %v8509_v12, 0.0 }
 0x75d   : > { %v7485_v36 = vpop.f32.mrb[132].mxu1 }
 0x75e   : > { %v8532_v18 = vmax.f32 %v8512_v7, 0.0  ;;  %v17899_v53 = vadd.f32 %v7485_v36, %v17746_v22  ;;  %v13660_v21 = vpop.f32.mrb[133].mxu1  ;;  %14119 = vmatmul.mubr.msk.bf16.gmra.mrb[92].mxu0 %vm311_vm3, %v14568_v5  ;;  %v14569_v22 = vld [vmem:[%s14682_s29 + $0x6c0] sm:$0xff]   ;;  %v14572_v7 = vld [vmem:[%s14682_s29 + $0x6d0] sm:$0xff]  }
 0x75f   : > { %v7488_v2 = vpop.f32.mrb[134].mxu1  ;;  %14170 = vmatprep.mubr.msk.bf16.mxu0 %vm14616_vm2, %v14614_v1 }
 0x760   : > { %v8541_v26 = vpack.c.bf16 %v8532_v18, %v8531_v17  ;;  %v17905_v56 = vadd.f32 %v7488_v2, %v17751_v61  ;;  %v13661_v44 = vpop.f32.mrb[135].mxu1 }
 0x761   : > { %v8849_v16 = vpop.f32.mrb[244].mxu0 }
 0x762   : > { %v8850_v20 = vadd.f32 %v17596_v35, %v8849_v16  ;;  %13911 = vmatmul.mubr.msk.bf16.gmra.mrb[240].mxu1 %vm741_vm4, %v8541_v26  ;;  %v13920_v32 = vpop.f32.mrb[245].mxu0 }
 0x763   : > { %v8852_v57 = vpop.f32.mrb[246].mxu0  ;;  %13962 = vmatprep.mubr.msk.bf16.mxu1 %vm14616_vm2, %v14614_v1 }
 0x764   : > { %v8853_v13 = vadd.f32 %v17596_v35, %v8852_v57  ;;  %v13921_v24 = vpop.f32.mrb[247].mxu0  ;;  %v8920_v39 = vmax.f32 %v8850_v20, 0.0 }
 0x765   : > { %v7826_v11 = vpop.f32.mrb[136].mxu1  ;;  %v14574_v24 = vld [vmem:[%s14682_s29 + $0x6d8] sm:$0xff]  }
 0x766   : > { %v8921_v61 = vmax.f32 %v8853_v13, 0.0  ;;  %v17914_v60 = vadd.f32 %v7826_v11, %v17761_v38  ;;  %v13712_v15 = vpop.f32.mrb[137].mxu1  ;;  %14171 = vmatmul.mubr.msk.bf16.vlgmr.msra.gmra.mrb[96].mxu0 %vm311_vm3, %v14569_v22 }
 0x767   : > { %v7829_v23 = vpop.f32.mrb[138].mxu1  ;;  %14174 = vmatprep.mubr.msk.bf16.mxu0 %vm14616_vm2, %v14614_v1 }
 0x768   : > { %v8938_v63 = vpack.c.bf16 %v8921_v61, %v8920_v39  ;;  %v17923_v27 = vadd.f32 %v7829_v23, %v17771_v48  ;;  %v13713_v55 = vpop.f32.mrb[139].mxu1 }
 0x769   : > { %v8857_v28 = vpop.f32.mrb[248].mxu0 }
 0x76a   : > { %v8858_v38 = vadd.f32 %v17596_v35, %v8857_v28  ;;  %v13924_v37 = vpop.f32.mrb[249].mxu0  ;;  %13963 = vmatmul.mubr.msk.bf16.vlgmr.msra.gmra.mrb[244].mxu1 %vm741_vm4, %v8938_v63 }
 0x76b   : > { %14039 = vmatpush3.bf16.msra.mxu1 %v14570_v54  ;;  %v8860_v49 = vpop.f32.mrb[250].mxu0  ;;  %13966 = vmatprep.mubr.msk.bf16.mxu1 %vm14616_vm2, %v14614_v1 }
 0x76c   : > { %v8861_v48 = vadd.f32 %v17596_v35, %v8860_v49  ;;  %v13925_v14 = vpop.f32.mrb[251].mxu0  ;;  %14040 = vmatprep.subr.bf16.mxu1 %v14614_v1  ;;  %v8922_v29 = vmax.f32 %v8858_v38, 0.0 }
 0x76d   : > { %v7834_v62 = vpop.f32.mrb[140].mxu1 }
 0x76e   : > { %v8923_v8 = vmax.f32 %v8861_v48, 0.0  ;;  %v17936_v4 = vadd.f32 %v7834_v62, %v17786_v25  ;;  %v13716_v58 = vpop.f32.mrb[141].mxu1  ;;  %14175 = vmatmul.mubr.msk.bf16.gmra.mrb[100].mxu0 %vm311_vm3, %v14571_v47 }
 0x76f   : > { %v7837_v46 = vpop.f32.mrb[142].mxu1  ;;  %14178 = vmatprep.mubr.msk.bf16.mxu0 %vm14616_vm2, %v14614_v1  ;;  %14041 = vmatpush3.bf16.msra.mxu1 %v14573_v33 }
 0x770   : > { %v8939_v30 = vpack.c.bf16 %v8923_v8, %v8922_v29  ;;  %v17945_v12 = vadd.f32 %v7837_v46, %v17795_v10  ;;  %v13717_v41 = vpop.f32.mrb[143].mxu1  ;;  %14042 = vmatprep.subr.bf16.mxu1 %v14614_v1  ;;  %v14580_v10 = vld [vmem:[%s18521_s3 + $0x2d8] sm:$0xff]  }
 0x771   : > { %v8865_v25 = vpop.f32.mrb[252].mxu0 }
 0x772   : > { %v8866_v5 = vadd.f32 %v17596_v35, %v8865_v25  ;;  %v13928_v0 = vpop.f32.mrb[253].mxu0  ;;  %13967 = vmatmul.mubr.msk.bf16.gmra.mrb[248].mxu1 %vm741_vm4, %v8939_v30 }
 0x773   : > { %v8868_v34 = vpop.f32.mrb[254].mxu0  ;;  %13970 = vmatprep.mubr.msk.bf16.mxu1 %vm14616_vm2, %v14614_v1  ;;  %14043 = vmatpush3.bf16.msra.mxu1 %v14576_v6 }
 0x774   : > { %v8869_v36 = vadd.f32 %v17596_v35, %v8868_v34  ;;  %v13929_v17 = vpop.f32.mrb[255].mxu0  ;;  %14044 = vmatprep.subr.bf16.mxu1 %v14614_v1  ;;  %v8924_v21 = vmax.f32 %v8866_v5, 0.0 }
 0x775   : > { %v7842_v18 = vpop.f32.mrb[144].mxu1 }
 0x776   : > { %v8925_v2 = vmax.f32 %v8869_v36, 0.0  ;;  %v17959_v26 = vadd.f32 %v7842_v18, %v17809_v42  ;;  %v13720_v44 = vpop.f32.mrb[145].mxu1  ;;  %14179 = vmatmul.mubr.msk.bf16.gmra.mrb[104].mxu0 %vm311_vm3, %v14572_v7 }
 0x777   : > { %v7845_v16 = vpop.f32.mrb[146].mxu1  ;;  %14182 = vmatprep.mubr.msk.bf16.mxu0 %vm14616_vm2, %v14614_v1  ;;  %14045 = vmatpush3.bf16.msra.mxu1 %v14580_v10 }
 0x778   : > { %v8940_v20 = vpack.c.bf16 %v8925_v2, %v8924_v21  ;;  %v17965_v32 = vadd.f32 %v7845_v16, %v17815_v19  ;;  %v13721_v22 = vpop.f32.mrb[147].mxu1  ;;  %14122 = vmatprep.subr.bf16.mxu1 %v14614_v1 }
 0x779   : > { %v8873_v57 = vpop.f32.mrb[0].mxu0 }
 0x77a   : > { %v8874_v13 = vadd.f32 %v17596_v35, %v8873_v57  ;;  %v13932_v42 = vpop.f32.mrb[1].mxu0  ;;  %13971 = vmatmul.mubr.msk.bf16.gmra.mrb[252].mxu1 %vm741_vm4, %v8940_v20  ;;  %v18016_v57 = vld [vmem:[%s18520_s2] ss:$0 sm:$0xff] }
 0x77b   : > { %v8876_v11 = vpop.f32.mrb[2].mxu0  ;;  %13974 = vmatprep.mubr.msk.bf16.mxu1 %vm14616_vm2, %v14614_v1  ;;  %v14578_v42 = vld [vmem:[%s14682_s29 + $0x6f0] sm:$0xff]  }
 0x77c   : > { %v8877_v39 = vadd.f32 %v17596_v35, %v8876_v11  ;;  %v13933_v61 = vpop.f32.mrb[3].mxu0  ;;  %v8926_v15 = vmax.f32 %v8874_v13, 0.0 }
 0x77d   : > { %v7850_v19 = vpop.f32.mrb[148].mxu1 }
 0x77e   : > { %v8927_v23 = vmax.f32 %v8877_v39, 0.0  ;;  %v17975_v54 = vadd.f32 %v7850_v19, %v17825_v59  ;;  %v13724_v63 = vpop.f32.mrb[149].mxu1  ;;  %14183 = vmatmul.mubr.msk.bf16.gmra.mrb[108].mxu0 %vm311_vm3, %v14574_v24  ;;  %v14575_v59 = vld [vmem:[%s14682_s29 + $0x6e0] sm:$0xff]  }
 0x77f   : > { %v7853_v55 = vpop.f32.mrb[150].mxu1  ;;  %14186 = vmatprep.mubr.msk.bf16.mxu0 %vm14616_vm2, %v14614_v1 }
 0x780   : > { %v8941_v28 = vpack.c.bf16 %v8927_v23, %v8926_v15  ;;  %v17981_v38 = vadd.f32 %v7853_v55, %v17830_v50  ;;  %v13725_v37 = vpop.f32.mrb[151].mxu1 }
 0x781   : > { %v8881_v47 = vpop.f32.mrb[4].mxu0 }
 0x782   : > { %v8882_v49 = vadd.f32 %v17596_v35, %v8881_v47  ;;  %v13936_v33 = vpop.f32.mrb[5].mxu0  ;;  %13975 = vmatmul.mubr.msk.bf16.gmra.mrb[0].mxu1 %vm741_vm4, %v8941_v28 }
 0x783   : > { %v8884_v48 = vpop.f32.mrb[6].mxu0  ;;  %13978 = vmatprep.mubr.msk.bf16.mxu1 %vm14616_vm2, %v14614_v1 }
 0x784   : > { %v8885_v14 = vadd.f32 %v17596_v35, %v8884_v48  ;;  %v13937_v62 = vpop.f32.mrb[7].mxu0  ;;  %v8928_v8 = vmax.f32 %v8882_v49, 0.0 }
 0x785   : > { %v7858_v29 = vpop.f32.mrb[152].mxu1 }
 0x786   : > { %v8929_v50 = vmax.f32 %v8885_v14, 0.0  ;;  %v17990_v58 = vadd.f32 %v7858_v29, %v17840_v45  ;;  %v13728_v46 = vpop.f32.mrb[153].mxu1  ;;  %14187 = vmatmul.mubr.msk.bf16.gmra.mrb[112].mxu0 %vm311_vm3, %v14575_v59  ;;  %v14577_v45 = vld [vmem:[%s14682_s29 + $0x6e8] sm:$0xff]  }
 0x787   : > { %v7861_v6 = vpop.f32.mrb[154].mxu1  ;;  %14190 = vmatprep.mubr.msk.bf16.mxu0 %vm14616_vm2, %v14614_v1 }
 0x788   : > { %v8942_v30 = vpack.c.bf16 %v8929_v50, %v8928_v8  ;;  %v17996_v41 = vadd.f32 %v7861_v6, %v17845_v9  ;;  %v13729_v25 = vpop.f32.mrb[155].mxu1 }
 0x789   : > { %v8889_v5 = vpop.f32.mrb[8].mxu0 }
 0x78a   : > { %v8890_v0 = vadd.f32 %v17596_v35, %v8889_v5  ;;  %v13940_v7 = vpop.f32.mrb[9].mxu0  ;;  %13979 = vmatmul.mubr.msk.bf16.gmra.mrb[4].mxu1 %vm741_vm4, %v8942_v30 }
 0x78b   : > { %v8892_v34 = vpop.f32.mrb[10].mxu0  ;;  %13982 = vmatprep.mubr.msk.bf16.mxu1 %vm14616_vm2, %v14614_v1 }
 0x78c   : > { %v8893_v10 = vadd.f32 %v17596_v35, %v8892_v34  ;;  %v13941_v36 = vpop.f32.mrb[11].mxu0  ;;  %v8930_v18 = vmax.f32 %v8890_v0, 0.0 }
 0x78d   : > { %v7866_v17 = vpop.f32.mrb[156].mxu1 }
 0x78e   : > { %v8931_v9 = vmax.f32 %v8893_v10, 0.0  ;;  %v18005_v21 = vadd.f32 %v7866_v17, %v17855_v52  ;;  %v13732_v2 = vpop.f32.mrb[157].mxu1  ;;  %14191 = vmatmul.mubr.msk.bf16.gmra.mrb[116].mxu0 %vm311_vm3, %v14577_v45 }
 0x78f   : > { %v7869_v44 = vpop.f32.mrb[158].mxu1  ;;  %14194 = vmatprep.mubr.msk.bf16.mxu0 %vm14616_vm2, %v14614_v1 }
 0x790   : > { %v8943_v16 = vpack.c.bf16 %v8931_v9, %v8930_v18  ;;  %v18011_v20 = vadd.f32 %v7869_v44, %v17860_v43  ;;  %v13733_v35 = vpop.f32.mrb[159].mxu1 }
 0x791   : > { %v8897_v22 = vpop.f32.mrb[12].mxu0 }
 0x792   : > { %v8898_v52 = vadd.f32 %v18016_v57, %v8897_v22  ;;  %v13944_v13 = vpop.f32.mrb[13].mxu0  ;;  %13983 = vmatmul.mubr.msk.bf16.gmra.mrb[8].mxu1 %vm741_vm4, %v8943_v16 }
 0x793   : > { %v8900_v24 = vpop.f32.mrb[14].mxu0  ;;  %13986 = vmatprep.mubr.msk.bf16.mxu1 %vm14616_vm2, %v14614_v1 }
 0x794   : > { %v8901_v43 = vadd.f32 %v18016_v57, %v8900_v24  ;;  %v13945_v11 = vpop.f32.mrb[15].mxu0  ;;  %v8932_v61 = vmax.f32 %v8898_v52, 0.0 }
 0x795   : > { %v7874_v39 = vpop.f32.mrb[160].mxu1 }
 0x796   : > { %v8933_v19 = vmax.f32 %v8901_v43, 0.0  ;;  %v18025_v15 = vadd.f32 %v7874_v39, %v17870_v3  ;;  %v13736_v23 = vpop.f32.mrb[161].mxu1  ;;  %14195 = vmatmul.mubr.msk.bf16.gmra.mrb[120].mxu0 %vm311_vm3, %v14578_v42  ;;  %v14579_v3 = vld [vmem:[%s14682_s29 + $0x6f8] sm:$0xff]  }
 0x797   : > { %v7877_v63 = vpop.f32.mrb[162].mxu1  ;;  %14198 = vmatprep.mubr.msk.bf16.mxu0 %vm14616_vm2, %v14614_v1  ;;  %v14582_v23 = vld [vmem:[%s18521_s3 + $0x2e0] sm:$0xff]  }
 0x798   : > { %v8944_v55 = vpack.c.bf16 %v8933_v19, %v8932_v61  ;;  %v18031_v28 = vadd.f32 %v7877_v63, %v17875_v31  ;;  %v13737_v37 = vpop.f32.mrb[163].mxu1 }
 0x799   : > { %v8905_v47 = vpop.f32.mrb[16].mxu0 }
 0x79a   : > { %v8906_v49 = vadd.f32 %v18016_v57, %v8905_v47  ;;  %v13948_v33 = vpop.f32.mrb[17].mxu0  ;;  %13987 = vmatmul.mubr.msk.bf16.gmra.mrb[12].mxu1 %vm741_vm4, %v8944_v55 }
 0x79b   : > { %v8908_v59 = vpop.f32.mrb[18].mxu0  ;;  %13990 = vmatprep.mubr.msk.bf16.mxu1 %vm14616_vm2, %v14614_v1 }
 0x79c   : > { %v8909_v48 = vadd.f32 %v18016_v57, %v8908_v59  ;;  %v13949_v14 = vpop.f32.mrb[19].mxu0  ;;  %v8934_v29 = vmax.f32 %v8906_v49, 0.0 }
 0x79d   : > { %v7882_v62 = vpop.f32.mrb[164].mxu1 }
 0x79e   : > { %v8935_v31 = vmax.f32 %v8909_v48, 0.0  ;;  %v18040_v8 = vadd.f32 %v7882_v62, %v17885_v40  ;;  %v13740_v50 = vpop.f32.mrb[165].mxu1  ;;  %14199 = vmatmul.mubr.msk.bf16.gmra.mrb[124].mxu0 %vm311_vm3, %v14579_v3  ;;  %v14581_v40 = vld [vmem:[%s14682_s29 + $0x700] sm:$0xff]   ;;  %v14583_v3 = vld [vmem:[%s18521_s3 + $0x2e8] sm:$0xff]   ;;  %s18445_s29 = scalar_lea.vmem %s18523_s5, %s14251_s20 }
 0x79f   : > { %v7885_v46 = vpop.f32.mrb[166].mxu1  ;;  %14202 = vmatprep.mubr.msk.bf16.mxu0 %vm14616_vm2, %v14614_v1 }
 0x7a0   : > { %v8945_v6 = vpack.c.bf16 %v8935_v31, %v8934_v29  ;;  %v18046_v30 = vadd.f32 %v7885_v46, %v17890_v51  ;;  %v13741_v25 = vpop.f32.mrb[167].mxu1  ;;  %v14584_v46 = vld [vmem:[%s18521_s3 + $0x2f0] sm:$0xff]  }
 0x7a1   : > { %v8913_v5 = vpop.f32.mrb[20].mxu0 }
 0x7a2   : > { %v8914_v0 = vadd.f32 %v18016_v57, %v8913_v5  ;;  %v13952_v7 = vpop.f32.mrb[21].mxu0  ;;  %13991 = vmatmul.mubr.msk.bf16.gmra.mrb[16].mxu1 %vm741_vm4, %v8945_v6 }
 0x7a3   : > { %v8916_v45 = vpop.f32.mrb[22].mxu0  ;;  %13994 = vmatprep.mubr.msk.bf16.mxu1 %vm14616_vm2, %v14614_v1 }
 0x7a4   : > { %v8917_v34 = vadd.f32 %v18016_v57, %v8916_v45  ;;  %v13953_v10 = vpop.f32.mrb[23].mxu0  ;;  %v8936_v17 = vmax.f32 %v8914_v0, 0.0  ;;  %v14585_v45 = vld [vmem:[%s18521_s3 + $0x2f8] sm:$0xff]  }
 0x7a5   : > { %v7890_v36 = vpop.f32.mrb[168].mxu1 }
 0x7a6   : > { %v8937_v18 = vmax.f32 %v8917_v34, 0.0  ;;  %v18055_v51 = vadd.f32 %v7890_v36, %v17899_v53  ;;  %v13744_v9 = vpop.f32.mrb[169].mxu1  ;;  %14203 = vmatmul.mubr.msk.bf16.gmra.mrb[128].mxu0 %vm311_vm3, %v14581_v40 }
 0x7a7   : > { %v7893_v2 = vpop.f32.mrb[170].mxu1 }
 0x7a8   : > { %v8946_v44 = vpack.c.bf16 %v8937_v18, %v8936_v17  ;;  %v18059_v16 = vadd.f32 %v7893_v2, %v17905_v56  ;;  %v13745_v35 = vpop.f32.mrb[171].mxu1 }
 0x7a9   : > { %v9254_v22 = vpop.f32.mrb[24].mxu0 }
 0x7aa   : > { %v9255_v52 = vadd.f32 %v18016_v57, %v9254_v22  ;;  %13995 = vmatmul.mubr.msk.bf16.gmra.mrb[20].mxu1 %vm741_vm4, %v8946_v44  ;;  %v14004_v13 = vpop.f32.mrb[25].mxu0 }
 0x7ab   : > { %v9257_v42 = vpop.f32.mrb[26].mxu0  ;;  %14046 = vmatprep.mubr.msk.bf16.mxu1 %vm14616_vm2, %v14614_v1 }
 0x7ac   : > { %v9258_v53 = vadd.f32 %v18016_v57, %v9257_v42  ;;  %v14005_v24 = vpop.f32.mrb[27].mxu0  ;;  %v9325_v11 = vmax.f32 %v9255_v52, 0.0 }
 0x7ad   : > { %v8231_v43 = vpop.f32.mrb[172].mxu1 }
 0x7ae   : > { %v9326_v39 = vmax.f32 %v9258_v53, 0.0  ;;  %v18067_v56 = vadd.f32 %v8231_v43, %v17914_v60  ;;  %v13796_v61 = vpop.f32.mrb[173].mxu1 }
 0x7af   : > { %v8234_v19 = vpop.f32.mrb[174].mxu1 }
 0x7b0   : > { %v9343_v63 = vpack.c.bf16 %v9326_v39, %v9325_v11  ;;  %v18073_v55 = vadd.f32 %v8234_v19, %v17923_v27  ;;  %v13797_v37 = vpop.f32.mrb[175].mxu1 }
 0x7b1   : > { %v9262_v47 = vpop.f32.mrb[28].mxu0 }
 0x7b2   : > { %v9263_v49 = vadd.f32 %v18016_v57, %v9262_v47  ;;  %v14008_v33 = vpop.f32.mrb[29].mxu0  ;;  %14047 = vmatmul.mubr.msk.bf16.vlgmr.msra.gmra.mrb[24].mxu1 %vm741_vm4, %v9343_v63 }
 0x7b3   : > { %14123 = vmatpush3.bf16.msra.mxu1 %v14582_v23  ;;  %v9265_v60 = vpop.f32.mrb[30].mxu0  ;;  %14050 = vmatprep.mubr.msk.bf16.mxu1 %vm14616_vm2, %v14614_v1 }
 0x7b4   : > { %v9266_v59 = vadd.f32 %v18016_v57, %v9265_v60  ;;  %v14009_v27 = vpop.f32.mrb[31].mxu0  ;;  %14124 = vmatprep.subr.bf16.mxu1 %v14614_v1  ;;  %v9327_v14 = vmax.f32 %v9263_v49, 0.0 }
 0x7b5   : > { %v8239_v48 = vpop.f32.mrb[176].mxu1 }
 0x7b6   : > { %v9328_v62 = vmax.f32 %v9266_v59, 0.0  ;;  %v18085_v29 = vadd.f32 %v8239_v48, %v17936_v4  ;;  %v13800_v31 = vpop.f32.mrb[177].mxu1 }
 0x7b7   : > { %v8242_v50 = vpop.f32.mrb[178].mxu1  ;;  %14125 = vmatpush3.bf16.msra.mxu1 %v14583_v3 }
 0x7b8   : > { %v9344_v6 = vpack.c.bf16 %v9328_v62, %v9327_v14  ;;  %v18091_v25 = vadd.f32 %v8242_v50, %v17945_v12  ;;  %v13801_v5 = vpop.f32.mrb[179].mxu1  ;;  %14126 = vmatprep.subr.bf16.mxu1 %v14614_v1 }
 0x7b9   : > { %v9270_v0 = vpop.f32.mrb[32].mxu0 }
 0x7ba   : > { %v9271_v7 = vadd.f32 %v18016_v57, %v9270_v0  ;;  %v14012_v40 = vpop.f32.mrb[33].mxu0  ;;  %14051 = vmatmul.mubr.msk.bf16.gmra.mrb[28].mxu1 %vm741_vm4, %v9344_v6 }
 0x7bb   : > { %v9273_v4 = vpop.f32.mrb[34].mxu0  ;;  %14054 = vmatprep.mubr.msk.bf16.mxu1 %vm14616_vm2, %v14614_v1  ;;  %14127 = vmatpush3.bf16.msra.mxu1 %v14584_v46 }
 0x7bc   : > { %v9274_v12 = vadd.f32 %v18016_v57, %v9273_v4  ;;  %v14013_v34 = vpop.f32.mrb[35].mxu0  ;;  %14128 = vmatprep.subr.bf16.mxu1 %v14614_v1  ;;  %v9329_v36 = vmax.f32 %v9271_v7, 0.0 }
 0x7bd   : > { %v8247_v10 = vpop.f32.mrb[180].mxu1 }
 0x7be   : > { %v9330_v17 = vmax.f32 %v9274_v12, 0.0  ;;  %v18104_v18 = vadd.f32 %v8247_v10, %v17959_v26  ;;  %v13804_v9 = vpop.f32.mrb[181].mxu1 }
 0x7bf   : > { %v8250_v2 = vpop.f32.mrb[182].mxu1  ;;  %14129 = vmatpush3.bf16.msra.mxu1 %v14585_v45 }
 0x7c0   : > { %v9345_v44 = vpack.c.bf16 %v9330_v17, %v9329_v36  ;;  %v18107_v35 = vadd.f32 %v8250_v2, %v17965_v32  ;;  %v13805_v22 = vpop.f32.mrb[183].mxu1  ;;  %14206 = vmatprep.subr.bf16.mxu1 %v14614_v1 }
 0x7c1   : > { %v9278_v52 = vpop.f32.mrb[36].mxu0 }
 0x7c2   : > { %v9279_v13 = vadd.f32 %v18016_v57, %v9278_v52  ;;  %v14016_v42 = vpop.f32.mrb[37].mxu0  ;;  %14055 = vmatmul.mubr.msk.bf16.gmra.mrb[32].mxu1 %vm741_vm4, %v9345_v44 }
 0x7c3   : > { %v9281_v53 = vpop.f32.mrb[38].mxu0  ;;  %14058 = vmatprep.mubr.msk.bf16.mxu1 %vm14616_vm2, %v14614_v1 }
 0x7c4   : > { %v9282_v26 = vadd.f32 %v18016_v57, %v9281_v53  ;;  %v14017_v24 = vpop.f32.mrb[39].mxu0  ;;  %v9331_v11 = vmax.f32 %v9279_v13, 0.0 }
 0x7c5   : > { %v8255_v43 = vpop.f32.mrb[184].mxu1 }
 0x7c6   : > { %v9332_v32 = vmax.f32 %v9282_v26, 0.0  ;;  %v18116_v39 = vadd.f32 %v8255_v43, %v17975_v54  ;;  %v13808_v61 = vpop.f32.mrb[185].mxu1 }
 0x7c7   : > { %v8258_v19 = vpop.f32.mrb[186].mxu1 }
 0x7c8   : > { %v9346_v23 = vpack.c.bf16 %v9332_v32, %v9331_v11  ;;  %v18119_v63 = vadd.f32 %v8258_v19, %v17981_v38  ;;  %v13809_v37 = vpop.f32.mrb[187].mxu1 }
 0x7c9   : > { %v9286_v47 = vpop.f32.mrb[40].mxu0 }
 0x7ca   : > { %v9287_v49 = vadd.f32 %v18016_v57, %v9286_v47  ;;  %v14020_v33 = vpop.f32.mrb[41].mxu0  ;;  %14059 = vmatmul.mubr.msk.bf16.gmra.mrb[36].mxu1 %vm741_vm4, %v9346_v23 }
 0x7cb   : > { %v9289_v60 = vpop.f32.mrb[42].mxu0  ;;  %14062 = vmatprep.mubr.msk.bf16.mxu1 %vm14616_vm2, %v14614_v1 }
 0x7cc   : > { %v9290_v54 = vadd.f32 %v18016_v57, %v9289_v60  ;;  %v14021_v3 = vpop.f32.mrb[43].mxu0  ;;  %v9333_v27 = vmax.f32 %v9287_v49, 0.0 }
 0x7cd   : > { %v8263_v59 = vpop.f32.mrb[188].mxu1 }
 0x7ce   : > { %v9334_v48 = vmax.f32 %v9290_v54, 0.0  ;;  %v18127_v38 = vadd.f32 %v8263_v59, %v17990_v58  ;;  %v13812_v14 = vpop.f32.mrb[189].mxu1 }
 0x7cf   : > { %v8266_v62 = vpop.f32.mrb[190].mxu1 }
 0x7d0   : > { %v9347_v31 = vpack.c.bf16 %v9334_v48, %v9333_v27  ;;  %v18130_v50 = vadd.f32 %v8266_v62, %v17996_v41  ;;  %v13813_v46 = vpop.f32.mrb[191].mxu1 }
 0x7d1   : > { %v9294_v6 = vpop.f32.mrb[44].mxu0 }
 0x7d2   : > { %v9295_v5 = vadd.f32 %v18016_v57, %v9294_v6  ;;  %v14024_v0 = vpop.f32.mrb[45].mxu0  ;;  %14063 = vmatmul.mubr.msk.bf16.gmra.mrb[40].mxu1 %vm741_vm4, %v9347_v31 }
 0x7d3   : > { %v9297_v7 = vpop.f32.mrb[46].mxu0  ;;  %14066 = vmatprep.mubr.msk.bf16.mxu1 %vm14616_vm2, %v14614_v1 }
 0x7d4   : > { %v9298_v58 = vadd.f32 %v18016_v57, %v9297_v7  ;;  %v14025_v40 = vpop.f32.mrb[47].mxu0  ;;  %v9335_v45 = vmax.f32 %v9295_v5, 0.0 }
 0x7d5   : > { %v8271_v4 = vpop.f32.mrb[192].mxu1 }
 0x7d6   : > { %v9336_v12 = vmax.f32 %v9298_v58, 0.0  ;;  %v18138_v41 = vadd.f32 %v8271_v4, %v18005_v21  ;;  %v13816_v34 = vpop.f32.mrb[193].mxu1 }
 0x7d7   : > { %v8274_v10 = vpop.f32.mrb[194].mxu1 }
 0x7d8   : > { %v9348_v36 = vpack.c.bf16 %v9336_v12, %v9335_v45  ;;  %v18141_v17 = vadd.f32 %v8274_v10, %v18011_v20  ;;  %v13817_v9 = vpop.f32.mrb[195].mxu1 }
 0x7d9   : > { %v9302_v2 = vpop.f32.mrb[48].mxu0 }
 0x7da   : > { %v9303_v44 = vadd.f32 %v18016_v57, %v9302_v2  ;;  %v14028_v22 = vpop.f32.mrb[49].mxu0  ;;  %14067 = vmatmul.mubr.msk.bf16.gmra.mrb[44].mxu1 %vm741_vm4, %v9348_v36 }
 0x7db   : > { %v9305_v52 = vpop.f32.mrb[50].mxu0  ;;  %14070 = vmatprep.mubr.msk.bf16.mxu1 %vm14616_vm2, %v14614_v1 }
 0x7dc   : > { %v9306_v21 = vadd.f32 %v18016_v57, %v9305_v52  ;;  %v14029_v13 = vpop.f32.mrb[51].mxu0  ;;  %v9337_v53 = vmax.f32 %v9303_v44, 0.0 }
 0x7dd   : > { %v8279_v42 = vpop.f32.mrb[196].mxu1 }
 0x7de   : > { %v9338_v26 = vmax.f32 %v9306_v21, 0.0  ;;  %v18149_v20 = vadd.f32 %v8279_v42, %v18025_v15  ;;  %v13820_v24 = vpop.f32.mrb[197].mxu1 }
 0x7df   : > { %v8282_v43 = vpop.f32.mrb[198].mxu1 }
 0x7e0   : > { %v9349_v11 = vpack.c.bf16 %v9338_v26, %v9337_v53  ;;  %v18152_v32 = vadd.f32 %v8282_v43, %v18031_v28  ;;  %v13821_v61 = vpop.f32.mrb[199].mxu1  ;;  %v14586_v53 = vld [vmem:[%s18521_s3 + $0x300] sm:$0xff]  }
 0x7e1   : > { %v9310_v19 = vpop.f32.mrb[52].mxu0 }
 0x7e2   : > { %v9311_v23 = vadd.f32 %v18016_v57, %v9310_v19  ;;  %v14032_v37 = vpop.f32.mrb[53].mxu0  ;;  %14071 = vmatmul.mubr.msk.bf16.gmra.mrb[48].mxu1 %vm741_vm4, %v9349_v11 }
 0x7e3   : > { %v9313_v47 = vpop.f32.mrb[54].mxu0  ;;  %14074 = vmatprep.mubr.msk.bf16.mxu1 %vm14616_vm2, %v14614_v1 }
 0x7e4   : > { %v9314_v15 = vadd.f32 %v18016_v57, %v9313_v47  ;;  %v14033_v49 = vpop.f32.mrb[55].mxu0  ;;  %v9339_v60 = vmax.f32 %v9311_v23, 0.0  ;;  %v14587_v23 = vld [vmem:[%s18521_s3 + $0x308] sm:$0xff]  }
 0x7e5   : > { %v8287_v33 = vpop.f32.mrb[200].mxu1 }
 0x7e6   : > { %v9340_v54 = vmax.f32 %v9314_v15, 0.0  ;;  %v18160_v28 = vadd.f32 %v8287_v33, %v18040_v8  ;;  %v13824_v3 = vpop.f32.mrb[201].mxu1 }
 0x7e7   : > { %v8290_v59 = vpop.f32.mrb[202].mxu1  ;;  %v14588_v3 = vld [vmem:[%s18521_s3 + $0x310] sm:$0xff]  }
 0x7e8   : > { %v9350_v27 = vpack.c.bf16 %v9340_v54, %v9339_v60  ;;  %v18163_v48 = vadd.f32 %v8290_v59, %v18046_v30  ;;  %v13825_v14 = vpop.f32.mrb[203].mxu1 }
 0x7e9   : > { %v9318_v62 = vpop.f32.mrb[56].mxu0 }
 0x7ea   : > { %v9319_v31 = vadd.f32 %v18016_v57, %v9318_v62  ;;  %v14036_v46 = vpop.f32.mrb[57].mxu0  ;;  %14075 = vmatmul.mubr.msk.bf16.gmra.mrb[52].mxu1 %vm741_vm4, %v9350_v27 }
 0x7eb   : > { %v9321_v6 = vpop.f32.mrb[58].mxu0  ;;  %14078 = vmatprep.mubr.msk.bf16.mxu1 %vm14616_vm2, %v14614_v1 }
 0x7ec   : > { %v9322_v8 = vadd.f32 %v18016_v57, %v9321_v6  ;;  %v14037_v5 = vpop.f32.mrb[59].mxu0  ;;  %v9341_v7 = vmax.f32 %v9319_v31, 0.0  ;;  %v14589_v6 = vld [vmem:[%s18521_s3 + $0x318] sm:$0xff]  }
 0x7ed   : > { %v8295_v0 = vpop.f32.mrb[204].mxu1 }
 0x7ee   : > { %v9342_v58 = vmax.f32 %v9322_v8, 0.0  ;;  %v18171_v30 = vadd.f32 %v8295_v0, %v18055_v51  ;;  %v13828_v40 = vpop.f32.mrb[205].mxu1 }
 0x7ef   : > { %v8298_v4 = vpop.f32.mrb[206].mxu1 }
 0x7f0   : > { %v9351_v45 = vpack.c.bf16 %v9342_v58, %v9341_v7  ;;  %v18174_v12 = vadd.f32 %v8298_v4, %v18059_v16  ;;  %v13829_v34 = vpop.f32.mrb[207].mxu1 }
 0x7f1   : > { %v9659_v10 = vpop.f32.mrb[60].mxu0 }
 0x7f2   : > { %v9660_v36 = vadd.f32 %v18016_v57, %v9659_v10  ;;  %14079 = vmatmul.mubr.msk.bf16.gmra.mrb[56].mxu1 %vm741_vm4, %v9351_v45  ;;  %v14088_v9 = vpop.f32.mrb[61].mxu0 }
 0x7f3   : > { %v9662_v2 = vpop.f32.mrb[62].mxu0  ;;  %14130 = vmatprep.mubr.msk.bf16.mxu1 %vm14616_vm2, %v14614_v1 }
 0x7f4   : > { %v9663_v51 = vadd.f32 %v18016_v57, %v9662_v2  ;;  %v14089_v44 = vpop.f32.mrb[63].mxu0  ;;  %v9730_v52 = vmax.f32 %v9660_v36, 0.0 }
 0x7f5   : > { %v8636_v22 = vpop.f32.mrb[208].mxu1 }
 0x7f6   : > { %v9731_v21 = vmax.f32 %v9663_v51, 0.0  ;;  %v18182_v16 = vadd.f32 %v8636_v22, %v18067_v56  ;;  %v13880_v13 = vpop.f32.mrb[209].mxu1 }
 0x7f7   : > { %v8639_v42 = vpop.f32.mrb[210].mxu1 }
 0x7f8   : > { %v9748_v26 = vpack.c.bf16 %v9731_v21, %v9730_v52  ;;  %v18188_v24 = vadd.f32 %v8639_v42, %v18073_v55  ;;  %v13881_v43 = vpop.f32.mrb[211].mxu1 }
 0x7f9   : > { %v9667_v11 = vpop.f32.mrb[64].mxu0 }
 0x7fa   : > { %v9668_v61 = vadd.f32 %v18016_v57, %v9667_v11  ;;  %v14092_v19 = vpop.f32.mrb[65].mxu0  ;;  %14131 = vmatmul.mubr.msk.bf16.vlgmr.msra.gmra.mrb[60].mxu1 %vm741_vm4, %v9748_v26 }
 0x7fb   : > { %14207 = vmatpush3.bf16.msra.mxu1 %v14586_v53  ;;  %v9670_v56 = vpop.f32.mrb[66].mxu0  ;;  %14134 = vmatprep.mubr.msk.bf16.mxu1 %vm14616_vm2, %v14614_v1 }
 0x7fc   : > { %v9671_v37 = vadd.f32 %v18016_v57, %v9670_v56  ;;  %v14093_v55 = vpop.f32.mrb[67].mxu0  ;;  %14208 = vmatprep.subr.bf16.mxu1 %v14614_v1  ;;  %v9732_v15 = vmax.f32 %v9668_v61, 0.0 }
 0x7fd   : > { %v8644_v47 = vpop.f32.mrb[212].mxu1 }
 0x7fe   : > { %v9733_v49 = vmax.f32 %v9671_v37, 0.0  ;;  %v18200_v33 = vadd.f32 %v8644_v47, %v18085_v29  ;;  %v13884_v60 = vpop.f32.mrb[213].mxu1 }
 0x7ff   : > { %v8647_v54 = vpop.f32.mrb[214].mxu1  ;;  %14209 = vmatpush3.bf16.msra.mxu1 %v14587_v23 }
 0x800   : > { %v9749_v59 = vpack.c.bf16 %v9733_v49, %v9732_v15  ;;  %v18206_v27 = vadd.f32 %v8647_v54, %v18091_v25  ;;  %v13885_v14 = vpop.f32.mrb[215].mxu1  ;;  %14210 = vmatprep.subr.bf16.mxu1 %v14614_v1 }
 0x801   : > { %v9675_v62 = vpop.f32.mrb[68].mxu0 }
 0x802   : > { %v9676_v31 = vadd.f32 %v18016_v57, %v9675_v62  ;;  %v14096_v46 = vpop.f32.mrb[69].mxu0  ;;  %14135 = vmatmul.mubr.msk.bf16.gmra.mrb[64].mxu1 %vm741_vm4, %v9749_v59 }
 0x803   : > { %v9678_v29 = vpop.f32.mrb[70].mxu0  ;;  %14138 = vmatprep.mubr.msk.bf16.mxu1 %vm14616_vm2, %v14614_v1  ;;  %14211 = vmatpush3.bf16.msra.mxu1 %v14588_v3 }
 0x804   : > { %v9679_v25 = vadd.f32 %v18016_v57, %v9678_v29  ;;  %v14097_v8 = vpop.f32.mrb[71].mxu0  ;;  %14212 = vmatprep.subr.bf16.mxu1 %v14614_v1  ;;  %v9734_v0 = vmax.f32 %v9676_v31, 0.0 }
 0x805   : > { %v8652_v5 = vpop.f32.mrb[216].mxu1 }
 0x806   : > { %v9735_v7 = vmax.f32 %v9679_v25, 0.0  ;;  %v18219_v58 = vadd.f32 %v8652_v5, %v18104_v18  ;;  %v13888_v40 = vpop.f32.mrb[217].mxu1 }
 0x807   : > { %v8655_v4 = vpop.f32.mrb[218].mxu1  ;;  %14213 = vmatpush3.bf16.msra.mxu1 %v14589_v6 }
 0x808   : > { %v9750_v45 = vpack.c.bf16 %v9735_v7, %v9734_v0  ;;  %v18222_v34 = vadd.f32 %v8655_v4, %v18107_v35  ;;  %v13889_v10 = vpop.f32.mrb[219].mxu1 }
 0x809   : > { %v9683_v36 = vpop.f32.mrb[72].mxu0 }
 0x80a   : > { %v9684_v9 = vadd.f32 %v18016_v57, %v9683_v36  ;;  %v14100_v2 = vpop.f32.mrb[73].mxu0  ;;  %14139 = vmatmul.mubr.msk.bf16.gmra.mrb[68].mxu1 %vm741_vm4, %v9750_v45 }
 0x80b   : > { %v9686_v51 = vpop.f32.mrb[74].mxu0  ;;  %14142 = vmatprep.mubr.msk.bf16.mxu1 %vm14616_vm2, %v14614_v1 }
 0x80c   : > { %v9687_v18 = vadd.f32 %v18016_v57, %v9686_v51  ;;  %v14101_v44 = vpop.f32.mrb[75].mxu0  ;;  %v9736_v52 = vmax.f32 %v9684_v9, 0.0 }
 0x80d   : > { %v8660_v22 = vpop.f32.mrb[220].mxu1 }
 0x80e   : > { %v9737_v21 = vmax.f32 %v9687_v18, 0.0  ;;  %v18230_v35 = vadd.f32 %v8660_v22, %v18116_v39  ;;  %v13892_v13 = vpop.f32.mrb[221].mxu1 }
 0x80f   : > { %v8663_v42 = vpop.f32.mrb[222].mxu1 }
 0x810   : > { %v9751_v53 = vpack.c.bf16 %v9737_v21, %v9736_v52  ;;  %v18233_v26 = vadd.f32 %v8663_v42, %v18119_v63  ;;  %v13893_v43 = vpop.f32.mrb[223].mxu1 }
 0x811   : > { %v9691_v11 = vpop.f32.mrb[76].mxu0 }
 0x812   : > { %v9692_v61 = vadd.f32 %v18016_v57, %v9691_v11  ;;  %v14104_v19 = vpop.f32.mrb[77].mxu0  ;;  %14143 = vmatmul.mubr.msk.bf16.gmra.mrb[72].mxu1 %vm741_vm4, %v9751_v53 }
 0x813   : > { %v9694_v56 = vpop.f32.mrb[78].mxu0  ;;  %14146 = vmatprep.mubr.msk.bf16.mxu1 %vm14616_vm2, %v14614_v1 }
 0x814   : > { %v9695_v39 = vadd.f32 %v18016_v57, %v9694_v56  ;;  %v14105_v23 = vpop.f32.mrb[79].mxu0  ;;  %v9738_v55 = vmax.f32 %v9692_v61, 0.0 }
 0x815   : > { %v8668_v37 = vpop.f32.mrb[224].mxu1 }
 0x816   : > { %v9739_v47 = vmax.f32 %v9695_v39, 0.0  ;;  %v18241_v63 = vadd.f32 %v8668_v37, %v18127_v38  ;;  %v13896_v15 = vpop.f32.mrb[225].mxu1 }
 0x817   : > { %v8671_v49 = vpop.f32.mrb[226].mxu1 }
 0x818   : > { %v9752_v60 = vpack.c.bf16 %v9739_v47, %v9738_v55  ;;  %v18244_v54 = vadd.f32 %v8671_v49, %v18130_v50  ;;  %v13897_v3 = vpop.f32.mrb[227].mxu1 }
 0x819   : > { %v9699_v59 = vpop.f32.mrb[80].mxu0 }
 0x81a   : > { %v9700_v14 = vadd.f32 %v18016_v57, %v9699_v59  ;;  %v14108_v62 = vpop.f32.mrb[81].mxu0  ;;  %14147 = vmatmul.mubr.msk.bf16.gmra.mrb[76].mxu1 %vm741_vm4, %v9752_v60 }
 0x81b   : > { %v9702_v31 = vpop.f32.mrb[82].mxu0  ;;  %14150 = vmatprep.mubr.msk.bf16.mxu1 %vm14616_vm2, %v14614_v1 }
 0x81c   : > { %v9703_v38 = vadd.f32 %v18016_v57, %v9702_v31  ;;  %v14109_v46 = vpop.f32.mrb[83].mxu0  ;;  %v9740_v6 = vmax.f32 %v9700_v14, 0.0 }
 0x81d   : > { %v8676_v29 = vpop.f32.mrb[228].mxu1 }
 0x81e   : > { %v9741_v25 = vmax.f32 %v9703_v38, 0.0  ;;  %v18252_v50 = vadd.f32 %v8676_v29, %v18138_v41  ;;  %v13900_v8 = vpop.f32.mrb[229].mxu1 }
 0x81f   : > { %v8679_v5 = vpop.f32.mrb[230].mxu1 }
 0x820   : > { %v9753_v0 = vpack.c.bf16 %v9741_v25, %v9740_v6  ;;  %v18255_v7 = vadd.f32 %v8679_v5, %v18141_v17  ;;  %v13901_v40 = vpop.f32.mrb[231].mxu1 }
 0x821   : > { %v9707_v4 = vpop.f32.mrb[84].mxu0 }
 0x822   : > { %v9708_v45 = vadd.f32 %v18016_v57, %v9707_v4  ;;  %v14112_v10 = vpop.f32.mrb[85].mxu0  ;;  %14151 = vmatmul.mubr.msk.bf16.gmra.mrb[80].mxu1 %vm741_vm4, %v9753_v0 }
 0x823   : > { %v9710_v36 = vpop.f32.mrb[86].mxu0  ;;  %14154 = vmatprep.mubr.msk.bf16.mxu1 %vm14616_vm2, %v14614_v1 }
 0x824   : > { %v9711_v41 = vadd.f32 %v18016_v57, %v9710_v36  ;;  %v14113_v9 = vpop.f32.mrb[87].mxu0  ;;  %v9742_v51 = vmax.f32 %v9708_v45, 0.0 }
 0x825   : > { %v8684_v2 = vpop.f32.mrb[232].mxu1 }
 0x826   : > { %v9743_v18 = vmax.f32 %v9711_v41, 0.0  ;;  %v18263_v17 = vadd.f32 %v8684_v2, %v18149_v20  ;;  %v13904_v44 = vpop.f32.mrb[233].mxu1 }
 0x827   : > { %v8687_v22 = vpop.f32.mrb[234].mxu1 }
 0x828   : > { %v9754_v52 = vpack.c.bf16 %v9743_v18, %v9742_v51  ;;  %v18266_v21 = vadd.f32 %v8687_v22, %v18152_v32  ;;  %v13905_v13 = vpop.f32.mrb[235].mxu1 }
 0x829   : > { %v9715_v42 = vpop.f32.mrb[88].mxu0 }
 0x82a   : > { %v9716_v53 = vadd.f32 %v18016_v57, %v9715_v42  ;;  %v14116_v43 = vpop.f32.mrb[89].mxu0  ;;  %14155 = vmatmul.mubr.msk.bf16.gmra.mrb[84].mxu1 %vm741_vm4, %v9754_v52 }
 0x82b   : > { %v9718_v11 = vpop.f32.mrb[90].mxu0  ;;  %14158 = vmatprep.mubr.msk.bf16.mxu1 %vm14616_vm2, %v14614_v1 }
 0x82c   : > { %v9719_v20 = vadd.f32 %v18016_v57, %v9718_v11  ;;  %v14117_v61 = vpop.f32.mrb[91].mxu0  ;;  %v9744_v56 = vmax.f32 %v9716_v53, 0.0 }
 0x82d   : > { %v8692_v19 = vpop.f32.mrb[236].mxu1 }
 0x82e   : > { %v9745_v39 = vmax.f32 %v9719_v20, 0.0  ;;  %v18274_v32 = vadd.f32 %v8692_v19, %v18160_v28  ;;  %v13908_v23 = vpop.f32.mrb[237].mxu1 }
 0x82f   : > { %v8695_v37 = vpop.f32.mrb[238].mxu1 }
 0x830   : > { %v9755_v55 = vpack.c.bf16 %v9745_v39, %v9744_v56  ;;  %v18277_v47 = vadd.f32 %v8695_v37, %v18163_v48  ;;  %v13909_v15 = vpop.f32.mrb[239].mxu1 }
 0x831   : > { %v9723_v49 = vpop.f32.mrb[92].mxu0 }
 0x832   : > { %v9724_v60 = vadd.f32 %v18016_v57, %v9723_v49  ;;  %v14120_v3 = vpop.f32.mrb[93].mxu0  ;;  %14159 = vmatmul.mubr.msk.bf16.gmra.mrb[88].mxu1 %vm741_vm4, %v9755_v55 }
 0x833   : > { %v9726_v59 = vpop.f32.mrb[94].mxu0  ;;  %14162 = vmatprep.mubr.msk.bf16.mxu1 %vm14616_vm2, %v14614_v1 }
 0x834   : > { %v9727_v28 = vadd.f32 %v18016_v57, %v9726_v59  ;;  %v14121_v14 = vpop.f32.mrb[95].mxu0  ;;  %v9746_v31 = vmax.f32 %v9724_v60, 0.0 }
 0x835   : > { %v8700_v62 = vpop.f32.mrb[240].mxu1 }
 0x836   : > { %v9747_v38 = vmax.f32 %v9727_v28, 0.0  ;;  %v18285_v48 = vadd.f32 %v8700_v62, %v18171_v30  ;;  %v13912_v46 = vpop.f32.mrb[241].mxu1 }
 0x837   : > { %v8703_v29 = vpop.f32.mrb[242].mxu1 }
 0x838   : > { %v9756_v6 = vpack.c.bf16 %v9747_v38, %v9746_v31  ;;  %v18288_v25 = vadd.f32 %v8703_v29, %v18174_v12  ;;  %v13913_v8 = vpop.f32.mrb[243].mxu1 }
 0x839   : > { %v10064_v5 = vpop.f32.mrb[96].mxu0 }
 0x83a   : > { %v10065_v0 = vadd.f32 %v18016_v57, %v10064_v5  ;;  %14163 = vmatmul.mubr.msk.bf16.gmra.mrb[92].mxu1 %vm741_vm4, %v9756_v6  ;;  %v14172_v40 = vpop.f32.mrb[97].mxu0 }
 0x83b   : > { %v10067_v4 = vpop.f32.mrb[98].mxu0  ;;  %14214 = vmatprep.mubr.msk.bf16.mxu1 %vm14616_vm2, %v14614_v1 }
 0x83c   : > { %v10068_v30 = vadd.f32 %v18016_v57, %v10067_v4  ;;  %v14173_v45 = vpop.f32.mrb[99].mxu0  ;;  %v10135_v36 = vmax.f32 %v10065_v0, 0.0 }
 0x83d   : > { %v9041_v10 = vpop.f32.mrb[244].mxu1 }
 0x83e   : > { %v10136_v41 = vmax.f32 %v10068_v30, 0.0  ;;  %v18296_v12 = vadd.f32 %v9041_v10, %v18182_v16  ;;  %v13964_v9 = vpop.f32.mrb[245].mxu1 }
 0x83f   : > { %v9044_v2 = vpop.f32.mrb[246].mxu1 }
 0x840   : > { %v10153_v51 = vpack.c.bf16 %v10136_v41, %v10135_v36  ;;  %v18299_v18 = vadd.f32 %v9044_v2, %v18188_v24  ;;  %v13965_v44 = vpop.f32.mrb[247].mxu1 }
 0x841   : > { %v10072_v22 = vpop.f32.mrb[100].mxu0 }
 0x842   : > { %v10073_v52 = vadd.f32 %v18016_v57, %v10072_v22  ;;  %v14176_v13 = vpop.f32.mrb[101].mxu0  ;;  %14215 = vmatmul.mubr.msk.bf16.vlgmr.msra.gmra.mrb[96].mxu1 %vm741_vm4, %v10153_v51 }
 0x843   : > { %v10075_v42 = vpop.f32.mrb[102].mxu0  ;;  %14218 = vmatprep.mubr.msk.bf16.mxu1 %vm14616_vm2, %v14614_v1 }
 0x844   : > { %v10076_v16 = vadd.f32 %v18016_v57, %v10075_v42  ;;  %v14177_v53 = vpop.f32.mrb[103].mxu0  ;;  %v10137_v11 = vmax.f32 %v10073_v52, 0.0 }
 0x845   : > { %v9049_v43 = vpop.f32.mrb[248].mxu1 }
 0x846   : > { %v10138_v20 = vmax.f32 %v10076_v16, 0.0  ;;  %v18307_v24 = vadd.f32 %v9049_v43, %v18200_v33  ;;  %v13968_v61 = vpop.f32.mrb[249].mxu1 }
 0x847   : > { %v9052_v19 = vpop.f32.mrb[250].mxu1 }
 0x848   : > { %v10154_v56 = vpack.c.bf16 %v10138_v20, %v10137_v11  ;;  %v18310_v39 = vadd.f32 %v9052_v19, %v18206_v27  ;;  %v13969_v23 = vpop.f32.mrb[251].mxu1 }
 0x849   : > { %v10080_v37 = vpop.f32.mrb[104].mxu0 }
 0x84a   : > { %v10081_v55 = vadd.f32 %v18016_v57, %v10080_v37  ;;  %v14180_v15 = vpop.f32.mrb[105].mxu0  ;;  %14219 = vmatmul.mubr.msk.bf16.gmra.mrb[100].mxu1 %vm741_vm4, %v10154_v56 }
 0x84b   : > { %v10083_v49 = vpop.f32.mrb[106].mxu0  ;;  %14222 = vmatprep.mubr.msk.bf16.mxu1 %vm14616_vm2, %v14614_v1 }
 0x84c   : > { %v10084_v33 = vadd.f32 %v18016_v57, %v10083_v49  ;;  %v14181_v60 = vpop.f32.mrb[107].mxu0  ;;  %v10139_v59 = vmax.f32 %v10081_v55, 0.0 }
 0x84d   : > { %v9057_v3 = vpop.f32.mrb[252].mxu1 }
 0x84e   : > { %v10140_v28 = vmax.f32 %v10084_v33, 0.0  ;;  %v18318_v27 = vadd.f32 %v9057_v3, %v18219_v58  ;;  %v13972_v14 = vpop.f32.mrb[253].mxu1 }
 0x84f   : > { %v9060_v62 = vpop.f32.mrb[254].mxu1 }
 0x850   : > { %v10155_v31 = vpack.c.bf16 %v10140_v28, %v10139_v59  ;;  %v18321_v38 = vadd.f32 %v9060_v62, %v18222_v34  ;;  %v13973_v46 = vpop.f32.mrb[255].mxu1 }
 0x851   : > { %v10088_v29 = vpop.f32.mrb[108].mxu0 }
 0x852   : > { %v10089_v6 = vadd.f32 %v18016_v57, %v10088_v29  ;;  %v14184_v8 = vpop.f32.mrb[109].mxu0  ;;  %14223 = vmatmul.mubr.msk.bf16.gmra.mrb[104].mxu1 %vm741_vm4, %v10155_v31 }
 0x853   : > { %v10091_v5 = vpop.f32.mrb[110].mxu0  ;;  %14226 = vmatprep.mubr.msk.bf16.mxu1 %vm14616_vm2, %v14614_v1 }
 0x854   : > { %v10092_v58 = vadd.f32 %v18016_v57, %v10091_v5  ;;  %v14185_v0 = vpop.f32.mrb[111].mxu0  ;;  %v10141_v4 = vmax.f32 %v10089_v6, 0.0 }
 0x855   : > { %v9065_v40 = vpop.f32.mrb[0].mxu1 }
 0x856   : > { %v10142_v30 = vmax.f32 %v10092_v58, 0.0  ;;  %v18329_v34 = vadd.f32 %v9065_v40, %v18230_v35  ;;  %v13976_v45 = vpop.f32.mrb[1].mxu1 }
 0x857   : > { %v9068_v10 = vpop.f32.mrb[2].mxu1 }
 0x858   : > { %v10156_v36 = vpack.c.bf16 %v10142_v30, %v10141_v4  ;;  %v18332_v41 = vadd.f32 %v9068_v10, %v18233_v26  ;;  %v13977_v9 = vpop.f32.mrb[3].mxu1 }
 0x859   : > { %v10096_v2 = vpop.f32.mrb[112].mxu0 }
 0x85a   : > { %v10097_v51 = vadd.f32 %v18016_v57, %v10096_v2  ;;  %v14188_v44 = vpop.f32.mrb[113].mxu0  ;;  %14227 = vmatmul.mubr.msk.bf16.gmra.mrb[108].mxu1 %vm741_vm4, %v10156_v36 }
 0x85b   : > { %v10099_v22 = vpop.f32.mrb[114].mxu0  ;;  %14230 = vmatprep.mubr.msk.bf16.mxu1 %vm14616_vm2, %v14614_v1 }
 0x85c   : > { %v10100_v35 = vadd.f32 %v18016_v57, %v10099_v22  ;;  %v14189_v52 = vpop.f32.mrb[115].mxu0  ;;  %v10143_v42 = vmax.f32 %v10097_v51, 0.0 }
 0x85d   : > { %v9073_v13 = vpop.f32.mrb[4].mxu1 }
 0x85e   : > { %v10144_v16 = vmax.f32 %v10100_v35, 0.0  ;;  %v18340_v26 = vadd.f32 %v9073_v13, %v18241_v63  ;;  %v13980_v53 = vpop.f32.mrb[5].mxu1 }
 0x85f   : > { %v9076_v43 = vpop.f32.mrb[6].mxu1 }
 0x860   : > { %v10157_v11 = vpack.c.bf16 %v10144_v16, %v10143_v42  ;;  %v18343_v20 = vadd.f32 %v9076_v43, %v18244_v54  ;;  %v13981_v61 = vpop.f32.mrb[7].mxu1 }
 0x861   : > { %v10104_v19 = vpop.f32.mrb[116].mxu0 }
 0x862   : > { %v10105_v56 = vadd.f32 %v18016_v57, %v10104_v19  ;;  %v14192_v23 = vpop.f32.mrb[117].mxu0  ;;  %14231 = vmatmul.mubr.msk.bf16.gmra.mrb[112].mxu1 %vm741_vm4, %v10157_v11 }
 0x863   : > { %v10107_v37 = vpop.f32.mrb[118].mxu0  ;;  %14234 = vmatprep.mubr.msk.bf16.mxu1 %vm14616_vm2, %v14614_v1 }
 0x864   : > { %v10108_v63 = vadd.f32 %v18016_v57, %v10107_v37  ;;  %v14193_v55 = vpop.f32.mrb[119].mxu0  ;;  %v10145_v49 = vmax.f32 %v10105_v56, 0.0 }
 0x865   : > { %v9081_v15 = vpop.f32.mrb[8].mxu1 }
 0x866   : > { %v10146_v33 = vmax.f32 %v10108_v63, 0.0  ;;  %v18351_v54 = vadd.f32 %v9081_v15, %v18252_v50  ;;  %v13984_v60 = vpop.f32.mrb[9].mxu1 }
 0x867   : > { %v9084_v3 = vpop.f32.mrb[10].mxu1 }
 0x868   : > { %v10158_v59 = vpack.c.bf16 %v10146_v33, %v10145_v49  ;;  %v18354_v28 = vadd.f32 %v9084_v3, %v18255_v7  ;;  %v13985_v14 = vpop.f32.mrb[11].mxu1 }
 0x869   : > { %v10112_v62 = vpop.f32.mrb[120].mxu0 }
 0x86a   : > { %v10113_v31 = vadd.f32 %v18016_v57, %v10112_v62  ;;  %v14196_v46 = vpop.f32.mrb[121].mxu0  ;;  %14235 = vmatmul.mubr.msk.bf16.gmra.mrb[116].mxu1 %vm741_vm4, %v10158_v59 }
 0x86b   : > { %v10115_v29 = vpop.f32.mrb[122].mxu0  ;;  %14238 = vmatprep.mubr.msk.bf16.mxu1 %vm14616_vm2, %v14614_v1 }
 0x86c   : > { %v10116_v50 = vadd.f32 %v18016_v57, %v10115_v29  ;;  %v14197_v6 = vpop.f32.mrb[123].mxu0  ;;  %v10147_v5 = vmax.f32 %v10113_v31, 0.0 }
 0x86d   : > { %v9089_v8 = vpop.f32.mrb[12].mxu1 }
 0x86e   : > { %v10148_v58 = vmax.f32 %v10116_v50, 0.0  ;;  %v18362_v7 = vadd.f32 %v9089_v8, %v18263_v17  ;;  %v13988_v0 = vpop.f32.mrb[13].mxu1  ;;  %v14605_v17 = vld [vmem:[%s18520_s2] ss:$0 sm:$0xff] }
 0x86f   : > { %v9092_v40 = vpop.f32.mrb[14].mxu1 }
 0x870   : > { %v10159_v4 = vpack.c.bf16 %v10148_v58, %v10147_v5  ;;  %v18365_v30 = vadd.f32 %v9092_v40, %v18266_v21  ;;  %v13989_v45 = vpop.f32.mrb[15].mxu1 }
 0x871   : > { %v10120_v10 = vpop.f32.mrb[124].mxu0 }
 0x872   : > { %v10121_v36 = vadd.f32 %v18016_v57, %v10120_v10  ;;  %v14200_v9 = vpop.f32.mrb[125].mxu0  ;;  %14239 = vmatmul.mubr.msk.bf16.gmra.mrb[120].mxu1 %vm741_vm4, %v10159_v4 }
 0x873   : > { %v10123_v2 = vpop.f32.mrb[126].mxu0  ;;  %14242 = vmatprep.mubr.msk.bf16.mxu1 %vm14616_vm2, %v14614_v1 }
 0x874   : > { %v10124_v51 = vadd.f32 %v14605_v17, %v10123_v2  ;;  %v14201_v44 = vpop.f32.mrb[127].mxu0  ;;  %v10149_v21 = vmax.f32 %v10121_v36, 0.0 }
 0x875   : > { %v9097_v22 = vpop.f32.mrb[16].mxu1 }
 0x876   : > { %v10150_v35 = vmax.f32 %v10124_v51, 0.0  ;;  %v18375_v52 = vadd.f32 %v9097_v22, %v18274_v32  ;;  %v13992_v57 = vpop.f32.mrb[17].mxu1 }
 0x877   : > { %v9100_v13 = vpop.f32.mrb[18].mxu1 }
 0x878   : > { %v10160_v42 = vpack.c.bf16 %v10150_v35, %v10149_v21  ;;  %v18378_v16 = vadd.f32 %v9100_v13, %v18277_v47  ;;  %v13993_v53 = vpop.f32.mrb[19].mxu1 }
 0x879   : > { %v10128_v43 = vpop.f32.mrb[128].mxu0 }
 0x87a   : > { %v10129_v11 = vadd.f32 %v14605_v17, %v10128_v43  ;;  %v14204_v61 = vpop.f32.mrb[129].mxu0  ;;  %14243 = vmatmul.mubr.msk.bf16.gmra.mrb[124].mxu1 %vm741_vm4, %v10160_v42 }
 0x87b   : > { %v10131_v19 = vpop.f32.mrb[130].mxu0  ;;  %14246 = vmatprep.mubr.msk.bf16.mxu1 %vm14616_vm2, %v14614_v1 }
 0x87c   : > { %v10132_v56 = vadd.f32 %v14605_v17, %v10131_v19  ;;  %v14205_v23 = vpop.f32.mrb[131].mxu0  ;;  %v10151_v37 = vmax.f32 %v10129_v11, 0.0 }
 0x87d   : > { %v9105_v32 = vpop.f32.mrb[20].mxu1 }
 0x87e   : > { %v10152_v63 = vmax.f32 %v10132_v56, 0.0  ;;  %v9128_v55 = vadd.f32 %v9105_v32, %v18285_v48  ;;  %v13996_v15 = vpop.f32.mrb[21].mxu1 }
 0x87f   : > { %v9108_v47 = vpop.f32.mrb[22].mxu1 }
 0x880   : > { %v10161_v49 = vpack.c.bf16 %v10152_v63, %v10151_v37  ;;  %v9129_v33 = vadd.f32 %v9108_v47, %v18288_v25  ;;  %v13997_v60 = vpop.f32.mrb[23].mxu1 }
 0x882   : > { %14247 = vmatmul.mubr.msk.bf16.gmra.mrb[128].mxu1 %vm741_vm4, %v10161_v49 }
 0x885   : > { %v9446_v3 = vpop.f32.mrb[24].mxu1 }
 0x886   : > { %v9517_v59 = vadd.f32 %v9446_v3, %v18296_v12  ;;  %v14048_v14 = vpop.f32.mrb[25].mxu1 }
 0x887   : > { %v9449_v1 = vpop.f32.mrb[26].mxu1 }
 0x888   : > { %v9518_v62 = vadd.f32 %v9449_v1, %v18299_v18  ;;  %v14049_v31 = vpop.f32.mrb[27].mxu1 }
 0x88d   : > { %v9454_v46 = vpop.f32.mrb[28].mxu1 }
 0x88e   : > { %v9519_v29 = vadd.f32 %v9454_v46, %v18307_v24  ;;  %v14052_v48 = vpop.f32.mrb[29].mxu1 }
 0x88f   : > { %v9457_v50 = vpop.f32.mrb[30].mxu1 }
 0x890   : > { %v9520_v6 = vadd.f32 %v9457_v50, %v18310_v39  ;;  %v14053_v8 = vpop.f32.mrb[31].mxu1 }
 0x895   : > { %v9462_v25 = vpop.f32.mrb[32].mxu1 }
 0x896   : > { %v9521_v5 = vadd.f32 %v9462_v25, %v18318_v27  ;;  %v14056_v58 = vpop.f32.mrb[33].mxu1 }
 0x897   : > { %v9465_v0 = vpop.f32.mrb[34].mxu1 }
 0x898   : > { %v9522_v12 = vadd.f32 %v9465_v0, %v18321_v38  ;;  %v14057_v40 = vpop.f32.mrb[35].mxu1 }
 0x89d   : > { %v9470_v4 = vpop.f32.mrb[36].mxu1 }
 0x89e   : > { %v9523_v18 = vadd.f32 %v9470_v4, %v18329_v34  ;;  %v14060_v45 = vpop.f32.mrb[37].mxu1 }
 0x89f   : > { %v9473_v10 = vpop.f32.mrb[38].mxu1 }
 0x8a0   : > { %v9524_v24 = vadd.f32 %v9473_v10, %v18332_v41  ;;  %v14061_v36 = vpop.f32.mrb[39].mxu1 }
 0x8a5   : > { %v9478_v9 = vpop.f32.mrb[40].mxu1 }
 0x8a6   : > { %v9525_v39 = vadd.f32 %v9478_v9, %v18340_v26  ;;  %v14064_v2 = vpop.f32.mrb[41].mxu1 }
 0x8a7   : > { %v9481_v17 = vpop.f32.mrb[42].mxu1 }
 0x8a8   : > { %v9526_v27 = vadd.f32 %v9481_v17, %v18343_v20  ;;  %v14065_v51 = vpop.f32.mrb[43].mxu1 }
 0x8ad   : > { %v9486_v44 = vpop.f32.mrb[44].mxu1 }
 0x8ae   : > { %v9527_v38 = vadd.f32 %v9486_v44, %v18351_v54  ;;  %v14068_v22 = vpop.f32.mrb[45].mxu1 }
 0x8af   : > { %v9489_v21 = vpop.f32.mrb[46].mxu1 }
 0x8b0   : > { %v9528_v34 = vadd.f32 %v9489_v21, %v18354_v28  ;;  %v14069_v35 = vpop.f32.mrb[47].mxu1 }
 0x8b5   : > { %v9494_v57 = vpop.f32.mrb[48].mxu1 }
 0x8b6   : > { %v9529_v41 = vadd.f32 %v9494_v57, %v18362_v7  ;;  %v14072_v13 = vpop.f32.mrb[49].mxu1 }
 0x8b7   : > { %v9497_v42 = vpop.f32.mrb[50].mxu1 }
 0x8b8   : > { %v9530_v26 = vadd.f32 %v9497_v42, %v18365_v30  ;;  %v14073_v53 = vpop.f32.mrb[51].mxu1 }
 0x8bd   : > { %v9502_v43 = vpop.f32.mrb[52].mxu1 }
 0x8be   : > { %v9531_v20 = vadd.f32 %v9502_v43, %v18375_v52  ;;  %v14076_v11 = vpop.f32.mrb[53].mxu1 }
 0x8bf   : > { %v9505_v61 = vpop.f32.mrb[54].mxu1 }
 0x8c0   : > { %v9532_v54 = vadd.f32 %v9505_v61, %v18378_v16  ;;  %v14077_v19 = vpop.f32.mrb[55].mxu1 }
 0x8c1   : > { %v18437_v19 = vld [vmem:[%s18522_s4] ss:$0 sm:$0xff] }
 0x8c5   : > { %v9510_v56 = vpop.f32.mrb[56].mxu1 }
 0x8c6   : > { %v9533_v23 = vadd.f32 %v9510_v56, %v9128_v55  ;;  %v14080_v28 = vpop.f32.mrb[57].mxu1 }
 0x8c7   : > { %v9513_v32 = vpop.f32.mrb[58].mxu1 }
 0x8c8   : > { %v9534_v37 = vadd.f32 %v9513_v32, %v9129_v33  ;;  %v14081_v63 = vpop.f32.mrb[59].mxu1 }
 0x8cd   : > { %v9851_v7 = vpop.f32.mrb[60].mxu1 }
 0x8ce   : > { %v9922_v15 = vadd.f32 %v9851_v7, %v9517_v59  ;;  %v14132_v47 = vpop.f32.mrb[61].mxu1 }
 0x8cf   : > { %v9854_v49 = vpop.f32.mrb[62].mxu1 }
 0x8d0   : > { %v9923_v30 = vadd.f32 %v9854_v49, %v9518_v62  ;;  %v14133_v60 = vpop.f32.mrb[63].mxu1 }
 0x8d5   : > { %v9859_v3 = vpop.f32.mrb[64].mxu1 }
 0x8d6   : > { %v18402_v14 = vadd.f32 %v9859_v3, %v9519_v29  ;;  %v14136_v52 = vpop.f32.mrb[65].mxu1 }
 0x8d7   : > { %v9862_v1 = vpop.f32.mrb[66].mxu1 }
 0x8d8   : > { %v18404_v31 = vadd.f32 %v9862_v1, %v9520_v6  ;;  %v14137_v16 = vpop.f32.mrb[67].mxu1 }
 0x8dd   : > { %v9867_v46 = vpop.f32.mrb[68].mxu1 }
 0x8de   : > { %v18406_v55 = vadd.f32 %v9867_v46, %v9521_v5  ;;  %v14140_v48 = vpop.f32.mrb[69].mxu1 }
 0x8df   : > { %v9870_v33 = vpop.f32.mrb[70].mxu1 }
 0x8e0   : > { %v18408_v50 = vadd.f32 %v9870_v33, %v9522_v12  ;;  %v14141_v59 = vpop.f32.mrb[71].mxu1 }
 0x8e5   : > { %v9875_v8 = vpop.f32.mrb[72].mxu1 }
 0x8e6   : > { %v18410_v25 = vadd.f32 %v9875_v8, %v9523_v18  ;;  %v14144_v62 = vpop.f32.mrb[73].mxu1 }
 0x8e7   : > { %v9878_v58 = vpop.f32.mrb[74].mxu1 }
 0x8e8   : > { %v18412_v29 = vadd.f32 %v9878_v58, %v9524_v24  ;;  %v14145_v0 = vpop.f32.mrb[75].mxu1 }
 0x8ed   : > { %v9883_v40 = vpop.f32.mrb[76].mxu1 }
 0x8ee   : > { %v18414_v6 = vadd.f32 %v9883_v40, %v9525_v39  ;;  %v14148_v4 = vpop.f32.mrb[77].mxu1 }
 0x8ef   : > { %v9886_v45 = vpop.f32.mrb[78].mxu1 }
 0x8f0   : > { %v18416_v5 = vadd.f32 %v9886_v45, %v9526_v27  ;;  %v14149_v10 = vpop.f32.mrb[79].mxu1 }
 0x8f5   : > { %v9891_v36 = vpop.f32.mrb[80].mxu1 }
 0x8f6   : > { %v18418_v12 = vadd.f32 %v9891_v36, %v9527_v38  ;;  %v14152_v9 = vpop.f32.mrb[81].mxu1 }
 0x8f7   : > { %v9894_v2 = vpop.f32.mrb[82].mxu1 }
 0x8f8   : > { %v18420_v18 = vadd.f32 %v9894_v2, %v9528_v34  ;;  %v14153_v17 = vpop.f32.mrb[83].mxu1 }
 0x8fd   : > { %v9899_v51 = vpop.f32.mrb[84].mxu1 }
 0x8fe   : > { %v18422_v24 = vadd.f32 %v9899_v51, %v9529_v41  ;;  %v14156_v44 = vpop.f32.mrb[85].mxu1 }
 0x8ff   : > { %v9902_v22 = vpop.f32.mrb[86].mxu1 }
 0x900   : > { %v18424_v39 = vadd.f32 %v9902_v22, %v9530_v26  ;;  %v14157_v21 = vpop.f32.mrb[87].mxu1 }
 0x905   : > { %v9907_v35 = vpop.f32.mrb[88].mxu1 }
 0x906   : > { %v18426_v27 = vadd.f32 %v9907_v35, %v9531_v20  ;;  %v14160_v57 = vpop.f32.mrb[89].mxu1 }
 0x907   : > { %v9910_v38 = vpop.f32.mrb[90].mxu1 }
 0x908   : > { %v18428_v13 = vadd.f32 %v9910_v38, %v9532_v54  ;;  %v14161_v42 = vpop.f32.mrb[91].mxu1 }
 0x90d   : > { %v9915_v34 = vpop.f32.mrb[92].mxu1 }
 0x90e   : > { %v18430_v53 = vadd.f32 %v9915_v34, %v9533_v23  ;;  %v14164_v43 = vpop.f32.mrb[93].mxu1 }
 0x90f   : > { %v9918_v41 = vpop.f32.mrb[94].mxu1 }
 0x910   : > { %v18432_v11 = vadd.f32 %v9918_v41, %v9534_v37  ;;  %v14165_v61 = vpop.f32.mrb[95].mxu1 }
 0x915   : > { %v10256_v26 = vpop.f32.mrb[96].mxu1 }
 0x916   : > { %v10327_v20 = vadd.f32 %v10256_v26, %v9922_v15  ;;  %v14216_v56 = vpop.f32.mrb[97].mxu1 }
 0x917   : > { %v10259_v54 = vpop.f32.mrb[98].mxu1 }
 0x918   : > { %v10352_v28 = vadd.f32 %v18437_v19, %v10327_v20  ;;  %v10328_v32 = vadd.f32 %v10259_v54, %v9923_v30  ;;  %v14217_v23 = vpop.f32.mrb[99].mxu1 }
 0x91a   : > { %v10370_v63 = vmax.f32 %v10352_v28, 0.0  ;;  %v10353_v7 = vadd.f32 %v18437_v19, %v10328_v32 }
 0x91c   : > { %v11532_v37 = vpack.c.bf16 %v10370_v63, %v10370_v63  ;;  %v10371_v15 = vmax.f32 %v10353_v7, 0.0 }
 0x91d   : > { %v10264_v47 = vpop.f32.mrb[100].mxu1 }
 0x91e   : > { %10461 = vst.msk [vmem:[%s18445_s29] sm:$0xf] %vm10460_vm5, %v11532_v37  ;;  %v11533_v49 = vpack.c.bf16 %v10371_v15, %v10371_v15  ;;  %v10329_v30 = vadd.f32 %v10264_v47, %v18402_v14  ;;  %v14220_v60 = vpop.f32.mrb[101].mxu1 }
 0x91f   : > { %v10267_v3 = vpop.f32.mrb[102].mxu1 }
 0x920   : > { %10462 = vst.msk [vmem:[%s18445_s29 + $0x4] sm:$0xf] %vm10460_vm5, %v11533_v49  ;;  %v10354_v52 = vadd.f32 %v18437_v19, %v10329_v30  ;;  %v10330_v1 = vadd.f32 %v10267_v3, %v18404_v31  ;;  %v14221_v16 = vpop.f32.mrb[103].mxu1 }
 0x922   : > { %v10372_v46 = vmax.f32 %v10354_v52, 0.0  ;;  %v10355_v48 = vadd.f32 %v18437_v19, %v10330_v1 }
 0x924   : > { %v11534_v33 = vpack.c.bf16 %v10372_v46, %v10372_v46  ;;  %v10373_v59 = vmax.f32 %v10355_v48, 0.0 }
 0x925   : > { %v10272_v8 = vpop.f32.mrb[104].mxu1 }
 0x926   : > { %10463 = vst.msk [vmem:[%s18445_s29 + $0x8] sm:$0xf] %vm10460_vm5, %v11534_v33  ;;  %v11535_v14 = vpack.c.bf16 %v10373_v59, %v10373_v59  ;;  %v10331_v62 = vadd.f32 %v10272_v8, %v18406_v55  ;;  %v14224_v58 = vpop.f32.mrb[105].mxu1 }
 0x927   : > { %v10275_v0 = vpop.f32.mrb[106].mxu1 }
 0x928   : > { %10464 = vst.msk [vmem:[%s18445_s29 + $0xc] sm:$0xf] %vm10460_vm5, %v11535_v14  ;;  %v10356_v31 = vadd.f32 %v18437_v19, %v10331_v62  ;;  %v10332_v40 = vadd.f32 %v10275_v0, %v18408_v50  ;;  %v14225_v4 = vpop.f32.mrb[107].mxu1 }
 0x92a   : > { %v10374_v45 = vmax.f32 %v10356_v31, 0.0  ;;  %v10357_v10 = vadd.f32 %v18437_v19, %v10332_v40 }
 0x92c   : > { %v11536_v36 = vpack.c.bf16 %v10374_v45, %v10374_v45  ;;  %v10375_v9 = vmax.f32 %v10357_v10, 0.0 }
 0x92d   : > { %v10280_v2 = vpop.f32.mrb[108].mxu1 }
 0x92e   : > { %10465 = vst.msk [vmem:[%s18445_s29 + $0x10] sm:$0xf] %vm10460_vm5, %v11536_v36  ;;  %v11537_v55 = vpack.c.bf16 %v10375_v9, %v10375_v9  ;;  %v10333_v17 = vadd.f32 %v10280_v2, %v18410_v25  ;;  %v14228_v51 = vpop.f32.mrb[109].mxu1 }
 0x92f   : > { %v10283_v44 = vpop.f32.mrb[110].mxu1 }
 0x930   : > { %10466 = vst.msk [vmem:[%s18445_s29 + $0x14] sm:$0xf] %vm10460_vm5, %v11537_v55  ;;  %v10358_v50 = vadd.f32 %v18437_v19, %v10333_v17  ;;  %v10334_v22 = vadd.f32 %v10283_v44, %v18412_v29  ;;  %v14229_v21 = vpop.f32.mrb[111].mxu1 }
 0x932   : > { %v10376_v35 = vmax.f32 %v10358_v50, 0.0  ;;  %v10359_v57 = vadd.f32 %v18437_v19, %v10334_v22 }
 0x934   : > { %v11538_v38 = vpack.c.bf16 %v10376_v35, %v10376_v35  ;;  %v10377_v42 = vmax.f32 %v10359_v57, 0.0 }
 0x935   : > { %v10288_v34 = vpop.f32.mrb[112].mxu1 }
 0x936   : > { %10467 = vst.msk [vmem:[%s18445_s29 + $0x18] sm:$0xf] %vm10460_vm5, %v11538_v38  ;;  %v11539_v25 = vpack.c.bf16 %v10377_v42, %v10377_v42  ;;  %v10335_v43 = vadd.f32 %v10288_v34, %v18414_v6  ;;  %v14232_v41 = vpop.f32.mrb[113].mxu1 }
 0x937   : > { %v10291_v61 = vpop.f32.mrb[114].mxu1 }
 0x938   : > { %10468 = vst.msk [vmem:[%s18445_s29 + $0x1c] sm:$0xf] %vm10460_vm5, %v11539_v25  ;;  %v10360_v29 = vadd.f32 %v18437_v19, %v10335_v43  ;;  %v10336_v26 = vadd.f32 %v10291_v61, %v18416_v5  ;;  %v14233_v20 = vpop.f32.mrb[115].mxu1 }
 0x93a   : > { %v10378_v56 = vmax.f32 %v10360_v29, 0.0  ;;  %v10361_v54 = vadd.f32 %v18437_v19, %v10336_v26 }
 0x93c   : > { %v11540_v28 = vpack.c.bf16 %v10378_v56, %v10378_v56  ;;  %v10379_v32 = vmax.f32 %v10361_v54, 0.0 }
 0x93d   : > { %v10296_v23 = vpop.f32.mrb[116].mxu1 }
 0x93e   : > { %10469 = vst.msk [vmem:[%s18445_s29 + $0x20] sm:$0xf] %vm10460_vm5, %v11540_v28  ;;  %v11541_v6 = vpack.c.bf16 %v10379_v32, %v10379_v32  ;;  %v10337_v63 = vadd.f32 %v10296_v23, %v18418_v12  ;;  %v14236_v7 = vpop.f32.mrb[117].mxu1 }
 0x93f   : > { %v10299_v37 = vpop.f32.mrb[118].mxu1 }
 0x940   : > { %10470 = vst.msk [vmem:[%s18445_s29 + $0x24] sm:$0xf] %vm10460_vm5, %v11541_v6  ;;  %v10362_v5 = vadd.f32 %v18437_v19, %v10337_v63  ;;  %v10338_v15 = vadd.f32 %v10299_v37, %v18420_v18  ;;  %v14237_v47 = vpop.f32.mrb[119].mxu1 }
 0x942   : > { %v10380_v49 = vmax.f32 %v10362_v5, 0.0  ;;  %v10363_v30 = vadd.f32 %v18437_v19, %v10338_v15 }
 0x944   : > { %v11542_v60 = vpack.c.bf16 %v10380_v49, %v10380_v49  ;;  %v10381_v3 = vmax.f32 %v10363_v30, 0.0 }
 0x945   : > { %v10304_v52 = vpop.f32.mrb[120].mxu1 }
 0x946   : > { %10471 = vst.msk [vmem:[%s18445_s29 + $0x28] sm:$0xf] %vm10460_vm5, %v11542_v60  ;;  %v11543_v12 = vpack.c.bf16 %v10381_v3, %v10381_v3  ;;  %v10339_v1 = vadd.f32 %v10304_v52, %v18422_v24  ;;  %v14240_v16 = vpop.f32.mrb[121].mxu1 }
 0x947   : > { %v10307_v46 = vpop.f32.mrb[122].mxu1 }
 0x948   : > { %10472 = vst.msk [vmem:[%s18445_s29 + $0x2c] sm:$0xf] %vm10460_vm5, %v11543_v12  ;;  %v10364_v18 = vadd.f32 %v18437_v19, %v10339_v1  ;;  %v10340_v48 = vadd.f32 %v10307_v46, %v18424_v39  ;;  %v14241_v33 = vpop.f32.mrb[123].mxu1 }
 0x94a   : > { %v10382_v59 = vmax.f32 %v10364_v18, 0.0  ;;  %v10365_v8 = vadd.f32 %v18437_v19, %v10340_v48 }
 0x94c   : > { %v11544_v14 = vpack.c.bf16 %v10382_v59, %v10382_v59  ;;  %v10383_v62 = vmax.f32 %v10365_v8, 0.0 }
 0x94d   : > { %v10312_v58 = vpop.f32.mrb[124].mxu1 }
 0x94e   : > { %10473 = vst.msk [vmem:[%s18445_s29 + $0x30] sm:$0xf] %vm10460_vm5, %v11544_v14  ;;  %v11545_v24 = vpack.c.bf16 %v10383_v62, %v10383_v62  ;;  %v10341_v0 = vadd.f32 %v10312_v58, %v18426_v27  ;;  %v14244_v31 = vpop.f32.mrb[125].mxu1 }
 0x94f   : > { %v10315_v40 = vpop.f32.mrb[126].mxu1 }
 0x950   : > { %10474 = vst.msk [vmem:[%s18445_s29 + $0x34] sm:$0xf] %vm10460_vm5, %v11545_v24  ;;  %v10366_v39 = vadd.f32 %v18437_v19, %v10341_v0  ;;  %v10342_v4 = vadd.f32 %v10315_v40, %v18428_v13  ;;  %v14245_v45 = vpop.f32.mrb[127].mxu1 }
 0x952   : > { %v10384_v10 = vmax.f32 %v10366_v39, 0.0  ;;  %v10367_v36 = vadd.f32 %v18437_v19, %v10342_v4 }
 0x954   : > { %v11546_v9 = vpack.c.bf16 %v10384_v10, %v10384_v10  ;;  %v10385_v2 = vmax.f32 %v10367_v36, 0.0 }
 0x955   : > { %v10320_v55 = vpop.f32.mrb[128].mxu1 }
 0x956   : > { %10475 = vst.msk [vmem:[%s18445_s29 + $0x38] sm:$0xf] %vm10460_vm5, %v11546_v9  ;;  %v11547_v27 = vpack.c.bf16 %v10385_v2, %v10385_v2  ;;  %v10343_v17 = vadd.f32 %v10320_v55, %v18430_v53  ;;  %v14248_v51 = vpop.f32.mrb[129].mxu1 }
 0x957   : > { %v10323_v44 = vpop.f32.mrb[130].mxu1 }
 0x958   : > { %10476 = vst.msk [vmem:[%s18445_s29 + $0x3c] sm:$0xf] %vm10460_vm5, %v11547_v27  ;;  %v10368_v13 = vadd.f32 %v18437_v19, %v10343_v17  ;;  %v10344_v50 = vadd.f32 %v10323_v44, %v18432_v11  ;;  %v14249_v22 = vpop.f32.mrb[131].mxu1 }
 0x95a   : > { %v10386_v21 = vmax.f32 %v10368_v13, 0.0  ;;  %v10369_v35 = vadd.f32 %v18437_v19, %v10344_v50 }
 0x95c   : > { %v11548_v57 = vpack.c.bf16 %v10386_v21, %v10386_v21  ;;  %v10387_v38 = vmax.f32 %v10369_v35, 0.0 }
 0x95e   : > { %10477 = vst.msk [vmem:[%s18445_s29 + $0x40] sm:$0xf] %vm10460_vm5, %v11548_v57  ;;  %v11549_v42 = vpack.c.bf16 %v10387_v38, %v10387_v38 }
 0x960   : > { %10478 = vst.msk [vmem:[%s18445_s29 + $0x44] sm:$0xf] %vm10460_vm5, %v11549_v42 }
 0x961 PF: > { %s15_s18 = sadd.s32 1, %s14612_s18  }
 0x962   : > { %p12_p4 = scmp.ge.s32.totalorder %s15_s18, 4  }
 0x964   :  { %14 = sbr.rel (!%p12_p4) target bundleno = 1 (0x1), region = 94 }

</bundles_post_ra>
